<compile_context>
chip_gen: v7x
topology: tpu7x:2x2x1
jax: 0.10.0
libtpu: 0.0.40
codegen_flags: <defaults>
</compile_context>

<pallas_src>
import jax
import jax.numpy as jnp
from jax import lax
from jax.experimental import pallas as pl
from jax.experimental.pallas import tpu as pltpu

BN_EPS = 1e-5
WP = 8  # sublane-aligned left padding inside the padded VMEM scratch buffers


def upblock_kernel(upb_ref, w1_ref, b1_ref, w2_ref, b2_ref, w3_ref, b3_ref,
                   w4_ref, b4_ref, alpha_ref, o_ref,
                   pad1_ref, pad2_ref, pad3_ref):
    # upb_ref : (1, H, W, Cin) bf16  pixel-shuffled x ++ skip (NHWC)
    # wK_ref  : (9*Cin_k, Co) bf16   im2col-packed folded conv+BN weights
    # w4_ref  : (3*Co, Co)   bf16    1x1 conv over the concat
    # bK_ref  : (1, Co) f32          folded biases
    # alpha   : (4,) f32 in SMEM     PReLU slopes
    # o_ref   : (1, Co, H*W) f32     lane-dense (HW on lanes) output
    H, W = upb_ref.shape[1], upb_ref.shape[2]
    Co = b1_ref.shape[1]
    HW = H * W

    def prelu(v, a):
        return jnp.maximum(v, 0.0) + a * jnp.minimum(v, 0.0)

    def zero_halo(pad_ref, d):
        # Zero only the halo strips the conv windows actually read.  Done on
        # EVERY grid step so results stay correct when the batch axis is
        # sharded across TensorCores (v7x megacore) -- each core has its own
        # scratch.  Column strips are 2 wide / even-offset so bf16 stores stay
        # packed-pair aligned; row strips are whole leading-dim planes.
        Hp, Wp, C = pad_ref.shape
        z = pad_ref.dtype
        pad_ref[0:d, :, :] = jnp.zeros((d, Wp, C), z)                 # top rows
        pad_ref[d + H:Hp, :, :] = jnp.zeros((Hp - H - d, Wp, C), z)   # bottom rows
        pad_ref[d:d + H, WP - 2:WP, :] = jnp.zeros((H, 2, C), z)      # left cols
        pad_ref[d:d + H, WP + W:WP + W + 2, :] = jnp.zeros((H, 2, C), z)  # right

    def conv3x3(pad_ref, w_ref, b_ref, a, dil):
        # im2col: the 9 shifted windows are K-packed along the channel axis so
        # the whole conv is a single bf16 MXU matmul with f32 accumulation.
        cin = pad_ref.shape[2]
        c0 = WP - dil
        wins = [
            pad_ref[dy * dil:dy * dil + H,
                    c0 + dx * dil:c0 + dx * dil + W, :].reshape(HW, cin)
            for dy in range(3) for dx in range(3)
        ]
        patches = jnp.concatenate(wins, axis=-1)              # (HW, 9*cin) bf16
        y = jnp.dot(patches, w_ref[...],
                    preferred_element_type=jnp.float32) + b_ref[...]
        return prelu(y, a)                                    # (HW, Co) f32

    a0, a1, a2, a3 = alpha_ref[0], alpha_ref[1], alpha_ref[2], alpha_ref[3]

    # conv1 (3x3, pad 1) + bn1 + PReLU
    zero_halo(pad1_ref, 1)
    pad1_ref[1:H + 1, WP:WP + W, :] = upb_ref[0]
    e1 = conv3x3(pad1_ref, w1_ref, b1_ref, a0, 1)
    e1_bf = e1.astype(jnp.bfloat16)

    # conv2 (3x3, pad 1) + bn2 + PReLU
    zero_halo(pad2_ref, 1)
    pad2_ref[1:H + 1, WP:WP + W, :] = e1_bf.reshape(H, W, Co)
    e2 = conv3x3(pad2_ref, w2_ref, b2_ref, a1, 1)
    e2_bf = e2.astype(jnp.bfloat16)

    # conv3 (3x3, dilation 2, pad 2) + bn3 + PReLU
    zero_halo(pad3_ref, 2)
    pad3_ref[2:H + 2, WP:WP + W, :] = e2_bf.reshape(H, W, Co)
    e3 = conv3x3(pad3_ref, w3_ref, b3_ref, a2, 2)
    e3_bf = e3.astype(jnp.bfloat16)

    # conv4: 1x1 over concat([e1, e2, e3]) + bn4 + PReLU (single matmul; the
    # 3*Co concat never touches HBM).
    cat = jnp.concatenate([e1_bf, e2_bf, e3_bf], axis=-1)     # (HW, 3*Co) bf16
    y = jnp.dot(cat, w4_ref[...],
                preferred_element_type=jnp.float32) + b4_ref[...]
    out = prelu(y, a3)                                        # (HW, Co) f32

    # Lane-dense store: pad Co up to a multiple of 128 lanes, do the aligned
    # 32-bit transpose, slice back, and write (Co, HW) with HW on lanes.
    cpad = (-Co) % 128
    if cpad:
        out = jnp.concatenate(
            [out, jnp.zeros((HW, cpad), jnp.float32)], axis=-1)
    o_ref[0] = jnp.transpose(out)[:Co, :].astype(o_ref.dtype)


def pixel_shuffle(x, r):
    """torch.nn.PixelShuffle(r) for NCHW."""
    N, C, H, W = x.shape
    x = x.reshape(N, C // (r * r), r, r, H, W)
    x = jnp.transpose(x, (0, 1, 4, 2, 5, 3))
    return x.reshape(N, C // (r * r), H * r, W * r)


def upblock_forward(x, skip, fp):
    """x: (N, Cx, Hs, Ws) NCHW; skip: (N, Cskip, 2Hs, 2Ws) NCHW."""
    upA = pixel_shuffle(x, 2)
    upB = jnp.concatenate([upA, skip], axis=1)               # (N, Cin, H, W)
    N, Cin, H, W = upB.shape
    Co = fp["b1"].shape[-1]
    upb_nhwc = jnp.transpose(upB, (0, 2, 3, 1)).astype(jnp.bfloat16)

    out = pl.pallas_call(
        upblock_kernel,
        out_shape=jax.ShapeDtypeStruct((N, Co, H * W), jnp.float32),
        grid_spec=pltpu.PrefetchScalarGridSpec(
            num_scalar_prefetch=0,
            grid=(N,),
            in_specs=[
                pl.BlockSpec((1, H, W, Cin), lambda n: (n, 0, 0, 0)),
                pl.BlockSpec((9 * Cin, Co), lambda n: (0, 0)),
                pl.BlockSpec((1, Co), lambda n: (0, 0)),
                pl.BlockSpec((9 * Co, Co), lambda n: (0, 0)),
                pl.BlockSpec((1, Co), lambda n: (0, 0)),
                pl.BlockSpec((9 * Co, Co), lambda n: (0, 0)),
                pl.BlockSpec((1, Co), lambda n: (0, 0)),
                pl.BlockSpec((3 * Co, Co), lambda n: (0, 0)),
                pl.BlockSpec((1, Co), lambda n: (0, 0)),
                pl.BlockSpec(memory_space=pltpu.MemorySpace.SMEM),  # alphas
            ],
            out_specs=pl.BlockSpec((1, Co, H * W), lambda n: (n, 0, 0)),
            scratch_shapes=[
                pltpu.VMEM((H + 2, W + 2 * WP, Cin), jnp.bfloat16),  # conv1 pad
                pltpu.VMEM((H + 2, W + 2 * WP, Co), jnp.bfloat16),   # conv2 pad
                pltpu.VMEM((H + 4, W + 2 * WP, Co), jnp.bfloat16),   # conv3 pad
            ],
        ),
        compiler_params=pltpu.CompilerParams(
            dimension_semantics=("parallel",),
            vmem_limit_bytes=32 * 1024 * 1024),
    )(upb_nhwc, fp["w1"], fp["b1"], fp["w2"], fp["b2"], fp["w3"], fp["b3"],
      fp["w4"], fp["b4"], fp["alphas"])

    return out.reshape(N, Co, H, W)                           # already NCHW


# ----------------------------------------------------------------------------
# Parameter construction (PyTorch layouts) + inference-mode BN folding and
# im2col weight packing (bf16 for the MXU).
# ----------------------------------------------------------------------------
def _conv_bn(key, cin, cout, k):
    kw, kb, kg, kbe, km, kv = jax.random.split(key, 6)
    return dict(
        w=0.1 * jax.random.normal(kw, (cout, cin, k, k), jnp.float32),
        b=0.1 * jax.random.normal(kb, (cout,), jnp.float32),
        g=1.0 + 0.1 * jax.random.normal(kg, (cout,), jnp.float32),
        beta=0.1 * jax.random.normal(kbe, (cout,), jnp.float32),
        m=0.1 * jax.random.normal(km, (cout,), jnp.float32),
        v=0.5 + jnp.abs(jax.random.normal(kv, (cout,), jnp.float32)),
    )


def init_params(key, in_filters, out_filters):
    k1, k2, k3, k4, ka = jax.random.split(key, 5)
    return dict(
        c1=_conv_bn(k1, in_filters, out_filters, 3),
        c2=_conv_bn(k2, out_filters, out_filters, 3),
        c3=_conv_bn(k3, out_filters, out_filters, 3),
        c4=_conv_bn(k4, 3 * out_filters, out_filters, 1),
        alphas=0.25 + 0.05 * jax.random.normal(ka, (4,), jnp.float32),
    )


def fold_params(p):
    def _fold(c):
        s = c["g"] / jnp.sqrt(c["v"] + BN_EPS)                 # (Co,)
        w = jnp.transpose(c["w"], (2, 3, 1, 0)) * s            # OIHW -> HWIO
        b = (c["b"] * s + c["beta"] - c["m"] * s).reshape(1, -1)
        return w, b

    def pack(w):                                               # HWIO -> im2col
        kh, kw, cin, co = w.shape
        return w.reshape(kh * kw * cin, co).astype(jnp.bfloat16)

    w1, b1 = _fold(p["c1"])
    w2, b2 = _fold(p["c2"])
    w3, b3 = _fold(p["c3"])
    w4, b4 = _fold(p["c4"])                                    # (1,1,3Co,Co)
    return dict(
        w1=pack(w1), b1=b1, w2=pack(w2), b2=b2, w3=pack(w3), b3=b3,
        w4=w4.reshape(w4.shape[2], w4.shape[3]).astype(jnp.bfloat16), b4=b4,
        alphas=p["alphas"])


# ----------------------------------------------------------------------------
# Pure-JAX reference (same bf16-rounded weights/activations, f32 accumulation)
# for a correctness check.
# ----------------------------------------------------------------------------
def upblock_ref(upb_nchw, fp):
    Co = fp["b1"].shape[-1]

    def prelu(v, a):
        return jnp.maximum(v, 0.0) + a * jnp.minimum(v, 0.0)

    def conv(x, w_pack, b, dil):
        cin = w_pack.shape[0] // 9
        w = w_pack.reshape(3, 3, cin, Co).astype(jnp.float32)
        xq = x.astype(jnp.bfloat16).astype(jnp.float32)        # match bf16 feed
        y = lax.conv_general_dilated(
            xq, w, window_strides=(1, 1),
            padding=((dil, dil), (dil, dil)),
            rhs_dilation=(dil, dil),
            dimension_numbers=("NCHW", "HWIO", "NCHW"),
            precision=lax.Precision.HIGHEST)
        return y + b.reshape(1, -1, 1, 1)

    a = fp["alphas"]
    e1 = prelu(conv(upb_nchw, fp["w1"], fp["b1"], 1), a[0])
    e2 = prelu(conv(e1, fp["w2"], fp["b2"], 1), a[1])
    e3 = prelu(conv(e2, fp["w3"], fp["b3"], 2), a[2])
    cat = jnp.concatenate([e1, e2, e3], axis=1)
    cat = cat.astype(jnp.bfloat16).astype(jnp.float32)
    w4 = fp["w4"].astype(jnp.float32)
    y = jnp.einsum("nchw,cd->ndhw", cat, w4,
                   precision=lax.Precision.HIGHEST) + fp["b4"].reshape(1, -1, 1, 1)
    return prelu(y, a[3])


if __name__ == "__main__":
    key = jax.random.PRNGKey(0)
    kx, ks, kp = jax.random.split(key, 3)

    # x: (N, 16, 8, 8) --PixelShuffle(2)--> (N, 4, 16, 16); skip: (N, 12, 16, 16)
    # => upB has in_filters = 16 channels; out_filters = 32.
    N, Cx, Hs, Ws = 2, 16, 8, 8
    in_filters, out_filters = 16, 32
    skip_c = in_filters - Cx // 4

    x = jax.random.normal(kx, (N, Cx, Hs, Ws), jnp.float32)
    skip = jax.random.normal(ks, (N, skip_c, 2 * Hs, 2 * Ws), jnp.float32)

    params = init_params(kp, in_filters, out_filters)
    fp = fold_params(params)

    out = jax.block_until_ready(upblock_forward(x, skip, fp))

    upB = jnp.concatenate([pixel_shuffle(x, 2), skip], axis=1)
    ref = upblock_ref(upB, fp)

    assert out.shape == ref.shape == (N, out_filters, 2 * Hs, 2 * Ws)
    rel_err = float(jnp.max(jnp.abs(out - ref)) / (jnp.max(jnp.abs(ref)) + 1e-6))
    assert rel_err < 2e-2, rel_err

    print("KERNEL_OK")
</pallas_src>

<mosaic_0001>
module attributes {stable_mosaic.version = 11 : i64} {
  func.func @upblock_kernel(%arg0: i32, %arg1: memref<1x16x16x16xbf16, #tpu.memory_space<vmem>>, %arg2: memref<144x32xbf16, #tpu.memory_space<vmem>>, %arg3: memref<1x32xf32, #tpu.memory_space<vmem>>, %arg4: memref<288x32xbf16, #tpu.memory_space<vmem>>, %arg5: memref<1x32xf32, #tpu.memory_space<vmem>>, %arg6: memref<288x32xbf16, #tpu.memory_space<vmem>>, %arg7: memref<1x32xf32, #tpu.memory_space<vmem>>, %arg8: memref<96x32xbf16, #tpu.memory_space<vmem>>, %arg9: memref<1x32xf32, #tpu.memory_space<vmem>>, %arg10: memref<4xf32, #tpu.memory_space<smem>>, %arg11: memref<1x32x256xf32, #tpu.memory_space<vmem>>, %arg12: memref<18x32x16xbf16, #tpu.memory_space<vmem>>, %arg13: memref<18x32x32xbf16, #tpu.memory_space<vmem>>, %arg14: memref<20x32x32xbf16, #tpu.memory_space<vmem>>) attributes {dimension_semantics = [#tpu.dimension_semantics<parallel>], iteration_bounds = array<i64: 2>, scalar_prefetch = 0 : i64, scratch_operands = 3 : i64, tpu.core_type = #tpu.core_type<tc>, window_params = [{transform_indices = @transform_0, window_bounds = array<i64: 1, 16, 16, 16>}, {pipeline_mode = #tpu.pipeline_mode<synchronous>, transform_indices = @transform_1, window_bounds = array<i64: 144, 32>}, {pipeline_mode = #tpu.pipeline_mode<synchronous>, transform_indices = @transform_2, window_bounds = array<i64: 1, 32>}, {pipeline_mode = #tpu.pipeline_mode<synchronous>, transform_indices = @transform_3, window_bounds = array<i64: 288, 32>}, {pipeline_mode = #tpu.pipeline_mode<synchronous>, transform_indices = @transform_4, window_bounds = array<i64: 1, 32>}, {pipeline_mode = #tpu.pipeline_mode<synchronous>, transform_indices = @transform_5, window_bounds = array<i64: 288, 32>}, {pipeline_mode = #tpu.pipeline_mode<synchronous>, transform_indices = @transform_6, window_bounds = array<i64: 1, 32>}, {pipeline_mode = #tpu.pipeline_mode<synchronous>, transform_indices = @transform_7, window_bounds = array<i64: 96, 32>}, {pipeline_mode = #tpu.pipeline_mode<synchronous>, transform_indices = @transform_8, window_bounds = array<i64: 1, 32>}, {transform_indices = @transform_9, window_bounds = array<i64: 4>}, {transform_indices = @transform_10, window_bounds = array<i64: 1, 32, 256>}]} {
    %c0 = arith.constant 0 : index
    %0 = memref.load %arg10[%c0] : memref<4xf32, #tpu.memory_space<smem>>
    %c1 = arith.constant 1 : index
    %1 = memref.load %arg10[%c1] : memref<4xf32, #tpu.memory_space<smem>>
    %c2 = arith.constant 2 : index
    %2 = memref.load %arg10[%c2] : memref<4xf32, #tpu.memory_space<smem>>
    %c3 = arith.constant 3 : index
    %3 = memref.load %arg10[%c3] : memref<4xf32, #tpu.memory_space<smem>>
    %cst = arith.constant 0.000000e+00 : bf16
    %4 = vector.broadcast %cst : bf16 to vector<1x32x16xbf16>
    %c0_0 = arith.constant 0 : index
    %c0_1 = arith.constant 0 : index
    %c0_2 = arith.constant 0 : index
    %5 = vector.load %arg12[%c0_0, %c0_1, %c0_2] : memref<18x32x16xbf16, #tpu.memory_space<vmem>>, vector<1x32x16xbf16>
    tpu.vector_store %arg12[%c0_0, %c0_1, %c0_2], %4 {strides = array<i32>} : memref<18x32x16xbf16, #tpu.memory_space<vmem>>, vector<1x32x16xbf16>,
    %cst_3 = arith.constant 0.000000e+00 : bf16
    %6 = vector.broadcast %cst_3 : bf16 to vector<1x32x16xbf16>
    %c17 = arith.constant 17 : index
    %c0_4 = arith.constant 0 : index
    %c0_5 = arith.constant 0 : index
    %7 = vector.load %arg12[%c17, %c0_4, %c0_5] : memref<18x32x16xbf16, #tpu.memory_space<vmem>>, vector<1x32x16xbf16>
    tpu.vector_store %arg12[%c17, %c0_4, %c0_5], %6 {strides = array<i32>} : memref<18x32x16xbf16, #tpu.memory_space<vmem>>, vector<1x32x16xbf16>,
    %cst_6 = arith.constant 0.000000e+00 : bf16
    %8 = vector.broadcast %cst_6 : bf16 to vector<16x2x16xbf16>
    %c1_7 = arith.constant 1 : index
    %c6 = arith.constant 6 : index
    %c0_8 = arith.constant 0 : index
    %9 = vector.load %arg12[%c1_7, %c6, %c0_8] : memref<18x32x16xbf16, #tpu.memory_space<vmem>>, vector<16x2x16xbf16>
    tpu.vector_store %arg12[%c1_7, %c6, %c0_8], %8 {strides = array<i32>} : memref<18x32x16xbf16, #tpu.memory_space<vmem>>, vector<16x2x16xbf16>,
    %cst_9 = arith.constant 0.000000e+00 : bf16
    %10 = vector.broadcast %cst_9 : bf16 to vector<16x2x16xbf16>
    %c1_10 = arith.constant 1 : index
    %c24 = arith.constant 24 : index
    %c0_11 = arith.constant 0 : index
    %11 = vector.load %arg12[%c1_10, %c24, %c0_11] : memref<18x32x16xbf16, #tpu.memory_space<vmem>>, vector<16x2x16xbf16>
    tpu.vector_store %arg12[%c1_10, %c24, %c0_11], %10 {strides = array<i32>} : memref<18x32x16xbf16, #tpu.memory_space<vmem>>, vector<16x2x16xbf16>,
    %c0_12 = arith.constant 0 : index
    %c0_13 = arith.constant 0 : index
    %c0_14 = arith.constant 0 : index
    %c0_15 = arith.constant 0 : index
    %12 = vector.load %arg1[%c0_12, %c0_13, %c0_14, %c0_15] : memref<1x16x16x16xbf16, #tpu.memory_space<vmem>>, vector<1x16x16x16xbf16>
    %13 = vector.shape_cast %12 : vector<1x16x16x16xbf16> to vector<16x16x16xbf16>
    %c1_16 = arith.constant 1 : index
    %c8 = arith.constant 8 : index
    %c0_17 = arith.constant 0 : index
    %14 = vector.load %arg12[%c1_16, %c8, %c0_17] : memref<18x32x16xbf16, #tpu.memory_space<vmem>>, vector<16x16x16xbf16>
    tpu.vector_store %arg12[%c1_16, %c8, %c0_17], %13 {strides = array<i32>} : memref<18x32x16xbf16, #tpu.memory_space<vmem>>, vector<16x16x16xbf16>,
    %c0_18 = arith.constant 0 : index
    %c7 = arith.constant 7 : index
    %c0_19 = arith.constant 0 : index
    %15 = vector.load %arg12[%c0_18, %c7, %c0_19] : memref<18x32x16xbf16, #tpu.memory_space<vmem>>, vector<16x16x16xbf16>
    %16 = vector.shape_cast %15 : vector<16x16x16xbf16> to vector<256x16xbf16>
    %c0_20 = arith.constant 0 : index
    %c8_21 = arith.constant 8 : index
    %c0_22 = arith.constant 0 : index
    %17 = vector.load %arg12[%c0_20, %c8_21, %c0_22] : memref<18x32x16xbf16, #tpu.memory_space<vmem>>, vector<16x16x16xbf16>
    %18 = vector.shape_cast %17 : vector<16x16x16xbf16> to vector<256x16xbf16>
    %c0_23 = arith.constant 0 : index
    %c9 = arith.constant 9 : index
    %c0_24 = arith.constant 0 : index
    %19 = vector.load %arg12[%c0_23, %c9, %c0_24] : memref<18x32x16xbf16, #tpu.memory_space<vmem>>, vector<16x16x16xbf16>
    %20 = vector.shape_cast %19 : vector<16x16x16xbf16> to vector<256x16xbf16>
    %c1_25 = arith.constant 1 : index
    %c7_26 = arith.constant 7 : index
    %c0_27 = arith.constant 0 : index
    %21 = vector.load %arg12[%c1_25, %c7_26, %c0_27] : memref<18x32x16xbf16, #tpu.memory_space<vmem>>, vector<16x16x16xbf16>
    %22 = vector.shape_cast %21 : vector<16x16x16xbf16> to vector<256x16xbf16>
    %c1_28 = arith.constant 1 : index
    %c8_29 = arith.constant 8 : index
    %c0_30 = arith.constant 0 : index
    %23 = vector.load %arg12[%c1_28, %c8_29, %c0_30] : memref<18x32x16xbf16, #tpu.memory_space<vmem>>, vector<16x16x16xbf16>
    %24 = vector.shape_cast %23 : vector<16x16x16xbf16> to vector<256x16xbf16>
    %c1_31 = arith.constant 1 : index
    %c9_32 = arith.constant 9 : index
    %c0_33 = arith.constant 0 : index
    %25 = vector.load %arg12[%c1_31, %c9_32, %c0_33] : memref<18x32x16xbf16, #tpu.memory_space<vmem>>, vector<16x16x16xbf16>
    %26 = vector.shape_cast %25 : vector<16x16x16xbf16> to vector<256x16xbf16>
    %c2_34 = arith.constant 2 : index
    %c7_35 = arith.constant 7 : index
    %c0_36 = arith.constant 0 : index
    %27 = vector.load %arg12[%c2_34, %c7_35, %c0_36] : memref<18x32x16xbf16, #tpu.memory_space<vmem>>, vector<16x16x16xbf16>
    %28 = vector.shape_cast %27 : vector<16x16x16xbf16> to vector<256x16xbf16>
    %c2_37 = arith.constant 2 : index
    %c8_38 = arith.constant 8 : index
    %c0_39 = arith.constant 0 : index
    %29 = vector.load %arg12[%c2_37, %c8_38, %c0_39] : memref<18x32x16xbf16, #tpu.memory_space<vmem>>, vector<16x16x16xbf16>
    %30 = vector.shape_cast %29 : vector<16x16x16xbf16> to vector<256x16xbf16>
    %c2_40 = arith.constant 2 : index
    %c9_41 = arith.constant 9 : index
    %c0_42 = arith.constant 0 : index
    %31 = vector.load %arg12[%c2_40, %c9_41, %c0_42] : memref<18x32x16xbf16, #tpu.memory_space<vmem>>, vector<16x16x16xbf16>
    %32 = vector.shape_cast %31 : vector<16x16x16xbf16> to vector<256x16xbf16>
    %33 = tpu.concatenate %16, %18, %20, %22, %24, %26, %28, %30, %32 in 1 : vector<256x16xbf16>, vector<256x16xbf16>, vector<256x16xbf16>, vector<256x16xbf16>, vector<256x16xbf16>, vector<256x16xbf16>, vector<256x16xbf16>, vector<256x16xbf16>, vector<256x16xbf16> -> vector<256x144xbf16>
    %c0_43 = arith.constant 0 : index
    %c0_44 = arith.constant 0 : index
    %34 = vector.load %arg2[%c0_43, %c0_44] : memref<144x32xbf16, #tpu.memory_space<vmem>>, vector<144x32xbf16>
    %cst_45 = arith.constant dense<0.000000e+00> : vector<256x32xf32>
    %35 = tpu.matmul %33, %34, %cst_45 {dimension_numbers = #tpu.dot_dimension_numbers<[1], [0], [0], [1], [0, 0, 1, 1], [], []>} : vector<256x144xbf16>, vector<144x32xbf16>, vector<256x32xf32> -> vector<256x32xf32>
    %c0_46 = arith.constant 0 : index
    %c0_47 = arith.constant 0 : index
    %36 = vector.load %arg3[%c0_46, %c0_47] : memref<1x32xf32, #tpu.memory_space<vmem>>, vector<1x32xf32>
    %37 = vector.broadcast %36 : vector<1x32xf32> to vector<256x32xf32>
    %38 = arith.addf %35, %37 : vector<256x32xf32>
    %cst_48 = arith.constant 0.000000e+00 : f32
    %39 = vector.broadcast %cst_48 : f32 to vector<256x32xf32>
    %40 = arith.maximumf %38, %39 : vector<256x32xf32>
    %cst_49 = arith.constant 0.000000e+00 : f32
    %41 = vector.broadcast %cst_49 : f32 to vector<256x32xf32>
    %42 = arith.minimumf %38, %41 : vector<256x32xf32>
    %43 = vector.broadcast %0 : f32 to vector<256x32xf32>
    %44 = arith.mulf %43, %42 : vector<256x32xf32>
    %45 = arith.addf %40, %44 : vector<256x32xf32>
    %46 = arith.truncf %45 : vector<256x32xf32> to vector<256x32xbf16>
    %cst_50 = arith.constant 0.000000e+00 : bf16
    %47 = vector.broadcast %cst_50 : bf16 to vector<1x32x32xbf16>
    %c0_51 = arith.constant 0 : index
    %c0_52 = arith.constant 0 : index
    %c0_53 = arith.constant 0 : index
    %48 = vector.load %arg13[%c0_51, %c0_52, %c0_53] : memref<18x32x32xbf16, #tpu.memory_space<vmem>>, vector<1x32x32xbf16>
    tpu.vector_store %arg13[%c0_51, %c0_52, %c0_53], %47 {strides = array<i32>} : memref<18x32x32xbf16, #tpu.memory_space<vmem>>, vector<1x32x32xbf16>,
    %cst_54 = arith.constant 0.000000e+00 : bf16
    %49 = vector.broadcast %cst_54 : bf16 to vector<1x32x32xbf16>
    %c17_55 = arith.constant 17 : index
    %c0_56 = arith.constant 0 : index
    %c0_57 = arith.constant 0 : index
    %50 = vector.load %arg13[%c17_55, %c0_56, %c0_57] : memref<18x32x32xbf16, #tpu.memory_space<vmem>>, vector<1x32x32xbf16>
    tpu.vector_store %arg13[%c17_55, %c0_56, %c0_57], %49 {strides = array<i32>} : memref<18x32x32xbf16, #tpu.memory_space<vmem>>, vector<1x32x32xbf16>,
    %cst_58 = arith.constant 0.000000e+00 : bf16
    %51 = vector.broadcast %cst_58 : bf16 to vector<16x2x32xbf16>
    %c1_59 = arith.constant 1 : index
    %c6_60 = arith.constant 6 : index
    %c0_61 = arith.constant 0 : index
    %52 = vector.load %arg13[%c1_59, %c6_60, %c0_61] : memref<18x32x32xbf16, #tpu.memory_space<vmem>>, vector<16x2x32xbf16>
    tpu.vector_store %arg13[%c1_59, %c6_60, %c0_61], %51 {strides = array<i32>} : memref<18x32x32xbf16, #tpu.memory_space<vmem>>, vector<16x2x32xbf16>,
    %cst_62 = arith.constant 0.000000e+00 : bf16
    %53 = vector.broadcast %cst_62 : bf16 to vector<16x2x32xbf16>
    %c1_63 = arith.constant 1 : index
    %c24_64 = arith.constant 24 : index
    %c0_65 = arith.constant 0 : index
    %54 = vector.load %arg13[%c1_63, %c24_64, %c0_65] : memref<18x32x32xbf16, #tpu.memory_space<vmem>>, vector<16x2x32xbf16>
    tpu.vector_store %arg13[%c1_63, %c24_64, %c0_65], %53 {strides = array<i32>} : memref<18x32x32xbf16, #tpu.memory_space<vmem>>, vector<16x2x32xbf16>,
    %55 = vector.shape_cast %46 : vector<256x32xbf16> to vector<16x16x32xbf16>
    %c1_66 = arith.constant 1 : index
    %c8_67 = arith.constant 8 : index
    %c0_68 = arith.constant 0 : index
    %56 = vector.load %arg13[%c1_66, %c8_67, %c0_68] : memref<18x32x32xbf16, #tpu.memory_space<vmem>>, vector<16x16x32xbf16>
    tpu.vector_store %arg13[%c1_66, %c8_67, %c0_68], %55 {strides = array<i32>} : memref<18x32x32xbf16, #tpu.memory_space<vmem>>, vector<16x16x32xbf16>,
    %c0_69 = arith.constant 0 : index
    %c7_70 = arith.constant 7 : index
    %c0_71 = arith.constant 0 : index
    %57 = vector.load %arg13[%c0_69, %c7_70, %c0_71] : memref<18x32x32xbf16, #tpu.memory_space<vmem>>, vector<16x16x32xbf16>
    %58 = vector.shape_cast %57 : vector<16x16x32xbf16> to vector<256x32xbf16>
    %c0_72 = arith.constant 0 : index
    %c8_73 = arith.constant 8 : index
    %c0_74 = arith.constant 0 : index
    %59 = vector.load %arg13[%c0_72, %c8_73, %c0_74] : memref<18x32x32xbf16, #tpu.memory_space<vmem>>, vector<16x16x32xbf16>
    %60 = vector.shape_cast %59 : vector<16x16x32xbf16> to vector<256x32xbf16>
    %c0_75 = arith.constant 0 : index
    %c9_76 = arith.constant 9 : index
    %c0_77 = arith.constant 0 : index
    %61 = vector.load %arg13[%c0_75, %c9_76, %c0_77] : memref<18x32x32xbf16, #tpu.memory_space<vmem>>, vector<16x16x32xbf16>
    %62 = vector.shape_cast %61 : vector<16x16x32xbf16> to vector<256x32xbf16>
    %c1_78 = arith.constant 1 : index
    %c7_79 = arith.constant 7 : index
    %c0_80 = arith.constant 0 : index
    %63 = vector.load %arg13[%c1_78, %c7_79, %c0_80] : memref<18x32x32xbf16, #tpu.memory_space<vmem>>, vector<16x16x32xbf16>
    %64 = vector.shape_cast %63 : vector<16x16x32xbf16> to vector<256x32xbf16>
    %c1_81 = arith.constant 1 : index
    %c8_82 = arith.constant 8 : index
    %c0_83 = arith.constant 0 : index
    %65 = vector.load %arg13[%c1_81, %c8_82, %c0_83] : memref<18x32x32xbf16, #tpu.memory_space<vmem>>, vector<16x16x32xbf16>
    %66 = vector.shape_cast %65 : vector<16x16x32xbf16> to vector<256x32xbf16>
    %c1_84 = arith.constant 1 : index
    %c9_85 = arith.constant 9 : index
    %c0_86 = arith.constant 0 : index
    %67 = vector.load %arg13[%c1_84, %c9_85, %c0_86] : memref<18x32x32xbf16, #tpu.memory_space<vmem>>, vector<16x16x32xbf16>
    %68 = vector.shape_cast %67 : vector<16x16x32xbf16> to vector<256x32xbf16>
    %c2_87 = arith.constant 2 : index
    %c7_88 = arith.constant 7 : index
    %c0_89 = arith.constant 0 : index
    %69 = vector.load %arg13[%c2_87, %c7_88, %c0_89] : memref<18x32x32xbf16, #tpu.memory_space<vmem>>, vector<16x16x32xbf16>
    %70 = vector.shape_cast %69 : vector<16x16x32xbf16> to vector<256x32xbf16>
    %c2_90 = arith.constant 2 : index
    %c8_91 = arith.constant 8 : index
    %c0_92 = arith.constant 0 : index
    %71 = vector.load %arg13[%c2_90, %c8_91, %c0_92] : memref<18x32x32xbf16, #tpu.memory_space<vmem>>, vector<16x16x32xbf16>
    %72 = vector.shape_cast %71 : vector<16x16x32xbf16> to vector<256x32xbf16>
    %c2_93 = arith.constant 2 : index
    %c9_94 = arith.constant 9 : index
    %c0_95 = arith.constant 0 : index
    %73 = vector.load %arg13[%c2_93, %c9_94, %c0_95] : memref<18x32x32xbf16, #tpu.memory_space<vmem>>, vector<16x16x32xbf16>
    %74 = vector.shape_cast %73 : vector<16x16x32xbf16> to vector<256x32xbf16>
    %75 = tpu.concatenate %58, %60, %62, %64, %66, %68, %70, %72, %74 in 1 : vector<256x32xbf16>, vector<256x32xbf16>, vector<256x32xbf16>, vector<256x32xbf16>, vector<256x32xbf16>, vector<256x32xbf16>, vector<256x32xbf16>, vector<256x32xbf16>, vector<256x32xbf16> -> vector<256x288xbf16>
    %c0_96 = arith.constant 0 : index
    %c0_97 = arith.constant 0 : index
    %76 = vector.load %arg4[%c0_96, %c0_97] : memref<288x32xbf16, #tpu.memory_space<vmem>>, vector<288x32xbf16>
    %cst_98 = arith.constant dense<0.000000e+00> : vector<256x32xf32>
    %77 = tpu.matmul %75, %76, %cst_98 {dimension_numbers = #tpu.dot_dimension_numbers<[1], [0], [0], [1], [0, 0, 1, 1], [], []>} : vector<256x288xbf16>, vector<288x32xbf16>, vector<256x32xf32> -> vector<256x32xf32>
    %c0_99 = arith.constant 0 : index
    %c0_100 = arith.constant 0 : index
    %78 = vector.load %arg5[%c0_99, %c0_100] : memref<1x32xf32, #tpu.memory_space<vmem>>, vector<1x32xf32>
    %79 = vector.broadcast %78 : vector<1x32xf32> to vector<256x32xf32>
    %80 = arith.addf %77, %79 : vector<256x32xf32>
    %cst_101 = arith.constant 0.000000e+00 : f32
    %81 = vector.broadcast %cst_101 : f32 to vector<256x32xf32>
    %82 = arith.maximumf %80, %81 : vector<256x32xf32>
    %cst_102 = arith.constant 0.000000e+00 : f32
    %83 = vector.broadcast %cst_102 : f32 to vector<256x32xf32>
    %84 = arith.minimumf %80, %83 : vector<256x32xf32>
    %85 = vector.broadcast %1 : f32 to vector<256x32xf32>
    %86 = arith.mulf %85, %84 : vector<256x32xf32>
    %87 = arith.addf %82, %86 : vector<256x32xf32>
    %88 = arith.truncf %87 : vector<256x32xf32> to vector<256x32xbf16>
    %cst_103 = arith.constant 0.000000e+00 : bf16
    %89 = vector.broadcast %cst_103 : bf16 to vector<2x32x32xbf16>
    %c0_104 = arith.constant 0 : index
    %c0_105 = arith.constant 0 : index
    %c0_106 = arith.constant 0 : index
    %90 = vector.load %arg14[%c0_104, %c0_105, %c0_106] : memref<20x32x32xbf16, #tpu.memory_space<vmem>>, vector<2x32x32xbf16>
    tpu.vector_store %arg14[%c0_104, %c0_105, %c0_106], %89 {strides = array<i32>} : memref<20x32x32xbf16, #tpu.memory_space<vmem>>, vector<2x32x32xbf16>,
    %cst_107 = arith.constant 0.000000e+00 : bf16
    %91 = vector.broadcast %cst_107 : bf16 to vector<2x32x32xbf16>
    %c18 = arith.constant 18 : index
    %c0_108 = arith.constant 0 : index
    %c0_109 = arith.constant 0 : index
    %92 = vector.load %arg14[%c18, %c0_108, %c0_109] : memref<20x32x32xbf16, #tpu.memory_space<vmem>>, vector<2x32x32xbf16>
    tpu.vector_store %arg14[%c18, %c0_108, %c0_109], %91 {strides = array<i32>} : memref<20x32x32xbf16, #tpu.memory_space<vmem>>, vector<2x32x32xbf16>,
    %cst_110 = arith.constant 0.000000e+00 : bf16
    %93 = vector.broadcast %cst_110 : bf16 to vector<16x2x32xbf16>
    %c2_111 = arith.constant 2 : index
    %c6_112 = arith.constant 6 : index
    %c0_113 = arith.constant 0 : index
    %94 = vector.load %arg14[%c2_111, %c6_112, %c0_113] : memref<20x32x32xbf16, #tpu.memory_space<vmem>>, vector<16x2x32xbf16>
    tpu.vector_store %arg14[%c2_111, %c6_112, %c0_113], %93 {strides = array<i32>} : memref<20x32x32xbf16, #tpu.memory_space<vmem>>, vector<16x2x32xbf16>,
    %cst_114 = arith.constant 0.000000e+00 : bf16
    %95 = vector.broadcast %cst_114 : bf16 to vector<16x2x32xbf16>
    %c2_115 = arith.constant 2 : index
    %c24_116 = arith.constant 24 : index
    %c0_117 = arith.constant 0 : index
    %96 = vector.load %arg14[%c2_115, %c24_116, %c0_117] : memref<20x32x32xbf16, #tpu.memory_space<vmem>>, vector<16x2x32xbf16>
    tpu.vector_store %arg14[%c2_115, %c24_116, %c0_117], %95 {strides = array<i32>} : memref<20x32x32xbf16, #tpu.memory_space<vmem>>, vector<16x2x32xbf16>,
    %97 = vector.shape_cast %88 : vector<256x32xbf16> to vector<16x16x32xbf16>
    %c2_118 = arith.constant 2 : index
    %c8_119 = arith.constant 8 : index
    %c0_120 = arith.constant 0 : index
    %98 = vector.load %arg14[%c2_118, %c8_119, %c0_120] : memref<20x32x32xbf16, #tpu.memory_space<vmem>>, vector<16x16x32xbf16>
    tpu.vector_store %arg14[%c2_118, %c8_119, %c0_120], %97 {strides = array<i32>} : memref<20x32x32xbf16, #tpu.memory_space<vmem>>, vector<16x16x32xbf16>,
    %c0_121 = arith.constant 0 : index
    %c6_122 = arith.constant 6 : index
    %c0_123 = arith.constant 0 : index
    %99 = vector.load %arg14[%c0_121, %c6_122, %c0_123] : memref<20x32x32xbf16, #tpu.memory_space<vmem>>, vector<16x16x32xbf16>
    %100 = vector.shape_cast %99 : vector<16x16x32xbf16> to vector<256x32xbf16>
    %c0_124 = arith.constant 0 : index
    %c8_125 = arith.constant 8 : index
    %c0_126 = arith.constant 0 : index
    %101 = vector.load %arg14[%c0_124, %c8_125, %c0_126] : memref<20x32x32xbf16, #tpu.memory_space<vmem>>, vector<16x16x32xbf16>
    %102 = vector.shape_cast %101 : vector<16x16x32xbf16> to vector<256x32xbf16>
    %c0_127 = arith.constant 0 : index
    %c10 = arith.constant 10 : index
    %c0_128 = arith.constant 0 : index
    %103 = vector.load %arg14[%c0_127, %c10, %c0_128] : memref<20x32x32xbf16, #tpu.memory_space<vmem>>, vector<16x16x32xbf16>
    %104 = vector.shape_cast %103 : vector<16x16x32xbf16> to vector<256x32xbf16>
    %c2_129 = arith.constant 2 : index
    %c6_130 = arith.constant 6 : index
    %c0_131 = arith.constant 0 : index
    %105 = vector.load %arg14[%c2_129, %c6_130, %c0_131] : memref<20x32x32xbf16, #tpu.memory_space<vmem>>, vector<16x16x32xbf16>
    %106 = vector.shape_cast %105 : vector<16x16x32xbf16> to vector<256x32xbf16>
    %c2_132 = arith.constant 2 : index
    %c8_133 = arith.constant 8 : index
    %c0_134 = arith.constant 0 : index
    %107 = vector.load %arg14[%c2_132, %c8_133, %c0_134] : memref<20x32x32xbf16, #tpu.memory_space<vmem>>, vector<16x16x32xbf16>
    %108 = vector.shape_cast %107 : vector<16x16x32xbf16> to vector<256x32xbf16>
    %c2_135 = arith.constant 2 : index
    %c10_136 = arith.constant 10 : index
    %c0_137 = arith.constant 0 : index
    %109 = vector.load %arg14[%c2_135, %c10_136, %c0_137] : memref<20x32x32xbf16, #tpu.memory_space<vmem>>, vector<16x16x32xbf16>
    %110 = vector.shape_cast %109 : vector<16x16x32xbf16> to vector<256x32xbf16>
    %c4 = arith.constant 4 : index
    %c6_138 = arith.constant 6 : index
    %c0_139 = arith.constant 0 : index
    %111 = vector.load %arg14[%c4, %c6_138, %c0_139] : memref<20x32x32xbf16, #tpu.memory_space<vmem>>, vector<16x16x32xbf16>
    %112 = vector.shape_cast %111 : vector<16x16x32xbf16> to vector<256x32xbf16>
    %c4_140 = arith.constant 4 : index
    %c8_141 = arith.constant 8 : index
    %c0_142 = arith.constant 0 : index
    %113 = vector.load %arg14[%c4_140, %c8_141, %c0_142] : memref<20x32x32xbf16, #tpu.memory_space<vmem>>, vector<16x16x32xbf16>
    %114 = vector.shape_cast %113 : vector<16x16x32xbf16> to vector<256x32xbf16>
    %c4_143 = arith.constant 4 : index
    %c10_144 = arith.constant 10 : index
    %c0_145 = arith.constant 0 : index
    %115 = vector.load %arg14[%c4_143, %c10_144, %c0_145] : memref<20x32x32xbf16, #tpu.memory_space<vmem>>, vector<16x16x32xbf16>
    %116 = vector.shape_cast %115 : vector<16x16x32xbf16> to vector<256x32xbf16>
    %117 = tpu.concatenate %100, %102, %104, %106, %108, %110, %112, %114, %116 in 1 : vector<256x32xbf16>, vector<256x32xbf16>, vector<256x32xbf16>, vector<256x32xbf16>, vector<256x32xbf16>, vector<256x32xbf16>, vector<256x32xbf16>, vector<256x32xbf16>, vector<256x32xbf16> -> vector<256x288xbf16>
    %c0_146 = arith.constant 0 : index
    %c0_147 = arith.constant 0 : index
    %118 = vector.load %arg6[%c0_146, %c0_147] : memref<288x32xbf16, #tpu.memory_space<vmem>>, vector<288x32xbf16>
    %cst_148 = arith.constant dense<0.000000e+00> : vector<256x32xf32>
    %119 = tpu.matmul %117, %118, %cst_148 {dimension_numbers = #tpu.dot_dimension_numbers<[1], [0], [0], [1], [0, 0, 1, 1], [], []>} : vector<256x288xbf16>, vector<288x32xbf16>, vector<256x32xf32> -> vector<256x32xf32>
    %c0_149 = arith.constant 0 : index
    %c0_150 = arith.constant 0 : index
    %120 = vector.load %arg7[%c0_149, %c0_150] : memref<1x32xf32, #tpu.memory_space<vmem>>, vector<1x32xf32>
    %121 = vector.broadcast %120 : vector<1x32xf32> to vector<256x32xf32>
    %122 = arith.addf %119, %121 : vector<256x32xf32>
    %cst_151 = arith.constant 0.000000e+00 : f32
    %123 = vector.broadcast %cst_151 : f32 to vector<256x32xf32>
    %124 = arith.maximumf %122, %123 : vector<256x32xf32>
    %cst_152 = arith.constant 0.000000e+00 : f32
    %125 = vector.broadcast %cst_152 : f32 to vector<256x32xf32>
    %126 = arith.minimumf %122, %125 : vector<256x32xf32>
    %127 = vector.broadcast %2 : f32 to vector<256x32xf32>
    %128 = arith.mulf %127, %126 : vector<256x32xf32>
    %129 = arith.addf %124, %128 : vector<256x32xf32>
    %130 = arith.truncf %129 : vector<256x32xf32> to vector<256x32xbf16>
    %131 = tpu.concatenate %46, %88, %130 in 1 : vector<256x32xbf16>, vector<256x32xbf16>, vector<256x32xbf16> -> vector<256x96xbf16>
    %c0_153 = arith.constant 0 : index
    %c0_154 = arith.constant 0 : index
    %132 = vector.load %arg8[%c0_153, %c0_154] : memref<96x32xbf16, #tpu.memory_space<vmem>>, vector<96x32xbf16>
    %cst_155 = arith.constant dense<0.000000e+00> : vector<256x32xf32>
    %133 = tpu.matmul %131, %132, %cst_155 {dimension_numbers = #tpu.dot_dimension_numbers<[1], [0], [0], [1], [0, 0, 1, 1], [], []>} : vector<256x96xbf16>, vector<96x32xbf16>, vector<256x32xf32> -> vector<256x32xf32>
    %c0_156 = arith.constant 0 : index
    %c0_157 = arith.constant 0 : index
    %134 = vector.load %arg9[%c0_156, %c0_157] : memref<1x32xf32, #tpu.memory_space<vmem>>, vector<1x32xf32>
    %135 = vector.broadcast %134 : vector<1x32xf32> to vector<256x32xf32>
    %136 = arith.addf %133, %135 : vector<256x32xf32>
    %cst_158 = arith.constant 0.000000e+00 : f32
    %137 = vector.broadcast %cst_158 : f32 to vector<256x32xf32>
    %138 = arith.maximumf %136, %137 : vector<256x32xf32>
    %cst_159 = arith.constant 0.000000e+00 : f32
    %139 = vector.broadcast %cst_159 : f32 to vector<256x32xf32>
    %140 = arith.minimumf %136, %139 : vector<256x32xf32>
    %141 = vector.broadcast %3 : f32 to vector<256x32xf32>
    %142 = arith.mulf %141, %140 : vector<256x32xf32>
    %143 = arith.addf %138, %142 : vector<256x32xf32>
    %cst_160 = arith.constant 0.000000e+00 : f32
    %144 = vector.broadcast %cst_160 : f32 to vector<256x96xf32>
    %145 = tpu.concatenate %143, %144 in 1 : vector<256x32xf32>, vector<256x96xf32> -> vector<256x128xf32>
    %146 = tpu.transpose %145, [1, 0] : vector<256x128xf32> -> vector<128x256xf32>
    %147 = vector.extract_strided_slice %146 {offsets = [0, 0], sizes = [32, 256], strides = [1, 1]} : vector<128x256xf32> to vector<32x256xf32>
    %c0_161 = arith.constant 0 : index
    %c0_162 = arith.constant 0 : index
    %c0_163 = arith.constant 0 : index
    %148 = vector.load %arg11[%c0_161, %c0_162, %c0_163] : memref<1x32x256xf32, #tpu.memory_space<vmem>>, vector<1x32x256xf32>
    %149 = vector.shape_cast %148 : vector<1x32x256xf32> to vector<32x256xf32>
    %150 = vector.shape_cast %147 : vector<32x256xf32> to vector<1x32x256xf32>
    tpu.vector_store %arg11[%c0_161, %c0_162, %c0_163], %150 {strides = array<i32>} : memref<1x32x256xf32, #tpu.memory_space<vmem>>, vector<1x32x256xf32>,
    return
  }
  func.func @transform_0(%arg0: i32) -> (i32, i32, i32, i32) {
    %c0_i32 = arith.constant 0 : i32
    %c0_i32_0 = arith.constant 0 : i32
    %c0_i32_1 = arith.constant 0 : i32
    %c0_i32_2 = arith.constant 0 : i32
    return %arg0, %c0_i32, %c0_i32_0, %c0_i32_1 : i32, i32, i32, i32
  }
  func.func @transform_1(%arg0: i32) -> (i32, i32) {
    %c0_i32 = arith.constant 0 : i32
    %c0_i32_0 = arith.constant 0 : i32
    %c0_i32_1 = arith.constant 0 : i32
    return %c0_i32, %c0_i32_0 : i32, i32
  }
  func.func @transform_2(%arg0: i32) -> (i32, i32) {
    %c0_i32 = arith.constant 0 : i32
    %c0_i32_0 = arith.constant 0 : i32
    %c0_i32_1 = arith.constant 0 : i32
    return %c0_i32, %c0_i32_0 : i32, i32
  }
  func.func @transform_3(%arg0: i32) -> (i32, i32) {
    %c0_i32 = arith.constant 0 : i32
    %c0_i32_0 = arith.constant 0 : i32
    %c0_i32_1 = arith.constant 0 : i32
    return %c0_i32, %c0_i32_0 : i32, i32
  }
  func.func @transform_4(%arg0: i32) -> (i32, i32) {
    %c0_i32 = arith.constant 0 : i32
    %c0_i32_0 = arith.constant 0 : i32
    %c0_i32_1 = arith.constant 0 : i32
    return %c0_i32, %c0_i32_0 : i32, i32
  }
  func.func @transform_5(%arg0: i32) -> (i32, i32) {
    %c0_i32 = arith.constant 0 : i32
    %c0_i32_0 = arith.constant 0 : i32
    %c0_i32_1 = arith.constant 0 : i32
    return %c0_i32, %c0_i32_0 : i32, i32
  }
  func.func @transform_6(%arg0: i32) -> (i32, i32) {
    %c0_i32 = arith.constant 0 : i32
    %c0_i32_0 = arith.constant 0 : i32
    %c0_i32_1 = arith.constant 0 : i32
    return %c0_i32, %c0_i32_0 : i32, i32
  }
  func.func @transform_7(%arg0: i32) -> (i32, i32) {
    %c0_i32 = arith.constant 0 : i32
    %c0_i32_0 = arith.constant 0 : i32
    %c0_i32_1 = arith.constant 0 : i32
    return %c0_i32, %c0_i32_0 : i32, i32
  }
  func.func @transform_8(%arg0: i32) -> (i32, i32) {
    %c0_i32 = arith.constant 0 : i32
    %c0_i32_0 = arith.constant 0 : i32
    %c0_i32_1 = arith.constant 0 : i32
    return %c0_i32, %c0_i32_0 : i32, i32
  }
  func.func @transform_9(%arg0: i32) -> i32 {
    %c0_i32 = arith.constant 0 : i32
    %c0_i32_0 = arith.constant 0 : i32
    return %c0_i32 : i32
  }
  func.func @transform_10(%arg0: i32) -> (i32, i32, i32) {
    %c0_i32 = arith.constant 0 : i32
    %c0_i32_0 = arith.constant 0 : i32
    %c0_i32_1 = arith.constant 0 : i32
    return %arg0, %c0_i32, %c0_i32_0 : i32, i32, i32
  }
}

</mosaic_0001>

<bundles_post_ra>
// kernel: tpu_custom_call.1
= control target key start
LH: loop header
LB: loop body
LE: loop exit
PB: predicated region body
PF: predicated region fallthrough
CT: control target
= control target key end

     0   :  { %15 = vsyncpa [#allocation7], 0  ;;  %s14709_s0 = inlined_call_operand.vmem [shape: bf16[2,16,16,16], index: 0, kind: input, shape index: {}]   ;;  %s14710_s1 = inlined_call_operand.vmem [shape: bf16[144,32], index: 1, kind: input, shape index: {}]   ;;  %s14711_s2 = inlined_call_operand.vmem [shape: f32[1,32], index: 2, kind: input, shape index: {}]   ;;  %s14712_s3 = inlined_call_operand.vmem [shape: bf16[288,32], index: 3, kind: input, shape index: {}]   ;;  %s14713_s4 = inlined_call_operand.vmem [shape: f32[1,32], index: 4, kind: input, shape index: {}]   ;;  %s14714_s5 = inlined_call_operand.vmem [shape: bf16[288,32], index: 5, kind: input, shape index: {}]   ;;  %s14715_s6 = inlined_call_operand.vmem [shape: f32[1,32], index: 6, kind: input, shape index: {}]   ;;  %s14716_s7 = inlined_call_operand.vmem [shape: bf16[96,32], index: 7, kind: input, shape index: {}]   ;;  %s14717_s8 = inlined_call_operand.vmem [shape: f32[1,32], index: 8, kind: input, shape index: {}]   ;;  %s14718_s9 = inlined_call_operand.vmem [shape: f32[4], index: 9, kind: input, shape index: {}]   ;;  %s14719_s10 = inlined_call_operand.hbm [shape: f32[2,32,256], index: 10, kind: output, shape index: {}]  }
   0x1   :  { %16 = vsyncpa [#allocation6], 0 }
   0x2   :  { %18 = vsyncpa [#allocation6 + $0x1], 0  ;;  %s10799_s13 = smov 0   ;;  %s10801_s14 = smov 0  }
   0x3   :  { %s10803_s15 = smov 0   ;;  %s10805_s16 = smov 0  }
   0x4 LB: > { %s10820_s17 = sadd.s32 4294967295, %s10731_s16   ;;  %s9876_s18 = sadd.s32 4294967294, %s10731_s16   ;;  %s10731_s16 = sphi %s10805_s16, %s14809_s16   ;;  %s10727_s15 = sphi %s10803_s15, %s14808_s15   ;;  %s10723_s14 = sphi %s10801_s14, %s14807_s14   ;;  %s10719_s13 = sphi %s10799_s13, %s14806_s13  }
   0x5   : > { %s10824_s19 = sadd.s32 1, %s10731_s16   ;;  %s246_s20 = sadd.s32 1, %s10727_s15 }
   0x6   : > { %s243_s21 = ssub.s32 %s10731_s16, %s10824_s19  ;;  %p256_p0 = scmp.ne.s32.totalorder %s10727_s15, %s10723_s14 }
   0x7   : > { %p244_p1 = scmp.eq.s32.totalorder %s243_s21, 0  ;;  %p257_p2 = scmp.eq.s32.totalorder %s10820_s17, 1 }
   0x8   : > { %p262_p3 = scmp.ne.s32.totalorder %s10723_s14, %s10719_s13  ;;  %p263_p4 = scmp.eq.s32.totalorder %s9876_s18, 1 }
   0x9   : > { %s10835_s22 = scalar_select %p244_p1, %s10727_s15, %s246_s20  }
   0xa   : > { %p10837_p5 = por %p257_p2, %p256_p0  ;;  %p10841_p6 = por %p263_p4, %p262_p3 }
   0xb   : > { %p9877_p7 = scmp.ge.s32.totalorder %s10731_s16, 1  ;;  %p270_p8 = scmp.lt.s32.totalorder %s10731_s16, 3 }
   0xc   : > { %p10462_p9 = scmp.eq.s32.totalorder %s10820_s17, 0  ;;  %s307_s28 = sshll.u32 %s14718_s9, 4  ;;  %s308_s28 = int_to_ptr.vmem [resolvable:$true] %s307_s28 }
   0xd   : > { %p10848_p10 = pnand %p9877_p7, %p270_p8  ;;  %s10650_s29 = scalar_lea.vmem %s308_s28, 16 }
   0xe   : > { %p10651_p13 = scmp.ne.s32.totalorder %s308_s28, %s10650_s29  ;;  %p10658_p3 = scmp.lt.s32.totalorder %s308_s28, %s308_s28 }
   0xf   : > { %p10454_p11 = pneg %p10848_p10  ;;  %p10659_p4 = scmp.lt.s32.totalorder %s10650_s29, %s10650_s29 }
  0x11   : > { %p10455_p12 = pnand %p10462_p9, %p10454_p11  ;;  %p10660_p7 = por %p10659_p4, %p10658_p3 }
  0x13   : > { %p10652_p0 = pneg %p10455_p12 }
  0x15   : > { %p10653_p1 = pnand %p10652_p0, %p10651_p13 }
  0x17   : > { %p10654_p2 = pneg %p10653_p1 }
  0x19   : > { %p10661_p8 = pnand %p10660_p7, %p10654_p2 }
  0x1b   : > { %10664 = shalt.err (!%p10661_p8)
}
  0x1c   : > { %s10733_s30 = smov [#allocation5]   ;;  %328 = sbr.rel (%p10848_p10) target bundleno = 2186 (0x88a), region = 60 }
  0x1d   : > { %10457 = dma.vmem_to_smem (!%p10455_p12), %s308_s28, 16, %s10733_s30, [#allocation7]  }
  0x23   : > { %10710 = dma.done.wait (%p10462_p9), [#allocation7], 16  }
  0x24   : > { %10712 = vsyncadd (%p10462_p9), [#allocation7], 4294967280 }
  0x25   : > { %334 = sfence }
  0x26   : > { %vm377_vm0 = vcmask 130048   ;;  %v10734_v0 = vmov 0   ;;  %p367_p10 = scmp.lt.s32.totalorder %s10820_s17, 1  ;;  %vm401_vm1 = vcmask 126980   ;;  %vm384_vm2 = vcmask 125955   ;;  %v10523_v1 = vld [vmem:[%s14710_s1] sm:$0xff]  }
  0x27   : > { %378 = vst.msk [vmem:[#allocation2] sm:$0xff] %vm377_vm0, %v10734_v0  ;;  %379 = vst.msk [vmem:[#allocation2 + $0x8] sm:$0xff] %vm377_vm0, %v10734_v0  ;;  %3293 = vmatprep.subr.bf16.mxu0 %v10734_v0  ;;  %vm965_vm3 = vcmask 1043456   ;;  %vm578_vm4 = vcmask 130052   ;;  %vm1030_vm5 = vsmask.f32 3328 }
  0x28   : > { %381 = vst.msk [vmem:[#allocation2 + $0x110] sm:$0xff] %vm377_vm0, %v10734_v0  ;;  %382 = vst.msk [vmem:[#allocation2 + $0x118] sm:$0xff] %vm377_vm0, %v10734_v0  ;;  %s368_s11 = scalar_select %p367_p10, %s10820_s17, 1  ;;  %3294 = vmatpush1.bf16.msra.mxu0 %v10523_v1  ;;  %v10524_v2 = vld [vmem:[%s14710_s1 + $0x8] sm:$0xff]   ;;  %vm580_vm6 = vcmask 125952   ;;  %vm2952_vm7 = vcmask 261120  }
  0x29   : > { %402 = vst.msk [vmem:[#allocation2 + $0x18] sm:$0x10] %vm401_vm1, %v10734_v0  ;;  %403 = vst.msk [vmem:[#allocation2 + $0x28] sm:$0x10] %vm401_vm1, %v10734_v0  ;;  %3295 = vmatprep.subr.bf16.mxu0 %v10734_v0  ;;  %v10527_v10 = vld [vmem:[%s14710_s1 + $0x10] sm:$0xff]   ;;  %v10528_v19 = vld [vmem:[%s14710_s1 + $0x18] sm:$0xff]  }
  0x2a   : > { %404 = vst.msk [vmem:[#allocation2 + $0x38] sm:$0x10] %vm401_vm1, %v10734_v0  ;;  %405 = vst.msk [vmem:[#allocation2 + $0x48] sm:$0x10] %vm401_vm1, %v10734_v0  ;;  %s10044_s20 = sshll.u32 %s368_s11, 7  ;;  %s14739_s18 = smov 16  }
  0x2b   : > { %406 = vst.msk [vmem:[#allocation2 + $0x58] sm:$0x10] %vm401_vm1, %v10734_v0  ;;  %407 = vst.msk [vmem:[#allocation2 + $0x68] sm:$0x10] %vm401_vm1, %v10734_v0  ;;  %s10951_s28 = scalar_lea.vmem %s14709_s0, %s10044_s20  ;;  %s10736_s20 = smov 32   ;;  %vm2985_vm9 = vcmask 392192  }
  0x2c   : > { %408 = vst.msk [vmem:[#allocation2 + $0x78] sm:$0x10] %vm401_vm1, %v10734_v0  ;;  %409 = vst.msk [vmem:[#allocation2 + $0x88] sm:$0x10] %vm401_vm1, %v10734_v0  ;;  %v10507_v3 = vld [vmem:[%s10951_s28 + $0x8] ss:$0 sps:$4 sm:$0xff]   ;;  %3296 = vmatpush1.bf16.msra.mxu0 %v10524_v2 }
  0x2d   : > { %410 = vst.msk [vmem:[#allocation2 + $0x98] sm:$0x10] %vm401_vm1, %v10734_v0  ;;  %411 = vst.msk [vmem:[#allocation2 + $0xa8] sm:$0x10] %vm401_vm1, %v10734_v0  ;;  %v10508_v9 = vld [vmem:[%s10951_s28 + $0xc] ss:$0 sps:$4 sm:$0xff]   ;;  %3297 = vmatprep.subr.bf16.mxu0 %v10734_v0 }
  0x2e   : > { %412 = vst.msk [vmem:[#allocation2 + $0xb8] sm:$0x10] %vm401_vm1, %v10734_v0  ;;  %413 = vst.msk [vmem:[#allocation2 + $0xc8] sm:$0x10] %vm401_vm1, %v10734_v0  ;;  %v613_v4 = vld [vmem:[#allocation2 + $0x8] sm:$0xf] }
  0x2f   : > { %414 = vst.msk [vmem:[#allocation2 + $0xd8] sm:$0x10] %vm401_vm1, %v10734_v0  ;;  %415 = vst.msk [vmem:[#allocation2 + $0xe8] sm:$0x10] %vm401_vm1, %v10734_v0  ;;  %v917_v5 = vld [vmem:[#allocation2] sm:$0xf0] }
  0x30   : > { %416 = vst.msk [vmem:[#allocation2 + $0xf8] sm:$0x10] %vm401_vm1, %v10734_v0  ;;  %417 = vst.msk [vmem:[#allocation2 + $0x108] sm:$0x10] %vm401_vm1, %v10734_v0  ;;  %v1014_v6 = vld [vmem:[#allocation2 + $0x8] sm:$0x1f]  ;;  %3298 = vmatpush1.bf16.msra.mxu0 %v10527_v10 }
  0x31   : > { %385 = vst.msk [vmem:[#allocation2 + $0x10] sm:$0x8] %vm384_vm2, %v10734_v0  ;;  %386 = vst.msk [vmem:[#allocation2 + $0x20] sm:$0x8] %vm384_vm2, %v10734_v0  ;;  %v966_v7 = vrot.slane %v917_v5, 4  ;;  %v967_v8 = vrot.slane %v613_v4, 4  ;;  %3299 = vmatprep.subr.bf16.mxu0 %v10734_v0 }
  0x32   : > { %387 = vst.msk [vmem:[#allocation2 + $0x30] sm:$0x8] %vm384_vm2, %v10734_v0  ;;  %388 = vst.msk [vmem:[#allocation2 + $0x40] sm:$0x8] %vm384_vm2, %v10734_v0  ;;  %v1032_v11 = vshrl.u32 %v917_v5, 16  ;;  %v1035_v12 = vshll.u32 %v917_v5, 16 }
  0x33   : > { %389 = vst.msk [vmem:[#allocation2 + $0x50] sm:$0x8] %vm384_vm2, %v10734_v0  ;;  %390 = vst.msk [vmem:[#allocation2 + $0x60] sm:$0x8] %vm384_vm2, %v10734_v0  ;;  %v1040_v13 = vshrl.u32 %v1014_v6, 16  ;;  %v1043_v14 = vshll.u32 %v1014_v6, 16  ;;  %v968_v17 = vsel %vm965_vm3, %v966_v7, %v967_v8 }
  0x34   : > { %391 = vst.msk [vmem:[#allocation2 + $0x70] sm:$0x8] %vm384_vm2, %v10734_v0  ;;  %392 = vst.msk [vmem:[#allocation2 + $0x80] sm:$0x8] %vm384_vm2, %v10734_v0  ;;  %v654_v15 = vshrl.u32 %v613_v4, 16  ;;  %v657_v16 = vshll.u32 %v613_v4, 16  ;;  %2680 = vrot.lane.b32.xlu0 %v968_v17, %s14739_s18  ;;  %3300 = vmatpush1.bf16.msra.mxu0 %v10528_v19 }
  0x35   : > { %393 = vst.msk [vmem:[#allocation2 + $0x90] sm:$0x8] %vm384_vm2, %v10734_v0  ;;  %394 = vst.msk [vmem:[#allocation2 + $0xa0] sm:$0x8] %vm384_vm2, %v10734_v0  ;;  %v10509_v18 = vld [vmem:[%s10951_s28] ss:$0 sps:$4 sm:$0xff]   ;;  %3301 = vmatprep.subr.bf16.mxu0 %v10734_v0 }
  0x36   : > { %395 = vst.msk [vmem:[#allocation2 + $0xb0] sm:$0x8] %vm384_vm2, %v10734_v0  ;;  %396 = vst.msk [vmem:[#allocation2 + $0xc0] sm:$0x8] %vm384_vm2, %v10734_v0  ;;  %v1034_v20 = vrot.slane %v1032_v11, 4  ;;  %v1037_v21 = vrot.slane %v1035_v12, 5 }
  0x37   : > { %397 = vst.msk [vmem:[#allocation2 + $0xd0] sm:$0x8] %vm384_vm2, %v10734_v0  ;;  %398 = vst.msk [vmem:[#allocation2 + $0xe0] sm:$0x8] %vm384_vm2, %v10734_v0  ;;  %v1042_v22 = vrot.slane %v1040_v13, 4  ;;  %v1045_v23 = vrot.slane %v1043_v14, 5 }
  0x38   : > { %399 = vst.msk [vmem:[#allocation2 + $0xf0] sm:$0x8] %vm384_vm2, %v10734_v0  ;;  %400 = vst.msk [vmem:[#allocation2 + $0x100] sm:$0x8] %vm384_vm2, %v10734_v0  ;;  %v10510_v24 = vld [vmem:[%s10951_s28 + $0x4] ss:$0 sps:$4 sm:$0xff]   ;;  %v1038_v26 = vor.u32 %v1037_v21, %v1034_v20 }
  0x39   : > { %3599 = vst.msk [vmem:[#allocation3] sm:$0xff] %vm2952_vm7, %v10734_v0  ;;  %3600 = vst.msk [vmem:[#allocation3 + $0x8] sm:$0xff] %vm2952_vm7, %v10734_v0  ;;  %v10511_v25 = vld [vmem:[%s10951_s28 + $0x10] ss:$0 sps:$4 sm:$0xff]   ;;  %v1046_v27 = vor.u32 %v1045_v23, %v1042_v22  ;;  %v10512_v28 = vld [vmem:[%s10951_s28 + $0x14] ss:$0 sps:$4 sm:$0xff]  }
  0x3a   : > { %3602 = vst.msk [vmem:[#allocation3 + $0x110] sm:$0xff] %vm2952_vm7, %v10734_v0  ;;  %3603 = vst.msk [vmem:[#allocation3 + $0x118] sm:$0xff] %vm2952_vm7, %v10734_v0  ;;  %v10513_v29 = vld [vmem:[%s10951_s28 + $0x18] ss:$0 sps:$4 sm:$0xff]   ;;  %v10514_v30 = vld [vmem:[%s10951_s28 + $0x1c] ss:$0 sps:$4 sm:$0xff]  }
  0x3b   : > { %6900 = vst.msk [vmem:[#allocation4] sm:$0xff] %vm2952_vm7, %v10734_v0  ;;  %6901 = vst.msk [vmem:[#allocation4 + $0x8] sm:$0xff] %vm2952_vm7, %v10734_v0  ;;  %v1047_v31 = vsel %vm1030_vm5, %v1038_v26, %v1046_v27  ;;  %v11011_v40 = vrot.slane %v654_v15, 3  ;;  %v11013_v41 = vrot.slane %v657_v16, 4  ;;  %s10737_s21 = smov 112   ;;  %s10738_s25 = smov 64  }
  0x3c   : > { %6902 = vst.msk [vmem:[#allocation4 + $0x10] sm:$0xff] %vm2952_vm7, %v10734_v0  ;;  %6903 = vst.msk [vmem:[#allocation4 + $0x18] sm:$0xff] %vm2952_vm7, %v10734_v0  ;;  %2712 = vrot.lane.b32.xlu0 %v1047_v31, %s10736_s20  ;;  %vm644_vm8 = vsmask.f32 4352  ;;  %s10739_s29 = smov 80   ;;  %s10740_s27 = smov 48  }
  0x3d   : > { %6905 = vst.msk [vmem:[#allocation4 + $0x120] sm:$0xff] %vm2952_vm7, %v10734_v0  ;;  %6906 = vst.msk [vmem:[#allocation4 + $0x128] sm:$0xff] %vm2952_vm7, %v10734_v0  ;;  %s10741_s12 = smov 96   ;;  %vm3018_vm10 = vcmask 523264   ;;  %vm3051_vm11 = vcmask 654336   ;;  %vm3084_vm12 = vcmask 785408  }
  0x3e   : > { %6907 = vst.msk [vmem:[#allocation4 + $0x130] sm:$0xff] %vm2952_vm7, %v10734_v0  ;;  %6908 = vst.msk [vmem:[#allocation4 + $0x138] sm:$0xff] %vm2952_vm7, %v10734_v0  ;;  %vm3117_vm13 = vcmask 916480   ;;  %vm3622_vm14 = vcmask 258052   ;;  %vm3605_vm15 = vcmask 257027   ;;  %vm3687_vm1 = vcmask 261124  }
  0x3f   : > { %582 = vst.msk [vmem:[#allocation2 + $0x20] sm:$0xf0] %vm578_vm4, %v10507_v3  ;;  %579 = vst.msk [vmem:[#allocation2 + $0x10] sm:$0xf0] %vm578_vm4, %v10509_v18  ;;  %vm3689_vm2 = vcmask 257024   ;;  %s9885_s30 = sld [smem:[#allocation5 + $0x1]] }
  0x40   : > { %583 = vst.msk [vmem:[#allocation2 + $0x28] sm:$0xf] %vm580_vm6, %v10508_v9  ;;  %581 = vst.msk [vmem:[#allocation2 + $0x18] sm:$0xf] %vm580_vm6, %v10510_v24  ;;  %s10045_s26 = sshll.u32 %s10820_s17, 10  ;;  %s10742_s17 = smov [#allocation8]  }
  0x41   : > { %584 = vst.msk [vmem:[#allocation2 + $0x30] sm:$0xf0] %vm578_vm4, %v10511_v25  ;;  %586 = vst.msk [vmem:[#allocation2 + $0x40] sm:$0xf0] %vm578_vm4, %v10513_v29 }
  0x42   : > { %585 = vst.msk [vmem:[#allocation2 + $0x38] sm:$0xf] %vm580_vm6, %v10512_v28  ;;  %587 = vst.msk [vmem:[#allocation2 + $0x48] sm:$0xf] %vm580_vm6, %v10514_v30  ;;  %v10529_v28 = vld [vmem:[%s14710_s1 + $0x20] sm:$0xff]  }
  0x43   : > { %3302 = vmatpush1.bf16.msra.mxu0 %v10529_v28  ;;  %3623 = vst.msk [vmem:[#allocation3 + $0x18] sm:$0x10] %vm3622_vm14, %v10734_v0  ;;  %3624 = vst.msk [vmem:[#allocation3 + $0x28] sm:$0x10] %vm3622_vm14, %v10734_v0 }
  0x44   : > { %3303 = vmatprep.subr.bf16.mxu0 %v10734_v0  ;;  %3625 = vst.msk [vmem:[#allocation3 + $0x38] sm:$0x10] %vm3622_vm14, %v10734_v0  ;;  %3626 = vst.msk [vmem:[#allocation3 + $0x48] sm:$0x10] %vm3622_vm14, %v10734_v0 }
  0x45   : > { %3627 = vst.msk [vmem:[#allocation3 + $0x58] sm:$0x10] %vm3622_vm14, %v10734_v0  ;;  %3628 = vst.msk [vmem:[#allocation3 + $0x68] sm:$0x10] %vm3622_vm14, %v10734_v0 }
  0x46   : > { %v2296_v32 = vld [vmem:[#allocation2 + $0x20] sm:$0xf0]  ;;  %v1607_v48 = vld [vmem:[#allocation2 + $0x10] sm:$0xf0]  ;;  %3629 = vst.msk [vmem:[#allocation3 + $0x78] sm:$0x10] %vm3622_vm14, %v10734_v0 }
  0x47   : > { %v11002_v33 = vld [vmem:[#allocation2 + $0x20] sm:$0xf0]  ;;  %v2344_v35 = vrot.slane %v2296_v32, 4  ;;  %v11015_v42 = vld [vmem:[#allocation2 + $0x28] sm:$0xf]  ;;  %v1655_v54 = vrot.slane %v1607_v48, 4 }
  0x48   : > { %v1992_v34 = vld [vmem:[#allocation2 + $0x20] sm:$0xf8]  ;;  %v1658_v36 = vrot.slane %v11002_v33, 4  ;;  %v11017_v43 = vld [vmem:[#allocation2 + $0x28] sm:$0xf]  ;;  %v2345_v44 = vrot.slane %v11015_v42, 4 }
  0x49   : > { %v2025_v37 = vshrl.u32 %v1992_v34, 16  ;;  %v2028_v38 = vshll.u32 %v1992_v34, 16  ;;  %v11007_v39 = vld [vmem:[#allocation2 + $0x20] sm:$0xf8]  ;;  %v1659_v45 = vrot.slane %v11017_v43, 4  ;;  %v1720_v1 = vshrl.u32 %v1607_v48, 16 }
  0x4a   : > { %v1353_v46 = vshrl.u32 %v11007_v39, 16  ;;  %v1356_v47 = vshll.u32 %v11007_v39, 16  ;;  %v918_v49 = vld [vmem:[#allocation2 + $0x10] sm:$0xf0]  ;;  %v2346_v52 = vsel %vm965_vm3, %v2344_v35, %v2345_v44  ;;  %v11029_v53 = vld [vmem:[#allocation2 + $0x18] sm:$0xf] }
  0x4b   : > { %v11024_v50 = vrot.slane %v2025_v37, 3  ;;  %v11026_v51 = vrot.slane %v2028_v38, 4  ;;  %v1660_v55 = vsel %vm965_vm3, %v1658_v36, %v1659_v45  ;;  %v11032_v56 = vld [vmem:[#allocation2 + $0x18] sm:$0xf]  ;;  %v969_v57 = vrot.slane %v918_v49, 4  ;;  %2872 = vrot.lane.b32.xlu0 %v2346_v52, %s10737_s21  ;;  %v10530_v38 = vld [vmem:[%s14710_s1 + $0x28] sm:$0xff]  }
  0x4c   : > { %v1656_v58 = vrot.slane %v11029_v53, 4  ;;  %v671_v59 = vshrl.u32 %v11032_v56, 16  ;;  %v674_v60 = vshll.u32 %v11032_v56, 16  ;;  %v970_v61 = vrot.slane %v11032_v56, 4  ;;  %v1703_v62 = vld [vmem:[#allocation2 + $0x18] sm:$0x1f]  ;;  %3304 = vmatpush1.bf16.msra.mxu0 %v10530_v38 }
  0x4d   : > { %v1303_v63 = vld [vmem:[#allocation2 + $0x10] sm:$0xf8]  ;;  %v1723_v2 = vshll.u32 %v1607_v48, 16  ;;  %v1728_v3 = vshrl.u32 %v1703_v62, 16  ;;  %v1731_v4 = vshll.u32 %v1703_v62, 16  ;;  %v1049_v11 = vshrl.u32 %v918_v49, 16  ;;  %3305 = vmatprep.subr.bf16.mxu0 %v10734_v0 }
  0x4e   : > { %v11039_v5 = vld [vmem:[#allocation2 + $0x38] sm:$0xf]  ;;  %v1657_v6 = vsel %vm965_vm3, %v1655_v54, %v1656_v58  ;;  %v971_v7 = vsel %vm965_vm3, %v969_v57, %v970_v61  ;;  %v2297_v8 = vld [vmem:[#allocation2 + $0x30] sm:$0xf0]  ;;  %v1722_v12 = vrot.slane %v1720_v1, 4  ;;  %v1052_v18 = vshll.u32 %v918_v49, 16 }
  0x4f   : > { %v2348_v9 = vrot.slane %v11039_v5, 4  ;;  %v1015_v10 = vld [vmem:[#allocation2 + $0x18] sm:$0x1f]  ;;  %2776 = vrot.lane.b32.xlu1 %v1657_v6, %s10738_s25  ;;  %v1725_v13 = vrot.slane %v1723_v2, 5  ;;  %v1730_v14 = vrot.slane %v1728_v3, 4  ;;  %v1733_v15 = vrot.slane %v1731_v4, 5  ;;  %2778 = vrot.lane.b32.xlu0 %v1660_v55, %s10738_s25 }
  0x50   : > { %v2347_v16 = vrot.slane %v2297_v8, 4  ;;  %v1051_v17 = vrot.slane %v1049_v11, 4  ;;  %v1057_v19 = vshrl.u32 %v1015_v10, 16  ;;  %v1060_v22 = vshll.u32 %v1015_v10, 16  ;;  %v1994_v52 = vld [vmem:[#allocation2 + $0x30] sm:$0xf8] }
  0x51   : > { %v1726_v20 = vor.u32 %v1725_v13, %v1722_v12  ;;  %v1734_v21 = vor.u32 %v1733_v15, %v1730_v14  ;;  %v1336_v23 = vshrl.u32 %v1303_v63, 16  ;;  %v1054_v25 = vrot.slane %v1052_v18, 5  ;;  %v10533_v39 = vld [vmem:[%s14710_s1 + $0x30] sm:$0xff]   ;;  %v1704_v4 = vld [vmem:[#allocation2 + $0x28] sm:$0x1f]  ;;  %v10535_v38 = vld [vmem:[%s14710_s1 + $0x40] sm:$0xff]  }
  0x52   : > { %v2349_v24 = vsel %vm965_vm3, %v2347_v16, %v2348_v9  ;;  %v1059_v26 = vrot.slane %v1057_v19, 4  ;;  %v1339_v27 = vshll.u32 %v1303_v63, 16  ;;  %v1062_v30 = vrot.slane %v1060_v22, 5  ;;  %v11082_v13 = vld [vmem:[#allocation2 + $0x28] sm:$0xf]  ;;  %3306 = vmatpush1.bf16.msra.mxu0 %v10533_v39 }
  0x53   : > { %2682 = vrot.lane.b32.xlu1 %v971_v7, %s14739_s18  ;;  %v1735_v29 = vsel %vm1030_vm5, %v1726_v20, %v1734_v21  ;;  %v1338_v31 = vrot.slane %v1336_v23, 3  ;;  %v1344_v32 = vshrl.u32 %v11029_v53, 16  ;;  %v1055_v34 = vor.u32 %v1054_v25, %v1051_v17  ;;  %v919_v18 = vld [vmem:[#allocation2 + $0x20] sm:$0xf0]  ;;  %v1016_v22 = vld [vmem:[#allocation2 + $0x28] sm:$0x1f]  ;;  %3307 = vmatprep.subr.bf16.mxu0 %v10734_v0 }
  0x54   : > { %2808 = vrot.lane.b32.xlu0 %v1735_v29, %s10739_s29  ;;  %v1341_v35 = vrot.slane %v1339_v27, 4  ;;  %v1347_v36 = vshll.u32 %v11029_v53, 16  ;;  %v2031_v37 = vor.u32 %v11026_v51, %v11024_v50  ;;  %v1063_v44 = vor.u32 %v1062_v30, %v1059_v26  ;;  %v1307_v23 = vld [vmem:[#allocation2 + $0x30] sm:$0xf8]  ;;  %v10515_v27 = vld [vmem:[%s10951_s28 + $0x20] ss:$0 sps:$4 sm:$0xff]  }
  0x55   : > { %v1346_v45 = vrot.slane %v1344_v32, 3  ;;  %v2033_v48 = vshrl.u32 %v11015_v42, 16  ;;  %v2036_v49 = vshll.u32 %v11015_v42, 16  ;;  %v1355_v53 = vrot.slane %v1353_v46, 3  ;;  %588 = vst.msk [vmem:[#allocation2 + $0x50] sm:$0xf0] %vm578_vm4, %v10515_v27 }
  0x56   : > { %v1342_v54 = vor.u32 %v1341_v35, %v1338_v31  ;;  %v1349_v55 = vrot.slane %v1347_v36, 4  ;;  %v1358_v50 = vrot.slane %v1356_v47, 4  ;;  %v1064_v51 = vsel %vm1030_vm5, %v1055_v34, %v1063_v44  ;;  %v10516_v31 = vld [vmem:[%s10951_s28 + $0x24] ss:$0 sps:$4 sm:$0xff]   ;;  %3630 = vst.msk [vmem:[#allocation3 + $0x88] sm:$0x10] %vm3622_vm14, %v10734_v0 }
  0x57   : > { %2874 = vrot.lane.b32.xlu1 %v2349_v24, %s10737_s21  ;;  %v2035_v57 = vrot.slane %v2033_v48, 3  ;;  %v2038_v58 = vrot.slane %v2036_v49, 4  ;;  %v1361_v61 = vshrl.u32 %v11017_v43, 16  ;;  %v1364_v63 = vshll.u32 %v11017_v43, 16  ;;  %589 = vst.msk [vmem:[#allocation2 + $0x58] sm:$0xf] %vm580_vm6, %v10516_v31 }
  0x58   : > { %2714 = vrot.lane.b32.xlu0 %v1064_v51, %s10736_s20  ;;  %v1350_v42 = vor.u32 %v1349_v55, %v1346_v45  ;;  %v1359_v62 = vor.u32 %v1358_v50, %v1355_v53  ;;  %v2042_v1 = vshrl.u32 %v1994_v52, 16  ;;  %v2045_v2 = vshll.u32 %v1994_v52, 16  ;;  %v11103_v52 = vld [vmem:[#allocation2 + $0x30] sm:$0xf0]  ;;  %v1705_v51 = vld [vmem:[#allocation2 + $0x38] sm:$0x1f] }
  0x59   : > { %v2039_v46 = vor.u32 %v2038_v58, %v2035_v57  ;;  %v1363_v47 = vrot.slane %v1361_v61, 3  ;;  %v2050_v3 = vshrl.u32 %v11039_v5, 16  ;;  %v1366_v7 = vrot.slane %v1364_v63, 4  ;;  %v10517_v63 = vld [vmem:[%s10951_s28 + $0x28] ss:$0 sps:$4 sm:$0xff]  }
  0x5a   : > { %v1351_v6 = vsel %vm644_vm8, %v1342_v54, %v1350_v42  ;;  %v2044_v8 = vrot.slane %v2042_v1, 3  ;;  %v2053_v43 = vshll.u32 %v11039_v5, 16  ;;  %v2047_v10 = vrot.slane %v2045_v2, 4  ;;  %v10534_v5 = vld [vmem:[%s14710_s1 + $0x38] sm:$0xff]   ;;  %v10518_v2 = vld [vmem:[%s10951_s28 + $0x2c] ss:$0 sps:$4 sm:$0xff]  }
  0x5b   : > { %2744 = vrot.lane.b32.xlu1 %v1351_v6, %s10740_s27  ;;  %v2040_v9 = vsel %vm644_vm8, %v2031_v37, %v2039_v46  ;;  %v2052_v11 = vrot.slane %v2050_v3, 3  ;;  %v1737_v12 = vshrl.u32 %v11002_v33, 16  ;;  %v1367_v14 = vor.u32 %v1366_v7, %v1363_v47  ;;  %v11095_v37 = vld [vmem:[#allocation2 + $0x38] sm:$0xf]  ;;  %3308 = vmatpush1.bf16.msra.mxu0 %v10534_v5  ;;  %v1997_v7 = vld [vmem:[#allocation2 + $0x48] sm:$0xf] }
  0x5c   : > { %v2055_v15 = vrot.slane %v2053_v43, 4  ;;  %v1740_v16 = vshll.u32 %v11002_v33, 16  ;;  %v1745_v17 = vshrl.u32 %v1704_v4, 16  ;;  %v2048_v19 = vor.u32 %v2047_v10, %v2044_v8  ;;  %3309 = vmatprep.subr.bf16.mxu0 %v10734_v0  ;;  %590 = vst.msk [vmem:[#allocation2 + $0x60] sm:$0xf0] %vm578_vm4, %v10517_v63 }
  0x5d   : > { %v1739_v20 = vrot.slane %v1737_v12, 4  ;;  %v1748_v21 = vshll.u32 %v1704_v4, 16  ;;  %v1368_v33 = vsel %vm644_vm8, %v1359_v62, %v1367_v14  ;;  %v972_v29 = vrot.slane %v919_v18, 4  ;;  %v1996_v62 = vld [vmem:[#allocation2 + $0x40] sm:$0xf8] }
  0x5e   : > { %v2056_v24 = vor.u32 %v2055_v15, %v2052_v11  ;;  %v1742_v25 = vrot.slane %v1740_v16, 5  ;;  %v1747_v26 = vrot.slane %v1745_v17, 4  ;;  %v973_v30 = vrot.slane %v11082_v13, 4  ;;  %591 = vst.msk [vmem:[#allocation2 + $0x68] sm:$0xf] %vm580_vm6, %v10518_v2 }
  0x5f   : > { %2840 = vrot.lane.b32.xlu1 %v2040_v9, %s10741_s12  ;;  %v1750_v28 = vrot.slane %v1748_v21, 5  ;;  %v1066_v35 = vshrl.u32 %v919_v18, 16  ;;  %v1069_v36 = vshll.u32 %v919_v18, 16  ;;  %v1074_v48 = vshrl.u32 %v1016_v22, 16  ;;  %3310 = vmatpush1.bf16.msra.mxu0 %v10535_v38  ;;  %v1610_v63 = vld [vmem:[#allocation2 + $0x40] sm:$0xf0] }
  0x60   : > { %v2057_v32 = vsel %vm644_vm8, %v2048_v19, %v2056_v24  ;;  %v1743_v34 = vor.u32 %v1742_v25, %v1739_v20  ;;  %v974_v45 = vsel %vm965_vm3, %v972_v29, %v973_v30  ;;  %v1077_v49 = vshll.u32 %v1016_v22, 16  ;;  %v2298_v20 = vld [vmem:[#allocation2 + $0x40] sm:$0xf0]  ;;  %v920_v29 = vld [vmem:[#allocation2 + $0x30] sm:$0xf0] }
  0x61   : > { %2842 = vrot.lane.b32.xlu0 %v2057_v32, %s10741_s12  ;;  %v1751_v44 = vor.u32 %v1750_v28, %v1747_v26  ;;  %v1068_v54 = vrot.slane %v1066_v35, 4  ;;  %v1071_v55 = vrot.slane %v1069_v36, 5  ;;  %v1370_v53 = vshrl.u32 %v1307_v23, 16  ;;  %v11125_v28 = vld [vmem:[#allocation2 + $0x38] sm:$0xf] }
  0x62   : > { %v1373_v50 = vshll.u32 %v1307_v23, 16  ;;  %v1076_v58 = vrot.slane %v1074_v48, 4  ;;  %v1079_v61 = vrot.slane %v1077_v49, 5  ;;  %v1378_v42 = vshrl.u32 %v11095_v37, 16  ;;  %v1017_v35 = vld [vmem:[#allocation2 + $0x38] sm:$0x1f] }
  0x63   : > { %2746 = vrot.lane.b32.xlu1 %v1368_v33, %s10740_s27  ;;  %v1752_v57 = vsel %vm1030_vm5, %v1743_v34, %v1751_v44  ;;  %v1072_v1 = vor.u32 %v1071_v55, %v1068_v54  ;;  %v1372_v39 = vrot.slane %v1370_v53, 3  ;;  %v1381_v47 = vshll.u32 %v11095_v37, 16  ;;  %3631 = vst.msk [vmem:[#allocation3 + $0x98] sm:$0x10] %vm3622_vm14, %v10734_v0  ;;  %3632 = vst.msk [vmem:[#allocation3 + $0xa8] sm:$0x10] %vm3622_vm14, %v10734_v0 }
  0x64   : > { %v1375_v46 = vrot.slane %v1373_v50, 4  ;;  %v1080_v3 = vor.u32 %v1079_v61, %v1076_v58  ;;  %v1380_v4 = vrot.slane %v1378_v42, 3  ;;  %v1661_v6 = vrot.slane %v11103_v52, 4  ;;  %3633 = vst.msk [vmem:[#allocation3 + $0xb8] sm:$0x10] %vm3622_vm14, %v10734_v0 }
  0x65   : > { %2684 = vrot.lane.b32.xlu0 %v974_v45, %s14739_s18  ;;  %v660_v8 = vor.u32 %v11013_v41, %v11011_v40  ;;  %v1383_v9 = vrot.slane %v1381_v47, 4  ;;  %v1754_v10 = vshrl.u32 %v11103_v52, 16  ;;  %v1757_v11 = vshll.u32 %v11103_v52, 16  ;;  %v1309_v45 = vld [vmem:[#allocation2 + $0x40] sm:$0xf8] }
  0x66   : > { %v1376_v43 = vor.u32 %v1375_v46, %v1372_v39  ;;  %v1081_v12 = vsel %vm1030_vm5, %v1072_v1, %v1080_v3  ;;  %v1662_v14 = vrot.slane %v11095_v37, 4  ;;  %v1762_v15 = vshrl.u32 %v1705_v51, 16  ;;  %3634 = vst.msk [vmem:[#allocation3 + $0xc8] sm:$0x10] %vm3622_vm14, %v10734_v0  ;;  %3635 = vst.msk [vmem:[#allocation3 + $0xd8] sm:$0x10] %vm3622_vm14, %v10734_v0 }
  0x67   : > { %2810 = vrot.lane.b32.xlu1 %v1752_v57, %s10739_s29  ;;  %v1765_v16 = vshll.u32 %v1705_v51, 16  ;;  %v1384_v17 = vor.u32 %v1383_v9, %v1380_v4  ;;  %v1756_v18 = vrot.slane %v1754_v10, 4  ;;  %v1759_v5 = vrot.slane %v1757_v11, 5  ;;  %v1310_v57 = vld [vmem:[#allocation2 + $0x48] sm:$0xf] }
  0x68   : > { %v2059_v19 = vshrl.u32 %v1996_v62, 16  ;;  %v1764_v21 = vrot.slane %v1762_v15, 4  ;;  %v2062_v23 = vshll.u32 %v1996_v62, 16  ;;  %v2067_v24 = vshrl.u32 %v1997_v7, 16  ;;  %3636 = vst.msk [vmem:[#allocation3 + $0xe8] sm:$0x10] %vm3622_vm14, %v10734_v0 }
  0x69   : > { %v1767_v22 = vrot.slane %v1765_v16, 5  ;;  %v1385_v25 = vsel %vm644_vm8, %v1376_v43, %v1384_v17  ;;  %v1760_v26 = vor.u32 %v1759_v5, %v1756_v18  ;;  %v2070_v33 = vshll.u32 %v1997_v7, 16  ;;  %v1999_v18 = vld [vmem:[#allocation2 + $0x58] sm:$0xf]  ;;  %3637 = vst.msk [vmem:[#allocation3 + $0xf8] sm:$0x10] %vm3622_vm14, %v10734_v0 }
  0x6a   : > { %v2061_v27 = vrot.slane %v2059_v19, 3  ;;  %2748 = vrot.lane.b32.xlu0 %v1385_v25, %s10740_s27  ;;  %v2064_v31 = vrot.slane %v2062_v23, 4  ;;  %v2069_v32 = vrot.slane %v2067_v24, 3  ;;  %v2350_v34 = vrot.slane %v2298_v20, 4  ;;  %3638 = vst.msk [vmem:[#allocation3 + $0x108] sm:$0x10] %vm3622_vm14, %v10734_v0 }
  0x6b   : > { %2716 = vrot.lane.b32.xlu1 %v1081_v12, %s10736_s20  ;;  %v1768_v30 = vor.u32 %v1767_v22, %v1764_v21  ;;  %v688_v36 = vshrl.u32 %v11082_v13, 16  ;;  %v1663_v37 = vsel %vm965_vm3, %v1661_v6, %v1662_v14  ;;  %v2072_v38 = vrot.slane %v2070_v33, 4  ;;  %v1998_v12 = vld [vmem:[#allocation2 + $0x50] sm:$0xf8]  ;;  %v10519_v22 = vld [vmem:[%s10951_s28 + $0x30] ss:$0 sps:$4 sm:$0xff]  }
  0x6c   : > { %v2351_v44 = vrot.slane %v1997_v7, 4  ;;  %v2065_v49 = vor.u32 %v2064_v31, %v2061_v27  ;;  %v975_v52 = vrot.slane %v920_v29, 4  ;;  %v976_v54 = vrot.slane %v11125_v28, 4  ;;  %v1706_v7 = vld [vmem:[#allocation2 + $0x48] sm:$0x1f] }
  0x6d   : > { %v1769_v48 = vsel %vm1030_vm5, %v1760_v26, %v1768_v30  ;;  %v2073_v55 = vor.u32 %v2072_v38, %v2069_v32  ;;  %v1083_v50 = vshrl.u32 %v920_v29, 16  ;;  %v1086_v51 = vshll.u32 %v920_v29, 16  ;;  %v2299_v27 = vld [vmem:[#allocation2 + $0x50] sm:$0xf0]  ;;  %592 = vst.msk [vmem:[#allocation2 + $0x70] sm:$0xf0] %vm578_vm4, %v10519_v22 }
  0x6e   : > { %v2352_v53 = vsel %vm965_vm3, %v2350_v34, %v2351_v44  ;;  %2812 = vrot.lane.b32.xlu0 %v1769_v48, %s10739_s29  ;;  %v977_v58 = vsel %vm965_vm3, %v975_v52, %v976_v54  ;;  %v1091_v61 = vshrl.u32 %v1017_v35, 16  ;;  %v1094_v42 = vshll.u32 %v1017_v35, 16  ;;  %v10520_v33 = vld [vmem:[%s10951_s28 + $0x34] ss:$0 sps:$4 sm:$0xff]   ;;  %v921_v34 = vld [vmem:[#allocation2 + $0x40] sm:$0xf0] }
  0x6f   : > { %2780 = vrot.lane.b32.xlu1 %v1663_v37, %s10738_s25  ;;  %v1387_v62 = vshrl.u32 %v1309_v45, 16  ;;  %v2074_v1 = vsel %vm644_vm8, %v2065_v49, %v2073_v55  ;;  %v1085_v39 = vrot.slane %v1083_v50, 4  ;;  %v1088_v46 = vrot.slane %v1086_v51, 5  ;;  %v1018_v48 = vld [vmem:[#allocation2 + $0x48] sm:$0x1f] }
  0x70   : > { %v1390_v47 = vshll.u32 %v1309_v45, 16  ;;  %v1093_v2 = vrot.slane %v1091_v61, 4  ;;  %v1096_v3 = vrot.slane %v1094_v42, 5  ;;  %v1395_v6 = vshrl.u32 %v1310_v57, 16  ;;  %v11147_v45 = vld [vmem:[#allocation2 + $0x48] sm:$0xf] }
  0x71   : > { %v1389_v4 = vrot.slane %v1387_v62, 3  ;;  %v1089_v43 = vor.u32 %v1088_v46, %v1085_v39  ;;  %v1398_v10 = vshll.u32 %v1310_v57, 16  ;;  %v1664_v11 = vrot.slane %v1610_v63, 4  ;;  %593 = vst.msk [vmem:[#allocation2 + $0x78] sm:$0xf] %vm580_vm6, %v10520_v33 }
  0x72   : > { %v1392_v9 = vrot.slane %v1390_v47, 4  ;;  %2876 = vrot.lane.b32.xlu0 %v2352_v53, %s10737_s21  ;;  %v1097_v14 = vor.u32 %v1096_v3, %v1093_v2  ;;  %v1397_v15 = vrot.slane %v1395_v6, 3  ;;  %v1665_v16 = vrot.slane %v1310_v57, 4  ;;  %v1311_v53 = vld [vmem:[#allocation2 + $0x50] sm:$0xf8] }
  0x73   : > { %2844 = vrot.lane.b32.xlu1 %v2074_v1, %s10741_s12  ;;  %v1771_v17 = vshrl.u32 %v1610_v63, 16  ;;  %v1400_v19 = vrot.slane %v1398_v10, 4  ;;  %v1774_v20 = vshll.u32 %v1610_v63, 16  ;;  %v1779_v21 = vshrl.u32 %v1706_v7, 16  ;;  %v10521_v61 = vld [vmem:[%s10951_s28 + $0x38] ss:$0 sps:$4 sm:$0xff]  }
  0x74   : > { %v1393_v5 = vor.u32 %v1392_v9, %v1389_v4  ;;  %v1098_v23 = vsel %vm1030_vm5, %v1089_v43, %v1097_v14  ;;  %v1666_v24 = vsel %vm965_vm3, %v1664_v11, %v1665_v16  ;;  %v1782_v26 = vshll.u32 %v1706_v7, 16  ;;  %v11155_v39 = vld [vmem:[#allocation2 + $0x58] sm:$0xf]  ;;  %v10522_v46 = vld [vmem:[%s10951_s28 + $0x3c] ss:$0 sps:$4 sm:$0xff]  }
  0x75   : > { %v1773_v25 = vrot.slane %v1771_v17, 4  ;;  %v1401_v29 = vor.u32 %v1400_v19, %v1397_v15  ;;  %v1776_v30 = vrot.slane %v1774_v20, 5  ;;  %v1781_v31 = vrot.slane %v1779_v21, 4  ;;  %594 = vst.msk [vmem:[#allocation2 + $0x80] sm:$0xf0] %vm578_vm4, %v10521_v61 }
  0x76   : > { %v2076_v32 = vshrl.u32 %v1998_v12, 16  ;;  %2718 = vrot.lane.b32.xlu0 %v1098_v23, %s10736_s20  ;;  %v1784_v35 = vrot.slane %v1782_v26, 5  ;;  %v2079_v37 = vshll.u32 %v1998_v12, 16  ;;  %v2084_v38 = vshrl.u32 %v1999_v18, 16  ;;  %595 = vst.msk [vmem:[#allocation2 + $0x88] sm:$0xf] %vm580_vm6, %v10522_v46 }
  0x77   : > { %2686 = vrot.lane.b32.xlu1 %v977_v58, %s14739_s18  ;;  %v2087_v44 = vshll.u32 %v1999_v18, 16  ;;  %v1402_v49 = vsel %vm644_vm8, %v1393_v5, %v1401_v29  ;;  %v1777_v52 = vor.u32 %v1776_v30, %v1773_v25  ;;  %v2353_v55 = vrot.slane %v2299_v27, 4  ;;  %v10525_v10 = vld [vmem:[%s10951_s28 + $0x40] ss:$0 sps:$4 sm:$0xff]   ;;  %v1611_v19 = vld [vmem:[#allocation2 + $0x50] sm:$0xf0] }
  0x78   : > { %v2078_v54 = vrot.slane %v2076_v32, 3  ;;  %v1785_v50 = vor.u32 %v1784_v35, %v1781_v31  ;;  %v2081_v51 = vrot.slane %v2079_v37, 4  ;;  %v2086_v57 = vrot.slane %v2084_v38, 3  ;;  %596 = vst.msk [vmem:[#allocation2 + $0x90] sm:$0xf0] %vm578_vm4, %v10525_v10 }
  0x79   : > { %v2089_v58 = vrot.slane %v2087_v44, 4  ;;  %v691_v42 = vshll.u32 %v11082_v13, 16  ;;  %v705_v62 = vshrl.u32 %v11125_v28, 16  ;;  %v708_v63 = vshll.u32 %v11125_v28, 16  ;;  %6926 = vst.msk [vmem:[#allocation4 + $0x28] sm:$0x10] %vm3622_vm14, %v10734_v0 }
  0x7a   : > { %v2354_v1 = vrot.slane %v1999_v18, 4  ;;  %2782 = vrot.lane.b32.xlu0 %v1666_v24, %s10738_s25  ;;  %v1786_v47 = vsel %vm1030_vm5, %v1777_v52, %v1785_v50  ;;  %v2082_v2 = vor.u32 %v2081_v51, %v2078_v54  ;;  %v978_v4 = vrot.slane %v921_v34, 4  ;;  %v1707_v24 = vld [vmem:[#allocation2 + $0x58] sm:$0x1f]  ;;  %6927 = vst.msk [vmem:[#allocation4 + $0x38] sm:$0x10] %vm3622_vm14, %v10734_v0 }
  0x7b   : > { %2750 = vrot.lane.b32.xlu1 %v1402_v49, %s10740_s27  ;;  %v2090_v3 = vor.u32 %v2089_v58, %v2086_v57  ;;  %v979_v6 = vrot.slane %v11147_v45, 4  ;;  %v1100_v7 = vshrl.u32 %v921_v34, 16  ;;  %v1103_v43 = vshll.u32 %v921_v34, 16  ;;  %v2000_v34 = vld [vmem:[#allocation2 + $0x60] sm:$0xf8] }
  0x7c   : > { %v1108_v9 = vshrl.u32 %v1018_v48, 16  ;;  %v2355_v12 = vsel %vm965_vm3, %v2353_v55, %v2354_v1  ;;  %v1111_v14 = vshll.u32 %v1018_v48, 16  ;;  %v1404_v15 = vshrl.u32 %v1311_v53, 16  ;;  %v2001_v48 = vld [vmem:[#allocation2 + $0x68] sm:$0xf] }
  0x7d   : > { %v2091_v11 = vsel %vm644_vm8, %v2082_v2, %v2090_v3  ;;  %v1102_v16 = vrot.slane %v1100_v7, 4  ;;  %v1105_v17 = vrot.slane %v1103_v43, 5  ;;  %v1407_v5 = vshll.u32 %v1311_v53, 16  ;;  %v2300_v53 = vld [vmem:[#allocation2 + $0x60] sm:$0xf0] }
  0x7e   : > { %v1110_v18 = vrot.slane %v1108_v9, 4  ;;  %2846 = vrot.lane.b32.xlu0 %v2091_v11, %s10741_s12  ;;  %v1113_v20 = vrot.slane %v1111_v14, 5  ;;  %v1406_v21 = vrot.slane %v1404_v15, 3  ;;  %v1412_v22 = vshrl.u32 %v11155_v39, 16  ;;  %v922_v7 = vld [vmem:[#allocation2 + $0x50] sm:$0xf0] }
  0x7f   : > { %2814 = vrot.lane.b32.xlu1 %v1786_v47, %s10739_s29  ;;  %v1415_v23 = vshll.u32 %v11155_v39, 16  ;;  %v980_v25 = vsel %vm965_vm3, %v978_v4, %v979_v6  ;;  %v1106_v26 = vor.u32 %v1105_v17, %v1102_v16  ;;  %v1409_v27 = vrot.slane %v1407_v5, 4  ;;  %v11178_v47 = vld [vmem:[#allocation2 + $0x58] sm:$0xf]  ;;  %6928 = vst.msk [vmem:[#allocation4 + $0x48] sm:$0x10] %vm3622_vm14, %v10734_v0 }
  0x80   : > { %v1667_v33 = vrot.slane %v1611_v19, 4  ;;  %v1114_v29 = vor.u32 %v1113_v20, %v1110_v18  ;;  %v1414_v30 = vrot.slane %v1412_v22, 3  ;;  %v1788_v32 = vshrl.u32 %v1611_v19, 16  ;;  %v1313_v18 = vld [vmem:[#allocation2 + $0x60] sm:$0xf8] }
  0x81   : > { %v1417_v31 = vrot.slane %v1415_v23, 4  ;;  %v1410_v35 = vor.u32 %v1409_v27, %v1406_v21  ;;  %v1668_v37 = vrot.slane %v11155_v39, 4  ;;  %v1791_v38 = vshll.u32 %v1611_v19, 16  ;;  %v1314_v22 = vld [vmem:[#allocation2 + $0x68] sm:$0xf] }
  0x82   : > { %v1796_v44 = vshrl.u32 %v1707_v24, 16  ;;  %2688 = vrot.lane.b32.xlu0 %v980_v25, %s14739_s18  ;;  %v1115_v49 = vsel %vm1030_vm5, %v1106_v26, %v1114_v29  ;;  %v1790_v54 = vrot.slane %v1788_v32, 4  ;;  %v1799_v55 = vshll.u32 %v1707_v24, 16  ;;  %v10526_v27 = vld [vmem:[%s10951_s28 + $0x44] ss:$0 sps:$4 sm:$0xff]  }
  0x83   : > { %2878 = vrot.lane.b32.xlu1 %v2355_v12, %s10737_s21  ;;  %v1418_v52 = vor.u32 %v1417_v31, %v1414_v30  ;;  %v1793_v50 = vrot.slane %v1791_v38, 5  ;;  %v2093_v57 = vshrl.u32 %v2000_v34, 16  ;;  %v2096_v58 = vshll.u32 %v2000_v34, 16  ;;  %v1019_v12 = vld [vmem:[#allocation2 + $0x58] sm:$0x1f] }
  0x84   : > { %v1798_v51 = vrot.slane %v1796_v44, 4  ;;  %v1801_v1 = vrot.slane %v1799_v55, 5  ;;  %v2101_v39 = vshrl.u32 %v2001_v48, 16  ;;  %v2104_v46 = vshll.u32 %v2001_v48, 16  ;;  %v1612_v32 = vld [vmem:[#allocation2 + $0x60] sm:$0xf0] }
  0x85   : > { %v1419_v61 = vsel %vm644_vm8, %v1410_v35, %v1418_v52  ;;  %v1794_v2 = vor.u32 %v1793_v50, %v1790_v54  ;;  %v2095_v3 = vrot.slane %v2093_v57, 3  ;;  %v2098_v4 = vrot.slane %v2096_v58, 4  ;;  %597 = vst.msk [vmem:[#allocation2 + $0x98] sm:$0xf] %vm580_vm6, %v10526_v27  ;;  %v1708_v54 = vld [vmem:[#allocation2 + $0x68] sm:$0x1f] }
  0x86   : > { %v2356_v6 = vrot.slane %v2300_v53, 4  ;;  %2752 = vrot.lane.b32.xlu0 %v1419_v61, %s10740_s27  ;;  %v1802_v43 = vor.u32 %v1801_v1, %v1798_v51  ;;  %v2103_v9 = vrot.slane %v2101_v39, 3  ;;  %v2106_v10 = vrot.slane %v2104_v46, 4  ;;  %v2002_v57 = vld [vmem:[#allocation2 + $0x70] sm:$0xf8] }
  0x87   : > { %2720 = vrot.lane.b32.xlu1 %v1115_v49, %s10736_s20  ;;  %v2357_v11 = vrot.slane %v2001_v48, 4  ;;  %v722_v14 = vshrl.u32 %v11147_v45, 16  ;;  %v1669_v15 = vsel %vm965_vm3, %v1667_v33, %v1668_v37  ;;  %v2099_v16 = vor.u32 %v2098_v4, %v2095_v3  ;;  %v2003_v46 = vld [vmem:[#allocation2 + $0x78] sm:$0xf]  ;;  %v1020_v27 = vld [vmem:[#allocation2 + $0x68] sm:$0x1f] }
  0x88   : > { %v981_v17 = vrot.slane %v922_v7, 4  ;;  %v1803_v5 = vsel %vm1030_vm5, %v1794_v2, %v1802_v43  ;;  %v2107_v19 = vor.u32 %v2106_v10, %v2103_v9  ;;  %v982_v21 = vrot.slane %v11178_v47, 4  ;;  %6929 = vst.msk [vmem:[#allocation4 + $0x58] sm:$0x10] %vm3622_vm14, %v10734_v0  ;;  %6930 = vst.msk [vmem:[#allocation4 + $0x68] sm:$0x10] %vm3622_vm14, %v10734_v0 }
  0x89   : > { %v2358_v20 = vsel %vm965_vm3, %v2356_v6, %v2357_v11  ;;  %v1117_v23 = vshrl.u32 %v922_v7, 16  ;;  %v1120_v24 = vshll.u32 %v922_v7, 16  ;;  %v1125_v25 = vshrl.u32 %v1019_v12, 16  ;;  %v2301_v11 = vld [vmem:[#allocation2 + $0x70] sm:$0xf0] }
  0x8a   : > { %v1128_v26 = vshll.u32 %v1019_v12, 16  ;;  %2816 = vrot.lane.b32.xlu0 %v1803_v5, %s10739_s29  ;;  %v2108_v33 = vsel %vm644_vm8, %v2099_v16, %v2107_v19  ;;  %v983_v29 = vsel %vm965_vm3, %v981_v17, %v982_v21  ;;  %v1421_v30 = vshrl.u32 %v1313_v18, 16  ;;  %6931 = vst.msk [vmem:[#allocation4 + $0x78] sm:$0x10] %vm3622_vm14, %v10734_v0  ;;  %6932 = vst.msk [vmem:[#allocation4 + $0x88] sm:$0x10] %vm3622_vm14, %v10734_v0 }
  0x8b   : > { %2784 = vrot.lane.b32.xlu1 %v1669_v15, %s10738_s25  ;;  %v1424_v31 = vshll.u32 %v1313_v18, 16  ;;  %v1119_v34 = vrot.slane %v1117_v23, 4  ;;  %v1122_v35 = vrot.slane %v1120_v24, 5  ;;  %v1127_v37 = vrot.slane %v1125_v25, 4  ;;  %v11197_v18 = vld [vmem:[#allocation2 + $0x68] sm:$0xf] }
  0x8c   : > { %v1130_v38 = vrot.slane %v1128_v26, 5  ;;  %v1423_v44 = vrot.slane %v1421_v30, 3  ;;  %v1429_v49 = vshrl.u32 %v1314_v22, 16  ;;  %v1432_v52 = vshll.u32 %v1314_v22, 16  ;;  %6933 = vst.msk [vmem:[#allocation4 + $0x98] sm:$0x10] %vm3622_vm14, %v10734_v0 }
  0x8d   : > { %v1426_v48 = vrot.slane %v1424_v31, 4  ;;  %v1123_v55 = vor.u32 %v1122_v35, %v1119_v34  ;;  %v1670_v50 = vrot.slane %v1612_v32, 4  ;;  %v1671_v51 = vrot.slane %v1314_v22, 4  ;;  %v923_v22 = vld [vmem:[#allocation2 + $0x60] sm:$0xf0] }
  0x8e   : > { %v1131_v53 = vor.u32 %v1130_v38, %v1127_v37  ;;  %2880 = vrot.lane.b32.xlu0 %v2358_v20, %s10737_s21  ;;  %v1431_v61 = vrot.slane %v1429_v49, 3  ;;  %v1434_v1 = vrot.slane %v1432_v52, 4  ;;  %v1805_v39 = vshrl.u32 %v1612_v32, 16  ;;  %v1315_v34 = vld [vmem:[#allocation2 + $0x70] sm:$0xf8] }
  0x8f   : > { %2848 = vrot.lane.b32.xlu1 %v2108_v33, %s10741_s12  ;;  %v1427_v58 = vor.u32 %v1426_v48, %v1423_v44  ;;  %v1672_v3 = vsel %vm965_vm3, %v1670_v50, %v1671_v51  ;;  %v1808_v4 = vshll.u32 %v1612_v32, 16  ;;  %v1813_v6 = vshrl.u32 %v1708_v54, 16  ;;  %6934 = vst.msk [vmem:[#allocation4 + $0xa8] sm:$0x10] %vm3622_vm14, %v10734_v0  ;;  %6935 = vst.msk [vmem:[#allocation4 + $0xb8] sm:$0x10] %vm3622_vm14, %v10734_v0 }
  0x90   : > { %v1132_v2 = vsel %vm1030_vm5, %v1123_v55, %v1131_v53  ;;  %v1435_v7 = vor.u32 %v1434_v1, %v1431_v61  ;;  %v1807_v43 = vrot.slane %v1805_v39, 4  ;;  %v1816_v9 = vshll.u32 %v1708_v54, 16  ;;  %v11209_v54 = vld [vmem:[#allocation2 + $0x78] sm:$0xf]  ;;  %6936 = vst.msk [vmem:[#allocation4 + $0xc8] sm:$0x10] %vm3622_vm14, %v10734_v0 }
  0x91   : > { %v2110_v10 = vshrl.u32 %v2002_v57, 16  ;;  %v1810_v12 = vrot.slane %v1808_v4, 5  ;;  %v1815_v15 = vrot.slane %v1813_v6, 4  ;;  %v2113_v16 = vshll.u32 %v2002_v57, 16  ;;  %v1613_v57 = vld [vmem:[#allocation2 + $0x70] sm:$0xf0] }
  0x92   : > { %v2118_v17 = vshrl.u32 %v2003_v46, 16  ;;  %2722 = vrot.lane.b32.xlu0 %v1132_v2, %s10736_s20  ;;  %v1436_v5 = vsel %vm644_vm8, %v1427_v58, %v1435_v7  ;;  %v1818_v19 = vrot.slane %v1816_v9, 5  ;;  %v2121_v21 = vshll.u32 %v2003_v46, 16  ;;  %v10531_v2 = vld [vmem:[%s10951_s28 + $0x48] ss:$0 sps:$4 sm:$0xff]  }
  0x93   : > { %2690 = vrot.lane.b32.xlu1 %v983_v29, %s14739_s18  ;;  %v2112_v20 = vrot.slane %v2110_v10, 3  ;;  %v1811_v23 = vor.u32 %v1810_v12, %v1807_v43  ;;  %v2115_v24 = vrot.slane %v2113_v16, 4  ;;  %v2359_v26 = vrot.slane %v2301_v11, 4  ;;  %v2004_v43 = vld [vmem:[#allocation2 + $0x80] sm:$0xf8] }
  0x94   : > { %v2120_v25 = vrot.slane %v2118_v17, 3  ;;  %v725_v33 = vshll.u32 %v11147_v45, 16  ;;  %v1819_v30 = vor.u32 %v1818_v19, %v1815_v15  ;;  %v2123_v31 = vrot.slane %v2121_v21, 4  ;;  %v10532_v9 = vld [vmem:[%s10951_s28 + $0x4c] ss:$0 sps:$4 sm:$0xff]  }
  0x95   : > { %v2360_v32 = vrot.slane %v2003_v46, 4  ;;  %v739_v29 = vshrl.u32 %v11178_v47, 16  ;;  %v742_v35 = vshll.u32 %v11178_v47, 16  ;;  %v2116_v37 = vor.u32 %v2115_v24, %v2112_v20  ;;  %v1709_v46 = vld [vmem:[#allocation2 + $0x78] sm:$0x1f] }
  0x96   : > { %v984_v38 = vrot.slane %v923_v22, 4  ;;  %2786 = vrot.lane.b32.xlu0 %v1672_v3, %s10738_s25  ;;  %v1820_v44 = vsel %vm1030_vm5, %v1811_v23, %v1819_v30  ;;  %v2124_v48 = vor.u32 %v2123_v31, %v2120_v25  ;;  %v985_v49 = vrot.slane %v11197_v18, 4  ;;  %598 = vst.msk [vmem:[#allocation2 + $0xa0] sm:$0xf0] %vm578_vm4, %v10531_v2  ;;  %v2005_v20 = vld [vmem:[#allocation2 + $0x88] sm:$0xf] }
  0x97   : > { %2754 = vrot.lane.b32.xlu1 %v1436_v5, %s10740_s27  ;;  %v1134_v52 = vshrl.u32 %v923_v22, 16  ;;  %v2361_v55 = vsel %vm965_vm3, %v2359_v26, %v2360_v32  ;;  %v1137_v53 = vshll.u32 %v923_v22, 16  ;;  %v1142_v50 = vshrl.u32 %v1020_v27, 16  ;;  %599 = vst.msk [vmem:[#allocation2 + $0xa8] sm:$0xf] %vm580_vm6, %v10532_v9 }
  0x98   : > { %v1145_v51 = vshll.u32 %v1020_v27, 16  ;;  %v2125_v58 = vsel %vm644_vm8, %v2116_v37, %v2124_v48  ;;  %v1438_v1 = vshrl.u32 %v1315_v34, 16  ;;  %v1441_v39 = vshll.u32 %v1315_v34, 16  ;;  %v2302_v25 = vld [vmem:[#allocation2 + $0x80] sm:$0xf0] }
  0x99   : > { %v1136_v61 = vrot.slane %v1134_v52, 4  ;;  %v1139_v3 = vrot.slane %v1137_v53, 5  ;;  %v1144_v4 = vrot.slane %v1142_v50, 4  ;;  %v1446_v7 = vshrl.u32 %v11209_v54, 16  ;;  %6937 = vst.msk [vmem:[#allocation4 + $0xd8] sm:$0x10] %vm3622_vm14, %v10734_v0 }
  0x9a   : > { %v1147_v6 = vrot.slane %v1145_v51, 5  ;;  %2850 = vrot.lane.b32.xlu0 %v2125_v58, %s10741_s12  ;;  %v986_v10 = vsel %vm965_vm3, %v984_v38, %v985_v49  ;;  %v1440_v11 = vrot.slane %v1438_v1, 3  ;;  %v1443_v12 = vrot.slane %v1441_v39, 4  ;;  %v924_v58 = vld [vmem:[#allocation2 + $0x70] sm:$0xf0] }
  0x9b   : > { %2818 = vrot.lane.b32.xlu1 %v1820_v44, %s10739_s29  ;;  %v1449_v15 = vshll.u32 %v11209_v54, 16  ;;  %v1140_v16 = vor.u32 %v1139_v3, %v1136_v61  ;;  %v1448_v5 = vrot.slane %v1446_v7, 3  ;;  %v1673_v19 = vrot.slane %v1613_v57, 4  ;;  %v11226_v44 = vld [vmem:[#allocation2 + $0x78] sm:$0xf] }
  0x9c   : > { %v1148_v17 = vor.u32 %v1147_v6, %v1144_v4  ;;  %v1444_v21 = vor.u32 %v1443_v12, %v1440_v11  ;;  %v1822_v23 = vshrl.u32 %v1613_v57, 16  ;;  %v1825_v24 = vshll.u32 %v1613_v57, 16  ;;  %v1317_v7 = vld [vmem:[#allocation2 + $0x80] sm:$0xf8]  ;;  %6938 = vst.msk [vmem:[#allocation4 + $0xe8] sm:$0x10] %vm3622_vm14, %v10734_v0 }
  0x9d   : > { %v1451_v22 = vrot.slane %v1449_v15, 4  ;;  %v1674_v27 = vrot.slane %v11209_v54, 4  ;;  %v1830_v30 = vshrl.u32 %v1709_v46, 16  ;;  %v1833_v31 = vshll.u32 %v1709_v46, 16  ;;  %v1021_v46 = vld [vmem:[#allocation2 + $0x78] sm:$0x1f] }
  0x9e   : > { %v1149_v26 = vsel %vm1030_vm5, %v1140_v16, %v1148_v17  ;;  %2692 = vrot.lane.b32.xlu0 %v986_v10, %s14739_s18  ;;  %v1824_v34 = vrot.slane %v1822_v23, 4  ;;  %v1827_v37 = vrot.slane %v1825_v24, 5  ;;  %v2127_v38 = vshrl.u32 %v2004_v43, 16  ;;  %6939 = vst.msk [vmem:[#allocation4 + $0xf8] sm:$0x10] %vm3622_vm14, %v10734_v0 }
  0x9f   : > { %2882 = vrot.lane.b32.xlu1 %v2361_v55, %s10737_s21  ;;  %v1452_v32 = vor.u32 %v1451_v22, %v1448_v5  ;;  %v1832_v48 = vrot.slane %v1830_v30, 4  ;;  %v1835_v49 = vrot.slane %v1833_v31, 5  ;;  %v2130_v52 = vshll.u32 %v2004_v43, 16  ;;  %v1318_v5 = vld [vmem:[#allocation2 + $0x88] sm:$0xf] }
  0xa0   : > { %v2135_v53 = vshrl.u32 %v2005_v20, 16  ;;  %v1828_v51 = vor.u32 %v1827_v37, %v1824_v34  ;;  %v2129_v54 = vrot.slane %v2127_v38, 3  ;;  %v2138_v57 = vshll.u32 %v2005_v20, 16  ;;  %v2006_v38 = vld [vmem:[#allocation2 + $0x90] sm:$0xf8] }
  0xa1   : > { %v1453_v50 = vsel %vm644_vm8, %v1444_v21, %v1452_v32  ;;  %v1836_v61 = vor.u32 %v1835_v49, %v1832_v48  ;;  %v2132_v55 = vrot.slane %v2130_v52, 4  ;;  %v2362_v39 = vrot.slane %v2302_v25, 4  ;;  %v1614_v21 = vld [vmem:[#allocation2 + $0x80] sm:$0xf0]  ;;  %6940 = vst.msk [vmem:[#allocation4 + $0x108] sm:$0x10] %vm3622_vm14, %v10734_v0 }
  0xa2   : > { %v2137_v1 = vrot.slane %v2135_v53, 3  ;;  %v756_v2 = vshrl.u32 %v11197_v18, 16  ;;  %2756 = vrot.lane.b32.xlu0 %v1453_v50, %s10740_s27  ;;  %v1675_v3 = vsel %vm965_vm3, %v1673_v19, %v1674_v27  ;;  %v2140_v4 = vrot.slane %v2138_v57, 4  ;;  %v10536_v50 = vld [vmem:[%s10951_s28 + $0x50] ss:$0 sps:$4 sm:$0xff]  }
  0xa3   : > { %2724 = vrot.lane.b32.xlu1 %v1149_v26, %s10736_s20  ;;  %v2363_v6 = vrot.slane %v2005_v20, 4  ;;  %v1837_v43 = vsel %vm1030_vm5, %v1828_v51, %v1836_v61  ;;  %v2133_v9 = vor.u32 %v2132_v55, %v2129_v54  ;;  %v987_v10 = vrot.slane %v924_v58, 4  ;;  %v1710_v20 = vld [vmem:[#allocation2 + $0x88] sm:$0x1f]  ;;  %v10537_v61 = vld [vmem:[%s10951_s28 + $0x54] ss:$0 sps:$4 sm:$0xff]  }
  0xa4   : > { %v988_v11 = vrot.slane %v11226_v44, 4  ;;  %v2141_v12 = vor.u32 %v2140_v4, %v2137_v1  ;;  %v1151_v16 = vshrl.u32 %v924_v58, 16  ;;  %v1154_v17 = vshll.u32 %v924_v58, 16  ;;  %600 = vst.msk [vmem:[#allocation2 + $0xb0] sm:$0xf0] %vm578_vm4, %v10536_v50 }
  0xa5   : > { %v2364_v15 = vsel %vm965_vm3, %v2362_v39, %v2363_v6  ;;  %v1159_v23 = vshrl.u32 %v1021_v46, 16  ;;  %v1162_v19 = vshll.u32 %v1021_v46, 16  ;;  %v1455_v24 = vshrl.u32 %v1317_v7, 16  ;;  %601 = vst.msk [vmem:[#allocation2 + $0xb8] sm:$0xf] %vm580_vm6, %v10537_v61 }
  0xa6   : > { %v989_v22 = vsel %vm965_vm3, %v987_v10, %v988_v11  ;;  %2820 = vrot.lane.b32.xlu0 %v1837_v43, %s10739_s29  ;;  %v2142_v25 = vsel %vm644_vm8, %v2133_v9, %v2141_v12  ;;  %v1153_v26 = vrot.slane %v1151_v16, 4  ;;  %v1156_v27 = vrot.slane %v1154_v17, 5  ;;  %v612_v9 = vld [vmem:[#allocation2] sm:$0xf8]  ;;  %v2303_v16 = vld [vmem:[#allocation2 + $0x90] sm:$0xf0] }
  0xa7   : > { %2788 = vrot.lane.b32.xlu1 %v1675_v3, %s10738_s25  ;;  %v1458_v30 = vshll.u32 %v1317_v7, 16  ;;  %v1161_v31 = vrot.slane %v1159_v23, 4  ;;  %v1164_v32 = vrot.slane %v1162_v19, 5  ;;  %v1457_v34 = vrot.slane %v1455_v24, 3  ;;  %v2007_v3 = vld [vmem:[#allocation2 + $0x98] sm:$0xf] }
  0xa8   : > { %v1463_v37 = vshrl.u32 %v1318_v5, 16  ;;  %v1157_v48 = vor.u32 %v1156_v27, %v1153_v26  ;;  %v1466_v52 = vshll.u32 %v1318_v5, 16  ;;  %v1676_v53 = vrot.slane %v1614_v21, 4  ;;  %v925_v19 = vld [vmem:[#allocation2 + $0x80] sm:$0xf0] }
  0xa9   : > { %v1460_v49 = vrot.slane %v1458_v30, 4  ;;  %v1165_v51 = vor.u32 %v1164_v32, %v1161_v31  ;;  %v1677_v57 = vrot.slane %v1318_v5, 4  ;;  %v1839_v58 = vshrl.u32 %v1614_v21, 16  ;;  %v11251_v27 = vld [vmem:[#allocation2 + $0x88] sm:$0xf] }
  0xaa   : > { %v1465_v54 = vrot.slane %v1463_v37, 3  ;;  %2884 = vrot.lane.b32.xlu0 %v2364_v15, %s10737_s21  ;;  %v1468_v1 = vrot.slane %v1466_v52, 4  ;;  %v1842_v39 = vshll.u32 %v1614_v21, 16  ;;  %v1847_v46 = vshrl.u32 %v1710_v20, 16  ;;  %v10538_v37 = vld [vmem:[%s10951_s28 + $0x58] ss:$0 sps:$4 sm:$0xff]  }
  0xab   : > { %2852 = vrot.lane.b32.xlu1 %v2142_v25, %s10741_s12  ;;  %v1461_v55 = vor.u32 %v1460_v49, %v1457_v34  ;;  %v1166_v4 = vsel %vm1030_vm5, %v1157_v48, %v1165_v51  ;;  %v1678_v6 = vsel %vm965_vm3, %v1676_v53, %v1677_v57  ;;  %v1841_v7 = vrot.slane %v1839_v58, 4  ;;  %v10539_v52 = vld [vmem:[%s10951_s28 + $0x5c] ss:$0 sps:$4 sm:$0xff]   ;;  %v1022_v57 = vld [vmem:[#allocation2 + $0x88] sm:$0x1f] }
  0xac   : > { %v1850_v43 = vshll.u32 %v1710_v20, 16  ;;  %v1469_v10 = vor.u32 %v1468_v1, %v1465_v54  ;;  %v1844_v11 = vrot.slane %v1842_v39, 5  ;;  %v1849_v12 = vrot.slane %v1847_v46, 4  ;;  %v1319_v58 = vld [vmem:[#allocation2 + $0x90] sm:$0xf8] }
  0xad   : > { %v2144_v15 = vshrl.u32 %v2006_v38, 16  ;;  %v2147_v5 = vshll.u32 %v2006_v38, 16  ;;  %v2152_v21 = vshrl.u32 %v2007_v3, 16  ;;  %v2155_v23 = vshll.u32 %v2007_v3, 16  ;;  %602 = vst.msk [vmem:[#allocation2 + $0xc0] sm:$0xf0] %vm578_vm4, %v10538_v37 }
  0xae   : > { %v1852_v17 = vrot.slane %v1850_v43, 5  ;;  %2726 = vrot.lane.b32.xlu0 %v1166_v4, %s10736_s20  ;;  %v1470_v24 = vsel %vm644_vm8, %v1461_v55, %v1469_v10  ;;  %v1845_v20 = vor.u32 %v1844_v11, %v1841_v7  ;;  %v646_v26 = vshrl.u32 %v612_v9, 16  ;;  %603 = vst.msk [vmem:[#allocation2 + $0xc8] sm:$0xf] %vm580_vm6, %v10539_v52  ;;  %v2681_v4 = vpop.permute.xlu0 %2680  ;;  %v1711_v52 = vld [vmem:[#allocation2 + $0x98] sm:$0x1f] }
  0xaf   : > { %2694 = vrot.lane.b32.xlu1 %v989_v22, %s14739_s18  ;;  %v2146_v25 = vrot.slane %v2144_v15, 3  ;;  %v2149_v31 = vrot.slane %v2147_v5, 4  ;;  %v2154_v32 = vrot.slane %v2152_v21, 3  ;;  %v2157_v34 = vrot.slane %v2155_v23, 4  ;;  %6941 = vst.msk [vmem:[#allocation4 + $0x118] sm:$0x10] %vm3622_vm14, %v10734_v0 }
  0xb0   : > { %v1853_v30 = vor.u32 %v1852_v17, %v1849_v12  ;;  %v759_v38 = vshll.u32 %v11197_v18, 16  ;;  %v773_v48 = vshrl.u32 %v11226_v44, 16  ;;  %v648_v22 = vrot.slane %v646_v26, 3  ;;  %v1320_v12 = vld [vmem:[#allocation2 + $0x98] sm:$0xf] }
  0xb1   : > { %v649_v49 = vshll.u32 %v612_v9, 16  ;;  %v2150_v53 = vor.u32 %v2149_v31, %v2146_v25  ;;  %v2158_v50 = vor.u32 %v2157_v34, %v2154_v32  ;;  %v2365_v51 = vrot.slane %v2303_v16, 4  ;;  %3606 = vst.msk [vmem:[#allocation3 + $0x10] sm:$0x8] %vm3605_vm15, %v10734_v0  ;;  %3607 = vst.msk [vmem:[#allocation3 + $0x20] sm:$0x8] %vm3605_vm15, %v10734_v0 }
  0xb2   : > { %v2366_v54 = vrot.slane %v2007_v3, 4  ;;  %v776_v61 = vshll.u32 %v11226_v44, 16  ;;  %2790 = vrot.lane.b32.xlu0 %v1678_v6, %s10738_s25  ;;  %v1854_v55 = vsel %vm1030_vm5, %v1845_v20, %v1853_v30  ;;  %v990_v39 = vrot.slane %v925_v19, 4  ;;  %v1615_v20 = vld [vmem:[#allocation2 + $0x90] sm:$0xf0]  ;;  %v2713_v32 = vpop.permute.xlu0 %2712 }
  0xb3   : > { %2758 = vrot.lane.b32.xlu1 %v1470_v24, %s10740_s27  ;;  %v651_v1 = vrot.slane %v649_v49, 4  ;;  %v2159_v46 = vsel %vm644_vm8, %v2150_v53, %v2158_v50  ;;  %v991_v3 = vrot.slane %v11251_v27, 4  ;;  %v1168_v7 = vshrl.u32 %v925_v19, 16  ;;  %v614_v50 = vld [vmem:[#allocation2 + $0x10] sm:$0xf8] }
  0xb4   : > { %v1171_v43 = vshll.u32 %v925_v19, 16  ;;  %v1176_v10 = vshrl.u32 %v1022_v57, 16  ;;  %v1179_v11 = vshll.u32 %v1022_v57, 16  ;;  %v1472_v15 = vshrl.u32 %v1319_v58, 16  ;;  %3608 = vst.msk [vmem:[#allocation3 + $0x30] sm:$0x8] %vm3605_vm15, %v10734_v0 }
  0xb5   : > { %v652_v9 = vor.u32 %v651_v1, %v648_v22  ;;  %v2367_v6 = vsel %vm965_vm3, %v2365_v51, %v2366_v54  ;;  %v1170_v16 = vrot.slane %v1168_v7, 4  ;;  %v1475_v5 = vshll.u32 %v1319_v58, 16  ;;  %v1714_v28 = vld [vmem:[#allocation2 + $0xc8] sm:$0x1f]  ;;  %3609 = vst.msk [vmem:[#allocation3 + $0x40] sm:$0x8] %vm3605_vm15, %v10734_v0 }
  0xb6   : > { %v1173_v17 = vrot.slane %v1171_v43, 5  ;;  %2854 = vrot.lane.b32.xlu0 %v2159_v46, %s10741_s12  ;;  %v1178_v23 = vrot.slane %v1176_v10, 4  ;;  %v1181_v19 = vrot.slane %v1179_v11, 5  ;;  %v1474_v24 = vrot.slane %v1472_v15, 3  ;;  %v2009_v10 = vld [vmem:[#allocation2 + $0xa8] sm:$0xf] }
  0xb7   : > { %2822 = vrot.lane.b32.xlu1 %v1854_v55, %s10739_s29  ;;  %v661_v21 = vsel %vm644_vm8, %v652_v9, %v660_v8  ;;  %v992_v25 = vsel %vm965_vm3, %v990_v39, %v991_v3  ;;  %v1477_v30 = vrot.slane %v1475_v5, 4  ;;  %v1480_v31 = vshrl.u32 %v1320_v12, 16  ;;  %v2008_v55 = vld [vmem:[#allocation2 + $0xa0] sm:$0xf8]  ;;  %3610 = vst.msk [vmem:[#allocation3 + $0x50] sm:$0x8] %vm3605_vm15, %v10734_v0 }
  0xb8   : > { %v1174_v26 = vor.u32 %v1173_v17, %v1170_v16  ;;  %v1182_v34 = vor.u32 %v1181_v19, %v1178_v23  ;;  %v1483_v37 = vshll.u32 %v1320_v12, 16  ;;  %v1679_v22 = vrot.slane %v1615_v20, 4  ;;  %v2304_v17 = vld [vmem:[#allocation2 + $0xa0] sm:$0xf0]  ;;  %v11286_v19 = vld [vmem:[#allocation2 + $0x98] sm:$0xf] }
  0xb9   : > { %v1680_v49 = vrot.slane %v1320_v12, 4  ;;  %v2906_v53 = vsel %vm377_vm0, %v661_v21, %v2681_v4  ;;  %v1478_v40 = vor.u32 %v1477_v30, %v1474_v24  ;;  %v1482_v41 = vrot.slane %v1480_v31, 3  ;;  %3611 = vst.msk [vmem:[#allocation3 + $0x60] sm:$0x8] %vm3605_vm15, %v10734_v0  ;;  %3612 = vst.msk [vmem:[#allocation3 + $0x70] sm:$0x8] %vm3605_vm15, %v10734_v0 }
  0xba   : > { %v1856_v8 = vshrl.u32 %v1615_v20, 16  ;;  %2696 = vrot.lane.b32.xlu0 %v992_v25, %s14739_s18  ;;  %v1183_v51 = vsel %vm1030_vm5, %v1174_v26, %v1182_v34  ;;  %v1485_v54 = vrot.slane %v1483_v37, 4  ;;  %v1859_v58 = vshll.u32 %v1615_v20, 16  ;;  %v926_v25 = vld [vmem:[#allocation2 + $0x90] sm:$0xf0] }
  0xbb   : > { %2886 = vrot.lane.b32.xlu1 %v2367_v6, %s10737_s21  ;;  %v1681_v57 = vsel %vm965_vm3, %v1679_v22, %v1680_v49  ;;  %v1864_v39 = vshrl.u32 %v1711_v52, 16  ;;  %v1867_v46 = vshll.u32 %v1711_v52, 16  ;;  %v673_v4 = vrot.slane %v671_v59, 3  ;;  %v1023_v26 = vld [vmem:[#allocation2 + $0x98] sm:$0x1f] }
  0xbc   : > { %v1858_v1 = vrot.slane %v1856_v8, 4  ;;  %v1486_v3 = vor.u32 %v1485_v54, %v1482_v41  ;;  %v1861_v7 = vrot.slane %v1859_v58, 5  ;;  %v676_v43 = vrot.slane %v674_v60, 4  ;;  %3613 = vst.msk [vmem:[#allocation3 + $0x80] sm:$0x8] %vm3605_vm15, %v10734_v0 }
  0xbd   : > { %v663_v9 = vshrl.u32 %v614_v50, 16  ;;  %v11282_v11 = vpop.permute.xlu0 %2872  ;;  %v1866_v12 = vrot.slane %v1864_v39, 4  ;;  %v1869_v15 = vrot.slane %v1867_v46, 5  ;;  %v666_v6 = vshll.u32 %v614_v50, 16  ;;  %v10540_v50 = vld [vmem:[%s10951_s28 + $0x60] ss:$0 sps:$4 sm:$0xff]  }
  0xbe   : > { %v2161_v16 = vshrl.u32 %v2008_v55, 16  ;;  %v1487_v5 = vsel %vm644_vm8, %v1478_v40, %v1486_v3  ;;  %v1862_v21 = vor.u32 %v1861_v7, %v1858_v1  ;;  %v677_v59 = vor.u32 %v676_v43, %v673_v4  ;;  %v1321_v7 = vld [vmem:[#allocation2 + $0xa0] sm:$0xf8]  ;;  %604 = vst.msk [vmem:[#allocation2 + $0xd0] sm:$0xf0] %vm578_vm4, %v10540_v50 }
  0xbf   : > { %2728 = vrot.lane.b32.xlu1 %v1183_v51, %s10736_s20  ;;  %v665_v23 = vrot.slane %v663_v9, 3  ;;  %2760 = vrot.lane.b32.xlu0 %v1487_v5, %s10740_s27  ;;  %v1870_v56 = vor.u32 %v1869_v15, %v1866_v12  ;;  %v668_v60 = vrot.slane %v666_v6, 4  ;;  %v2164_v20 = vshll.u32 %v2008_v55, 16  ;;  %v10541_v51 = vld [vmem:[%s10951_s28 + $0x64] ss:$0 sps:$4 sm:$0xff]  }
  0xc0   : > { %v2163_v24 = vrot.slane %v2161_v16, 3  ;;  %v2169_v31 = vshrl.u32 %v2009_v10, 16  ;;  %v2172_v34 = vshll.u32 %v2009_v10, 16  ;;  %v2368_v37 = vrot.slane %v2304_v17, 4  ;;  %605 = vst.msk [vmem:[#allocation2 + $0xd8] sm:$0xf] %vm580_vm6, %v10541_v51 }
  0xc1   : > { %v11289_v30 = vpop.permute.xlu1 %2776  ;;  %v2369_v22 = vrot.slane %v2009_v10, 4  ;;  %v790_v49 = vshrl.u32 %v11251_v27, 16  ;;  %v1871_v52 = vsel %vm1030_vm5, %v1862_v21, %v1870_v56  ;;  %v11293_v40 = vpop.permute.xlu0 %2778  ;;  %v669_v41 = vor.u32 %v668_v60, %v665_v23  ;;  %v1322_v10 = vld [vmem:[#allocation2 + $0xa8] sm:$0xf]  ;;  %v1616_v17 = vld [vmem:[#allocation2 + $0xa0] sm:$0xf0] }
  0xc2   : > { %v2166_v8 = vrot.slane %v2164_v20, 4  ;;  %v11298_v54 = vsel %vm2952_vm7, %v2906_v53, %v2713_v32  ;;  %v2171_v58 = vrot.slane %v2169_v31, 3  ;;  %v2174_v55 = vrot.slane %v2172_v34, 4  ;;  %v10542_v20 = vld [vmem:[%s10951_s28 + $0x68] ss:$0 sps:$4 sm:$0xff]  }
  0xc3   : > { %2792 = vrot.lane.b32.xlu1 %v1681_v57, %s10738_s25  ;;  %v2370_v1 = vsel %vm965_vm3, %v2368_v37, %v2369_v22  ;;  %2824 = vrot.lane.b32.xlu0 %v1871_v52, %s10739_s29  ;;  %v678_v39 = vsel %vm644_vm8, %v669_v41, %v677_v59  ;;  %v993_v4 = vrot.slane %v926_v25, 4  ;;  %v994_v3 = vrot.slane %v11286_v19, 4  ;;  %v10543_v22 = vld [vmem:[%s10951_s28 + $0x6c] ss:$0 sps:$4 sm:$0xff]   ;;  %606 = vst.msk [vmem:[#allocation2 + $0xe0] sm:$0xf0] %vm578_vm4, %v10542_v20 }
  0xc4   : > { %v2167_v46 = vor.u32 %v2166_v8, %v2163_v24  ;;  %v2175_v53 = vor.u32 %v2174_v55, %v2171_v58  ;;  %v1185_v57 = vshrl.u32 %v926_v25, 16  ;;  %v1188_v43 = vshll.u32 %v926_v25, 16  ;;  %v2392_v58 = vld [vmem:[#allocation2 + $0x28] sm:$0x1f]  ;;  %607 = vst.msk [vmem:[#allocation2 + $0xe8] sm:$0xf] %vm580_vm6, %v10543_v22 }
  0xc5   : > { %v2683_v32 = vpop.permute.xlu1 %2682  ;;  %v1193_v9 = vshrl.u32 %v1023_v26, 16  ;;  %v995_v6 = vsel %vm965_vm3, %v993_v4, %v994_v3  ;;  %v1196_v16 = vshll.u32 %v1023_v26, 16  ;;  %v1489_v60 = vshrl.u32 %v1321_v7, 16  ;;  %3614 = vst.msk [vmem:[#allocation3 + $0x90] sm:$0x8] %vm3605_vm15, %v10734_v0 }
  0xc6   : > { %v2909_v12 = vsel %vm377_vm0, %v678_v39, %v2683_v32  ;;  %v2809_v15 = vpop.permute.xlu0 %2808  ;;  %v2176_v5 = vsel %vm644_vm8, %v2167_v46, %v2175_v53  ;;  %v1187_v21 = vrot.slane %v1185_v57, 4  ;;  %v1190_v59 = vrot.slane %v1188_v43, 5  ;;  %v10590_v53 = vld [vmem:[#allocation2 + $0x20] sm:$0xf0]  ;;  %3615 = vst.msk [vmem:[#allocation3 + $0xa0] sm:$0x8] %vm3605_vm15, %v10734_v0 }
  0xc7   : > { %v1195_v23 = vrot.slane %v1193_v9, 4  ;;  %2856 = vrot.lane.b32.xlu1 %v2176_v5, %s10741_s12  ;;  %2888 = vrot.lane.b32.xlu0 %v2370_v1, %s10737_s21  ;;  %v1198_v56 = vrot.slane %v1196_v16, 5  ;;  %v1492_v24 = vshll.u32 %v1321_v7, 16  ;;  %v1497_v31 = vshrl.u32 %v1322_v10, 16  ;;  %v1712_v16 = vld [vmem:[#allocation2 + $0xa8] sm:$0x1f] }
  0xc8   : > { %v1191_v26 = vor.u32 %v1190_v59, %v1187_v21  ;;  %v1500_v34 = vshll.u32 %v1322_v10, 16  ;;  %v1682_v37 = vrot.slane %v1616_v17, 4  ;;  %v1491_v8 = vrot.slane %v1489_v60, 3  ;;  %v2010_v60 = vld [vmem:[#allocation2 + $0xb0] sm:$0xf8] }
  0xc9   : > { %v11313_v25 = vpop.permute.xlu1 %2874  ;;  %v1199_v52 = vor.u32 %v1198_v56, %v1195_v23  ;;  %v1494_v50 = vrot.slane %v1492_v24, 4  ;;  %v1683_v51 = vrot.slane %v1322_v10, 4  ;;  %v1499_v1 = vrot.slane %v1497_v31, 3  ;;  %3616 = vst.msk [vmem:[#allocation3 + $0xb0] sm:$0x8] %vm3605_vm15, %v10734_v0 }
  0xca   : > { %v2715_v41 = vpop.permute.xlu0 %2714  ;;  %v1502_v39 = vrot.slane %v1500_v34, 4  ;;  %v2409_v57 = vshrl.u32 %v10590_v53, 16  ;;  %v2412_v43 = vshll.u32 %v10590_v53, 16  ;;  %v2417_v9 = vshrl.u32 %v2392_v58, 16  ;;  %v11337_v53 = vld [vmem:[#allocation2 + $0xa8] sm:$0xf] }
  0xcb   : > { %v11318_v55 = vsel %vm2952_vm7, %v2909_v12, %v2715_v41  ;;  %2698 = vrot.lane.b32.xlu1 %v995_v6, %s14739_s18  ;;  %v1200_v46 = vsel %vm1030_vm5, %v1191_v26, %v1199_v52  ;;  %v1495_v4 = vor.u32 %v1494_v50, %v1491_v8  ;;  %v1684_v3 = vsel %vm965_vm3, %v1682_v37, %v1683_v51  ;;  %v2305_v51 = vld [vmem:[#allocation2 + $0xb0] sm:$0xf0] }
  0xcc   : > { %2730 = vrot.lane.b32.xlu0 %v1200_v46, %s10736_s20  ;;  %v1503_v32 = vor.u32 %v1502_v39, %v1499_v1  ;;  %v2420_v12 = vshll.u32 %v2392_v58, 16  ;;  %v1873_v6 = vshrl.u32 %v1616_v17, 16  ;;  %v1876_v5 = vshll.u32 %v1616_v17, 16  ;;  %3617 = vst.msk [vmem:[#allocation3 + $0xc0] sm:$0x8] %vm3605_vm15, %v10734_v0 }
  0xcd   : > { %v2745_v7 = vpop.permute.xlu1 %2744  ;;  %v2411_v23 = vrot.slane %v2409_v57, 4  ;;  %v2414_v56 = vrot.slane %v2412_v43, 5  ;;  %v2419_v20 = vrot.slane %v2417_v9, 4  ;;  %v1881_v22 = vshrl.u32 %v1712_v16, 16  ;;  %3618 = vst.msk [vmem:[#allocation3 + $0xd0] sm:$0x8] %vm3605_vm15, %v10734_v0 }
  0xce   : > { %v2987_v10 = vsel %vm2985_vm9, %v11298_v54, %v2745_v7  ;;  %v1504_v59 = vsel %vm644_vm8, %v1495_v4, %v1503_v32  ;;  %v2422_v26 = vrot.slane %v2420_v12, 5  ;;  %v1875_v31 = vrot.slane %v1873_v6, 4  ;;  %v2011_v54 = vld [vmem:[#allocation2 + $0xb8] sm:$0xf]  ;;  %v927_v12 = vld [vmem:[#allocation2 + $0xa0] sm:$0xf0] }
  0xcf   : > { %v3020_v21 = vsel %vm3018_vm10, %v2987_v10, %v11289_v30  ;;  %2762 = vrot.lane.b32.xlu1 %v1504_v59, %s10740_s27  ;;  %v2415_v17 = vor.u32 %v2414_v56, %v2411_v23  ;;  %v1878_v37 = vrot.slane %v1876_v5, 5  ;;  %v1884_v30 = vshll.u32 %v1712_v16, 16  ;;  %v616_v59 = vld [vmem:[#allocation2 + $0x20] sm:$0xf8]  ;;  %3619 = vst.msk [vmem:[#allocation3 + $0xe0] sm:$0x8] %vm3605_vm15, %v10734_v0 }
  0xd0   : > { %v3053_v24 = vsel %vm3051_vm11, %v3020_v21, %v2809_v15  ;;  %2794 = vrot.lane.b32.xlu0 %v1684_v3, %s10738_s25  ;;  %v2423_v41 = vor.u32 %v2422_v26, %v2419_v20  ;;  %v2178_v8 = vshrl.u32 %v2010_v60, 16  ;;  %v2181_v50 = vshll.u32 %v2010_v60, 16  ;;  %v1024_v26 = vld [vmem:[#allocation2 + $0xa8] sm:$0x1f]  ;;  %3620 = vst.msk [vmem:[#allocation3 + $0xf0] sm:$0x8] %vm3605_vm15, %v10734_v0 }
  0xd1   : > { %v2841_v34 = vpop.permute.xlu1 %2840  ;;  %v1879_v58 = vor.u32 %v1878_v37, %v1875_v31  ;;  %v1883_v1 = vrot.slane %v1881_v22, 4  ;;  %v1886_v15 = vrot.slane %v1884_v30, 5  ;;  %v2186_v39 = vshrl.u32 %v2011_v54, 16  ;;  %3621 = vst.msk [vmem:[#allocation3 + $0x100] sm:$0x8] %vm3605_vm15, %v10734_v0 }
  0xd2   : > { %v3086_v52 = vsel %vm3084_vm12, %v3053_v24, %v2841_v34  ;;  %v2424_v4 = vsel %vm1030_vm5, %v2415_v17, %v2423_v41  ;;  %v2180_v3 = vrot.slane %v2178_v8, 3  ;;  %v2183_v7 = vrot.slane %v2181_v50, 4  ;;  %v1323_v17 = vld [vmem:[#allocation2 + $0xb0] sm:$0xf8]  ;;  %6910 = vst.msk [vmem:[#allocation4 + $0x20] sm:$0x8] %vm3605_vm15, %v10734_v0 }
  0xd3   : > { %v11334_v46 = vpop.permute.xlu0 %2842  ;;  %v2189_v32 = vshll.u32 %v2011_v54, 16  ;;  %9930 = vmatprep.mubr.msk.bf16.mxu0 %vm377_vm0, %v2424_v4  ;;  %v1887_v57 = vor.u32 %v1886_v15, %v1883_v1  ;;  %v2188_v43 = vrot.slane %v2186_v39, 3  ;;  %v2371_v10 = vrot.slane %v2305_v51, 4  ;;  %6911 = vst.msk [vmem:[#allocation4 + $0x30] sm:$0x8] %vm3605_vm15, %v10734_v0 }
  0xd4   : > { %v2184_v16 = vor.u32 %v2183_v7, %v2180_v3  ;;  %v3119_v5 = vsel %vm3117_vm13, %v3086_v52, %v11282_v11  ;;  %v793_v23 = vshll.u32 %v11251_v27, 16  ;;  %v807_v56 = vshrl.u32 %v11286_v19, 16  ;;  %v11362_v3 = vld [vmem:[#allocation2 + $0xb8] sm:$0xf]  ;;  %6912 = vst.msk [vmem:[#allocation4 + $0x40] sm:$0x8] %vm3605_vm15, %v10734_v0 }
  0xd5   : > { %v2747_v9 = vpop.permute.xlu1 %2746  ;;  %v2191_v6 = vrot.slane %v2189_v32, 4  ;;  %v1888_v60 = vsel %vm1030_vm5, %v1879_v58, %v1887_v57  ;;  %3326 = vmatmul.mubr.bf16.vlgmr.msra.gmra.mrb[0].mxu0 %v3119_v5  ;;  %v2372_v24 = vrot.slane %v2011_v54, 4  ;;  %v996_v11 = vrot.slane %v927_v12, 4  ;;  %v10544_v58 = vld [vmem:[%s10951_s28 + $0x70] ss:$0 sps:$4 sm:$0xff]  }
  0xd6   : > { %v2989_v21 = vsel %vm2985_vm9, %v11318_v55, %v2747_v9  ;;  %2826 = vrot.lane.b32.xlu1 %v1888_v60, %s10739_s29  ;;  %v997_v34 = vrot.slane %v11337_v53, 4  ;;  %v680_v30 = vshrl.u32 %v616_v59, 16  ;;  %v683_v52 = vshll.u32 %v616_v59, 16  ;;  %608 = vst.msk [vmem:[#allocation2 + $0xf0] sm:$0xf0] %vm578_vm4, %v10544_v58 }
  0xd7   : > { %v2685_v20 = vpop.permute.xlu0 %2684  ;;  %v2192_v31 = vor.u32 %v2191_v6, %v2188_v43  ;;  %v3022_v55 = vsel %vm3018_vm10, %v2989_v21, %v11293_v40  ;;  %v2373_v37 = vsel %vm965_vm3, %v2371_v10, %v2372_v24  ;;  %v690_v54 = vrot.slane %v688_v36, 3  ;;  %v10545_v40 = vld [vmem:[%s10951_s28 + $0x74] ss:$0 sps:$4 sm:$0xff]   ;;  %v2393_v59 = vld [vmem:[#allocation2 + $0x38] sm:$0x1f] }
  0xd8   : > { %v998_v8 = vsel %vm965_vm3, %v996_v11, %v997_v34  ;;  %v693_v51 = vrot.slane %v691_v42, 4  ;;  %v682_v1 = vrot.slane %v680_v30, 3  ;;  %v685_v15 = vrot.slane %v683_v52, 4  ;;  %609 = vst.msk [vmem:[#allocation2 + $0xf8] sm:$0xf] %vm580_vm6, %v10545_v40 }
  0xd9   : > { %v2811_v22 = vpop.permute.xlu1 %2810  ;;  %v2193_v41 = vsel %vm644_vm8, %v2184_v16, %v2192_v31  ;;  %v1202_v39 = vshrl.u32 %v927_v12, 16  ;;  %v1205_v4 = vshll.u32 %v927_v12, 16  ;;  %v1210_v7 = vshrl.u32 %v1024_v26, 16  ;;  %v10547_v58 = vld [vmem:[%s10951_s28 + $0x7c] ss:$0 sps:$4 sm:$0xff]  }
  0xda   : > { %v3055_v50 = vsel %vm3051_vm11, %v3022_v55, %v2811_v22  ;;  %2858 = vrot.lane.b32.xlu0 %v2193_v41, %s10741_s12  ;;  %2890 = vrot.lane.b32.xlu1 %v2373_v37, %s10737_s21  ;;  %v694_v36 = vor.u32 %v693_v51, %v690_v54  ;;  %v1213_v32 = vshll.u32 %v1024_v26, 16  ;;  %v1506_v57 = vshrl.u32 %v1323_v17, 16  ;;  %v10546_v22 = vld [vmem:[%s10951_s28 + $0x78] ss:$0 sps:$4 sm:$0xff]   ;;  %611 = vst.msk [vmem:[#allocation2 + $0x108] sm:$0xf] %vm580_vm6, %v10547_v58 }
  0xdb   : > { %v686_v13 = vor.u32 %v685_v15, %v682_v1  ;;  %v1204_v42 = vrot.slane %v1202_v39, 4  ;;  %v1207_v43 = vrot.slane %v1205_v4, 5  ;;  %v1509_v9 = vshll.u32 %v1323_v17, 16  ;;  %v10591_v17 = vld [vmem:[#allocation2 + $0x30] sm:$0xf0]  ;;  %s373_s28 = sld [smem:[#allocation5]] }
  0xdc   : > { %v2749_v16 = vpop.permute.xlu0 %2748  ;;  %v1212_v12 = vrot.slane %v1210_v7, 4  ;;  %v1215_v6 = vrot.slane %v1213_v32, 5  ;;  %v1508_v5 = vrot.slane %v1506_v57, 3  ;;  %v1514_v21 = vshrl.u32 %v11362_v3, 16  ;;  %v1617_v4 = vld [vmem:[#allocation2 + $0xb0] sm:$0xf0] }
  0xdd   : > { %v2717_v10 = vpop.permute.xlu1 %2716  ;;  %v695_v60 = vsel %vm644_vm8, %v686_v13, %v694_v36  ;;  %v1208_v24 = vor.u32 %v1207_v43, %v1204_v42  ;;  %v1511_v26 = vrot.slane %v1509_v9, 4  ;;  %v1517_v31 = vshll.u32 %v11362_v3, 16  ;;  %610 = vst.msk [vmem:[#allocation2 + $0x100] sm:$0xf0] %vm578_vm4, %v10546_v22  ;;  %v1713_v57 = vld [vmem:[#allocation2 + $0xb8] sm:$0x1f] }
  0xde   : > { %2700 = vrot.lane.b32.xlu0 %v998_v8, %s14739_s18  ;;  %v2912_v11 = vsel %vm377_vm0, %v695_v60, %v2685_v20  ;;  %v1216_v34 = vor.u32 %v1215_v6, %v1212_v12  ;;  %v1516_v55 = vrot.slane %v1514_v21, 3  ;;  %v2426_v37 = vshrl.u32 %v10591_v17, 16  ;;  %v1331_v18 = vld [vmem:[#allocation2 + $0xf0] sm:$0xf8]  ;;  %6913 = vst.msk [vmem:[#allocation4 + $0x50] sm:$0x8] %vm3605_vm15, %v10734_v0 }
  0xdf   : > { %v1512_v30 = vor.u32 %v1511_v26, %v1508_v5  ;;  %v1519_v52 = vrot.slane %v1517_v31, 4  ;;  %v2429_v54 = vshll.u32 %v10591_v17, 16  ;;  %v2434_v41 = vshrl.u32 %v2393_v59, 16  ;;  %6914 = vst.msk [vmem:[#allocation4 + $0x60] sm:$0x8] %vm3605_vm15, %v10734_v0 }
  0xe0   : > { %v2813_v8 = vpop.permute.xlu0 %2812  ;;  %v1217_v40 = vsel %vm1030_vm5, %v1208_v24, %v1216_v34  ;;  %v2428_v1 = vrot.slane %v2426_v37, 4  ;;  %v2437_v15 = vshll.u32 %v2393_v59, 16  ;;  %v2958_v39 = vsel %vm2952_vm7, %v2912_v11, %v2717_v10  ;;  %v2012_v10 = vld [vmem:[#allocation2 + $0xc0] sm:$0xf8]  ;;  %6915 = vst.msk [vmem:[#allocation4 + $0x70] sm:$0x8] %vm3605_vm15, %v10734_v0 }
  0xe1   : > { %v2781_v51 = vpop.permute.xlu1 %2780  ;;  %2732 = vrot.lane.b32.xlu1 %v1217_v40, %s10736_s20  ;;  %v1520_v20 = vor.u32 %v1519_v52, %v1516_v55  ;;  %v2431_v36 = vrot.slane %v2429_v54, 5  ;;  %v2436_v7 = vrot.slane %v2434_v41, 4  ;;  %v3088_v32 = vsel %vm3084_vm12, %v3055_v50, %v11334_v46  ;;  %v2306_v55 = vld [vmem:[#allocation2 + $0xc0] sm:$0xf0]  ;;  %6916 = vst.msk [vmem:[#allocation4 + $0x80] sm:$0x8] %vm3605_vm15, %v10734_v0 }
  0xe2   : > { %v2439_v13 = vrot.slane %v2437_v15, 5  ;;  %v3122_v42 = vsel %vm3117_vm13, %v3088_v32, %v11313_v25  ;;  %v2991_v43 = vsel %vm2985_vm9, %v2958_v39, %v2749_v16  ;;  %v1685_v9 = vrot.slane %v1617_v4, 4  ;;  %v2013_v25 = vld [vmem:[#allocation2 + $0xc8] sm:$0xf]  ;;  %6917 = vst.msk [vmem:[#allocation4 + $0x90] sm:$0x8] %vm3605_vm15, %v10734_v0 }
  0xe3   : > { %v1521_v12 = vsel %vm644_vm8, %v1512_v30, %v1520_v20  ;;  %v2432_v6 = vor.u32 %v2431_v36, %v2428_v1  ;;  %v1686_v5 = vrot.slane %v11362_v3, 4  ;;  %v1890_v21 = vshrl.u32 %v1617_v4, 16  ;;  %6918 = vst.msk [vmem:[#allocation4 + $0xa0] sm:$0x8] %vm3605_vm15, %v10734_v0  ;;  %6919 = vst.msk [vmem:[#allocation4 + $0xb0] sm:$0x8] %vm3605_vm15, %v10734_v0 }
  0xe4   : > { %v11386_v60 = vpop.permute.xlu0 %2876  ;;  %2764 = vrot.lane.b32.xlu0 %v1521_v12, %s10740_s27  ;;  %v2440_v46 = vor.u32 %v2439_v13, %v2436_v7  ;;  %v1893_v50 = vshll.u32 %v1617_v4, 16  ;;  %v1898_v24 = vshrl.u32 %v1713_v57, 16  ;;  %v1901_v26 = vshll.u32 %v1713_v57, 16  ;;  %v11399_v4 = vld [vmem:[#allocation2 + $0xb8] sm:$0xf] }
  0xe5   : > { %v2845_v59 = vpop.permute.xlu1 %2844  ;;  %v1687_v16 = vsel %vm965_vm3, %v1685_v9, %v1686_v5  ;;  %v1892_v31 = vrot.slane %v1890_v21, 4  ;;  %v3024_v11 = vsel %vm3018_vm10, %v2991_v43, %v2781_v51  ;;  %v2195_v34 = vshrl.u32 %v2012_v10, 16  ;;  %v2394_v57 = vld [vmem:[#allocation2 + $0x48] sm:$0x1f]  ;;  %6920 = vst.msk [vmem:[#allocation4 + $0xc0] sm:$0x8] %vm3605_vm15, %v10734_v0 }
  0xe6   : > { %v2441_v3 = vsel %vm1030_vm5, %v2432_v6, %v2440_v46  ;;  %2796 = vrot.lane.b32.xlu1 %v1687_v16, %s10738_s25  ;;  %v1895_v17 = vrot.slane %v1893_v50, 5  ;;  %v1900_v37 = vrot.slane %v1898_v24, 4  ;;  %v1903_v22 = vrot.slane %v1901_v26, 5  ;;  %v10592_v24 = vld [vmem:[#allocation2 + $0x40] sm:$0xf0] }
  0xe7   : > { %v810_v30 = vshll.u32 %v11286_v19, 16  ;;  %9931 = vmatprep.mubr.msk.bf16.mxu0 %vm377_vm0, %v2441_v3  ;;  %v2197_v52 = vrot.slane %v2195_v34, 3  ;;  %v2198_v54 = vshll.u32 %v2012_v10, 16  ;;  %v2203_v41 = vshrl.u32 %v2013_v25, 16  ;;  %v618_v3 = vld [vmem:[#allocation2 + $0x30] sm:$0xf8] }
  0xe8   : > { %v11397_v40 = vpop.permute.xlu0 %2718  ;;  %3334 = vmatmul.mubr.bf16.gmra.mrb[4].mxu0 %v3122_v42  ;;  %v1896_v51 = vor.u32 %v1895_v17, %v1892_v31  ;;  %v1904_v1 = vor.u32 %v1903_v22, %v1900_v37  ;;  %v2206_v15 = vshll.u32 %v2013_v25, 16  ;;  %v2374_v39 = vrot.slane %v2306_v55, 4  ;;  %v928_v42 = vld [vmem:[#allocation2 + $0xb0] sm:$0xf0]  ;;  %v1025_v31 = vld [vmem:[#allocation2 + $0xb8] sm:$0x1f] }
  0xe9   : > { %v11395_v58 = vpop.permute.xlu1 %2686  ;;  %v3057_v20 = vsel %vm3051_vm11, %v3024_v11, %v2813_v8  ;;  %v2200_v36 = vrot.slane %v2198_v54, 4  ;;  %v2205_v7 = vrot.slane %v2203_v41, 3  ;;  %v2375_v32 = vrot.slane %v2013_v25, 4  ;;  %6921 = vst.msk [vmem:[#allocation4 + $0xd0] sm:$0x8] %vm3605_vm15, %v10734_v0 }
  0xea   : > { %v824_v13 = vshrl.u32 %v11337_v53, 16  ;;  %v1905_v43 = vsel %vm1030_vm5, %v1896_v51, %v1904_v1  ;;  %v2208_v9 = vrot.slane %v2206_v15, 4  ;;  %v3090_v10 = vsel %vm3084_vm12, %v3057_v20, %v2845_v59  ;;  %6922 = vst.msk [vmem:[#allocation4 + $0xe0] sm:$0x8] %vm3605_vm15, %v10734_v0  ;;  %6923 = vst.msk [vmem:[#allocation4 + $0xf0] sm:$0x8] %vm3605_vm15, %v10734_v0 }
  0xeb   : > { %2828 = vrot.lane.b32.xlu0 %v1905_v43, %s10739_s29  ;;  %v2201_v12 = vor.u32 %v2200_v36, %v2197_v52  ;;  %v2376_v6 = vsel %vm965_vm3, %v2374_v39, %v2375_v32  ;;  %v999_v5 = vrot.slane %v928_v42, 4  ;;  %v1000_v8 = vrot.slane %v11399_v4, 4  ;;  %6924 = vst.msk [vmem:[#allocation4 + $0x100] sm:$0x8] %vm3605_vm15, %v10734_v0  ;;  %6925 = vst.msk [vmem:[#allocation4 + $0x110] sm:$0x8] %vm3605_vm15, %v10734_v0 }
  0xec   : > { %v11410_v46 = vpop.permute.xlu0 %2782  ;;  %v2209_v50 = vor.u32 %v2208_v9, %v2205_v7  ;;  %v2443_v26 = vshrl.u32 %v10592_v24, 16  ;;  %v2446_v25 = vshll.u32 %v10592_v24, 16  ;;  %v2451_v16 = vshrl.u32 %v2394_v57, 16 }
  0xed   : > { %v11408_v21 = vpop.permute.xlu1 %2750  ;;  %v1001_v59 = vsel %vm965_vm3, %v999_v5, %v1000_v8  ;;  %v2454_v11 = vshll.u32 %v2394_v57, 16  ;;  %v1219_v34 = vshrl.u32 %v928_v42, 16  ;;  %v1222_v55 = vshll.u32 %v928_v42, 16  ;;  %v1325_v57 = vld [vmem:[#allocation2 + $0xc0] sm:$0xf8] }
  0xee   : > { %v2210_v17 = vsel %vm644_vm8, %v2201_v12, %v2209_v50  ;;  %v2445_v37 = vrot.slane %v2443_v26, 4  ;;  %v2448_v22 = vrot.slane %v2446_v25, 5  ;;  %v2453_v52 = vrot.slane %v2451_v16, 4  ;;  %v1618_v26 = vld [vmem:[#allocation2 + $0xc0] sm:$0xf0] }
  0xef   : > { %2860 = vrot.lane.b32.xlu1 %v2210_v17, %s10741_s12  ;;  %2892 = vrot.lane.b32.xlu0 %v2376_v6, %s10737_s21  ;;  %v2456_v54 = vrot.slane %v2454_v11, 5  ;;  %v1221_v41 = vrot.slane %v1219_v34, 4  ;;  %v1224_v51 = vrot.slane %v1222_v55, 5  ;;  %v1227_v1 = vshrl.u32 %v1025_v31, 16  ;;  %v1326_v6 = vld [vmem:[#allocation2 + $0xc8] sm:$0xf] }
  0xf0   : > { %v11418_v39 = vpop.permute.xlu0 %2846  ;;  %v2449_v20 = vor.u32 %v2448_v22, %v2445_v37  ;;  %v1230_v36 = vshll.u32 %v1025_v31, 16  ;;  %v3125_v7 = vsel %vm3117_vm13, %v3090_v10, %v11386_v60  ;;  %v697_v32 = vshrl.u32 %v618_v3, 16 }
  0xf1   : > { %v11416_v15 = vpop.permute.xlu1 %2814  ;;  %v2457_v43 = vor.u32 %v2456_v54, %v2453_v52  ;;  %v1225_v9 = vor.u32 %v1224_v51, %v1221_v41  ;;  %v1229_v42 = vrot.slane %v1227_v1, 4  ;;  %v700_v12 = vshll.u32 %v618_v3, 16  ;;  %v2014_v51 = vld [vmem:[#allocation2 + $0xd0] sm:$0xf8] }
  0xf2   : > { %v1232_v5 = vrot.slane %v1230_v36, 5  ;;  %v699_v8 = vrot.slane %v697_v32, 3  ;;  %v707_v50 = vrot.slane %v705_v62, 3  ;;  %v710_v24 = vrot.slane %v708_v63, 4 }
  0xf3   : > { %2702 = vrot.lane.b32.xlu1 %v1001_v59, %s14739_s18  ;;  %v2458_v60 = vsel %vm1030_vm5, %v2449_v20, %v2457_v43  ;;  %v702_v10 = vrot.slane %v700_v12, 4  ;;  %v1523_v25 = vshrl.u32 %v1325_v57, 16  ;;  %v1526_v16 = vshll.u32 %v1325_v57, 16  ;;  %v2015_v57 = vld [vmem:[#allocation2 + $0xd8] sm:$0xf] }
  0xf4   : > { %v11430_v11 = vpop.permute.xlu0 %2688  ;;  %9932 = vmatprep.mubr.msk.bf16.mxu0 %vm377_vm0, %v2458_v60  ;;  %v1233_v34 = vor.u32 %v1232_v5, %v1229_v42  ;;  %v711_v55 = vor.u32 %v710_v24, %v707_v50  ;;  %v1531_v62 = vshrl.u32 %v1326_v6, 16  ;;  %v1534_v3 = vshll.u32 %v1326_v6, 16 }
  0xf5   : > { %v11428_v31 = vpop.permute.xlu1 %2878  ;;  %3342 = vmatmul.mubr.bf16.gmra.mrb[8].mxu0 %v3125_v7  ;;  %v703_v63 = vor.u32 %v702_v10, %v699_v8  ;;  %v1525_v17 = vrot.slane %v1523_v25, 3  ;;  %v1528_v59 = vrot.slane %v1526_v16, 4  ;;  %v1688_v37 = vrot.slane %v1618_v26, 4  ;;  %v2307_v16 = vld [vmem:[#allocation2 + $0xd0] sm:$0xf0] }
  0xf6   : > { %v1234_v22 = vsel %vm1030_vm5, %v1225_v9, %v1233_v34  ;;  %v1533_v52 = vrot.slane %v1531_v62, 3  ;;  %v1536_v54 = vrot.slane %v1534_v3, 4  ;;  %v1689_v41 = vrot.slane %v1326_v6, 4  ;;  %v11448_v34 = vld [vmem:[#allocation2 + $0xc0] sm:$0xf0] }
  0xf7   : > { %2734 = vrot.lane.b32.xlu0 %v1234_v22, %s10736_s20  ;;  %v712_v1 = vsel %vm644_vm8, %v703_v63, %v711_v55  ;;  %v1529_v20 = vor.u32 %v1528_v59, %v1525_v17  ;;  %v1907_v36 = vshrl.u32 %v1618_v26, 16  ;;  %v1910_v32 = vshll.u32 %v1618_v26, 16  ;;  %v637_v3 = vld [vmem:[#allocation2 + $0xc8] sm:$0xf] }
  0xf8   : > { %v11438_v7 = vpop.permute.xlu0 %2752  ;;  %v2915_v42 = vsel %vm377_vm0, %v712_v1, %v11395_v58  ;;  %v1537_v9 = vor.u32 %v1536_v54, %v1533_v52  ;;  %v1690_v12 = vsel %vm965_vm3, %v1688_v37, %v1689_v41  ;;  %v1915_v6 = vshrl.u32 %v1714_v28, 16 }
  0xf9   : > { %v11436_v43 = vpop.permute.xlu1 %2720  ;;  %v2960_v5 = vsel %vm2952_vm7, %v2915_v42, %v11397_v40  ;;  %v1909_v8 = vrot.slane %v1907_v36, 4  ;;  %v1912_v50 = vrot.slane %v1910_v32, 5  ;;  %v1918_v24 = vshll.u32 %v1714_v28, 16  ;;  %v620_v28 = vld [vmem:[#allocation2 + $0x40] sm:$0xf8] }
  0xfa   : > { %v1538_v26 = vsel %vm644_vm8, %v1529_v20, %v1537_v9  ;;  %v2993_v60 = vsel %vm2985_vm9, %v2960_v5, %v11408_v21  ;;  %v1917_v10 = vrot.slane %v1915_v6, 4  ;;  %v2212_v25 = vshrl.u32 %v2014_v51, 16  ;;  %v2395_v36 = vld [vmem:[#allocation2 + $0x58] sm:$0x1f] }
  0xfb   : > { %2766 = vrot.lane.b32.xlu1 %v1538_v26, %s10740_s27  ;;  %2798 = vrot.lane.b32.xlu0 %v1690_v12, %s10738_s25  ;;  %v3026_v58 = vsel %vm3018_vm10, %v2993_v60, %v11410_v46  ;;  %v1913_v40 = vor.u32 %v1912_v50, %v1909_v8  ;;  %v1920_v55 = vrot.slane %v1918_v24, 5  ;;  %v2215_v62 = vshll.u32 %v2014_v51, 16  ;;  %v1026_v24 = vld [vmem:[#allocation2 + $0xc8] sm:$0x1f] }
  0xfc   : > { %v11456_v21 = vpop.permute.xlu0 %2816  ;;  %v2214_v17 = vrot.slane %v2212_v25, 3  ;;  %v2220_v59 = vshrl.u32 %v2015_v57, 16  ;;  %v2223_v37 = vshll.u32 %v2015_v57, 16  ;;  %v3059_v22 = vsel %vm3051_vm11, %v3026_v58, %v11416_v15 }
  0xfd   : > { %v11454_v63 = vpop.permute.xlu1 %2784  ;;  %v1921_v52 = vor.u32 %v1920_v55, %v1917_v10  ;;  %v2217_v54 = vrot.slane %v2215_v62, 4  ;;  %v2377_v41 = vrot.slane %v2307_v16, 4  ;;  %v827_v46 = vshll.u32 %v11337_v53, 16  ;;  %v10593_v10 = vld [vmem:[#allocation2 + $0x50] sm:$0xf0] }
  0xfe   : > { %v2222_v1 = vrot.slane %v2220_v59, 3  ;;  %v2225_v20 = vrot.slane %v2223_v37, 4  ;;  %v2378_v51 = vrot.slane %v2015_v57, 4  ;;  %v3092_v9 = vsel %vm3084_vm12, %v3059_v22, %v11418_v39  ;;  %v1327_v59 = vld [vmem:[#allocation2 + $0xd0] sm:$0xf8] }
  0xff   : > { %v1922_v32 = vsel %vm1030_vm5, %v1913_v40, %v1921_v52  ;;  %v2218_v42 = vor.u32 %v2217_v54, %v2214_v17  ;;  %v1002_v12 = vrot.slane %v11448_v34, 4  ;;  %v1003_v50 = vrot.slane %v637_v3, 4  ;;  %v1328_v54 = vld [vmem:[#allocation2 + $0xd8] sm:$0xf] }
 0x100   : > { %v11467_v15 = vpop.permute.xlu0 %2880  ;;  %2830 = vrot.lane.b32.xlu1 %v1922_v32, %s10739_s29  ;;  %v2226_v5 = vor.u32 %v2225_v20, %v2222_v1  ;;  %v2379_v8 = vsel %vm965_vm3, %v2377_v41, %v2378_v51  ;;  %v714_v57 = vshrl.u32 %v620_v28, 16  ;;  %v717_v26 = vshll.u32 %v620_v28, 16 }
 0x101   : > { %v11465_v6 = vpop.permute.xlu1 %2848  ;;  %v724_v60 = vrot.slane %v722_v14, 3  ;;  %v727_v39 = vrot.slane %v725_v33, 4  ;;  %v2460_v25 = vshrl.u32 %v10593_v10, 16  ;;  %v1004_v58 = vsel %vm965_vm3, %v1002_v12, %v1003_v50 }
 0x102   : > { %v2227_v16 = vsel %vm644_vm8, %v2218_v42, %v2226_v5  ;;  %v716_v40 = vrot.slane %v714_v57, 3  ;;  %v2463_v55 = vshll.u32 %v10593_v10, 16  ;;  %v719_v62 = vrot.slane %v717_v26, 4  ;;  %v1619_v26 = vld [vmem:[#allocation2 + $0xd0] sm:$0xf0] }
 0x103   : > { %2862 = vrot.lane.b32.xlu0 %v2227_v16, %s10741_s12  ;;  %v728_v3 = vor.u32 %v727_v39, %v724_v60  ;;  %v2462_v17 = vrot.slane %v2460_v25, 4  ;;  %v2468_v28 = vshrl.u32 %v2395_v36, 16  ;;  %v2471_v33 = vshll.u32 %v2395_v36, 16  ;;  %v1715_v16 = vld [vmem:[#allocation2 + $0xd8] sm:$0x1f] }
 0x104   : > { %v11480_v14 = vpop.permute.xlu0 %2722  ;;  %2894 = vrot.lane.b32.xlu1 %v2379_v8, %s10737_s21  ;;  %v2465_v45 = vrot.slane %v2463_v55, 5  ;;  %v1236_v22 = vshrl.u32 %v11448_v34, 16  ;;  %v1239_v52 = vshll.u32 %v11448_v34, 16  ;;  %v720_v41 = vor.u32 %v719_v62, %v716_v40 }
 0x105   : > { %v11478_v37 = vpop.permute.xlu1 %2690  ;;  %v2470_v1 = vrot.slane %v2468_v28, 4  ;;  %v1244_v20 = vshrl.u32 %v1026_v24, 16  ;;  %v1247_v51 = vshll.u32 %v1026_v24, 16  ;;  %v2473_v42 = vrot.slane %v2471_v33, 5 }
 0x106   : > { %v2466_v32 = vor.u32 %v2465_v45, %v2462_v17  ;;  %v1238_v12 = vrot.slane %v1236_v22, 4  ;;  %v1241_v5 = vrot.slane %v1239_v52, 5  ;;  %v729_v50 = vsel %vm644_vm8, %v720_v41, %v728_v3  ;;  %v2016_v22 = vld [vmem:[#allocation2 + $0xe0] sm:$0xf8]  ;;  %v2017_v52 = vld [vmem:[#allocation2 + $0xe8] sm:$0xf] }
 0x107   : > { %2704 = vrot.lane.b32.xlu0 %v1004_v58, %s14739_s18  ;;  %v1246_v8 = vrot.slane %v1244_v20, 4  ;;  %v1249_v57 = vrot.slane %v1247_v51, 5  ;;  %v3128_v36 = vsel %vm3117_vm13, %v3092_v9, %v11428_v31  ;;  %v2918_v24 = vsel %vm377_vm0, %v729_v50, %v11430_v11  ;;  %v2308_v50 = vld [vmem:[#allocation2 + $0xe0] sm:$0xf0] }
 0x108   : > { %v11491_v60 = vpop.permute.xlu0 %2786  ;;  %v2474_v39 = vor.u32 %v2473_v42, %v2470_v1  ;;  %v1242_v10 = vor.u32 %v1241_v5, %v1238_v12  ;;  %v1540_v25 = vshrl.u32 %v1327_v59, 16  ;;  %v1543_v40 = vshll.u32 %v1327_v59, 16 }
 0x109   : > { %v11489_v34 = vpop.permute.xlu1 %2754  ;;  %v1250_v58 = vor.u32 %v1249_v57, %v1246_v8  ;;  %v1548_v55 = vshrl.u32 %v1328_v54, 16  ;;  %v1551_v62 = vshll.u32 %v1328_v54, 16  ;;  %v2962_v31 = vsel %vm2952_vm7, %v2918_v24, %v11436_v43 }
 0x10a   : > { %v2475_v3 = vsel %vm1030_vm5, %v2466_v32, %v2474_v39  ;;  %v1542_v17 = vrot.slane %v1540_v25, 3  ;;  %v1691_v9 = vrot.slane %v1619_v26, 4  ;;  %v1545_v11 = vrot.slane %v1543_v40, 4 }
 0x10b   : > { %9933 = vmatprep.mubr.msk.bf16.mxu0 %vm377_vm0, %v2475_v3  ;;  %v1251_v28 = vsel %vm1030_vm5, %v1242_v10, %v1250_v58  ;;  %v1550_v45 = vrot.slane %v1548_v55, 3  ;;  %v1553_v33 = vrot.slane %v1551_v62, 4  ;;  %v841_v1 = vshrl.u32 %v11399_v4, 16  ;;  %v2396_v3 = vld [vmem:[#allocation2 + $0x68] sm:$0x1f] }
 0x10c   : > { %v11502_v59 = vpop.permute.xlu0 %2850  ;;  %2736 = vrot.lane.b32.xlu1 %v1251_v28, %s10736_s20  ;;  %3350 = vmatmul.mubr.bf16.gmra.mrb[12].mxu0 %v3128_v36  ;;  %v1692_v43 = vrot.slane %v1328_v54, 4  ;;  %v1924_v20 = vshrl.u32 %v1619_v26, 16  ;;  %v1927_v51 = vshll.u32 %v1619_v26, 16  ;;  %v1546_v32 = vor.u32 %v1545_v11, %v1542_v17  ;;  %v639_v36 = vld [vmem:[#allocation2 + $0xd8] sm:$0xf] }
 0x10d   : > { %v11500_v41 = vpop.permute.xlu1 %2818  ;;  %v1554_v42 = vor.u32 %v1553_v33, %v1550_v45  ;;  %v1932_v12 = vshrl.u32 %v1715_v16, 16  ;;  %v1935_v5 = vshll.u32 %v1715_v16, 16  ;;  %v2995_v8 = vsel %vm2985_vm9, %v2962_v31, %v11438_v7  ;;  %v930_v11 = vld [vmem:[#allocation2 + $0xd0] sm:$0xf0] }
 0x10e   : > { %v1693_v57 = vsel %vm965_vm3, %v1691_v9, %v1692_v43  ;;  %v1926_v24 = vrot.slane %v1924_v20, 4  ;;  %v1929_v39 = vrot.slane %v1927_v51, 5  ;;  %v3028_v54 = vsel %vm3018_vm10, %v2995_v8, %v11454_v63 }
 0x10f   : > { %v1555_v10 = vsel %vm644_vm8, %v1546_v32, %v1554_v42  ;;  %v1934_v25 = vrot.slane %v1932_v12, 4  ;;  %v1937_v58 = vrot.slane %v1935_v5, 5  ;;  %v2229_v16 = vshrl.u32 %v2016_v22, 16  ;;  %v1027_v42 = vld [vmem:[#allocation2 + $0xd8] sm:$0x1f] }
 0x110   : > { %v11514_v40 = vpop.permute.xlu0 %2692  ;;  %2768 = vrot.lane.b32.xlu0 %v1555_v10, %s10740_s27  ;;  %2800 = vrot.lane.b32.xlu1 %v1693_v57, %s10738_s25  ;;  %v1930_v7 = vor.u32 %v1929_v39, %v1926_v24  ;;  %v2232_v55 = vshll.u32 %v2016_v22, 16  ;;  %v2237_v62 = vshrl.u32 %v2017_v52, 16  ;;  %v2240_v31 = vshll.u32 %v2017_v52, 16  ;;  %v622_v57 = vld [vmem:[#allocation2 + $0x50] sm:$0xf8] }
 0x111   : > { %v11512_v26 = vpop.permute.xlu1 %2882  ;;  %v1938_v17 = vor.u32 %v1937_v58, %v1934_v25  ;;  %v2380_v9 = vrot.slane %v2308_v50, 4  ;;  %v2381_v28 = vrot.slane %v2017_v52, 4  ;;  %v3061_v63 = vsel %vm3051_vm11, %v3028_v54, %v11456_v21  ;;  %v10594_v39 = vld [vmem:[#allocation2 + $0x60] sm:$0xf0] }
 0x112   : > { %v2231_v45 = vrot.slane %v2229_v16, 3  ;;  %v2234_v33 = vrot.slane %v2232_v55, 4  ;;  %v2239_v43 = vrot.slane %v2237_v62, 3  ;;  %v844_v20 = vshll.u32 %v11399_v4, 16 }
 0x113   : > { %v1939_v51 = vsel %vm1030_vm5, %v1930_v7, %v1938_v17  ;;  %v2242_v32 = vrot.slane %v2240_v31, 4  ;;  %v3094_v22 = vsel %vm3084_vm12, %v3061_v63, %v11465_v6  ;;  %v2382_v21 = vsel %vm965_vm3, %v2380_v9, %v2381_v28  ;;  %v1329_v63 = vld [vmem:[#allocation2 + $0xe0] sm:$0xf8] }
 0x114   : > { %v11526_v5 = vpop.permute.xlu0 %2756  ;;  %2832 = vrot.lane.b32.xlu0 %v1939_v51, %s10739_s29  ;;  %v2235_v52 = vor.u32 %v2234_v33, %v2231_v45  ;;  %v1005_v50 = vrot.slane %v930_v11, 4  ;;  %v1006_v8 = vrot.slane %v639_v36, 4  ;;  %v2477_v10 = vshrl.u32 %v10594_v39, 16 }
 0x115   : > { %v11524_v12 = vpop.permute.xlu1 %2724  ;;  %v2243_v24 = vor.u32 %v2242_v32, %v2239_v43  ;;  %v2480_v25 = vshll.u32 %v10594_v39, 16  ;;  %v2485_v58 = vshrl.u32 %v2396_v3, 16  ;;  %v2488_v54 = vshll.u32 %v2396_v3, 16  ;;  %v1330_v43 = vld [vmem:[#allocation2 + $0xe8] sm:$0xf] }
 0x116   : > { %v1007_v6 = vsel %vm965_vm3, %v1005_v50, %v1006_v8  ;;  %v1253_v7 = vshrl.u32 %v930_v11, 16  ;;  %v1256_v16 = vshll.u32 %v930_v11, 16  ;;  %v2479_v62 = vrot.slane %v2477_v10, 4  ;;  %v1620_v50 = vld [vmem:[#allocation2 + $0xe0] sm:$0xf0] }
 0x117   : > { %v2244_v55 = vsel %vm644_vm8, %v2235_v52, %v2243_v24  ;;  %v2482_v17 = vrot.slane %v2480_v25, 5  ;;  %v2487_v31 = vrot.slane %v2485_v58, 4  ;;  %v2490_v28 = vrot.slane %v2488_v54, 5 }
 0x118   : > { %v11534_v36 = vpop.permute.xlu0 %2820  ;;  %2864 = vrot.lane.b32.xlu1 %v2244_v55, %s10741_s12  ;;  %2896 = vrot.lane.b32.xlu0 %v2382_v21, %s10737_s21  ;;  %v1255_v45 = vrot.slane %v1253_v7, 4  ;;  %v1258_v33 = vrot.slane %v1256_v16, 5  ;;  %v1261_v3 = vshrl.u32 %v1027_v42, 16  ;;  %v1264_v51 = vshll.u32 %v1027_v42, 16 }
 0x119   : > { %v11532_v9 = vpop.permute.xlu1 %2788  ;;  %v2483_v11 = vor.u32 %v2482_v17, %v2479_v62  ;;  %v3131_v32 = vsel %vm3117_vm13, %v3094_v22, %v11467_v15  ;;  %v731_v52 = vshrl.u32 %v622_v57, 16  ;;  %v2491_v8 = vor.u32 %v2490_v28, %v2487_v31 }
 0x11a   : > { %v1259_v24 = vor.u32 %v1258_v33, %v1255_v45  ;;  %v1263_v39 = vrot.slane %v1261_v3, 4  ;;  %v734_v10 = vshll.u32 %v622_v57, 16  ;;  %v1266_v25 = vrot.slane %v1264_v51, 5  ;;  %v1716_v57 = vld [vmem:[#allocation2 + $0xe8] sm:$0x1f] }
 0x11b   : > { %v733_v58 = vrot.slane %v731_v52, 3  ;;  %v741_v21 = vrot.slane %v739_v29, 3  ;;  %v744_v54 = vrot.slane %v742_v35, 4  ;;  %v2492_v15 = vsel %vm1030_vm5, %v2483_v11, %v2491_v8  ;;  %v2018_v51 = vld [vmem:[#allocation2 + $0xf0] sm:$0xf8] }
 0x11c   : > { %v11546_v42 = vpop.permute.xlu0 %2884  ;;  %2706 = vrot.lane.b32.xlu1 %v1007_v6, %s14739_s18  ;;  %v736_v22 = vrot.slane %v734_v10, 4  ;;  %v1557_v16 = vshrl.u32 %v1329_v63, 16  ;;  %v1560_v55 = vshll.u32 %v1329_v63, 16  ;;  %9934 = vmatprep.mubr.msk.bf16.mxu0 %vm377_vm0, %v2492_v15  ;;  %v1267_v62 = vor.u32 %v1266_v25, %v1263_v39  ;;  %v2019_v25 = vld [vmem:[#allocation2 + $0xf8] sm:$0xf] }
 0x11d   : > { %v11544_v7 = vpop.permute.xlu1 %2852  ;;  %v745_v17 = vor.u32 %v744_v54, %v741_v21  ;;  %v1565_v29 = vshrl.u32 %v1330_v43, 16  ;;  %v1568_v31 = vshll.u32 %v1330_v43, 16  ;;  %3358 = vmatmul.mubr.bf16.gmra.mrb[16].mxu0 %v3131_v32  ;;  %v1694_v45 = vrot.slane %v1620_v50, 4 }
 0x11e   : > { %v737_v47 = vor.u32 %v736_v22, %v733_v58  ;;  %v1559_v35 = vrot.slane %v1557_v16, 3  ;;  %v1562_v28 = vrot.slane %v1560_v55, 4  ;;  %v1268_v33 = vsel %vm1030_vm5, %v1259_v24, %v1267_v62  ;;  %v11563_v55 = vld [vmem:[#allocation2 + $0xe0] sm:$0xf0] }
 0x11f   : > { %v1567_v6 = vrot.slane %v1565_v29, 3  ;;  %v1570_v3 = vrot.slane %v1568_v31, 4  ;;  %v1695_v11 = vrot.slane %v1330_v43, 4  ;;  %2738 = vrot.lane.b32.xlu0 %v1268_v33, %s10736_s20  ;;  %v1941_v32 = vshrl.u32 %v1620_v50, 16  ;;  %v641_v31 = vld [vmem:[#allocation2 + $0xe8] sm:$0xf] }
 0x120   : > { %v11554_v63 = vpop.permute.xlu0 %2726  ;;  %v746_v8 = vsel %vm644_vm8, %v737_v47, %v745_v17  ;;  %v1563_v39 = vor.u32 %v1562_v28, %v1559_v35  ;;  %v1944_v10 = vshll.u32 %v1620_v50, 16  ;;  %v1949_v43 = vshrl.u32 %v1716_v57, 16  ;;  %v624_v47 = vld [vmem:[#allocation2 + $0x60] sm:$0xf8] }
 0x121   : > { %v11552_v52 = vpop.permute.xlu1 %2694  ;;  %v2921_v58 = vsel %vm377_vm0, %v746_v8, %v11478_v37  ;;  %v1571_v24 = vor.u32 %v1570_v3, %v1567_v6  ;;  %v1696_v21 = vsel %vm965_vm3, %v1694_v45, %v1695_v11  ;;  %v1943_v15 = vrot.slane %v1941_v32, 4  ;;  %v11568_v37 = vld [vmem:[#allocation2 + $0xf0] sm:$0xf0] }
 0x122   : > { %v2964_v54 = vsel %vm2952_vm7, %v2921_v58, %v11480_v14  ;;  %v1946_v22 = vrot.slane %v1944_v10, 5  ;;  %v1952_v16 = vshll.u32 %v1716_v57, 16  ;;  %v1951_v17 = vrot.slane %v1949_v43, 4  ;;  %v2397_v58 = vld [vmem:[#allocation2 + $0x78] sm:$0x1f] }
 0x123   : > { %v1572_v62 = vsel %vm644_vm8, %v1563_v39, %v1571_v24  ;;  %v2997_v50 = vsel %vm2985_vm9, %v2964_v54, %v11489_v34  ;;  %v2246_v29 = vshrl.u32 %v2018_v51, 16  ;;  %2802 = vrot.lane.b32.xlu0 %v1696_v21, %s10738_s25  ;;  %v2249_v34 = vshll.u32 %v2018_v51, 16 }
 0x124   : > { %v11572_v28 = vpop.permute.xlu0 %2790  ;;  %2770 = vrot.lane.b32.xlu1 %v1572_v62, %s10740_s27  ;;  %v3030_v14 = vsel %vm3018_vm10, %v2997_v50, %v11491_v60  ;;  %v1947_v57 = vor.u32 %v1946_v22, %v1943_v15  ;;  %v1954_v45 = vrot.slane %v1952_v16, 5  ;;  %v2254_v6 = vshrl.u32 %v2019_v25, 16 }
 0x125   : > { %v11570_v35 = vpop.permute.xlu1 %2758  ;;  %v2248_v33 = vrot.slane %v2246_v29, 3  ;;  %v2257_v3 = vshll.u32 %v2019_v25, 16  ;;  %v3063_v11 = vsel %vm3051_vm11, %v3030_v14, %v11500_v41  ;;  %v2251_v39 = vrot.slane %v2249_v34, 4 }
 0x126   : > { %v1955_v8 = vor.u32 %v1954_v45, %v1951_v17  ;;  %v3096_v32 = vsel %vm3084_vm12, %v3063_v11, %v11502_v59  ;;  %v2383_v10 = vrot.slane %v11568_v37, 4  ;;  %v2256_v24 = vrot.slane %v2254_v6, 3  ;;  %v1028_v17 = vld [vmem:[#allocation2 + $0xe8] sm:$0x1f] }
 0x127   : > { %v2259_v21 = vrot.slane %v2257_v3, 4  ;;  %v2384_v60 = vrot.slane %v2019_v25, 4  ;;  %v1008_v43 = vrot.slane %v11563_v55, 4  ;;  %v2252_v41 = vor.u32 %v2251_v39, %v2248_v33 }
 0x128   : > { %v11586_v54 = vpop.permute.xlu0 %2854  ;;  %v1956_v15 = vsel %vm1030_vm5, %v1947_v57, %v1955_v8  ;;  %v1009_v22 = vrot.slane %v641_v31, 4  ;;  %v748_v16 = vshrl.u32 %v624_v47, 16  ;;  %v751_v50 = vshll.u32 %v624_v47, 16  ;;  %v10595_v57 = vld [vmem:[#allocation2 + $0x70] sm:$0xf0] }
 0x129   : > { %v11584_v51 = vpop.permute.xlu1 %2822  ;;  %2834 = vrot.lane.b32.xlu1 %v1956_v15, %s10739_s29  ;;  %v2260_v59 = vor.u32 %v2259_v21, %v2256_v24  ;;  %v2385_v62 = vsel %vm965_vm3, %v2383_v10, %v2384_v60  ;;  %v758_v25 = vrot.slane %v756_v2, 3  ;;  %v761_v45 = vrot.slane %v759_v38, 4  ;;  %v1332_v38 = vld [vmem:[#allocation2 + $0xf8] sm:$0xf] }
 0x12a   : > { %v1010_v29 = vsel %vm965_vm3, %v1008_v43, %v1009_v22  ;;  %v750_v14 = vrot.slane %v748_v16, 3  ;;  %v2494_v34 = vshrl.u32 %v10595_v57, 16  ;;  %v753_v33 = vrot.slane %v751_v50, 4 }
 0x12b   : > { %v2261_v31 = vsel %vm644_vm8, %v2252_v41, %v2260_v59  ;;  %v2497_v6 = vshll.u32 %v10595_v57, 16  ;;  %v2502_v3 = vshrl.u32 %v2397_v58, 16  ;;  %v762_v2 = vor.u32 %v761_v45, %v758_v25 }
 0x12c   : > { %v11599_v47 = vpop.permute.xlu0 %2696  ;;  %2866 = vrot.lane.b32.xlu0 %v2261_v31, %s10741_s12  ;;  %v2496_v8 = vrot.slane %v2494_v34, 4  ;;  %v2505_v39 = vshll.u32 %v2397_v58, 16  ;;  %v1270_v10 = vshrl.u32 %v11563_v55, 16  ;;  %v754_v24 = vor.u32 %v753_v33, %v750_v14  ;;  %v1621_v34 = vld [vmem:[#allocation2 + $0xf0] sm:$0xf0] }
 0x12d   : > { %v11597_v11 = vpop.permute.xlu1 %2886  ;;  %2898 = vrot.lane.b32.xlu1 %v2385_v62, %s10737_s21  ;;  %v2499_v21 = vrot.slane %v2497_v6, 5  ;;  %v2504_v60 = vrot.slane %v2502_v3, 4  ;;  %v1273_v43 = vshll.u32 %v11563_v55, 16  ;;  %v1278_v22 = vshrl.u32 %v1028_v17, 16 }
 0x12e   : > { %v2507_v15 = vrot.slane %v2505_v39, 5  ;;  %v1272_v41 = vrot.slane %v1270_v10, 4  ;;  %v1281_v16 = vshll.u32 %v1028_v17, 16  ;;  %v763_v59 = vsel %vm644_vm8, %v754_v24, %v762_v2 }
 0x12f   : > { %v2500_v50 = vor.u32 %v2499_v21, %v2496_v8  ;;  %v1275_v25 = vrot.slane %v1273_v43, 5  ;;  %v3134_v58 = vsel %vm3117_vm13, %v3096_v32, %v11512_v26  ;;  %v2924_v62 = vsel %vm377_vm0, %v763_v59, %v11514_v40  ;;  %v1717_v8 = vld [vmem:[#allocation2 + $0xf8] sm:$0x1f] }
 0x130   : > { %2708 = vrot.lane.b32.xlu0 %v1010_v29, %s14739_s18  ;;  %v2508_v14 = vor.u32 %v2507_v15, %v2504_v60  ;;  %v1280_v55 = vrot.slane %v1278_v22, 4  ;;  %v1283_v57 = vrot.slane %v1281_v16, 5  ;;  %v1574_v33 = vshrl.u32 %v1331_v18, 16 }
 0x131   : > { %v11608_v45 = vpop.permute.xlu1 %2728  ;;  %v11613_v31 = vpop.permute.xlu0 %2760  ;;  %v1276_v17 = vor.u32 %v1275_v25, %v1272_v41  ;;  %v1577_v6 = vshll.u32 %v1331_v18, 16  ;;  %v1582_v3 = vshrl.u32 %v1332_v38, 16  ;;  %v1585_v32 = vshll.u32 %v1332_v38, 16 }
 0x132   : > { %v2509_v2 = vsel %vm1030_vm5, %v2500_v50, %v2508_v14  ;;  %v1284_v26 = vor.u32 %v1283_v57, %v1280_v55  ;;  %v2966_v29 = vsel %vm2952_vm7, %v2924_v62, %v11524_v12  ;;  %v1576_v40 = vrot.slane %v1574_v33, 3  ;;  %v2020_v50 = vld [vmem:[#allocation2 + $0x100] sm:$0xf8] }
 0x133   : > { %9935 = vmatprep.mubr.msk.bf16.mxu0 %vm377_vm0, %v2509_v2  ;;  %v1579_v39 = vrot.slane %v1577_v6, 4  ;;  %v1584_v10 = vrot.slane %v1582_v3, 3  ;;  %v2999_v24 = vsel %vm2985_vm9, %v2966_v29, %v11526_v5  ;;  %v1587_v60 = vrot.slane %v1585_v32, 4  ;;  %v11630_v55 = vld [vmem:[#allocation2 + $0x100] sm:$0xf0] }
 0x134   : > { %v1285_v18 = vsel %vm1030_vm5, %v1276_v17, %v1284_v26  ;;  %3366 = vmatmul.mubr.bf16.gmra.mrb[20].mxu0 %v3134_v58  ;;  %v1697_v43 = vrot.slane %v1621_v34, 4  ;;  %v1698_v15 = vrot.slane %v1332_v38, 4  ;;  %v1958_v22 = vshrl.u32 %v1621_v34, 16  ;;  %v2021_v58 = vld [vmem:[#allocation2 + $0x108] sm:$0xf] }
 0x135   : > { %v11621_v21 = vpop.permute.xlu1 %2792  ;;  %v11624_v41 = vpop.permute.xlu0 %2824  ;;  %2740 = vrot.lane.b32.xlu1 %v1285_v18, %s10736_s20  ;;  %v1580_v12 = vor.u32 %v1579_v39, %v1576_v40  ;;  %v1961_v16 = vshll.u32 %v1621_v34, 16  ;;  %v1966_v59 = vshrl.u32 %v1717_v8, 16  ;;  %v1588_v25 = vor.u32 %v1587_v60, %v1584_v10  ;;  %v2398_v26 = vld [vmem:[#allocation2 + $0x88] sm:$0x1f]  ;;  %v11640_v39 = vld [vmem:[#allocation2 + $0xf8] sm:$0xf] }
 0x136   : > { %v1699_v5 = vsel %vm965_vm3, %v1697_v43, %v1698_v15  ;;  %v1969_v62 = vshll.u32 %v1717_v8, 16  ;;  %v3032_v14 = vsel %vm3018_vm10, %v2999_v24, %v11532_v9  ;;  %v1960_v38 = vrot.slane %v1958_v22, 4  ;;  %v932_v43 = vld [vmem:[#allocation2 + $0xf0] sm:$0xf0] }
 0x137   : > { %v1963_v57 = vrot.slane %v1961_v16, 5  ;;  %v1968_v17 = vrot.slane %v1966_v59, 4  ;;  %v3065_v33 = vsel %vm3051_vm11, %v3032_v14, %v11534_v36  ;;  %v1589_v34 = vsel %vm644_vm8, %v1580_v12, %v1588_v25  ;;  %v10596_v14 = vld [vmem:[#allocation2 + $0x80] sm:$0xf0] }
 0x138   : > { %v1971_v6 = vrot.slane %v1969_v62, 5  ;;  %v2263_v3 = vshrl.u32 %v2020_v50, 16  ;;  %v2266_v2 = vshll.u32 %v2020_v50, 16  ;;  %2772 = vrot.lane.b32.xlu0 %v1589_v34, %s10740_s27  ;;  %v2271_v29 = vshrl.u32 %v2021_v58, 16 }
 0x139   : > { %v11635_v32 = vpop.permute.xlu1 %2856  ;;  %2804 = vrot.lane.b32.xlu1 %v1699_v5, %s10738_s25  ;;  %v1964_v9 = vor.u32 %v1963_v57, %v1960_v38  ;;  %v2274_v8 = vshll.u32 %v2021_v58, 16  ;;  %v2386_v40 = vrot.slane %v11630_v55, 4  ;;  %v11642_v36 = vpop.permute.xlu0 %2888  ;;  %v2387_v60 = vrot.slane %v2021_v58, 4 }
 0x13a   : > { %v1972_v10 = vor.u32 %v1971_v6, %v1968_v17  ;;  %v2265_v24 = vrot.slane %v2263_v3, 3  ;;  %v2268_v18 = vrot.slane %v2266_v2, 4  ;;  %v2273_v15 = vrot.slane %v2271_v29, 3  ;;  %v1029_v17 = vld [vmem:[#allocation2 + $0xf8] sm:$0x1f] }
 0x13b   : > { %v2276_v12 = vrot.slane %v2274_v8, 4  ;;  %v3098_v22 = vsel %vm3084_vm12, %v3065_v33, %v11544_v7  ;;  %v1011_v16 = vrot.slane %v932_v43, 4  ;;  %v2388_v25 = vsel %vm965_vm3, %v2386_v40, %v2387_v60  ;;  %v626_v2 = vld [vmem:[#allocation2 + $0x70] sm:$0xf8] }
 0x13c   : > { %v1973_v59 = vsel %vm1030_vm5, %v1964_v9, %v1972_v10  ;;  %v2269_v50 = vor.u32 %v2268_v18, %v2265_v24  ;;  %v1012_v5 = vrot.slane %v11640_v39, 4  ;;  %v2511_v38 = vshrl.u32 %v10596_v14, 16 }
 0x13d   : > { %2836 = vrot.lane.b32.xlu0 %v1973_v59, %s10739_s29  ;;  %v2277_v62 = vor.u32 %v2276_v12, %v2273_v15  ;;  %v2514_v58 = vshll.u32 %v10596_v14, 16  ;;  %v2519_v57 = vshrl.u32 %v2398_v26, 16  ;;  %v11650_v34 = vpop.permute.xlu1 %2698  ;;  %v2522_v33 = vshll.u32 %v2398_v26, 16  ;;  %v1333_v59 = vld [vmem:[#allocation2 + $0x100] sm:$0xf8] }
 0x13e   : > { %v1013_v7 = vsel %vm965_vm3, %v1011_v16, %v1012_v5  ;;  %v1287_v6 = vshrl.u32 %v932_v43, 16  ;;  %v1290_v3 = vshll.u32 %v932_v43, 16  ;;  %v2513_v29 = vrot.slane %v2511_v38, 4  ;;  %v11654_v10 = vpop.permute.xlu0 %2730  ;;  %v1334_v38 = vld [vmem:[#allocation2 + $0x108] sm:$0xf] }
 0x13f   : > { %v2278_v9 = vsel %vm644_vm8, %v2269_v50, %v2277_v62  ;;  %v2516_v8 = vrot.slane %v2514_v58, 5  ;;  %v2521_v40 = vrot.slane %v2519_v57, 4  ;;  %v2524_v24 = vrot.slane %v2522_v33, 5 }
 0x140   : > { %2868 = vrot.lane.b32.xlu1 %v2278_v9, %s10741_s12  ;;  %v1289_v18 = vrot.slane %v1287_v6, 4  ;;  %v1292_v60 = vrot.slane %v1290_v3, 5  ;;  %v1295_v15 = vshrl.u32 %v1029_v17, 16  ;;  %v1298_v26 = vshll.u32 %v1029_v17, 16  ;;  %v1622_v6 = vld [vmem:[#allocation2 + $0x100] sm:$0xf0] }
 0x141   : > { %2900 = vrot.lane.b32.xlu0 %v2388_v25, %s10737_s21  ;;  %v2517_v12 = vor.u32 %v2516_v8, %v2513_v29  ;;  %v3137_v43 = vsel %vm3117_vm13, %v3098_v22, %v11546_v42  ;;  %v765_v16 = vshrl.u32 %v626_v2, 16  ;;  %v2525_v50 = vor.u32 %v2524_v24, %v2521_v40  ;;  %v11664_v17 = vpop.permute.xlu1 %2762 }
 0x142   : > { %v1293_v5 = vor.u32 %v1292_v60, %v1289_v18  ;;  %v1297_v62 = vrot.slane %v1295_v15, 4  ;;  %v768_v14 = vshll.u32 %v626_v2, 16  ;;  %v1300_v58 = vrot.slane %v1298_v26, 5  ;;  %v1718_v60 = vld [vmem:[#allocation2 + $0x108] sm:$0x1f] }
 0x143   : > { %v767_v57 = vrot.slane %v765_v16, 3  ;;  %v775_v33 = vrot.slane %v773_v48, 3  ;;  %v778_v25 = vrot.slane %v776_v61, 4  ;;  %v2526_v42 = vsel %vm1030_vm5, %v2517_v12, %v2525_v50  ;;  %v11669_v48 = vpop.permute.xlu0 %2794 }
 0x144   : > { %2710 = vrot.lane.b32.xlu1 %v1013_v7, %s14739_s18  ;;  %v770_v22 = vrot.slane %v768_v14, 4  ;;  %v1591_v3 = vshrl.u32 %v1333_v59, 16  ;;  %v1594_v9 = vshll.u32 %v1333_v59, 16  ;;  %9936 = vmatprep.mubr.msk.bf16.mxu0 %vm377_vm0, %v2526_v42  ;;  %v1301_v2 = vor.u32 %v1300_v58, %v1297_v62  ;;  %v2022_v14 = vld [vmem:[#allocation2 + $0x110] sm:$0xf8] }
 0x145   : > { %v779_v29 = vor.u32 %v778_v25, %v775_v33  ;;  %v1599_v8 = vshrl.u32 %v1334_v38, 16  ;;  %v1602_v40 = vshll.u32 %v1334_v38, 16  ;;  %3374 = vmatmul.mubr.bf16.gmra.mrb[24].mxu0 %v3137_v43  ;;  %v1700_v18 = vrot.slane %v1622_v6, 4 }
 0x146   : > { %v771_v44 = vor.u32 %v770_v22, %v767_v57  ;;  %v1593_v61 = vrot.slane %v1591_v3, 3  ;;  %v1596_v24 = vrot.slane %v1594_v9, 4  ;;  %v1302_v7 = vsel %vm1030_vm5, %v1293_v5, %v1301_v2  ;;  %v2023_v3 = vld [vmem:[#allocation2 + $0x118] sm:$0xf] }
 0x147   : > { %v1601_v15 = vrot.slane %v1599_v8, 3  ;;  %v1604_v12 = vrot.slane %v1602_v40, 4  ;;  %v1701_v26 = vrot.slane %v1334_v38, 4  ;;  %2742 = vrot.lane.b32.xlu0 %v1302_v7, %s10736_s20  ;;  %v1975_v50 = vshrl.u32 %v1622_v6, 16 }
 0x148   : > { %v780_v16 = vsel %vm644_vm8, %v771_v44, %v779_v29  ;;  %v1597_v59 = vor.u32 %v1596_v24, %v1593_v61  ;;  %v1978_v62 = vshll.u32 %v1622_v6, 16  ;;  %v1983_v33 = vshrl.u32 %v1718_v60, 16  ;;  %v11677_v25 = vpop.permute.xlu1 %2826  ;;  %v11684_v29 = vld [vmem:[#allocation2 + $0x110] sm:$0xf0]  ;;  %v628_v24 = vld [vmem:[#allocation2 + $0x80] sm:$0xf8] }
 0x149   : > { %v2927_v43 = vsel %vm377_vm0, %v780_v16, %v11552_v52  ;;  %v1605_v58 = vor.u32 %v1604_v12, %v1601_v15  ;;  %v1702_v57 = vsel %vm965_vm3, %v1700_v18, %v1701_v26  ;;  %v1977_v38 = vrot.slane %v1975_v50, 4 }
 0x14a   : > { %v2968_v5 = vsel %vm2952_vm7, %v2927_v43, %v11554_v63  ;;  %v1980_v42 = vrot.slane %v1978_v62, 5  ;;  %v1986_v22 = vshll.u32 %v1718_v60, 16  ;;  %v1985_v2 = vrot.slane %v1983_v33, 4  ;;  %v2399_v43 = vld [vmem:[#allocation2 + $0x98] sm:$0x1f] }
 0x14b   : > { %v1606_v9 = vsel %vm644_vm8, %v1597_v59, %v1605_v58  ;;  %v3001_v6 = vsel %vm2985_vm9, %v2968_v5, %v11570_v35  ;;  %v2280_v52 = vshrl.u32 %v2022_v14, 16  ;;  %2806 = vrot.lane.b32.xlu0 %v1702_v57, %s10738_s25  ;;  %v2283_v61 = vshll.u32 %v2022_v14, 16 }
 0x14c   : > { %v11686_v8 = vpop.permute.xlu0 %2858  ;;  %2774 = vrot.lane.b32.xlu1 %v1606_v9, %s10740_s27  ;;  %v3034_v63 = vsel %vm3018_vm10, %v3001_v6, %v11572_v28  ;;  %v1981_v40 = vor.u32 %v1980_v42, %v1977_v38  ;;  %v1988_v44 = vrot.slane %v1986_v22, 5  ;;  %v2288_v60 = vshrl.u32 %v2023_v3, 16  ;;  %v11697_v14 = vpop.permute.xlu1 %2890  ;;  %v10597_v9 = vld [vmem:[#allocation2 + $0x90] sm:$0xf0] }
 0x14d   : > { %v2282_v18 = vrot.slane %v2280_v52, 3  ;;  %v2291_v35 = vshll.u32 %v2023_v3, 16  ;;  %v3067_v7 = vsel %vm3051_vm11, %v3034_v63, %v11584_v51  ;;  %v2285_v12 = vrot.slane %v2283_v61, 4  ;;  %v2400_v63 = vld [vmem:[#allocation2 + $0xa8] sm:$0x1f] }
 0x14e   : > { %v1989_v15 = vor.u32 %v1988_v44, %v1985_v2  ;;  %v3100_v26 = vsel %vm3084_vm12, %v3067_v7, %v11586_v54  ;;  %v2389_v16 = vrot.slane %v11684_v29, 4  ;;  %v2290_v59 = vrot.slane %v2288_v60, 3  ;;  %v10598_v7 = vld [vmem:[#allocation2 + $0xa0] sm:$0xf0] }
 0x14f   : > { %v2293_v50 = vrot.slane %v2291_v35, 4  ;;  %v2390_v28 = vrot.slane %v2023_v3, 4  ;;  %v782_v62 = vshrl.u32 %v628_v24, 16  ;;  %v2286_v57 = vor.u32 %v2285_v12, %v2282_v18 }
 0x150   : > { %v1990_v58 = vsel %vm1030_vm5, %v1981_v40, %v1989_v15  ;;  %v785_v33 = vshll.u32 %v628_v24, 16  ;;  %v792_v51 = vrot.slane %v790_v49, 3  ;;  %v795_v42 = vrot.slane %v793_v23, 4  ;;  %v11706_v22 = vpop.permute.xlu0 %2700  ;;  %v630_v24 = vld [vmem:[#allocation2 + $0x90] sm:$0xf8] }
 0x151   : > { %2838 = vrot.lane.b32.xlu1 %v1990_v58, %s10739_s29  ;;  %v2294_v5 = vor.u32 %v2293_v50, %v2290_v59  ;;  %v2391_v54 = vsel %vm965_vm3, %v2389_v16, %v2390_v28  ;;  %v784_v38 = vrot.slane %v782_v62, 3  ;;  %v2528_v6 = vshrl.u32 %v10597_v9, 16 }
 0x152   : > { %v787_v3 = vrot.slane %v785_v33, 4  ;;  %v2531_v2 = vshll.u32 %v10597_v9, 16  ;;  %v2536_v52 = vshrl.u32 %v2399_v43, 16  ;;  %v796_v49 = vor.u32 %v795_v42, %v792_v51  ;;  %v632_v42 = vld [vmem:[#allocation2 + $0xa0] sm:$0xf8] }
 0x153   : > { %v2295_v40 = vsel %vm644_vm8, %v2286_v57, %v2294_v5  ;;  %v2539_v44 = vshll.u32 %v2399_v43, 16  ;;  %v3140_v61 = vsel %vm3117_vm13, %v3100_v26, %v11597_v11  ;;  %v2530_v23 = vrot.slane %v2528_v6, 4  ;;  %v11713_v59 = vpop.permute.xlu1 %2732 }
 0x154   : > { %2870 = vrot.lane.b32.xlu0 %v2295_v40, %s10741_s12  ;;  %v788_v27 = vor.u32 %v787_v3, %v784_v38  ;;  %v2533_v18 = vrot.slane %v2531_v2, 5  ;;  %v2538_v60 = vrot.slane %v2536_v52, 4  ;;  %v2545_v15 = vshrl.u32 %v10598_v7, 16 }
 0x155   : > { %2902 = vrot.lane.b32.xlu1 %v2391_v54, %s10737_s21  ;;  %v2541_v35 = vrot.slane %v2539_v44, 5  ;;  %v2548_v12 = vshll.u32 %v10598_v7, 16  ;;  %v2553_v16 = vshrl.u32 %v2400_v63, 16  ;;  %v2556_v11 = vshll.u32 %v2400_v63, 16 }
 0x156   : > { %v797_v50 = vsel %vm644_vm8, %v788_v27, %v796_v49  ;;  %v2534_v28 = vor.u32 %v2533_v18, %v2530_v23  ;;  %v799_v26 = vshrl.u32 %v630_v24, 16  ;;  %v2547_v58 = vrot.slane %v2545_v15, 4  ;;  %v11718_v33 = vpop.permute.xlu0 %2764 }
 0x157   : > { %v2930_v62 = vsel %vm377_vm0, %v797_v50, %v11599_v47  ;;  %v2542_v43 = vor.u32 %v2541_v35, %v2538_v60  ;;  %v2550_v57 = vrot.slane %v2548_v12, 5  ;;  %v2555_v5 = vrot.slane %v2553_v16, 4 }
 0x158   : > { %v2970_v51 = vsel %vm2952_vm7, %v2930_v62, %v11608_v45  ;;  %v2558_v54 = vrot.slane %v2556_v11, 5  ;;  %v801_v38 = vrot.slane %v799_v26, 3  ;;  %v802_v2 = vshll.u32 %v630_v24, 16  ;;  %v2401_v24 = vld [vmem:[#allocation2 + $0xb8] sm:$0x1f]  ;;  %v2797_v27 = vpop.permute.xlu1 %2796 }
 0x159   : > { %v2543_v3 = vsel %vm1030_vm5, %v2534_v28, %v2542_v43  ;;  %v3003_v9 = vsel %vm2985_vm9, %v2970_v51, %v11613_v31  ;;  %v2551_v6 = vor.u32 %v2550_v57, %v2547_v58  ;;  %v809_v45 = vrot.slane %v807_v56, 3  ;;  %v10600_v28 = vld [vmem:[#allocation2 + $0xc0] sm:$0xf0]  ;;  %v2402_v58 = vld [vmem:[#allocation2 + $0xc8] sm:$0x1f] }
 0x15a   : > { %9937 = vmatprep.mubr.msk.bf16.mxu0 %vm377_vm0, %v2543_v3  ;;  %v3036_v47 = vsel %vm3018_vm10, %v3003_v9, %v11621_v21  ;;  %v2559_v52 = vor.u32 %v2558_v54, %v2555_v5  ;;  %v812_v63 = vrot.slane %v810_v30, 4  ;;  %v804_v49 = vrot.slane %v802_v2, 4 }
 0x15b   : > { %3382 = vmatmul.mubr.bf16.gmra.mrb[28].mxu0 %v3140_v61  ;;  %v3069_v40 = vsel %vm3051_vm11, %v3036_v47, %v11624_v41  ;;  %v816_v31 = vshrl.u32 %v632_v42, 16  ;;  %v819_v44 = vshll.u32 %v632_v42, 16  ;;  %v826_v56 = vrot.slane %v824_v13, 3 }
 0x15c   : > { %v3102_v23 = vsel %vm3084_vm12, %v3069_v40, %v11635_v32  ;;  %v2560_v21 = vsel %vm1030_vm5, %v2551_v6, %v2559_v52  ;;  %v813_v18 = vor.u32 %v812_v63, %v809_v45  ;;  %v805_v30 = vor.u32 %v804_v49, %v801_v38  ;;  %v10599_v32 = vld [vmem:[#allocation2 + $0xb0] sm:$0xf0] }
 0x15d   : > { %9938 = vmatprep.mubr.msk.bf16.mxu0 %vm377_vm0, %v2560_v21  ;;  %v3143_v19 = vsel %vm3117_vm13, %v3102_v23, %v11642_v36  ;;  %v818_v41 = vrot.slane %v816_v31, 3  ;;  %v821_v61 = vrot.slane %v819_v44, 4  ;;  %v11742_v60 = vpop.permute.xlu0 %2828  ;;  %v829_v35 = vrot.slane %v827_v46, 4  ;;  %v634_v63 = vld [vmem:[#allocation2 + $0xb0] sm:$0xf8] }
 0x15e   : > { %v2562_v7 = vshrl.u32 %v10599_v32, 16  ;;  %v2565_v15 = vshll.u32 %v10599_v32, 16  ;;  %v2570_v12 = vshrl.u32 %v2401_v24, 16  ;;  %v814_v16 = vsel %vm644_vm8, %v805_v30, %v813_v18 }
 0x15f   : > { %v822_v13 = vor.u32 %v821_v61, %v818_v41  ;;  %v2573_v50 = vshll.u32 %v2401_v24, 16  ;;  %v2579_v11 = vshrl.u32 %v10600_v28, 16  ;;  %v2933_v36 = vsel %vm377_vm0, %v814_v16, %v11650_v34  ;;  %v2403_v61 = vld [vmem:[#allocation2 + $0xd8] sm:$0x1f] }
 0x160   : > { %v830_v26 = vor.u32 %v829_v35, %v826_v56  ;;  %v2564_v62 = vrot.slane %v2562_v7, 4  ;;  %v2567_v43 = vrot.slane %v2565_v15, 5  ;;  %v2972_v53 = vsel %vm2952_vm7, %v2933_v36, %v11654_v10 }
 0x161   : > { %v2572_v46 = vrot.slane %v2570_v12, 4  ;;  %v2575_v57 = vrot.slane %v2573_v50, 5  ;;  %v2861_v51 = vpop.permute.xlu1 %2860  ;;  %v2581_v5 = vrot.slane %v2579_v11, 4  ;;  %v3005_v54 = vsel %vm2985_vm9, %v2972_v53, %v11664_v17  ;;  %v2893_v10 = vpop.permute.xlu0 %2892  ;;  %v10602_v12 = vld [vmem:[#allocation2 + $0xd0] sm:$0xf0] }
 0x162   : > { %v831_v38 = vsel %vm644_vm8, %v822_v13, %v830_v26  ;;  %v2568_v42 = vor.u32 %v2567_v43, %v2564_v62  ;;  %v2582_v3 = vshll.u32 %v10600_v28, 16  ;;  %v3038_v34 = vsel %vm3018_vm10, %v3005_v54, %v11669_v48  ;;  %v2404_v62 = vld [vmem:[#allocation2 + $0xe8] sm:$0x1f]  ;;  %v10603_v43 = vld [vmem:[#allocation2 + $0xe0] sm:$0xf0] }
 0x163   : > { %3390 = vmatmul.mubr.bf16.gmra.mrb[32].mxu0 %v3143_v19  ;;  %v2936_v9 = vsel %vm377_vm0, %v831_v38, %v11706_v22  ;;  %v2576_v6 = vor.u32 %v2575_v57, %v2572_v46  ;;  %v2587_v2 = vshrl.u32 %v2402_v58, 16  ;;  %v3071_v47 = vsel %vm3051_vm11, %v3038_v34, %v11677_v25 }
 0x164   : > { %v2974_v17 = vsel %vm2952_vm7, %v2936_v9, %v11713_v59  ;;  %v2584_v52 = vrot.slane %v2582_v3, 5  ;;  %v2590_v45 = vshll.u32 %v2402_v58, 16  ;;  %v3104_v48 = vsel %vm3084_vm12, %v3071_v47, %v11686_v8 }
 0x165   : > { %v2577_v40 = vsel %vm1030_vm5, %v2568_v42, %v2576_v6  ;;  %v2589_v49 = vrot.slane %v2587_v2, 4  ;;  %v3007_v44 = vsel %vm2985_vm9, %v2974_v17, %v11718_v33  ;;  %v833_v25 = vshrl.u32 %v634_v63, 16  ;;  %v2703_v23 = vpop.permute.xlu1 %2702  ;;  %v10601_v33 = vld [vmem:[#allocation2 + $0xc8] sm:$0xf] }
 0x166   : > { %9939 = vmatprep.mubr.msk.bf16.mxu0 %vm377_vm0, %v2577_v40  ;;  %v2585_v22 = vor.u32 %v2584_v52, %v2581_v5  ;;  %v2592_v31 = vrot.slane %v2590_v45, 5  ;;  %v836_v24 = vshll.u32 %v634_v63, 16  ;;  %v843_v59 = vrot.slane %v841_v1, 3  ;;  %v636_v1 = vld [vmem:[#allocation2 + $0xc0] sm:$0xf8] }
 0x167   : > { %v3146_v21 = vsel %vm3117_vm13, %v3104_v48, %v11697_v14  ;;  %v3040_v18 = vsel %vm3018_vm10, %v3007_v44, %v2797_v27  ;;  %v846_v8 = vrot.slane %v844_v20, 4  ;;  %v835_v19 = vrot.slane %v833_v25, 3 }
 0x168   : > { %v2593_v56 = vor.u32 %v2592_v31, %v2589_v49  ;;  %v838_v30 = vrot.slane %v836_v24, 4  ;;  %v858_v35 = vshrl.u32 %v10601_v33, 16  ;;  %v861_v15 = vshll.u32 %v10601_v33, 16 }
 0x169   : > { %v2735_v41 = vpop.permute.xlu0 %2734  ;;  %v847_v7 = vor.u32 %v846_v8, %v843_v59  ;;  %v3073_v14 = vsel %vm3051_vm11, %v3040_v18, %v11742_v60  ;;  %v2596_v16 = vshrl.u32 %v10602_v12, 16  ;;  %v2599_v20 = vshll.u32 %v10602_v12, 16  ;;  %v11800_v12 = vld [vmem:[#allocation2 + $0xd0] sm:$0xf8] }
 0x16a   : > { %v2594_v32 = vsel %vm1030_vm5, %v2585_v22, %v2593_v56  ;;  %v839_v27 = vor.u32 %v838_v30, %v835_v19  ;;  %v3106_v4 = vsel %vm3084_vm12, %v3073_v14, %v2861_v51  ;;  %v2604_v13 = vshrl.u32 %v2403_v61, 16  ;;  %v11797_v14 = vld [vmem:[#allocation2 + $0xd8] sm:$0xf] }
 0x16b   : > { %3398 = vmatmul.mubr.bf16.gmra.mrb[36].mxu0 %v3146_v21  ;;  %v2607_v50 = vshll.u32 %v2403_v61, 16  ;;  %v850_v36 = vshrl.u32 %v636_v1, 16  ;;  %v2598_v26 = vrot.slane %v2596_v16, 4  ;;  %v2613_v58 = vshrl.u32 %v10603_v43, 16  ;;  %v2405_v61 = vld [vmem:[#allocation2 + $0xf8] sm:$0x1f] }
 0x16c   : > { %9940 = vmatprep.mubr.msk.bf16.mxu0 %vm377_vm0, %v2594_v32  ;;  %v848_v28 = vsel %vm644_vm8, %v839_v27, %v847_v7  ;;  %v2601_v53 = vrot.slane %v2599_v20, 5  ;;  %v2606_v46 = vrot.slane %v2604_v13, 4  ;;  %v3149_v51 = vsel %vm3117_vm13, %v3106_v4, %v2893_v10 }
 0x16d   : > { %v2767_v11 = vpop.permute.xlu1 %2766  ;;  %v2939_v60 = vsel %vm377_vm0, %v848_v28, %v2703_v23  ;;  %v2609_v57 = vrot.slane %v2607_v50, 5  ;;  %v2799_v54 = vpop.permute.xlu0 %2798  ;;  %v853_v38 = vshll.u32 %v636_v1, 16  ;;  %v2616_v42 = vshll.u32 %v10603_v43, 16  ;;  %v11807_v50 = vld [vmem:[#allocation3 + $0x8] sm:$0xf] }
 0x16e   : > { %v2976_v5 = vsel %vm2952_vm7, %v2939_v60, %v2735_v41  ;;  %v2602_v34 = vor.u32 %v2601_v53, %v2598_v26  ;;  %v2621_v6 = vshrl.u32 %v2404_v62, 16  ;;  %v2615_v2 = vrot.slane %v2613_v58, 4 }
 0x16f   : > { %v3009_v3 = vsel %vm2985_vm9, %v2976_v5, %v2767_v11  ;;  %v2610_v9 = vor.u32 %v2609_v57, %v2606_v46  ;;  %v2618_v47 = vrot.slane %v2616_v42, 5  ;;  %v2624_v17 = vshll.u32 %v2404_v62, 16 }
 0x170   : > { %v2623_v63 = vrot.slane %v2621_v6, 4  ;;  %v3042_v10 = vsel %vm3018_vm10, %v3009_v3, %v2799_v54  ;;  %v852_v40 = vrot.slane %v850_v36, 3  ;;  %v855_v22 = vrot.slane %v853_v38, 4  ;;  %v4121_v36 = vld [vmem:[#allocation3 + $0x8] sm:$0x1f] }
 0x171   : > { %v2611_v45 = vsel %vm1030_vm5, %v2602_v34, %v2610_v9  ;;  %v2626_v49 = vrot.slane %v2624_v17, 5  ;;  %v860_v31 = vrot.slane %v858_v35, 3  ;;  %v863_v44 = vrot.slane %v861_v15, 4 }
 0x172   : > { %v2831_v52 = vpop.permute.xlu1 %2830  ;;  %v2619_v24 = vor.u32 %v2618_v47, %v2615_v2  ;;  %v856_v18 = vor.u32 %v855_v22, %v852_v40  ;;  %v2630_v33 = vshrl.u32 %v11568_v37, 16  ;;  %v2633_v35 = vshll.u32 %v11568_v37, 16  ;;  %v4025_v37 = vld [vmem:[#allocation3] sm:$0xf0] }
 0x173   : > { %3406 = vmatmul.mubr.bf16.gmra.mrb[40].mxu0 %v3149_v51  ;;  %v3075_v48 = vsel %vm3051_vm11, %v3042_v10, %v2831_v52  ;;  %v2627_v59 = vor.u32 %v2626_v49, %v2623_v63  ;;  %v864_v56 = vor.u32 %v863_v44, %v860_v31  ;;  %v2638_v1 = vshrl.u32 %v2405_v61, 16 }
 0x174   : > { %9941 = vmatprep.mubr.msk.bf16.mxu0 %vm377_vm0, %v2611_v45  ;;  %v2641_v15 = vshll.u32 %v2405_v61, 16  ;;  %v875_v27 = vshrl.u32 %v11797_v14, 16  ;;  %v11802_v16 = vrot.slane %v2630_v33, 4  ;;  %v11804_v4 = vrot.slane %v2633_v35, 5 }
 0x175   : > { %v2863_v25 = vpop.permute.xlu0 %2862  ;;  %v2628_v19 = vsel %vm1030_vm5, %v2619_v24, %v2627_v59  ;;  %v865_v30 = vsel %vm644_vm8, %v856_v18, %v864_v56  ;;  %v11809_v28 = vrot.slane %v2638_v1, 4  ;;  %v878_v26 = vshll.u32 %v11797_v14, 16  ;;  %v2406_v18 = vld [vmem:[#allocation2 + $0x108] sm:$0x1f] }
 0x176   : > { %v2895_v23 = vpop.permute.xlu1 %2894  ;;  %v3108_v21 = vsel %vm3084_vm12, %v3075_v48, %v2863_v25  ;;  %v11811_v11 = vrot.slane %v2641_v15, 5  ;;  %v867_v43 = vshrl.u32 %v11800_v12, 16  ;;  %v870_v58 = vshll.u32 %v11800_v12, 16 }
 0x177   : > { %v3152_v8 = vsel %vm3117_vm13, %v3108_v21, %v2895_v23  ;;  %v11816_v60 = vrot.slane %v875_v27, 3  ;;  %v2636_v46 = vor.u32 %v11804_v4, %v11802_v16  ;;  %v4073_v57 = vrot.slane %v4025_v37, 4 }
 0x178   : > { %v4074_v51 = vrot.slane %v11807_v50, 4  ;;  %v4138_v54 = vshrl.u32 %v4025_v37, 16  ;;  %v4141_v38 = vshll.u32 %v4025_v37, 16  ;;  %v4146_v42 = vshrl.u32 %v4121_v36, 16 }
 0x179   : > { %v2705_v41 = vpop.permute.xlu0 %2704  ;;  %v4149_v3 = vshll.u32 %v4121_v36, 16  ;;  %v2644_v9 = vor.u32 %v11811_v11, %v11809_v28  ;;  %v869_v45 = vrot.slane %v867_v43, 3  ;;  %v872_v63 = vrot.slane %v870_v58, 4 }
 0x17a   : > { %v2942_v7 = vsel %vm377_vm0, %v865_v30, %v2705_v41  ;;  %v4075_v6 = vsel %vm965_vm3, %v4073_v57, %v4074_v51  ;;  %v11827_v2 = vrot.slane %v4138_v54, 4  ;;  %v11829_v47 = vrot.slane %v4141_v38, 5 }
 0x17b   : > { %3414 = vmatmul.mubr.bf16.gmra.mrb[44].mxu0 %v3152_v8  ;;  %5786 = vrot.lane.b32.xlu1 %v4075_v6, %s10736_s20  ;;  %v11831_v17 = vrot.slane %v4146_v42, 4  ;;  %v11833_v52 = vrot.slane %v4149_v3, 5  ;;  %v880_v10 = vrot.slane %v878_v26, 4  ;;  %v2645_v25 = vsel %vm1030_vm5, %v2636_v46, %v2644_v9  ;;  %v2407_v3 = vld [vmem:[#allocation2 + $0x118] sm:$0x1f] }
 0x17c   : > { %9942 = vmatprep.mubr.msk.bf16.mxu0 %vm377_vm0, %v2628_v19  ;;  %v4144_v22 = vor.u32 %v11829_v47, %v11827_v2  ;;  %v873_v23 = vor.u32 %v872_v63, %v869_v45  ;;  %v2647_v19 = vshrl.u32 %v11630_v55, 16  ;;  %v2650_v30 = vshll.u32 %v11630_v55, 16  ;;  %v642_v6 = vld [vmem:[#allocation2 + $0xf0] sm:$0xf8]  ;;  %v11999_v45 = vld [vmem:[%s14711_s2] ss:$0 sm:$0xff] }
 0x17d   : > { %v4152_v31 = vor.u32 %v11833_v52, %v11831_v17  ;;  %v881_v21 = vor.u32 %v880_v10, %v11816_v60  ;;  %v2655_v41 = vshrl.u32 %v2406_v18, 16  ;;  %v2658_v61 = vshll.u32 %v2406_v18, 16 }
 0x17e   : > { %v2737_v32 = vpop.permute.xlu1 %2736  ;;  %v2652_v15 = vrot.slane %v2650_v30, 5  ;;  %v2664_v2 = vshrl.u32 %v11684_v29, 16  ;;  %v2667_v47 = vshll.u32 %v11684_v29, 16  ;;  %v2672_v17 = vshrl.u32 %v2407_v3, 16 }
 0x17f   : > { %v2978_v20 = vsel %vm2952_vm7, %v2942_v7, %v2737_v32  ;;  %v4153_v59 = vsel %vm1030_vm5, %v4144_v22, %v4152_v31  ;;  %v882_v56 = vsel %vm644_vm8, %v873_v23, %v881_v21  ;;  %v640_v32 = vld [vmem:[#allocation2 + $0xe0] sm:$0xf8]  ;;  %v2649_v7 = vrot.slane %v2647_v19, 4 }
 0x180   : > { %5818 = vrot.lane.b32.xlu1 %v4153_v59, %s10738_s25  ;;  %v2657_v14 = vrot.slane %v2655_v41, 4  ;;  %v2660_v27 = vrot.slane %v2658_v61, 5  ;;  %v884_v4 = vshrl.u32 %v640_v32, 16  ;;  %v2675_v52 = vshll.u32 %v2407_v3, 16 }
 0x181   : > { %v2653_v36 = vor.u32 %v2652_v15, %v2649_v7  ;;  %v2666_v22 = vrot.slane %v2664_v2, 4  ;;  %v12003_v59 = vstv %s373_s28  ;;  %v909_v19 = vshrl.u32 %v11640_v39, 16 }
 0x182   : > { %v2769_v13 = vpop.permute.xlu0 %2768  ;;  %v2801_v62 = vpop.permute.xlu1 %2800  ;;  %v2661_v26 = vor.u32 %v2660_v27, %v2657_v14  ;;  %v886_v43 = vrot.slane %v884_v4, 3  ;;  %v2677_v29 = vrot.slane %v2675_v52, 5  ;;  %v912_v30 = vshll.u32 %v11640_v39, 16 }
 0x183   : > { %v3011_v53 = vsel %vm2985_vm9, %v2978_v20, %v2769_v13  ;;  %v887_v20 = vshll.u32 %v640_v32, 16  ;;  %v10605_v13 = vld [vmem:[#allocation2 + $0xe8] sm:$0xf]  ;;  %vm7086_vm4 = vcmask 1044480  }
 0x184   : > { %v3044_v34 = vsel %vm3018_vm10, %v3011_v53, %v2801_v62  ;;  %v892_v37 = vshrl.u32 %v10605_v13, 16  ;;  %v895_v55 = vshll.u32 %v10605_v13, 16  ;;  %v914_v13 = vrot.slane %v912_v30, 4 }
 0x185   : > { %v889_v58 = vrot.slane %v887_v20, 4  ;;  %v911_v20 = vrot.slane %v909_v19, 3 }
 0x186   : > { %v2833_v5 = vpop.permute.xlu0 %2832  ;;  %v894_v60 = vrot.slane %v892_v37, 3  ;;  %v897_v53 = vrot.slane %v895_v55, 4 }
 0x187   : > { %v3077_v40 = vsel %vm3051_vm11, %v3044_v34, %v2833_v5  ;;  %v2662_v5 = vsel %vm1030_vm5, %v2653_v36, %v2661_v26  ;;  %v890_v38 = vor.u32 %v889_v58, %v886_v43 }
 0x188   : > { %v898_v42 = vor.u32 %v897_v53, %v894_v60  ;;  %v915_v60 = vor.u32 %v914_v13, %v911_v20 }
 0x18a   : > { %v2865_v49 = vpop.permute.xlu1 %2864  ;;  %v2897_v48 = vpop.permute.xlu0 %2896  ;;  %v899_v34 = vsel %vm644_vm8, %v890_v38, %v898_v42 }
 0x18b   : > { %v3110_v44 = vsel %vm3084_vm12, %v3077_v40, %v2865_v49  ;;  %v901_v49 = vshrl.u32 %v642_v6, 16 }
 0x18c   : > { %v3155_v24 = vsel %vm3117_vm13, %v3110_v44, %v2897_v48  ;;  %v904_v48 = vshll.u32 %v642_v6, 16 }
 0x18d   : > { %3422 = vmatmul.mubr.bf16.gmra.mrb[48].mxu0 %v3155_v24  ;;  %v2674_v24 = vrot.slane %v2672_v17, 4  ;;  %v903_v61 = vrot.slane %v901_v49, 3 }
 0x18e   : > { %9943 = vmatprep.mubr.msk.bf16.mxu0 %vm377_vm0, %v2645_v25  ;;  %v2707_v0 = vpop.permute.xlu1 %2706  ;;  %v2669_v25 = vrot.slane %v2667_v47, 5  ;;  %v906_v7 = vrot.slane %v904_v48, 4 }
 0x18f   : > { %v2945_v33 = vsel %vm377_vm0, %v882_v56, %v2707_v0  ;;  %v2678_v15 = vor.u32 %v2677_v29, %v2674_v24 }
 0x190   : > { %v907_v26 = vor.u32 %v906_v7, %v903_v61 }
 0x191   : > { %v2739_v8 = vpop.permute.xlu0 %2738 }
 0x192   : > { %v2980_v1 = vsel %vm2952_vm7, %v2945_v33, %v2739_v8 }
 0x195   : > { %v2803_v16 = vpop.permute.xlu0 %2802 }
 0x196   : > { %v2771_v35 = vpop.permute.xlu1 %2770 }
 0x197   : > { %v3013_v12 = vsel %vm2985_vm9, %v2980_v1, %v2771_v35  ;;  %v2670_v1 = vor.u32 %v2669_v25, %v2666_v22 }
 0x198   : > { %v3046_v28 = vsel %vm3018_vm10, %v3013_v12, %v2803_v16 }
 0x19b   : > { %v2835_v11 = vpop.permute.xlu1 %2834 }
 0x19c   : > { %v3079_v62 = vsel %vm3051_vm11, %v3046_v28, %v2835_v11 }
 0x19e   : > { %v2867_v46 = vpop.permute.xlu0 %2866 }
 0x19f   : > { %v3112_v57 = vsel %vm3084_vm12, %v3079_v62, %v2867_v46  ;;  %v2899_v51 = vpop.permute.xlu1 %2898  ;;  %v2679_v62 = vsel %vm1030_vm5, %v2670_v1, %v2678_v15  ;;  %v916_v46 = vsel %vm644_vm8, %v907_v26, %v915_v60 }
 0x1a0   : > { %v3158_v54 = vsel %vm3117_vm13, %v3112_v57, %v2899_v51 }
 0x1a1   : > { %3430 = vmatmul.mubr.bf16.gmra.mrb[52].mxu0 %v3158_v54 }
 0x1a2   : > { %9944 = vmatprep.mubr.msk.bf16.mxu0 %vm377_vm0, %v2662_v5  ;;  %v2709_v9 = vpop.permute.xlu0 %2708 }
 0x1a3   : > { %v2948_v10 = vsel %vm377_vm0, %v899_v34, %v2709_v9 }
 0x1a7   : > { %v2741_v63 = vpop.permute.xlu1 %2740 }
 0x1a8   : > { %v3327_v40 = vpop.f32.mrb[0].mxu0  ;;  %v2982_v21 = vsel %vm2952_vm7, %v2948_v10, %v2741_v63 }
 0x1a9   : > { %v3328_v31 = vadd.f32 %v11999_v45, %v3327_v40  ;;  %v3329_v44 = vpop.f32.mrb[1].mxu0 }
 0x1aa   : > { %v3330_v23 = vpop.f32.mrb[2].mxu0  ;;  %v2773_v0 = vpop.permute.xlu0 %2772 }
 0x1ab   : > { %v3486_v18 = vmin.f32 %v3328_v31, 0.0  ;;  %v3331_v56 = vadd.f32 %v11999_v45, %v3330_v23  ;;  %v2805_v8 = vpop.permute.xlu1 %2804  ;;  %v3332_v41 = vpop.f32.mrb[3].mxu0  ;;  %v3015_v32 = vsel %vm2985_vm9, %v2982_v21, %v2773_v0  ;;  %v3454_v12 = vmax.f32 %v3328_v31, 0.0 }
 0x1ac   : > { %v3048_v14 = vsel %vm3018_vm10, %v3015_v32, %v2805_v8 }
 0x1ad   : > { %v3519_v33 = vmul.f32 %v12003_v59, %v3486_v18  ;;  %v3487_v35 = vmin.f32 %v3331_v56, 0.0  ;;  %v3455_v16 = vmax.f32 %v3331_v56, 0.0 }
 0x1af   : > { %v2837_v27 = vpop.permute.xlu0 %2836  ;;  %v3520_v4 = vmul.f32 %v12003_v59, %v3487_v35  ;;  %v3551_v39 = vadd.f32 %v3519_v33, %v3454_v12 }
 0x1b0   : > { %v3081_v55 = vsel %vm3051_vm11, %v3048_v14, %v2837_v27 }
 0x1b1   : > { %v3552_v37 = vadd.f32 %v3520_v4, %v3455_v16 }
 0x1b2   : > { %v2869_v28 = vpop.permute.xlu1 %2868 }
 0x1b3   : > { %v3114_v11 = vsel %vm3084_vm12, %v3081_v55, %v2869_v28  ;;  %v2901_v36 = vpop.permute.xlu0 %2900  ;;  %v12016_v43 = vpack.c.bf16 %v3552_v37, %v3551_v39 }
 0x1b4   : > { %v3161_v58 = vsel %vm3117_vm13, %v3114_v11, %v2901_v36 }
 0x1b5   : > { %14743 = vst [vmem:[#allocation11_spill] sm:$0xff] %v12016_v43  ;;  %3438 = vmatmul.mubr.bf16.gmra.mrb[56].mxu0 %v3161_v58  ;;  %v3655_v53 = vrot.slane %v12016_v43, 4 }
 0x1b6   : > { %9945 = vmatprep.mubr.msk.bf16.mxu0 %vm377_vm0, %v2679_v62  ;;  %v2711_v57 = vpop.permute.xlu1 %2710 }
 0x1b7   : > { %3688 = vst.msk [vmem:[#allocation3 + $0x10] sm:$0xf0] %vm3687_vm1, %v3655_v53  ;;  %v2951_v5 = vsel %vm377_vm0, %v916_v46, %v2711_v57  ;;  %vm7311_vm0 = vcmask 1042432  }
 0x1b8   : > { %3690 = vst.msk [vmem:[#allocation3 + $0x18] sm:$0xf] %vm3689_vm2, %v3655_v53 }
 0x1b9   : > { %v2743_v51 = vpop.permute.xlu0 %2742 }
 0x1ba   : > { %v2984_v34 = vsel %vm2952_vm7, %v2951_v5, %v2743_v51 }
 0x1bb   : > { %v3335_v54 = vpop.f32.mrb[4].mxu0 }
 0x1bc   : > { %v3336_v38 = vadd.f32 %v11999_v45, %v3335_v54  ;;  %v3337_v42 = vpop.f32.mrb[5].mxu0 }
 0x1bd   : > { %v3338_v3 = vpop.f32.mrb[6].mxu0  ;;  %v2807_v6 = vpop.permute.xlu0 %2806 }
 0x1be   : > { %v2775_v9 = vpop.permute.xlu1 %2774  ;;  %v3456_v2 = vmax.f32 %v3336_v38, 0.0  ;;  %v3488_v47 = vmin.f32 %v3336_v38, 0.0  ;;  %v3339_v17 = vadd.f32 %v11999_v45, %v3338_v3  ;;  %v4026_v63 = vld [vmem:[#allocation3 + $0x10] sm:$0xf0]  ;;  %v3340_v40 = vpop.f32.mrb[7].mxu0 }
 0x1bf   : > { %v12028_v52 = vld [vmem:[#allocation3 + $0x18] sm:$0xf]  ;;  %v3017_v10 = vsel %vm2985_vm9, %v2984_v34, %v2775_v9  ;;  %v4076_v49 = vrot.slane %v4026_v63, 4  ;;  %v12032_v22 = vld [vmem:[#allocation3 + $0x10] sm:$0xf0]  ;;  %v4155_v31 = vshrl.u32 %v4026_v63, 16 }
 0x1c0   : > { %v4077_v48 = vrot.slane %v12028_v52, 4  ;;  %v3050_v44 = vsel %vm3018_vm10, %v3017_v10, %v2807_v6  ;;  %v3521_v25 = vmul.f32 %v12003_v59, %v3488_v47  ;;  %v3457_v24 = vmax.f32 %v3339_v17, 0.0  ;;  %v4809_v23 = vld [vmem:[#allocation3 + $0x18] sm:$0x1f]  ;;  %v4409_v21 = vld [vmem:[#allocation3 + $0x10] sm:$0xf8] }
 0x1c1   : > { %v3489_v29 = vmin.f32 %v3339_v17, 0.0  ;;  %v4826_v18 = vshrl.u32 %v12032_v22, 16  ;;  %v4829_v56 = vshll.u32 %v12032_v22, 16  ;;  %v4834_v8 = vshrl.u32 %v4809_v23, 16  ;;  %v12041_v61 = vld [vmem:[#allocation3 + $0x18] sm:$0xf] }
 0x1c2   : > { %v4078_v0 = vsel %vm965_vm3, %v4076_v49, %v4077_v48  ;;  %v3553_v19 = vadd.f32 %v3521_v25, %v3456_v2  ;;  %v4837_v41 = vshll.u32 %v4809_v23, 16  ;;  %v4442_v33 = vshrl.u32 %v4409_v21, 16  ;;  %v4122_v11 = vld [vmem:[#allocation3 + $0x18] sm:$0x1f] }
 0x1c3   : > { %v3522_v30 = vmul.f32 %v12003_v59, %v3489_v29  ;;  %5788 = vrot.lane.b32.xlu1 %v4078_v0, %s10736_s20  ;;  %v2839_v35 = vpop.permute.xlu1 %2838  ;;  %v4828_v32 = vrot.slane %v4826_v18, 4  ;;  %v4831_v7 = vrot.slane %v4829_v56, 5  ;;  %v4836_v1 = vrot.slane %v4834_v8, 4 }
 0x1c4   : > { %v4445_v15 = vshll.u32 %v4409_v21, 16  ;;  %v3083_v14 = vsel %vm3051_vm11, %v3050_v44, %v2839_v35  ;;  %v4839_v12 = vrot.slane %v4837_v41, 5  ;;  %v4444_v16 = vrot.slane %v4442_v33, 3 }
 0x1c5   : > { %v3554_v27 = vadd.f32 %v3522_v30, %v3457_v24  ;;  %v4832_v4 = vor.u32 %v4831_v7, %v4828_v32  ;;  %v4450_v13 = vshrl.u32 %v12041_v61, 16  ;;  %v4453_v39 = vshll.u32 %v12041_v61, 16 }
 0x1c6   : > { %v4447_v20 = vrot.slane %v4445_v15, 4  ;;  %v2871_v37 = vpop.permute.xlu0 %2870  ;;  %v4840_v28 = vor.u32 %v4839_v12, %v4836_v1  ;;  %v4157_v36 = vrot.slane %v4155_v31, 4  ;;  %v4158_v26 = vshll.u32 %v4026_v63, 16 }
 0x1c7   : > { %v12046_v55 = vpack.c.bf16 %v3554_v27, %v3553_v19  ;;  %v3116_v62 = vsel %vm3084_vm12, %v3083_v14, %v2871_v37  ;;  %v2903_v58 = vpop.permute.xlu1 %2902  ;;  %v4452_v53 = vrot.slane %v4450_v13, 3  ;;  %v4455_v46 = vrot.slane %v4453_v39, 4  ;;  %v10548_v37 = vld [vmem:[%s14712_s3 + $0x40] sm:$0xff]  }
 0x1c8   : > { %v4448_v60 = vor.u32 %v4447_v20, %v4444_v16  ;;  %v3164_v57 = vsel %vm3117_vm13, %v3116_v62, %v2903_v58  ;;  %v3343_v5 = vpop.f32.mrb[8].mxu0  ;;  %v4841_v54 = vsel %vm1030_vm5, %v4832_v4, %v4840_v28  ;;  %v4160_v38 = vrot.slane %v4158_v26, 5  ;;  %10046 = vmatprep.subr.bf16.mxu1 %v10548_v37  ;;  %v10553_v37 = vld [vmem:[%s14712_s3 + $0x10] sm:$0xff]  }
 0x1c9   : > { %14744 = vst [vmem:[#allocation12_spill] sm:$0xff] %v12046_v55  ;;  %v3656_v51 = vrot.slane %v12046_v55, 4  ;;  %3446 = vmatmul.mubr.bf16.gmra.mrb[60].mxu0 %v3164_v57  ;;  %v3344_v42 = vadd.f32 %v11999_v45, %v3343_v5  ;;  %v3345_v3 = vpop.f32.mrb[9].mxu0  ;;  %5882 = vrot.lane.b32.xlu0 %v4841_v54, %s10736_s20  ;;  %v4456_v34 = vor.u32 %v4455_v46, %v4452_v53  ;;  %v4163_v9 = vshrl.u32 %v4122_v11, 16 }
 0x1ca   : > { %v4166_v6 = vshll.u32 %v4122_v11, 16  ;;  %v3346_v2 = vpop.f32.mrb[10].mxu0  ;;  %v4161_v40 = vor.u32 %v4160_v38, %v4157_v36  ;;  %v4762_v24 = vrot.slane %v12041_v61, 4  ;;  %v4761_v0 = vrot.slane %v12032_v22, 4 }
 0x1cb   : > { %3691 = vst.msk [vmem:[#allocation3 + $0x20] sm:$0xf0] %vm3687_vm1, %v3656_v51  ;;  %v3490_v47 = vmin.f32 %v3344_v42, 0.0  ;;  %v3347_v17 = vadd.f32 %v11999_v45, %v3346_v2  ;;  %v3348_v63 = vpop.f32.mrb[11].mxu0  ;;  %v4457_v10 = vsel %vm644_vm8, %v4448_v60, %v4456_v34  ;;  %v4165_v49 = vrot.slane %v4163_v9, 4 }
 0x1cc   : > { %3692 = vst.msk [vmem:[#allocation3 + $0x28] sm:$0xf] %vm3689_vm2, %v3656_v51  ;;  %5850 = vrot.lane.b32.xlu1 %v4457_v10, %s10741_s12  ;;  %v4168_v48 = vrot.slane %v4166_v6, 5  ;;  %v3458_v29 = vmax.f32 %v3344_v42, 0.0  ;;  %v12068_v33 = vsel %vm965_vm3, %v4761_v0, %v4762_v24  ;;  %v10549_v42 = vld [vmem:[%s14712_s3] sm:$0xff]   ;;  %v10552_v0 = vld [vmem:[%s14712_s3 + $0x50] sm:$0xff]  }
 0x1cd   : > { %v3523_v31 = vmul.f32 %v12003_v59, %v3490_v47  ;;  %v3491_v44 = vmin.f32 %v3347_v17, 0.0  ;;  %v3459_v23 = vmax.f32 %v3347_v17, 0.0  ;;  %v10550_v47 = vld [vmem:[%s14712_s3 + $0x48] sm:$0xff]   ;;  %10047 = vmatpush3.bf16.msra.mxu1 %v10549_v42 }
 0x1ce   : > { %v4169_v25 = vor.u32 %v4168_v48, %v4165_v49  ;;  %v10551_v49 = vld [vmem:[%s14712_s3 + $0x8] sm:$0xff]   ;;  %10048 = vmatprep.subr.bf16.mxu1 %v10550_v47 }
 0x1cf   : > { %v3524_v21 = vmul.f32 %v12003_v59, %v3491_v44  ;;  %v3555_v56 = vadd.f32 %v3523_v31, %v3458_v29 }
 0x1d0   : > { %v4170_v18 = vsel %vm1030_vm5, %v4161_v40, %v4169_v25 }
 0x1d1   : > { %v3556_v8 = vadd.f32 %v3524_v21, %v3459_v23  ;;  %5820 = vrot.lane.b32.xlu1 %v4170_v18, %s10738_s25  ;;  %10049 = vmatpush3.bf16.msra.mxu1 %v10551_v49 }
 0x1d2   : > { %v5402_v30 = vld [vmem:[#allocation3 + $0x20] sm:$0xf0]  ;;  %10050 = vmatprep.subr.bf16.mxu1 %v10552_v0 }
 0x1d3   : > { %v5099_v19 = vld [vmem:[#allocation3 + $0x28] sm:$0xf]  ;;  %v5450_v61 = vrot.slane %v5402_v30, 4  ;;  %v12070_v32 = vld [vmem:[#allocation3 + $0x20] sm:$0xf0]  ;;  %v12073_v1 = vpack.c.bf16 %v3556_v8, %v3555_v56 }
 0x1d4   : > { %v12065_v41 = vld [vmem:[#allocation3 + $0x28] sm:$0xf]  ;;  %v5451_v35 = vrot.slane %v5099_v19, 4  ;;  %v5139_v22 = vshrl.u32 %v5099_v19, 16  ;;  %v4079_v15 = vrot.slane %v12070_v32, 4  ;;  %v5142_v27 = vshll.u32 %v5099_v19, 16 }
 0x1d5   : > { %v4080_v7 = vrot.slane %v12065_v41, 4  ;;  %14745 = vst [vmem:[#allocation13_spill] sm:$0xff] %v12073_v1  ;;  %v5098_v14 = vld [vmem:[#allocation3 + $0x20] sm:$0xf8]  ;;  %v12077_v39 = vld [vmem:[#allocation3 + $0x28] sm:$0xf]  ;;  %10051 = vmatpush3.bf16.msra.mxu1 %v10553_v37 }
 0x1d6   : > { %v4411_v12 = vld [vmem:[#allocation3 + $0x20] sm:$0xf8]  ;;  %v5452_v16 = vsel %vm965_vm3, %v5450_v61, %v5451_v35  ;;  %v5131_v4 = vshrl.u32 %v5098_v14, 16  ;;  %v5134_v20 = vshll.u32 %v5098_v14, 16  ;;  %v5141_v13 = vrot.slane %v5139_v22, 3 }
 0x1d7   : > { %v3657_v28 = vrot.slane %v12073_v1, 4  ;;  %5946 = vrot.lane.b32.xlu0 %v5452_v16, %s10741_s12  ;;  %v4081_v11 = vsel %vm965_vm3, %v4079_v15, %v4080_v7  ;;  %v5144_v36 = vrot.slane %v5142_v27, 4  ;;  %v4459_v26 = vshrl.u32 %v4411_v12, 16  ;;  %v12085_v62 = vld [vmem:[#allocation3 + $0x20] sm:$0xf0] }
 0x1d8   : > { %5790 = vrot.lane.b32.xlu1 %v4081_v11, %s10736_s20  ;;  %v5133_v58 = vrot.slane %v5131_v4, 3  ;;  %v5136_v60 = vrot.slane %v5134_v20, 4  ;;  %v4462_v53 = vshll.u32 %v4411_v12, 16  ;;  %v4467_v46 = vshrl.u32 %v12077_v39, 16  ;;  %v4810_v57 = vld [vmem:[#allocation3 + $0x28] sm:$0x1f] }
 0x1d9   : > { %3693 = vst.msk [vmem:[#allocation3 + $0x30] sm:$0xf0] %vm3687_vm1, %v3657_v28  ;;  %v5145_v51 = vor.u32 %v5144_v36, %v5141_v13  ;;  %v4461_v5 = vrot.slane %v4459_v26, 3  ;;  %v4470_v54 = vshll.u32 %v12077_v39, 16  ;;  %v4843_v38 = vshrl.u32 %v12085_v62, 16 }
 0x1da   : > { %3694 = vst.msk [vmem:[#allocation3 + $0x38] sm:$0xf] %vm3689_vm2, %v3657_v28  ;;  %v5137_v3 = vor.u32 %v5136_v60, %v5133_v58  ;;  %v4464_v34 = vrot.slane %v4462_v53, 4  ;;  %v4469_v9 = vrot.slane %v4467_v46, 3  ;;  %v4846_v6 = vshll.u32 %v12085_v62, 16 }
 0x1db   : > { %v4123_v2 = vld [vmem:[#allocation3 + $0x28] sm:$0x1f]  ;;  %v4472_v17 = vrot.slane %v4470_v54, 4  ;;  %v4845_v63 = vrot.slane %v4843_v38, 4  ;;  %v4851_v10 = vshrl.u32 %v4810_v57, 16  ;;  %v4854_v40 = vshll.u32 %v4810_v57, 16 }
 0x1dc   : > { %v5146_v48 = vsel %vm644_vm8, %v5137_v3, %v5145_v51  ;;  %v4465_v31 = vor.u32 %v4464_v34, %v4461_v5  ;;  %v4848_v44 = vrot.slane %v4846_v6, 5  ;;  %v4172_v25 = vshrl.u32 %v12070_v32, 16  ;;  %v12111_v7 = vld [vmem:[#allocation3 + $0x10] sm:$0xf8]  ;;  %v10554_v6 = vld [vmem:[%s14712_s3 + $0x58] sm:$0xff]  }
 0x1dd   : > { %5914 = vrot.lane.b32.xlu0 %v5146_v48, %s10738_s25  ;;  %v4473_v24 = vor.u32 %v4472_v17, %v4469_v9  ;;  %v4853_v29 = vrot.slane %v4851_v10, 4  ;;  %v4856_v23 = vrot.slane %v4854_v40, 5  ;;  %v4175_v21 = vshll.u32 %v12070_v32, 16  ;;  %v10555_v10 = vld [vmem:[%s14712_s3 + $0x18] sm:$0xff]   ;;  %10052 = vmatprep.subr.bf16.mxu1 %v10554_v6 }
 0x1de   : > { %v4849_v18 = vor.u32 %v4848_v44, %v4845_v63  ;;  %v4174_v56 = vrot.slane %v4172_v25, 4  ;;  %v4180_v8 = vshrl.u32 %v4123_v2, 16  ;;  %v4183_v19 = vshll.u32 %v4123_v2, 16  ;;  %10053 = vmatpush3.bf16.msra.mxu1 %v10555_v10 }
 0x1df   : > { %v4474_v30 = vsel %vm644_vm8, %v4465_v31, %v4473_v24  ;;  %v4857_v61 = vor.u32 %v4856_v23, %v4853_v29  ;;  %v4177_v35 = vrot.slane %v4175_v21, 5  ;;  %v3351_v27 = vpop.f32.mrb[12].mxu0  ;;  %v3771_v58 = vshrl.u32 %v12111_v7, 16 }
 0x1e0   : > { %5852 = vrot.lane.b32.xlu1 %v4474_v30, %s10741_s12  ;;  %v4182_v22 = vrot.slane %v4180_v8, 4  ;;  %v4185_v15 = vrot.slane %v4183_v19, 5  ;;  %v5403_v14 = vld [vmem:[#allocation3 + $0x30] sm:$0xf0]  ;;  %v3352_v28 = vadd.f32 %v11999_v45, %v3351_v27  ;;  %v3353_v11 = vpop.f32.mrb[13].mxu0  ;;  %v3774_v60 = vshll.u32 %v12111_v7, 16 }
 0x1e1   : > { %v5101_v32 = vld [vmem:[#allocation3 + $0x38] sm:$0xf]  ;;  %v4858_v12 = vsel %vm1030_vm5, %v4849_v18, %v4857_v61  ;;  %v4178_v16 = vor.u32 %v4177_v35, %v4174_v56  ;;  %v5453_v4 = vrot.slane %v5403_v14, 4  ;;  %v12122_v26 = vld [vmem:[#allocation3 + $0x30] sm:$0xf0]  ;;  %v3354_v53 = vpop.f32.mrb[14].mxu0 }
 0x1e2   : > { %v5454_v20 = vrot.slane %v5101_v32, 4  ;;  %v12115_v13 = vld [vmem:[#allocation3 + $0x38] sm:$0xf]  ;;  %5884 = vrot.lane.b32.xlu0 %v4858_v12, %s10736_s20  ;;  %v4186_v36 = vor.u32 %v4185_v15, %v4182_v22  ;;  %v4082_v57 = vrot.slane %v12122_v26, 4  ;;  %v5100_v5 = vld [vmem:[#allocation3 + $0x30] sm:$0xf8]  ;;  %v3355_v42 = vadd.f32 %v11999_v45, %v3354_v53 }
 0x1e3   : > { %v4083_v51 = vrot.slane %v12115_v13, 4  ;;  %v5156_v54 = vshrl.u32 %v5101_v32, 16  ;;  %v3492_v38 = vmin.f32 %v3352_v28, 0.0  ;;  %v3356_v3 = vpop.f32.mrb[15].mxu0  ;;  %v4413_v9 = vld [vmem:[#allocation3 + $0x30] sm:$0xf8] }
 0x1e4   : > { %v5455_v46 = vsel %vm965_vm3, %v5453_v4, %v5454_v20  ;;  %v4187_v34 = vsel %vm1030_vm5, %v4178_v16, %v4186_v36  ;;  %v3779_v2 = vshrl.u32 %v12028_v52, 16  ;;  %v3460_v47 = vmax.f32 %v3352_v28, 0.0  ;;  %v12143_v25 = vld [vmem:[#allocation3 + $0x38] sm:$0xf]  ;;  %v12145_v0 = vld [vmem:[#allocation3 + $0x30] sm:$0xf0] }
 0x1e5   : > { %5822 = vrot.lane.b32.xlu1 %v4187_v34, %s10738_s25  ;;  %v4084_v17 = vsel %vm965_vm3, %v4082_v57, %v4083_v51  ;;  %v5148_v63 = vshrl.u32 %v5100_v5, 16  ;;  %v3782_v40 = vshll.u32 %v12028_v52, 16  ;;  %v3525_v49 = vmul.f32 %v12003_v59, %v3492_v38  ;;  %v4811_v30 = vld [vmem:[#allocation3 + $0x38] sm:$0x1f]  ;;  %v10556_v61 = vld [vmem:[%s14712_s3 + $0x60] sm:$0xff]   ;;  %v10558_v27 = vld [vmem:[%s14712_s3 + $0x68] sm:$0xff]  }
 0x1e6   : > { %v3461_v48 = vmax.f32 %v3355_v42, 0.0  ;;  %v3493_v31 = vmin.f32 %v3355_v42, 0.0  ;;  %5948 = vrot.lane.b32.xlu0 %v5455_v46, %s10741_s12  ;;  %v5151_v44 = vshll.u32 %v5100_v5, 16  ;;  %v5158_v29 = vrot.slane %v5156_v54, 3  ;;  %v10557_v35 = vld [vmem:[%s14712_s3 + $0x20] sm:$0xff]   ;;  %10054 = vmatprep.subr.bf16.mxu1 %v10556_v61  ;;  %v10559_v54 = vld [vmem:[%s14712_s3 + $0x28] sm:$0xff]  }
 0x1e7   : > { %v5150_v24 = vrot.slane %v5148_v63, 3  ;;  %v5159_v23 = vshll.u32 %v5101_v32, 16  ;;  %v4476_v21 = vshrl.u32 %v4413_v9, 16  ;;  %v3557_v18 = vadd.f32 %v3525_v49, %v3460_v47  ;;  %10055 = vmatpush3.bf16.msra.mxu1 %v10557_v35  ;;  %v4124_v5 = vld [vmem:[#allocation3 + $0x38] sm:$0x1f] }
 0x1e8   : > { %v3526_v56 = vmul.f32 %v12003_v59, %v3493_v31  ;;  %v5153_v8 = vrot.slane %v5151_v44, 4  ;;  %v4479_v19 = vshll.u32 %v4413_v9, 16  ;;  %v4484_v32 = vshrl.u32 %v12143_v25, 16  ;;  %10056 = vmatprep.subr.bf16.mxu1 %v10558_v27  ;;  %v3721_v9 = vld [vmem:[#allocation3] sm:$0xf8] }
 0x1e9   : > { %5792 = vrot.lane.b32.xlu1 %v4084_v17, %s10736_s20  ;;  %v5161_v22 = vrot.slane %v5159_v23, 4  ;;  %v4478_v15 = vrot.slane %v4476_v21, 3  ;;  %v4487_v14 = vshll.u32 %v12143_v25, 16  ;;  %v4860_v20 = vshrl.u32 %v12145_v0, 16 }
 0x1ea   : > { %v3558_v12 = vadd.f32 %v3526_v56, %v3461_v48  ;;  %v5154_v16 = vor.u32 %v5153_v8, %v5150_v24  ;;  %v4481_v4 = vrot.slane %v4479_v19, 4  ;;  %v4486_v28 = vrot.slane %v4484_v32, 3 }
 0x1eb   : > { %v5162_v37 = vor.u32 %v5161_v22, %v5158_v29  ;;  %v4489_v11 = vrot.slane %v4487_v14, 4  ;;  %v4863_v36 = vshll.u32 %v12145_v0, 16  ;;  %v4862_v57 = vrot.slane %v4860_v20, 4  ;;  %10057 = vmatpush3.bf16.msra.mxu1 %v10559_v54  ;;  %v10562_v14 = vld [vmem:[%s14712_s3 + $0x78] sm:$0xff]  }
 0x1ec   : > { %v12162_v53 = vpack.c.bf16 %v3558_v12, %v3557_v18  ;;  %v4482_v46 = vor.u32 %v4481_v4, %v4478_v15  ;;  %v4868_v51 = vshrl.u32 %v4811_v30, 16  ;;  %v4871_v34 = vshll.u32 %v4811_v30, 16 }
 0x1ed   : > { %v5163_v38 = vsel %vm644_vm8, %v5154_v16, %v5162_v37  ;;  %v4490_v42 = vor.u32 %v4489_v11, %v4486_v28  ;;  %v4865_v3 = vrot.slane %v4863_v36, 5  ;;  %v4189_v17 = vshrl.u32 %v12122_v26, 16 }
 0x1ee   : > { %14746 = vst [vmem:[#allocation14_spill] sm:$0xff] %v12162_v53  ;;  %v3658_v6 = vrot.slane %v12162_v53, 4  ;;  %5916 = vrot.lane.b32.xlu0 %v5163_v38, %s10738_s25  ;;  %v4870_v47 = vrot.slane %v4868_v51, 4  ;;  %v4192_v63 = vshll.u32 %v12122_v26, 16  ;;  %v4873_v48 = vrot.slane %v4871_v34, 5  ;;  %v10560_v26 = vld [vmem:[%s14712_s3 + $0x70] sm:$0xff]  }
 0x1ef   : > { %v4491_v10 = vsel %vm644_vm8, %v4482_v46, %v4490_v42  ;;  %v4866_v49 = vor.u32 %v4865_v3, %v4862_v57  ;;  %v4197_v31 = vshrl.u32 %v4124_v5, 16  ;;  %v4191_v44 = vrot.slane %v4189_v17, 4  ;;  %10058 = vmatprep.subr.bf16.mxu1 %v10560_v26 }
 0x1f0   : > { %3695 = vst.msk [vmem:[#allocation3 + $0x40] sm:$0xf0] %vm3687_vm1, %v3658_v6  ;;  %5854 = vrot.lane.b32.xlu1 %v4491_v10, %s10741_s12  ;;  %v4194_v24 = vrot.slane %v4192_v63, 5  ;;  %v4200_v29 = vshll.u32 %v4124_v5, 16  ;;  %v3754_v23 = vshrl.u32 %v3721_v9, 16  ;;  %v4874_v21 = vor.u32 %v4873_v48, %v4870_v47  ;;  %v3359_v61 = vpop.f32.mrb[16].mxu0 }
 0x1f1   : > { %3696 = vst.msk [vmem:[#allocation3 + $0x48] sm:$0xf] %vm3689_vm2, %v3658_v6  ;;  %v4199_v18 = vrot.slane %v4197_v31, 4  ;;  %v3757_v56 = vshll.u32 %v3721_v9, 16  ;;  %v12181_v30 = vrot.slane %v3771_v58, 3  ;;  %v12186_v22 = vrot.slane %v3774_v60, 4 }
 0x1f2   : > { %v4195_v8 = vor.u32 %v4194_v24, %v4191_v44  ;;  %v4202_v19 = vrot.slane %v4200_v29, 5  ;;  %v4875_v35 = vsel %vm1030_vm5, %v4866_v49, %v4874_v21  ;;  %v12190_v15 = vrot.slane %v3779_v2, 3  ;;  %v10561_v58 = vld [vmem:[%s14712_s3 + $0x30] sm:$0xff]   ;;  %v3361_v60 = vpop.f32.mrb[17].mxu0  ;;  %v10563_v9 = vld [vmem:[%s14712_s3 + $0x38] sm:$0xff]  }
 0x1f3   : > { %v12194_v32 = vrot.slane %v3782_v40, 4  ;;  %v3360_v7 = vadd.f32 %v11999_v45, %v3359_v61  ;;  %5886 = vrot.lane.b32.xlu0 %v4875_v35, %s10736_s20  ;;  %v12204_v27 = vrot.slane %v3754_v23, 3  ;;  %v3762_v52 = vshrl.u32 %v11807_v50, 16  ;;  %v3362_v40 = vpop.f32.mrb[18].mxu0  ;;  %10059 = vmatpush3.bf16.msra.mxu1 %v10561_v58 }
 0x1f4   : > { %v4203_v2 = vor.u32 %v4202_v19, %v4199_v18  ;;  %v12207_v12 = vrot.slane %v3757_v56, 4  ;;  %v3765_v16 = vshll.u32 %v11807_v50, 16  ;;  %v3796_v4 = vshrl.u32 %v12065_v41, 16  ;;  %v3364_v36 = vpop.f32.mrb[19].mxu0  ;;  %10060 = vmatprep.subr.bf16.mxu1 %v10562_v14 }
 0x1f5   : > { %v3799_v20 = vshll.u32 %v12065_v41, 16  ;;  %v3462_v37 = vmax.f32 %v3360_v7, 0.0  ;;  %v3494_v28 = vmin.f32 %v3360_v7, 0.0  ;;  %v3363_v11 = vadd.f32 %v11999_v45, %v3362_v40 }
 0x1f6   : > { %v4204_v46 = vsel %vm1030_vm5, %v4195_v8, %v4203_v2  ;;  %v4765_v50 = vrot.slane %v12077_v39, 4  ;;  %v3813_v41 = vshrl.u32 %v12115_v13, 16  ;;  %v3816_v39 = vshll.u32 %v12115_v13, 16 }
 0x1f7   : > { %5824 = vrot.lane.b32.xlu1 %v4204_v46, %s10738_s25  ;;  %v5404_v51 = vld [vmem:[#allocation3 + $0x40] sm:$0xf0]  ;;  %v3527_v54 = vmul.f32 %v12003_v59, %v3494_v28  ;;  %v3463_v38 = vmax.f32 %v3363_v11, 0.0  ;;  %v3495_v42 = vmin.f32 %v3363_v11, 0.0  ;;  %10061 = vmatpush3.bf16.msra.mxu1 %v10563_v9 }
 0x1f8   : > { %v5103_v57 = vld [vmem:[#allocation3 + $0x48] sm:$0xf]  ;;  %v5456_v3 = vrot.slane %v5404_v51, 4  ;;  %v4029_v34 = vld [vmem:[#allocation3 + $0x40] sm:$0xf0] }
 0x1f9   : > { %v12215_v5 = vld [vmem:[#allocation3 + $0x48] sm:$0xf]  ;;  %v5457_v6 = vrot.slane %v5103_v57, 4  ;;  %v4085_v47 = vrot.slane %v4029_v34, 4  ;;  %v5102_v63 = vld [vmem:[#allocation3 + $0x40] sm:$0xf8]  ;;  %v3559_v49 = vadd.f32 %v3527_v54, %v3462_v37  ;;  %v3528_v48 = vmul.f32 %v12003_v59, %v3495_v42 }
 0x1fa   : > { %v4086_v17 = vrot.slane %v12215_v5, 4  ;;  %v5173_v10 = vshrl.u32 %v5103_v57, 16  ;;  %v5165_v31 = vshrl.u32 %v5102_v63, 16  ;;  %v5168_v44 = vshll.u32 %v5102_v63, 16  ;;  %v4415_v24 = vld [vmem:[#allocation3 + $0x40] sm:$0xf8] }
 0x1fb   : > { %v12223_v29 = vld [vmem:[#allocation3 + $0x48] sm:$0xf]  ;;  %v5458_v23 = vsel %vm965_vm3, %v5456_v3, %v5457_v6  ;;  %v5176_v56 = vshll.u32 %v5103_v57, 16  ;;  %v12227_v26 = vld [vmem:[#allocation3 + $0x40] sm:$0xf0]  ;;  %v3560_v8 = vadd.f32 %v3528_v48, %v3463_v38  ;;  %v4493_v35 = vshrl.u32 %v4415_v24, 16 }
 0x1fc   : > { %v4087_v21 = vsel %vm965_vm3, %v4085_v47, %v4086_v17  ;;  %v5175_v18 = vrot.slane %v5173_v10, 3  ;;  %5950 = vrot.lane.b32.xlu0 %v5458_v23, %s10741_s12  ;;  %v5167_v19 = vrot.slane %v5165_v31, 3  ;;  %v5170_v61 = vrot.slane %v5168_v44, 4  ;;  %v4812_v2 = vld [vmem:[#allocation3 + $0x48] sm:$0x1f] }
 0x1fd   : > { %5794 = vrot.lane.b32.xlu1 %v4087_v21, %s10736_s20  ;;  %v5178_v58 = vrot.slane %v5176_v56, 4  ;;  %v4496_v14 = vshll.u32 %v4415_v24, 16  ;;  %v4501_v7 = vshrl.u32 %v12223_v29, 16  ;;  %v4504_v60 = vshll.u32 %v12223_v29, 16  ;;  %v4125_v9 = vld [vmem:[#allocation3 + $0x48] sm:$0x1f] }
 0x1fe   : > { %v12233_v40 = vpack.c.bf16 %v3560_v8, %v3559_v49  ;;  %v5171_v37 = vor.u32 %v5170_v61, %v5167_v19  ;;  %v4495_v28 = vrot.slane %v4493_v35, 3  ;;  %v4877_v11 = vshrl.u32 %v12227_v26, 16 }
 0x1ff   : > { %v5179_v36 = vor.u32 %v5178_v58, %v5175_v18  ;;  %v4498_v46 = vrot.slane %v4496_v14, 4  ;;  %v4503_v57 = vrot.slane %v4501_v7, 3  ;;  %v4506_v51 = vrot.slane %v4504_v60, 4  ;;  %v12243_v18 = vld [vmem:[#allocation3 + $0x20] sm:$0xf8] }
 0x200   : > { %14747 = vst [vmem:[#allocation15_spill] sm:$0xff] %v12233_v40  ;;  %v3659_v54 = vrot.slane %v12233_v40, 4  ;;  %v4879_v38 = vrot.slane %v4877_v11, 4  ;;  %v4880_v42 = vshll.u32 %v12227_v26, 16  ;;  %v4885_v3 = vshrl.u32 %v4812_v2, 16 }
 0x201   : > { %v5180_v6 = vsel %vm644_vm8, %v5171_v37, %v5179_v36  ;;  %v4499_v47 = vor.u32 %v4498_v46, %v4495_v28  ;;  %v4507_v17 = vor.u32 %v4506_v51, %v4503_v57  ;;  %v4888_v63 = vshll.u32 %v4812_v2, 16  ;;  %v12254_v7 = vld [vmem:[#allocation3 + $0x30] sm:$0xf8] }
 0x202   : > { %3697 = vst.msk [vmem:[#allocation3 + $0x50] sm:$0xf0] %vm3687_vm1, %v3659_v54  ;;  %5918 = vrot.lane.b32.xlu0 %v5180_v6, %s10738_s25  ;;  %v4882_v10 = vrot.slane %v4880_v42, 5  ;;  %v4887_v49 = vrot.slane %v4885_v3, 4  ;;  %v4206_v48 = vshrl.u32 %v4029_v34, 16  ;;  %v4209_v31 = vshll.u32 %v4029_v34, 16 }
 0x203   : > { %3698 = vst.msk [vmem:[#allocation3 + $0x58] sm:$0xf] %vm3689_vm2, %v3659_v54  ;;  %v4508_v44 = vsel %vm644_vm8, %v4499_v47, %v4507_v17  ;;  %v4890_v24 = vrot.slane %v4888_v63, 5  ;;  %v4214_v23 = vshrl.u32 %v4125_v9, 16  ;;  %v4217_v21 = vshll.u32 %v4125_v9, 16 }
 0x204   : > { %5856 = vrot.lane.b32.xlu1 %v4508_v44, %s10741_s12  ;;  %v4883_v56 = vor.u32 %v4882_v10, %v4879_v38  ;;  %v4208_v8 = vrot.slane %v4206_v48, 4  ;;  %v4211_v19 = vrot.slane %v4209_v31, 5  ;;  %v12248_v61 = vrot.slane %v3762_v52, 3 }
 0x205   : > { %v4891_v35 = vor.u32 %v4890_v24, %v4887_v49  ;;  %v4216_v58 = vrot.slane %v4214_v23, 4  ;;  %v4219_v14 = vrot.slane %v4217_v21, 5  ;;  %v12252_v34 = vrot.slane %v3765_v16, 4 }
 0x206   : > { %v4212_v60 = vor.u32 %v4211_v19, %v4208_v8  ;;  %v12258_v2 = vrot.slane %v3796_v4, 3  ;;  %v12262_v37 = vrot.slane %v3799_v20, 4  ;;  %v3788_v52 = vshrl.u32 %v12243_v18, 16 }
 0x207   : > { %v4892_v28 = vsel %vm1030_vm5, %v4883_v56, %v4891_v35  ;;  %v4220_v11 = vor.u32 %v4219_v14, %v4216_v58  ;;  %v4764_v16 = vrot.slane %v12085_v62, 4  ;;  %v3791_v36 = vshll.u32 %v12243_v18, 16  ;;  %v3367_v20 = vpop.f32.mrb[20].mxu0 }
 0x208   : > { %5888 = vrot.lane.b32.xlu0 %v4892_v28, %s10736_s20  ;;  %v3805_v4 = vshrl.u32 %v12254_v7, 16  ;;  %v3808_v46 = vshll.u32 %v12254_v7, 16  ;;  %v3368_v62 = vadd.f32 %v11999_v45, %v3367_v20  ;;  %v3369_v42 = vpop.f32.mrb[21].mxu0 }
 0x209   : > { %v4221_v57 = vsel %vm1030_vm5, %v4212_v60, %v4220_v11  ;;  %v5405_v54 = vld [vmem:[#allocation3 + $0x50] sm:$0xf0]  ;;  %v12275_v38 = vsel %vm965_vm3, %v4764_v16, %v4765_v50  ;;  %v3370_v17 = vpop.f32.mrb[22].mxu0 }
 0x20a   : > { %v5105_v51 = vld [vmem:[#allocation3 + $0x58] sm:$0xf]  ;;  %5826 = vrot.lane.b32.xlu1 %v4221_v57, %s10738_s25  ;;  %v5459_v3 = vrot.slane %v5405_v54, 4  ;;  %v12282_v63 = vld [vmem:[#allocation3 + $0x50] sm:$0xf0]  ;;  %v3464_v24 = vmax.f32 %v3368_v62, 0.0  ;;  %v3371_v21 = vadd.f32 %v11999_v45, %v3370_v17 }
 0x20b   : > { %v5460_v9 = vrot.slane %v5105_v51, 4  ;;  %v12280_v6 = vld [vmem:[#allocation3 + $0x58] sm:$0xf]  ;;  %v5190_v47 = vshrl.u32 %v5105_v51, 16  ;;  %v5104_v49 = vld [vmem:[#allocation3 + $0x50] sm:$0xf8] }
 0x20c   : > { %v4089_v10 = vrot.slane %v12280_v6, 4  ;;  %v3496_v23 = vmin.f32 %v3368_v62, 0.0  ;;  %v3372_v56 = vpop.f32.mrb[23].mxu0  ;;  %v4417_v19 = vld [vmem:[#allocation3 + $0x50] sm:$0xf8]  ;;  %v4088_v35 = vrot.slane %v12282_v63, 4 }
 0x20d   : > { %v5461_v8 = vsel %vm965_vm3, %v5459_v3, %v5460_v9  ;;  %v5182_v58 = vshrl.u32 %v5104_v49, 16  ;;  %v5185_v14 = vshll.u32 %v5104_v49, 16  ;;  %v5192_v60 = vrot.slane %v5190_v47, 3  ;;  %v4418_v20 = vld [vmem:[#allocation3 + $0x58] sm:$0xf] }
 0x20e   : > { %5952 = vrot.lane.b32.xlu0 %v5461_v8, %s10741_s12  ;;  %v3529_v28 = vmul.f32 %v12003_v59, %v3496_v23  ;;  %v3465_v11 = vmax.f32 %v3371_v21, 0.0  ;;  %v3497_v50 = vmin.f32 %v3371_v21, 0.0  ;;  %v5193_v16 = vshll.u32 %v5105_v51, 16  ;;  %v4717_v42 = vld [vmem:[#allocation3 + $0x50] sm:$0xf0] }
 0x20f   : > { %v4090_v57 = vsel %vm965_vm3, %v4088_v35, %v4089_v10  ;;  %v5184_v45 = vrot.slane %v5182_v58, 3  ;;  %v5187_v54 = vrot.slane %v5185_v14, 4  ;;  %v4510_v62 = vshrl.u32 %v4417_v19, 16  ;;  %v4813_v47 = vld [vmem:[#allocation3 + $0x58] sm:$0x1f] }
 0x210   : > { %v3561_v3 = vadd.f32 %v3529_v28, %v3464_v24  ;;  %v3530_v9 = vmul.f32 %v12003_v59, %v3497_v50  ;;  %5796 = vrot.lane.b32.xlu1 %v4090_v57, %s10736_s20  ;;  %v5195_v17 = vrot.slane %v5193_v16, 4  ;;  %v4513_v49 = vshll.u32 %v4417_v19, 16  ;;  %v4126_v24 = vld [vmem:[#allocation3 + $0x58] sm:$0x1f] }
 0x211   : > { %v5188_v56 = vor.u32 %v5187_v54, %v5184_v45  ;;  %v4512_v23 = vrot.slane %v4510_v62, 3  ;;  %v4518_v8 = vshrl.u32 %v4418_v20, 16  ;;  %v4521_v21 = vshll.u32 %v4418_v20, 16 }
 0x212   : > { %v3562_v51 = vadd.f32 %v3530_v9, %v3465_v11  ;;  %v5196_v44 = vor.u32 %v5195_v17, %v5192_v60  ;;  %v4515_v48 = vrot.slane %v4513_v49, 4  ;;  %v4894_v10 = vshrl.u32 %v4717_v42, 16 }
 0x213   : > { %v4520_v35 = vrot.slane %v4518_v8, 3  ;;  %v4523_v58 = vrot.slane %v4521_v21, 4  ;;  %v4897_v14 = vshll.u32 %v4717_v42, 16  ;;  %v4902_v31 = vshrl.u32 %v4813_v47, 16 }
 0x214   : > { %v12299_v28 = vpack.c.bf16 %v3562_v51, %v3561_v3  ;;  %v5197_v50 = vsel %vm644_vm8, %v5188_v56, %v5196_v44  ;;  %v4516_v16 = vor.u32 %v4515_v48, %v4512_v23  ;;  %v4896_v19 = vrot.slane %v4894_v10, 4 }
 0x215   : > { %5920 = vrot.lane.b32.xlu0 %v5197_v50, %s10738_s25  ;;  %v4524_v57 = vor.u32 %v4523_v58, %v4520_v35  ;;  %v4899_v45 = vrot.slane %v4897_v14, 5  ;;  %v4904_v20 = vrot.slane %v4902_v31, 4  ;;  %v4905_v11 = vshll.u32 %v4813_v47, 16  ;;  %v12328_v35 = vld [vmem:[#allocation3 + $0x40] sm:$0xf8] }
 0x216   : > { %14748 = vst [vmem:[#allocation16_spill] sm:$0xff] %v12299_v28  ;;  %v3660_v60 = vrot.slane %v12299_v28, 4  ;;  %v4223_v54 = vshrl.u32 %v12282_v63, 16  ;;  %v4226_v62 = vshll.u32 %v12282_v63, 16  ;;  %v4231_v42 = vshrl.u32 %v4126_v24, 16 }
 0x217   : > { %v4525_v3 = vsel %vm644_vm8, %v4516_v16, %v4524_v57  ;;  %v4900_v9 = vor.u32 %v4899_v45, %v4896_v19  ;;  %v4907_v17 = vrot.slane %v4905_v11, 5  ;;  %v4234_v44 = vshll.u32 %v4126_v24, 16 }
 0x218   : > { %3699 = vst.msk [vmem:[#allocation3 + $0x60] sm:$0xf0] %vm3687_vm1, %v3660_v60  ;;  %5858 = vrot.lane.b32.xlu1 %v4525_v3, %s10741_s12  ;;  %v4225_v48 = vrot.slane %v4223_v54, 4  ;;  %v4228_v31 = vrot.slane %v4226_v62, 5  ;;  %v4233_v49 = vrot.slane %v4231_v42, 4  ;;  %v12312_v47 = vrot.slane %v3788_v52, 3 }
 0x219   : > { %3700 = vst.msk [vmem:[#allocation3 + $0x68] sm:$0xf] %vm3689_vm2, %v3660_v60  ;;  %v4908_v63 = vor.u32 %v4907_v17, %v4904_v20  ;;  %v4236_v56 = vrot.slane %v4234_v44, 5  ;;  %v12316_v23 = vrot.slane %v3791_v36, 4  ;;  %v12320_v8 = vrot.slane %v3805_v4, 3  ;;  %v3375_v58 = vpop.f32.mrb[24].mxu0  ;;  %v5787_v20 = vpop.permute.xlu1 %5786 }
 0x21a   : > { %v4229_v21 = vor.u32 %v4228_v31, %v4225_v48  ;;  %v12324_v51 = vrot.slane %v3808_v46, 4  ;;  %v4767_v10 = vrot.slane %v12145_v0, 4  ;;  %v4768_v52 = vrot.slane %v12143_v25, 4  ;;  %v12342_v0 = vld [vmem:[%s14711_s2] ss:$0 sm:$0xff]  ;;  %v3377_v7 = vpop.f32.mrb[25].mxu0 }
 0x21b   : > { %v4909_v18 = vsel %vm1030_vm5, %v4900_v9, %v4908_v63  ;;  %v4237_v36 = vor.u32 %v4236_v56, %v4233_v49  ;;  %v12333_v14 = vrot.slane %v3813_v41, 3  ;;  %v12337_v4 = vrot.slane %v3816_v39, 4  ;;  %v3378_v50 = vpop.f32.mrb[26].mxu0 }
 0x21c   : > { %v3376_v25 = vadd.f32 %v12342_v0, %v3375_v58  ;;  %5890 = vrot.lane.b32.xlu0 %v4909_v18, %s10736_s20  ;;  %v14749_v46 = vor.u32 %v12252_v34, %v12248_v61  ;;  %v14750_v41 = vor.u32 %v12207_v12, %v12204_v27  ;;  %v3785_v39 = vor.u32 %v12194_v32, %v12190_v15  ;;  %v3380_v45 = vpop.f32.mrb[27].mxu0 }
 0x21d   : > { %v12356_v24 = vsel %vm965_vm3, %v4767_v10, %v4768_v52  ;;  %v4238_v16 = vsel %vm1030_vm5, %v4229_v21, %v4237_v36  ;;  %v3802_v19 = vor.u32 %v12262_v37, %v12258_v2  ;;  %v3822_v57 = vshrl.u32 %v12328_v35, 16 }
 0x21e   : > { %v3769_v13 = vsel %vm644_vm8, %v14750_v41, %v14749_v46  ;;  %v3825_v61 = vshll.u32 %v12328_v35, 16  ;;  %v3466_v34 = vmax.f32 %v3376_v25, 0.0  ;;  %v3498_v27 = vmin.f32 %v3376_v25, 0.0  ;;  %5828 = vrot.lane.b32.xlu1 %v4238_v16, %s10738_s25 }
 0x21f   : > { %v3379_v12 = vadd.f32 %v12342_v0, %v3378_v50  ;;  %v5406_v54 = vld [vmem:[#allocation3 + $0x60] sm:$0xf0]  ;;  %v12367_v42 = vsel %vm2952_vm7, %v3769_v13, %v5787_v20  ;;  %v3794_v3 = vor.u32 %v12316_v23, %v12312_v47  ;;  %v4771_v32 = vrot.slane %v12223_v29, 4 }
 0x220   : > { %v5107_v60 = vld [vmem:[#allocation3 + $0x68] sm:$0xf]  ;;  %v3531_v44 = vmul.f32 %v12003_v59, %v3498_v27  ;;  %v5462_v49 = vrot.slane %v5406_v54, 4  ;;  %v4031_v63 = vld [vmem:[#allocation3 + $0x60] sm:$0xf0]  ;;  %v14753_v35 = vor.u32 %v12337_v4, %v12333_v14 }
 0x221   : > { %v3734_v62 = vld [vmem:[#allocation3 + $0x68] sm:$0xf]  ;;  %v3467_v48 = vmax.f32 %v3379_v12, 0.0  ;;  %v3499_v31 = vmin.f32 %v3379_v12, 0.0  ;;  %v5463_v56 = vrot.slane %v5107_v60, 4  ;;  %v4091_v21 = vrot.slane %v4031_v63, 4 }
 0x222   : > { %v4092_v10 = vrot.slane %v3734_v62, 4  ;;  %v5106_v52 = vld [vmem:[#allocation3 + $0x60] sm:$0xf8]  ;;  %v5207_v58 = vshrl.u32 %v5107_v60, 16  ;;  %v3563_v18 = vadd.f32 %v3531_v44, %v3466_v34  ;;  %v4420_v41 = vld [vmem:[#allocation3 + $0x68] sm:$0xf] }
 0x223   : > { %v3532_v36 = vmul.f32 %v12003_v59, %v3499_v31  ;;  %v5199_v25 = vshrl.u32 %v5106_v52, 16  ;;  %v5202_v7 = vshll.u32 %v5106_v52, 16  ;;  %v4419_v46 = vld [vmem:[#allocation3 + $0x60] sm:$0xf8]  ;;  %v5464_v13 = vsel %vm965_vm3, %v5462_v49, %v5463_v56  ;;  %v4814_v11 = vld [vmem:[#allocation3 + $0x68] sm:$0x1f] }
 0x224   : > { %v4093_v50 = vsel %vm965_vm3, %v4091_v21, %v4092_v10  ;;  %v5209_v16 = vrot.slane %v5207_v58, 3  ;;  %v5210_v27 = vshll.u32 %v5107_v60, 16  ;;  %v4718_v12 = vld [vmem:[#allocation3 + $0x60] sm:$0xf0]  ;;  %5954 = vrot.lane.b32.xlu0 %v5464_v13, %s10741_s12  ;;  %v4527_v54 = vshrl.u32 %v4419_v46, 16 }
 0x225   : > { %v3564_v45 = vadd.f32 %v3532_v36, %v3467_v48  ;;  %5798 = vrot.lane.b32.xlu1 %v4093_v50, %s10736_s20  ;;  %v5201_v20 = vrot.slane %v5199_v25, 3  ;;  %v5204_v34 = vrot.slane %v5202_v7, 4  ;;  %v4530_v44 = vshll.u32 %v4419_v46, 16  ;;  %v4127_v50 = vld [vmem:[#allocation3 + $0x68] sm:$0x1f] }
 0x226   : > { %v5212_v62 = vrot.slane %v5210_v27, 4  ;;  %v4535_v31 = vshrl.u32 %v4420_v41, 16  ;;  %v4538_v52 = vshll.u32 %v4420_v41, 16  ;;  %v4529_v56 = vrot.slane %v4527_v54, 3 }
 0x227   : > { %v12381_v9 = vpack.c.bf16 %v3564_v45, %v3563_v18  ;;  %v5205_v49 = vor.u32 %v5204_v34, %v5201_v20  ;;  %v4911_v21 = vshrl.u32 %v4718_v12, 16  ;;  %v4532_v10 = vrot.slane %v4530_v44, 4 }
 0x228   : > { %v5213_v60 = vor.u32 %v5212_v62, %v5209_v16  ;;  %v4537_v48 = vrot.slane %v4535_v31, 3  ;;  %v4540_v58 = vrot.slane %v4538_v52, 4  ;;  %v4914_v25 = vshll.u32 %v4718_v12, 16 }
 0x229   : > { %14751 = vst [vmem:[#allocation17_spill] sm:$0xff] %v12381_v9  ;;  %v3661_v36 = vrot.slane %v12381_v9, 4  ;;  %v4913_v13 = vrot.slane %v4911_v21, 4  ;;  %v4919_v7 = vshrl.u32 %v4814_v11, 16  ;;  %v4533_v27 = vor.u32 %v4532_v10, %v4529_v56  ;;  %v5819_v10 = vpop.permute.xlu1 %5818 }
 0x22a   : > { %v5214_v46 = vsel %vm644_vm8, %v5205_v49, %v5213_v60  ;;  %v4541_v41 = vor.u32 %v4540_v58, %v4537_v48  ;;  %v4922_v17 = vshll.u32 %v4814_v11, 16  ;;  %v4916_v18 = vrot.slane %v4914_v25, 5 }
 0x22b   : > { %3701 = vst.msk [vmem:[#allocation3 + $0x70] sm:$0xf0] %vm3687_vm1, %v3661_v36  ;;  %5922 = vrot.lane.b32.xlu0 %v5214_v46, %s10738_s25  ;;  %v4921_v16 = vrot.slane %v4919_v7, 4  ;;  %v4240_v45 = vshrl.u32 %v4031_v63, 16  ;;  %v4243_v20 = vshll.u32 %v4031_v63, 16  ;;  %v4248_v54 = vshrl.u32 %v4127_v50, 16 }
 0x22c   : > { %3702 = vst.msk [vmem:[#allocation3 + $0x78] sm:$0xf] %vm3689_vm2, %v3661_v36  ;;  %v4542_v34 = vsel %vm644_vm8, %v4533_v27, %v4541_v41  ;;  %v4924_v12 = vrot.slane %v4922_v17, 5  ;;  %v4251_v62 = vshll.u32 %v4127_v50, 16  ;;  %v4917_v44 = vor.u32 %v4916_v18, %v4913_v13  ;;  %v12409_v13 = vld [vmem:[#allocation3 + $0x50] sm:$0xf8] }
 0x22d   : > { %5860 = vrot.lane.b32.xlu1 %v4542_v34, %s10741_s12  ;;  %v4242_v31 = vrot.slane %v4240_v45, 4  ;;  %v4245_v11 = vrot.slane %v4243_v20, 5  ;;  %v3833_v52 = vshll.u32 %v12215_v5, 16  ;;  %v4250_v56 = vrot.slane %v4248_v54, 4 }
 0x22e   : > { %v4925_v49 = vor.u32 %v4924_v12, %v4921_v16  ;;  %v4253_v21 = vrot.slane %v4251_v62, 5  ;;  %v14752_v63 = vor.u32 %v12186_v22, %v12181_v30  ;;  %v12402_v48 = vrot.slane %v3822_v57, 3 }
 0x22f   : > { %v4246_v60 = vor.u32 %v4245_v11, %v4242_v31  ;;  %v12406_v58 = vrot.slane %v3825_v61, 4  ;;  %v4770_v36 = vrot.slane %v12227_v26, 4  ;;  %v12414_v22 = vsel %vm3018_vm10, %v12367_v42, %v5819_v10 }
 0x230   : > { %v12398_v17 = vsel %vm644_vm8, %v14752_v63, %v3785_v39  ;;  %v4926_v15 = vsel %vm1030_vm5, %v4917_v44, %v4925_v49  ;;  %v4254_v30 = vor.u32 %v4253_v21, %v4250_v56  ;;  %v3383_v39 = vpop.f32.mrb[28].mxu0  ;;  %v12425_v26 = vsel %vm644_vm8, %v3794_v3, %v3802_v19 }
 0x231   : > { %5892 = vrot.lane.b32.xlu0 %v4926_v15, %s10736_s20  ;;  %v14754_v57 = vor.u32 %v12324_v51, %v12320_v8  ;;  %v14755_v61 = vshrl.u32 %v12215_v5, 16  ;;  %v12440_v2 = vrot.slane %v3833_v52, 4  ;;  %v3384_v37 = vadd.f32 %v12342_v0, %v3383_v39  ;;  %v3385_v47 = vpop.f32.mrb[29].mxu0 }
 0x232   : > { %v4255_v23 = vsel %vm1030_vm5, %v4246_v60, %v4254_v30  ;;  %v5407_v3 = vld [vmem:[#allocation3 + $0x70] sm:$0xf0]  ;;  %v12445_v14 = vsel %vm965_vm3, %v4770_v36, %v4771_v32  ;;  %v3386_v51 = vpop.f32.mrb[30].mxu0 }
 0x233   : > { %v12434_v29 = vsel %vm644_vm8, %v14754_v57, %v14753_v35  ;;  %v12438_v42 = vrot.slane %v14755_v61, 3  ;;  %v5109_v19 = vld [vmem:[#allocation3 + $0x78] sm:$0xf]  ;;  %5830 = vrot.lane.b32.xlu1 %v4255_v23, %s10738_s25  ;;  %v5465_v5 = vrot.slane %v5407_v3, 4  ;;  %v3468_v46 = vmax.f32 %v3384_v37, 0.0  ;;  %v3388_v18 = vpop.f32.mrb[31].mxu0 }
 0x234   : > { %v5466_v4 = vrot.slane %v5109_v19, 4  ;;  %v3736_v25 = vld [vmem:[#allocation3 + $0x78] sm:$0xf]  ;;  %v5224_v7 = vshrl.u32 %v5109_v19, 16  ;;  %v3500_v27 = vmin.f32 %v3384_v37, 0.0  ;;  %v3387_v41 = vadd.f32 %v12342_v0, %v3386_v51 }
 0x235   : > { %v12452_v16 = vld [vmem:[#allocation3 + $0x70] sm:$0xf0]  ;;  %v4095_v45 = vrot.slane %v3736_v25, 4  ;;  %v5227_v62 = vshll.u32 %v5109_v19, 16  ;;  %v4422_v60 = vld [vmem:[#allocation3 + $0x78] sm:$0xf] }
 0x236   : > { %v5467_v20 = vsel %vm965_vm3, %v5465_v5, %v5466_v4  ;;  %v4094_v34 = vrot.slane %v12452_v16, 4  ;;  %v5108_v12 = vld [vmem:[#allocation3 + $0x70] sm:$0xf8]  ;;  %v5226_v54 = vrot.slane %v5224_v7, 3  ;;  %v3533_v44 = vmul.f32 %v12003_v59, %v3500_v27  ;;  %v3391_v35 = vpop.f32.mrb[32].mxu0 }
 0x237   : > { %v3469_v31 = vmax.f32 %v3387_v41, 0.0  ;;  %v3501_v11 = vmin.f32 %v3387_v41, 0.0  ;;  %5956 = vrot.lane.b32.xlu0 %v5467_v20, %s10741_s12  ;;  %v5216_v52 = vshrl.u32 %v5108_v12, 16  ;;  %v4421_v49 = vld [vmem:[#allocation3 + $0x70] sm:$0xf8]  ;;  %v5219_v21 = vshll.u32 %v5108_v12, 16 }
 0x238   : > { %v4096_v56 = vsel %vm965_vm3, %v4094_v34, %v4095_v45  ;;  %v5229_v63 = vrot.slane %v5227_v62, 4  ;;  %v4544_v10 = vshrl.u32 %v4421_v49, 16  ;;  %v3565_v36 = vadd.f32 %v3533_v44, %v3468_v46  ;;  %v4719_v39 = vld [vmem:[#allocation3 + $0x70] sm:$0xf0]  ;;  %v3393_v3 = vpop.f32.mrb[33].mxu0 }
 0x239   : > { %v3534_v15 = vmul.f32 %v12003_v59, %v3501_v11  ;;  %5800 = vrot.lane.b32.xlu1 %v4096_v56, %s10736_s20  ;;  %v5218_v30 = vrot.slane %v5216_v52, 3  ;;  %v4547_v32 = vshll.u32 %v4421_v49, 16  ;;  %v5221_v57 = vrot.slane %v5219_v21, 4  ;;  %v3394_v4 = vpop.f32.mrb[34].mxu0  ;;  %v4815_v12 = vld [vmem:[#allocation3 + $0x78] sm:$0x1f] }
 0x23a   : > { %v5230_v61 = vor.u32 %v5229_v63, %v5226_v54  ;;  %v4546_v37 = vrot.slane %v4544_v10, 3  ;;  %v4552_v47 = vshrl.u32 %v4422_v60, 16  ;;  %v3392_v19 = vadd.f32 %v12342_v0, %v3391_v35  ;;  %v3396_v34 = vpop.f32.mrb[35].mxu0 }
 0x23b   : > { %v3566_v23 = vadd.f32 %v3534_v15, %v3469_v31  ;;  %v4549_v51 = vrot.slane %v4547_v32, 4  ;;  %v4555_v5 = vshll.u32 %v4422_v60, 16  ;;  %v5222_v25 = vor.u32 %v5221_v57, %v5218_v30  ;;  %v5789_v34 = vpop.permute.xlu1 %5788 }
 0x23c   : > { %v4554_v7 = vrot.slane %v4552_v47, 3  ;;  %v4928_v46 = vshrl.u32 %v4719_v39, 16  ;;  %v4931_v27 = vshll.u32 %v4719_v39, 16  ;;  %v3470_v18 = vmax.f32 %v3392_v19, 0.0 }
 0x23d   : > { %v12462_v41 = vpack.c.bf16 %v3566_v23, %v3565_v36  ;;  %v3502_v45 = vmin.f32 %v3392_v19, 0.0  ;;  %v3395_v20 = vadd.f32 %v12342_v0, %v3394_v4  ;;  %v5231_v54 = vsel %vm644_vm8, %v5222_v25, %v5230_v61  ;;  %v4128_v36 = vld [vmem:[#allocation3 + $0x78] sm:$0x1f] }
 0x23e   : > { %v4550_v62 = vor.u32 %v4549_v51, %v4546_v37  ;;  %v4557_v44 = vrot.slane %v4555_v5, 4  ;;  %v4930_v31 = vrot.slane %v4928_v46, 4  ;;  %5924 = vrot.lane.b32.xlu0 %v5231_v54, %s10738_s25  ;;  %v4933_v63 = vrot.slane %v4931_v27, 5  ;;  %v3399_v47 = vpop.f32.mrb[36].mxu0 }
 0x23f   : > { %14756 = vst [vmem:[#allocation18_spill] sm:$0xff] %v12462_v41  ;;  %v3662_v11 = vrot.slane %v12462_v41, 4  ;;  %v3535_v52 = vmul.f32 %v12003_v59, %v3502_v45  ;;  %v3471_v49 = vmax.f32 %v3395_v20, 0.0  ;;  %v3503_v56 = vmin.f32 %v3395_v20, 0.0  ;;  %v3401_v5 = vpop.f32.mrb[37].mxu0 }
 0x240   : > { %v4558_v21 = vor.u32 %v4557_v44, %v4554_v7  ;;  %v4936_v60 = vshrl.u32 %v4815_v12, 16  ;;  %v4939_v10 = vshll.u32 %v4815_v12, 16  ;;  %v4257_v32 = vshrl.u32 %v12452_v16, 16  ;;  %v3402_v46 = vpop.f32.mrb[38].mxu0 }
 0x241   : > { %3703 = vst.msk [vmem:[#allocation3 + $0x80] sm:$0xf0] %vm3687_vm1, %v3662_v11  ;;  %v3567_v15 = vadd.f32 %v3535_v52, %v3470_v18  ;;  %v3536_v30 = vmul.f32 %v12003_v59, %v3503_v56  ;;  %v4260_v39 = vshll.u32 %v12452_v16, 16  ;;  %v4934_v57 = vor.u32 %v4933_v63, %v4930_v31  ;;  %v3404_v20 = vpop.f32.mrb[39].mxu0 }
 0x242   : > { %3704 = vst.msk [vmem:[#allocation3 + $0x88] sm:$0xf] %vm3689_vm2, %v3662_v11  ;;  %v4559_v35 = vsel %vm644_vm8, %v4550_v62, %v4558_v21  ;;  %v4938_v61 = vrot.slane %v4936_v60, 4  ;;  %v4941_v37 = vrot.slane %v4939_v10, 5  ;;  %v4259_v19 = vrot.slane %v4257_v32, 4 }
 0x243   : > { %v3568_v23 = vadd.f32 %v3536_v30, %v3471_v49  ;;  %5862 = vrot.lane.b32.xlu1 %v4559_v35, %s10741_s12  ;;  %v4262_v3 = vrot.slane %v4260_v39, 5  ;;  %v4265_v51 = vshrl.u32 %v4128_v36, 16  ;;  %v4268_v25 = vshll.u32 %v4128_v36, 16 }
 0x244   : > { %v4942_v4 = vor.u32 %v4941_v37, %v4938_v61  ;;  %v3400_v7 = vadd.f32 %v12342_v0, %v3399_v47  ;;  %v3403_v45 = vadd.f32 %v12342_v0, %v3402_v46 }
 0x245   : > { %v12478_v27 = vpack.c.bf16 %v3568_v23, %v3567_v15  ;;  %v4267_v18 = vrot.slane %v4265_v51, 4  ;;  %v4263_v62 = vor.u32 %v4262_v3, %v4259_v19  ;;  %v4270_v44 = vrot.slane %v4268_v25, 5 }
 0x246   : > { %v4943_v54 = vsel %vm1030_vm5, %v4934_v57, %v4942_v4  ;;  %v3504_v31 = vmin.f32 %v3400_v7, 0.0  ;;  %v3472_v52 = vmax.f32 %v3400_v7, 0.0  ;;  %v3473_v49 = vmax.f32 %v3403_v45, 0.0 }
 0x247   : > { %14757 = vst [vmem:[#allocation19_spill] sm:$0xff] %v12478_v27  ;;  %v3663_v11 = vrot.slane %v12478_v27, 4  ;;  %5894 = vrot.lane.b32.xlu0 %v4943_v54, %s10736_s20  ;;  %v3505_v56 = vmin.f32 %v3403_v45, 0.0  ;;  %v4271_v21 = vor.u32 %v4270_v44, %v4267_v18  ;;  %v12488_v15 = vsel %vm2952_vm7, %v12398_v17, %v5789_v34  ;;  %v3407_v54 = vpop.f32.mrb[40].mxu0 }
 0x248   : > { %v5408_v60 = vld [vmem:[#allocation3 + $0x80] sm:$0xf0]  ;;  %v3537_v36 = vmul.f32 %v12003_v59, %v3504_v31 }
 0x249   : > { %v5111_v63 = vld [vmem:[#allocation3 + $0x88] sm:$0xf]  ;;  %3705 = vst.msk [vmem:[#allocation3 + $0x90] sm:$0xf0] %vm3687_vm1, %v3663_v11  ;;  %v5468_v32 = vrot.slane %v5408_v60, 4  ;;  %v3538_v61 = vmul.f32 %v12003_v59, %v3505_v56  ;;  %v4272_v37 = vsel %vm1030_vm5, %v4263_v62, %v4271_v21  ;;  %v3409_v56 = vpop.f32.mrb[41].mxu0 }
 0x24a   : > { %v3738_v10 = vld [vmem:[#allocation3 + $0x88] sm:$0xf]  ;;  %3706 = vst.msk [vmem:[#allocation3 + $0x98] sm:$0xf] %vm3689_vm2, %v3663_v11  ;;  %v5469_v39 = vrot.slane %v5111_v63, 4  ;;  %v3569_v17 = vadd.f32 %v3537_v36, %v3472_v52  ;;  %v5241_v19 = vshrl.u32 %v5111_v63, 16  ;;  %5832 = vrot.lane.b32.xlu1 %v4272_v37, %s10738_s25 }
 0x24b   : > { %v12494_v35 = vld [vmem:[#allocation3 + $0x80] sm:$0xf0]  ;;  %v4098_v57 = vrot.slane %v3738_v10, 4  ;;  %v3570_v5 = vadd.f32 %v3538_v61, %v3473_v49  ;;  %v4424_v7 = vld [vmem:[#allocation3 + $0x88] sm:$0xf]  ;;  %v5244_v45 = vshll.u32 %v5111_v63, 16 }
 0x24c   : > { %v4097_v47 = vrot.slane %v12494_v35, 4  ;;  %v5110_v23 = vld [vmem:[#allocation3 + $0x80] sm:$0xf8]  ;;  %v5470_v51 = vsel %vm965_vm3, %v5468_v32, %v5469_v39  ;;  %v5243_v18 = vrot.slane %v5241_v19, 3  ;;  %v4816_v52 = vld [vmem:[#allocation3 + $0x88] sm:$0x1f] }
 0x24d   : > { %v4423_v3 = vld [vmem:[#allocation3 + $0x80] sm:$0xf8]  ;;  %v5233_v4 = vshrl.u32 %v5110_v23, 16  ;;  %v5236_v25 = vshll.u32 %v5110_v23, 16  ;;  %5958 = vrot.lane.b32.xlu0 %v5470_v51, %s10741_s12  ;;  %v12503_v62 = vpack.c.bf16 %v3570_v5, %v3569_v17  ;;  %v5246_v49 = vrot.slane %v5244_v45, 4  ;;  %v3410_v36 = vpop.f32.mrb[42].mxu0 }
 0x24e   : > { %v4099_v46 = vsel %vm965_vm3, %v4097_v47, %v4098_v57  ;;  %v4561_v20 = vshrl.u32 %v4423_v3, 16  ;;  %v4720_v34 = vld [vmem:[#allocation3 + $0x80] sm:$0xf0]  ;;  %v4564_v11 = vshll.u32 %v4423_v3, 16  ;;  %v4569_v60 = vshrl.u32 %v4424_v7, 16  ;;  %v3412_v61 = vpop.f32.mrb[43].mxu0 }
 0x24f   : > { %14758 = vst [vmem:[#allocation20_spill] sm:$0xff] %v12503_v62  ;;  %v5235_v44 = vrot.slane %v5233_v4, 3  ;;  %v5238_v31 = vrot.slane %v5236_v25, 4  ;;  %v4572_v10 = vshll.u32 %v4424_v7, 16  ;;  %5802 = vrot.lane.b32.xlu1 %v4099_v46, %s10736_s20  ;;  %v3664_v32 = vrot.slane %v12503_v62, 4 }
 0x250   : > { %v4563_v21 = vrot.slane %v4561_v20, 3  ;;  %v4566_v39 = vrot.slane %v4564_v11, 4  ;;  %v4945_v57 = vshrl.u32 %v4720_v34, 16  ;;  %v5247_v37 = vor.u32 %v5246_v49, %v5243_v18  ;;  %v4129_v19 = vld [vmem:[#allocation3 + $0x88] sm:$0x1f] }
 0x251   : > { %v5239_v63 = vor.u32 %v5238_v31, %v5235_v44  ;;  %v4571_v47 = vrot.slane %v4569_v60, 3  ;;  %v4574_v17 = vrot.slane %v4572_v10, 4  ;;  %v4948_v23 = vshll.u32 %v4720_v34, 16  ;;  %3707 = vst.msk [vmem:[#allocation3 + $0xa0] sm:$0xf0] %vm3687_vm1, %v3664_v32 }
 0x252   : > { %3708 = vst.msk [vmem:[#allocation3 + $0xa8] sm:$0xf] %vm3689_vm2, %v3664_v32  ;;  %v4567_v3 = vor.u32 %v4566_v39, %v4563_v21  ;;  %v4947_v51 = vrot.slane %v4945_v57, 4  ;;  %v4953_v5 = vshrl.u32 %v4816_v52, 16  ;;  %v4956_v4 = vshll.u32 %v4816_v52, 16  ;;  %v12517_v52 = vpop.permute.xlu0 %5882 }
 0x253   : > { %v12509_v25 = vld [vmem:[#allocation3 + $0x98] sm:$0xf]  ;;  %v5248_v7 = vsel %vm644_vm8, %v5239_v63, %v5247_v37  ;;  %v4575_v46 = vor.u32 %v4574_v17, %v4571_v47  ;;  %v4950_v45 = vrot.slane %v4948_v23, 5  ;;  %v4274_v18 = vshrl.u32 %v12494_v35, 16  ;;  %v5409_v20 = vld [vmem:[#allocation3 + $0x90] sm:$0xf0] }
 0x254   : > { %v3740_v44 = vld [vmem:[#allocation3 + $0x98] sm:$0xf]  ;;  %5926 = vrot.lane.b32.xlu0 %v5248_v7, %s10738_s25  ;;  %v4955_v34 = vrot.slane %v4953_v5, 4  ;;  %v4958_v31 = vrot.slane %v4956_v4, 5  ;;  %v4277_v11 = vshll.u32 %v12494_v35, 16  ;;  %v4282_v56 = vshrl.u32 %v4129_v19, 16  ;;  %v12525_v4 = vpop.permute.xlu1 %5850 }
 0x255   : > { %v12515_v49 = vld [vmem:[#allocation3 + $0x90] sm:$0xf0]  ;;  %v4576_v21 = vsel %vm644_vm8, %v4567_v3, %v4575_v46  ;;  %v4951_v60 = vor.u32 %v4950_v45, %v4947_v51  ;;  %v4276_v10 = vrot.slane %v4274_v18, 4  ;;  %v4285_v32 = vshll.u32 %v4129_v19, 16  ;;  %v12521_v47 = vpop.f32.mrb[44].mxu0 }
 0x256   : > { %5864 = vrot.lane.b32.xlu1 %v4576_v21, %s10741_s12  ;;  %v4959_v63 = vor.u32 %v4958_v31, %v4955_v34  ;;  %v4279_v39 = vrot.slane %v4277_v11, 5  ;;  %v4284_v57 = vrot.slane %v4282_v56, 4  ;;  %v5471_v61 = vrot.slane %v5409_v20, 4  ;;  %v5112_v37 = vld [vmem:[#allocation3 + $0x90] sm:$0xf8]  ;;  %v3417_v46 = vpop.f32.mrb[45].mxu0 }
 0x257   : > { %v4287_v35 = vrot.slane %v4285_v32, 5  ;;  %v5472_v17 = vrot.slane %v12509_v25, 4  ;;  %v4100_v23 = vrot.slane %v12515_v49, 4  ;;  %v4101_v5 = vrot.slane %v3740_v44, 4  ;;  %v4425_v31 = vld [vmem:[#allocation3 + $0x90] sm:$0xf8] }
 0x258   : > { %v4960_v3 = vsel %vm1030_vm5, %v4951_v60, %v4959_v63  ;;  %v4280_v19 = vor.u32 %v4279_v39, %v4276_v10  ;;  %v3408_v51 = vadd.f32 %v12342_v0, %v3407_v54  ;;  %v3411_v7 = vadd.f32 %v12342_v0, %v3410_v36  ;;  %v12533_v44 = vpop.f32.mrb[46].mxu0  ;;  %v4426_v10 = vld [vmem:[#allocation3 + $0x98] sm:$0xf]  ;;  %v12535_v54 = vpop.permute.xlu0 %5946 }
 0x259   : > { %5896 = vrot.lane.b32.xlu0 %v4960_v3, %s10736_s20  ;;  %v4288_v45 = vor.u32 %v4287_v35, %v4284_v57  ;;  %v5473_v18 = vsel %vm965_vm3, %v5471_v61, %v5472_v17  ;;  %v4102_v20 = vsel %vm965_vm3, %v4100_v23, %v4101_v5  ;;  %v5250_v34 = vshrl.u32 %v5112_v37, 16  ;;  %v3420_v57 = vpop.f32.mrb[47].mxu0  ;;  %v4818_v27 = vld [vmem:[#allocation3 + $0xa8] sm:$0x1f] }
 0x25a   : > { %v3474_v11 = vmax.f32 %v3408_v51, 0.0  ;;  %v3506_v56 = vmin.f32 %v3408_v51, 0.0  ;;  %v3475_v21 = vmax.f32 %v3411_v7, 0.0  ;;  %v3507_v60 = vmin.f32 %v3411_v7, 0.0  ;;  %v4721_v7 = vld [vmem:[#allocation3 + $0x90] sm:$0xf0] }
 0x25b   : > { %v4289_v36 = vsel %vm1030_vm5, %v4280_v19, %v4288_v45  ;;  %v5252_v32 = vrot.slane %v5250_v34, 3  ;;  %v5253_v63 = vshll.u32 %v5112_v37, 16  ;;  %v5258_v39 = vshrl.u32 %v12509_v25, 16  ;;  %v12544_v37 = vpop.permute.xlu1 %5820  ;;  %v4817_v57 = vld [vmem:[#allocation3 + $0x98] sm:$0x1f] }
 0x25c   : > { %5834 = vrot.lane.b32.xlu1 %v4289_v36, %s10738_s25  ;;  %v3539_v61 = vmul.f32 %v12003_v59, %v3506_v56  ;;  %v3540_v35 = vmul.f32 %v12003_v59, %v3507_v60  ;;  %v5261_v17 = vshll.u32 %v12509_v25, 16  ;;  %v4578_v23 = vshrl.u32 %v4425_v31, 16  ;;  %v12549_v12 = vpop.permute.xlu0 %5914 }
 0x25d   : > { %5960 = vrot.lane.b32.xlu0 %v5473_v18, %s10741_s12  ;;  %v5255_v5 = vrot.slane %v5253_v63, 4  ;;  %v5260_v3 = vrot.slane %v5258_v39, 3  ;;  %v4581_v51 = vshll.u32 %v4425_v31, 16  ;;  %v4586_v19 = vshrl.u32 %v4426_v10, 16  ;;  %v4130_v39 = vld [vmem:[#allocation3 + $0x98] sm:$0x1f] }
 0x25e   : > { %v3571_v46 = vadd.f32 %v3539_v61, %v3474_v11  ;;  %v3572_v45 = vadd.f32 %v3540_v35, %v3475_v21  ;;  %v5263_v34 = vrot.slane %v5261_v17, 4  ;;  %v4580_v36 = vrot.slane %v4578_v23, 3  ;;  %v12551_v35 = vld [vmem:[#allocation3 + $0xa8] sm:$0xf]  ;;  %v5410_v23 = vld [vmem:[#allocation3 + $0xa0] sm:$0xf0] }
 0x25f   : > { %v5256_v56 = vor.u32 %v5255_v5, %v5252_v32  ;;  %v4583_v50 = vrot.slane %v4581_v51, 4  ;;  %v4588_v60 = vrot.slane %v4586_v19, 3  ;;  %v4589_v30 = vshll.u32 %v4426_v10, 16 }
 0x260   : > { %5804 = vrot.lane.b32.xlu1 %v4102_v20, %s10736_s20  ;;  %v12547_v25 = vpack.c.bf16 %v3572_v45, %v3571_v46  ;;  %v5264_v18 = vor.u32 %v5263_v34, %v5260_v3  ;;  %v4962_v63 = vshrl.u32 %v4721_v7, 16  ;;  %v4965_v31 = vshll.u32 %v4721_v7, 16 }
 0x261   : > { %v4584_v16 = vor.u32 %v4583_v50, %v4580_v36  ;;  %v4591_v11 = vrot.slane %v4589_v30, 4  ;;  %v4970_v21 = vshrl.u32 %v4817_v57, 16  ;;  %v4973_v61 = vshll.u32 %v4817_v57, 16  ;;  %v3742_v50 = vld [vmem:[#allocation3 + $0xa8] sm:$0xf]  ;;  %v12557_v30 = vpop.permute.xlu1 %5790  ;;  %v12567_v57 = vld [vmem:[%s14712_s3 + $0x80] sm:$0xff]  }
 0x262   : > { %14759 = vst [vmem:[#allocation21_spill] sm:$0xff] %v12547_v25  ;;  %v3665_v32 = vrot.slane %v12547_v25, 4  ;;  %v5265_v10 = vsel %vm644_vm8, %v5256_v56, %v5264_v18  ;;  %v4964_v17 = vrot.slane %v4962_v63, 4  ;;  %v4967_v20 = vrot.slane %v4965_v31, 5  ;;  %v12562_v36 = vld [vmem:[#allocation3 + $0xa0] sm:$0xf0]  ;;  %10328 = vmatprep.subr.bf16.mxu1 %v12567_v57 }
 0x263   : > { %5928 = vrot.lane.b32.xlu0 %v5265_v10, %s10738_s25  ;;  %v4592_v5 = vor.u32 %v4591_v11, %v4588_v60  ;;  %v4972_v3 = vrot.slane %v4970_v21, 4  ;;  %v4975_v51 = vrot.slane %v4973_v61, 5  ;;  %v4291_v19 = vshrl.u32 %v12515_v49, 16  ;;  %v5114_v31 = vld [vmem:[#allocation3 + $0xa0] sm:$0xf8]  ;;  %v12570_v11 = vpop.f32.mrb[48].mxu0 }
 0x264   : > { %3709 = vst.msk [vmem:[#allocation3 + $0xb0] sm:$0xf0] %vm3687_vm1, %v3665_v32  ;;  %v4968_v7 = vor.u32 %v4967_v20, %v4964_v17  ;;  %v4294_v46 = vshll.u32 %v12515_v49, 16  ;;  %v4299_v45 = vshrl.u32 %v4130_v39, 16  ;;  %v4302_v34 = vshll.u32 %v4130_v39, 16  ;;  %v3425_v10 = vpop.f32.mrb[49].mxu0 }
 0x265   : > { %3710 = vst.msk [vmem:[#allocation3 + $0xb8] sm:$0xf] %vm3689_vm2, %v3665_v32  ;;  %v4593_v56 = vsel %vm644_vm8, %v4584_v16, %v4592_v5  ;;  %v4976_v60 = vor.u32 %v4975_v51, %v4972_v3  ;;  %v4293_v18 = vrot.slane %v4291_v19, 4  ;;  %v5474_v63 = vrot.slane %v5410_v23, 4  ;;  %v12574_v32 = vpop.permute.xlu0 %5884  ;;  %v12581_v5 = vpop.f32.mrb[50].mxu0 }
 0x266   : > { %5866 = vrot.lane.b32.xlu1 %v4593_v56, %s10741_s12  ;;  %v4296_v49 = vrot.slane %v4294_v46, 5  ;;  %v4301_v21 = vrot.slane %v4299_v45, 4  ;;  %v4304_v39 = vrot.slane %v4302_v34, 5  ;;  %v5475_v61 = vrot.slane %v12551_v35, 4  ;;  %v3428_v45 = vpop.f32.mrb[51].mxu0  ;;  %v12588_v10 = vpop.permute.xlu1 %5852 }
 0x267   : > { %v4977_v16 = vsel %vm1030_vm5, %v4968_v7, %v4976_v60  ;;  %v4103_v17 = vrot.slane %v12562_v36, 4  ;;  %v4104_v20 = vrot.slane %v3742_v50, 4  ;;  %v3416_v23 = vadd.f32 %v12342_v0, %v12521_v47  ;;  %v4427_v60 = vld [vmem:[#allocation3 + $0xa0] sm:$0xf8] }
 0x268   : > { %5898 = vrot.lane.b32.xlu0 %v4977_v16, %s10736_s20  ;;  %v4297_v3 = vor.u32 %v4296_v49, %v4293_v18  ;;  %v4305_v51 = vor.u32 %v4304_v39, %v4301_v21  ;;  %v5476_v19 = vsel %vm965_vm3, %v5474_v63, %v5475_v61  ;;  %v3419_v46 = vadd.f32 %v12342_v0, %v12533_v44  ;;  %v4428_v49 = vld [vmem:[#allocation3 + $0xa8] sm:$0xf] }
 0x269   : > { %v4105_v7 = vsel %vm965_vm3, %v4103_v17, %v4104_v20  ;;  %v3476_v34 = vmax.f32 %v3416_v23, 0.0  ;;  %v3508_v56 = vmin.f32 %v3416_v23, 0.0  ;;  %v5267_v50 = vshrl.u32 %v5114_v31, 16 }
 0x26a   : > { %v4306_v47 = vsel %vm1030_vm5, %v4297_v3, %v4305_v51  ;;  %v3477_v8 = vmax.f32 %v3419_v46, 0.0  ;;  %v3509_v16 = vmin.f32 %v3419_v46, 0.0  ;;  %v5270_v18 = vshll.u32 %v5114_v31, 16  ;;  %v12597_v3 = vpop.permute.xlu0 %5948 }
 0x26b   : > { %5836 = vrot.lane.b32.xlu1 %v4306_v47, %s10738_s25  ;;  %v3541_v63 = vmul.f32 %v12003_v59, %v3508_v56  ;;  %v5269_v44 = vrot.slane %v5267_v50, 3  ;;  %v5275_v21 = vshrl.u32 %v12551_v35, 16  ;;  %v5278_v39 = vshll.u32 %v12551_v35, 16  ;;  %v4722_v47 = vld [vmem:[#allocation3 + $0xa0] sm:$0xf0] }
 0x26c   : > { %5962 = vrot.lane.b32.xlu0 %v5476_v19, %s10741_s12  ;;  %v3542_v61 = vmul.f32 %v12003_v59, %v3509_v16  ;;  %v5272_v17 = vrot.slane %v5270_v18, 4  ;;  %v4595_v20 = vshrl.u32 %v4427_v60, 16  ;;  %v4598_v23 = vshll.u32 %v4427_v60, 16  ;;  %v12603_v18 = vpop.permute.xlu1 %5822 }
 0x26d   : > { %v3573_v31 = vadd.f32 %v3541_v63, %v3476_v34  ;;  %v5277_v51 = vrot.slane %v5275_v21, 3  ;;  %v5280_v46 = vrot.slane %v5278_v39, 4  ;;  %v4603_v45 = vshrl.u32 %v4428_v49, 16 }
 0x26e   : > { %v3574_v56 = vadd.f32 %v3542_v61, %v3477_v8  ;;  %v5273_v50 = vor.u32 %v5272_v17, %v5269_v44  ;;  %v4597_v25 = vrot.slane %v4595_v20, 3  ;;  %v4600_v62 = vrot.slane %v4598_v23, 4  ;;  %v12613_v23 = vld [vmem:[#allocation3 + $0xb8] sm:$0xf] }
 0x26f   : > { %v6108_v35 = vsel %vm2952_vm7, %v12068_v33, %v12517_v52  ;;  %5806 = vrot.lane.b32.xlu1 %v4105_v7, %s10736_s20  ;;  %v5281_v19 = vor.u32 %v5280_v46, %v5277_v51  ;;  %v4605_v60 = vrot.slane %v4603_v45, 3  ;;  %v4606_v16 = vshll.u32 %v4428_v49, 16  ;;  %v4131_v33 = vld [vmem:[#allocation3 + $0xa8] sm:$0x1f]  ;;  %v5411_v46 = vld [vmem:[#allocation3 + $0xb0] sm:$0xf0] }
 0x270   : > { %v12605_v34 = vpack.c.bf16 %v3574_v56, %v3573_v31  ;;  %v4601_v63 = vor.u32 %v4600_v62, %v4597_v25  ;;  %v6155_v8 = vsel %vm3018_vm10, %v6108_v35, %v12549_v12  ;;  %v4979_v44 = vshrl.u32 %v4722_v47, 16  ;;  %v12615_v62 = vpop.permute.xlu0 %5916 }
 0x271   : > { %v5282_v21 = vsel %vm644_vm8, %v5273_v50, %v5281_v19  ;;  %v4608_v39 = vrot.slane %v4606_v16, 4  ;;  %v4982_v61 = vshll.u32 %v4722_v47, 16  ;;  %v4987_v17 = vshrl.u32 %v4818_v27, 16  ;;  %v12620_v50 = vld [vmem:[#allocation3 + $0xb0] sm:$0xf0] }
 0x272   : > { %14760 = vst [vmem:[#allocation22_spill] sm:$0xff] %v12605_v34  ;;  %v3666_v52 = vrot.slane %v12605_v34, 4  ;;  %5930 = vrot.lane.b32.xlu0 %v5282_v21, %s10738_s25  ;;  %v4981_v7 = vrot.slane %v4979_v44, 4  ;;  %v4990_v49 = vshll.u32 %v4818_v27, 16  ;;  %v4308_v20 = vshrl.u32 %v12562_v36, 16 }
 0x273   : > { %v4609_v12 = vor.u32 %v4608_v39, %v4605_v60  ;;  %v4984_v25 = vrot.slane %v4982_v61, 5  ;;  %v4989_v31 = vrot.slane %v4987_v17, 4  ;;  %v4311_v51 = vshll.u32 %v12562_v36, 16  ;;  %v3744_v44 = vld [vmem:[#allocation3 + $0xb8] sm:$0xf]  ;;  %v12625_v36 = vpop.permute.xlu1 %5792 }
 0x274   : > { %3711 = vst.msk [vmem:[#allocation3 + $0xc0] sm:$0xf0] %vm3687_vm1, %v3666_v52  ;;  %v4992_v45 = vrot.slane %v4990_v49, 5  ;;  %v4310_v47 = vrot.slane %v4308_v20, 4  ;;  %v4316_v56 = vshrl.u32 %v4131_v33, 16  ;;  %v4319_v27 = vshll.u32 %v4131_v33, 16 }
 0x275   : > { %3712 = vst.msk [vmem:[#allocation3 + $0xc8] sm:$0xf] %vm3689_vm2, %v3666_v52  ;;  %v4610_v35 = vsel %vm644_vm8, %v4601_v63, %v4609_v12  ;;  %v4985_v19 = vor.u32 %v4984_v25, %v4981_v7  ;;  %v4313_v16 = vrot.slane %v4311_v51, 5  ;;  %v6187_v60 = vsel %vm3084_vm12, %v6155_v8, %v12535_v54  ;;  %v5116_v33 = vld [vmem:[#allocation3 + $0xb0] sm:$0xf8]  ;;  %v12636_v25 = vpop.permute.xlu0 %5886 }
 0x276   : > { %5868 = vrot.lane.b32.xlu1 %v4610_v35, %s10741_s12  ;;  %v4993_v21 = vor.u32 %v4992_v45, %v4989_v31  ;;  %v4318_v39 = vrot.slane %v4316_v56, 4  ;;  %v4321_v61 = vrot.slane %v4319_v27, 5  ;;  %6465 = vmatprep.mubr.bf16.mxu1 %v6187_v60  ;;  %v6059_v17 = vsel %vm3084_vm12, %v12414_v22, %v12525_v4  ;;  %v12648_v45 = vpop.f32.mrb[52].mxu0  ;;  %v4430_v27 = vld [vmem:[#allocation3 + $0xb8] sm:$0xf] }
 0x277   : > { %v4314_v63 = vor.u32 %v4313_v16, %v4310_v47  ;;  %6466 = vmatmul.mubr.bf16.vlgmr.msra.gmra.mrb[0].mxu1 %v6059_v17  ;;  %v5477_v52 = vrot.slane %v5411_v46, 4  ;;  %v5478_v7 = vrot.slane %v12613_v23, 4  ;;  %v4106_v54 = vrot.slane %v12620_v50, 4  ;;  %v4429_v46 = vld [vmem:[#allocation3 + $0xb0] sm:$0xf8]  ;;  %v12653_v60 = vpop.permute.xlu1 %5854 }
 0x278   : > { %v4994_v8 = vsel %vm1030_vm5, %v4985_v19, %v4993_v21  ;;  %v4322_v49 = vor.u32 %v4321_v61, %v4318_v39  ;;  %v4107_v20 = vrot.slane %v3744_v44, 4  ;;  %v3424_v12 = vadd.f32 %v12342_v0, %v12570_v11  ;;  %10329 = vmatpush3.bf16.msra.mxu1 %v12567_v57 }
 0x279   : > { %v12642_v22 = vsel %vm3018_vm10, %v12488_v15, %v12544_v37  ;;  %5900 = vrot.lane.b32.xlu0 %v4994_v8, %s10736_s20  ;;  %v5479_v4 = vsel %vm965_vm3, %v5477_v52, %v5478_v7  ;;  %v3427_v31 = vadd.f32 %v12342_v0, %v12581_v5  ;;  %v5284_v51 = vshrl.u32 %v5116_v33, 16  ;;  %v3433_v15 = vpop.f32.mrb[53].mxu0  ;;  %v12658_v39 = vpop.permute.xlu0 %5950 }
 0x27a   : > { %v4323_v11 = vsel %vm1030_vm5, %v4314_v63, %v4322_v49  ;;  %v4108_v57 = vsel %vm965_vm3, %v4106_v54, %v4107_v20  ;;  %v3478_v47 = vmax.f32 %v3424_v12, 0.0  ;;  %v3510_v56 = vmin.f32 %v3424_v12, 0.0  ;;  %v12660_v61 = vpop.f32.mrb[54].mxu0  ;;  %v4723_v20 = vld [vmem:[#allocation3 + $0xb0] sm:$0xf0] }
 0x27b   : > { %5838 = vrot.lane.b32.xlu1 %v4323_v11, %s10738_s25  ;;  %v3479_v37 = vmax.f32 %v3427_v31, 0.0  ;;  %v3511_v35 = vmin.f32 %v3427_v31, 0.0  ;;  %v5286_v19 = vrot.slane %v5284_v51, 3  ;;  %v5287_v16 = vshll.u32 %v5116_v33, 16  ;;  %v3436_v7 = vpop.f32.mrb[55].mxu0 }
 0x27c   : > { %v3543_v0 = vmul.f32 %v12003_v59, %v3510_v56  ;;  %v5292_v5 = vshrl.u32 %v12613_v23, 16  ;;  %v5295_v44 = vshll.u32 %v12613_v23, 16  ;;  %v4612_v21 = vshrl.u32 %v4429_v46, 16  ;;  %v4819_v11 = vld [vmem:[#allocation3 + $0xb8] sm:$0x1f] }
 0x27d   : > { %5964 = vrot.lane.b32.xlu0 %v5479_v4, %s10741_s12  ;;  %v3544_v17 = vmul.f32 %v12003_v59, %v3511_v35  ;;  %v5289_v63 = vrot.slane %v5287_v16, 4  ;;  %v4615_v52 = vshll.u32 %v4429_v46, 16  ;;  %v4620_v33 = vshrl.u32 %v4430_v27, 16 }
 0x27e   : > { %v6111_v54 = vsel %vm2952_vm7, %v12275_v38, %v12574_v32  ;;  %v5294_v8 = vrot.slane %v5292_v5, 3  ;;  %v5297_v49 = vrot.slane %v5295_v44, 4  ;;  %v4614_v23 = vrot.slane %v4612_v21, 3 }
 0x27f   : > { %5808 = vrot.lane.b32.xlu1 %v4108_v57, %s10736_s20  ;;  %v3575_v12 = vadd.f32 %v3543_v0, %v3478_v47  ;;  %v3576_v31 = vadd.f32 %v3544_v17, %v3479_v37  ;;  %v5290_v51 = vor.u32 %v5289_v63, %v5286_v19  ;;  %v4617_v4 = vrot.slane %v4615_v52, 4  ;;  %v4132_v37 = vld [vmem:[#allocation3 + $0xb8] sm:$0x1f]  ;;  %v12673_v19 = vpop.permute.xlu1 %5824  ;;  %v12675_v0 = vpop.permute.xlu0 %5918 }
 0x280   : > { %v5298_v56 = vor.u32 %v5297_v49, %v5294_v8  ;;  %v4622_v15 = vrot.slane %v4620_v33, 3  ;;  %v4623_v46 = vshll.u32 %v4430_v27, 16  ;;  %v6157_v35 = vsel %vm3018_vm10, %v6111_v54, %v12615_v62  ;;  %v5119_v8 = vld [vmem:[#allocation3 + $0xc8] sm:$0xf] }
 0x281   : > { %v12670_v16 = vpack.c.bf16 %v3576_v31, %v3575_v12  ;;  %v4618_v38 = vor.u32 %v4617_v4, %v4614_v23  ;;  %v4996_v32 = vshrl.u32 %v4723_v20, 16  ;;  %v4999_v5 = vshll.u32 %v4723_v20, 16  ;;  %v5412_v31 = vld [vmem:[#allocation3 + $0xc0] sm:$0xf0] }
 0x282   : > { %v5299_v44 = vsel %vm644_vm8, %v5290_v51, %v5298_v56  ;;  %v4625_v21 = vrot.slane %v4623_v46, 4  ;;  %v5004_v57 = vshrl.u32 %v4819_v11, 16  ;;  %v5007_v47 = vshll.u32 %v4819_v11, 16  ;;  %v12686_v46 = vld [vmem:[#allocation3 + $0xc0] sm:$0xf0] }
 0x283   : > { %14761 = vst [vmem:[#allocation23_spill] sm:$0xff] %v12670_v16  ;;  %v3667_v27 = vrot.slane %v12670_v16, 4  ;;  %5932 = vrot.lane.b32.xlu0 %v5299_v44, %s10738_s25  ;;  %v4998_v62 = vrot.slane %v4996_v32, 4  ;;  %v5001_v17 = vrot.slane %v4999_v5, 5  ;;  %v4325_v63 = vshrl.u32 %v12620_v50, 16 }
 0x284   : > { %v4626_v52 = vor.u32 %v4625_v21, %v4622_v15  ;;  %v5006_v33 = vrot.slane %v5004_v57, 4  ;;  %v5009_v7 = vrot.slane %v5007_v47, 5  ;;  %v4328_v54 = vshll.u32 %v12620_v50, 16  ;;  %v3746_v15 = vld [vmem:[#allocation3 + $0xc8] sm:$0xf] }
 0x285   : > { %3713 = vst.msk [vmem:[#allocation3 + $0xd0] sm:$0xf0] %vm3687_vm1, %v3667_v27  ;;  %v5002_v49 = vor.u32 %v5001_v17, %v4998_v62  ;;  %v4327_v23 = vrot.slane %v4325_v63, 4  ;;  %v4333_v20 = vshrl.u32 %v4132_v37, 16  ;;  %v4336_v12 = vshll.u32 %v4132_v37, 16 }
 0x286   : > { %3714 = vst.msk [vmem:[#allocation3 + $0xd8] sm:$0xf] %vm3689_vm2, %v3667_v27  ;;  %v4627_v51 = vsel %vm644_vm8, %v4618_v38, %v4626_v52  ;;  %v5010_v4 = vor.u32 %v5009_v7, %v5006_v33  ;;  %v4330_v11 = vrot.slane %v4328_v54, 5  ;;  %v6190_v56 = vsel %vm3084_vm12, %v6157_v35, %v12597_v3  ;;  %v5118_v44 = vld [vmem:[#allocation3 + $0xc0] sm:$0xf8] }
 0x287   : > { %v5986_v50 = vsel %vm2952_vm7, %v12425_v26, %v12557_v30  ;;  %5870 = vrot.lane.b32.xlu1 %v4627_v51, %s10741_s12  ;;  %v4335_v32 = vrot.slane %v4333_v20, 4  ;;  %v4338_v5 = vrot.slane %v4336_v12, 5  ;;  %6473 = vmatprep.mubr.bf16.mxu1 %v6190_v56  ;;  %v6062_v38 = vsel %vm3084_vm12, %v12642_v22, %v12588_v10  ;;  %v12700_v26 = vpop.permute.xlu1 %5794  ;;  %v12702_v30 = vpop.permute.xlu0 %5888  ;;  %v12712_v27 = vld [vmem:[%s14711_s2] ss:$0 sm:$0xff]  ;;  %v4432_v12 = vld [vmem:[#allocation3 + $0xc8] sm:$0xf] }
 0x288   : > { %v12697_v3 = vsel %vm3018_vm10, %v5986_v50, %v12603_v18  ;;  %v5011_v35 = vsel %vm1030_vm5, %v5002_v49, %v5010_v4  ;;  %v4331_v21 = vor.u32 %v4330_v11, %v4327_v23  ;;  %6474 = vmatmul.mubr.bf16.gmra.mrb[4].mxu1 %v6062_v38  ;;  %v5480_v57 = vrot.slane %v5412_v31, 4 }
 0x289   : > { %5902 = vrot.lane.b32.xlu0 %v5011_v35, %s10736_s20  ;;  %v4339_v47 = vor.u32 %v4338_v5, %v4335_v32  ;;  %v5481_v37 = vrot.slane %v5119_v8, 4  ;;  %v4109_v10 = vrot.slane %v12686_v46, 4  ;;  %v4110_v22 = vrot.slane %v3746_v15, 4 }
 0x28a   : > { %v6114_v18 = vsel %vm2952_vm7, %v12356_v24, %v12636_v25  ;;  %v3432_v62 = vadd.f32 %v12712_v27, %v12648_v45  ;;  %v3435_v17 = vadd.f32 %v12712_v27, %v12660_v61  ;;  %v5301_v63 = vshrl.u32 %v5118_v44, 16  ;;  %v4431_v24 = vld [vmem:[#allocation3 + $0xc0] sm:$0xf8] }
 0x28b   : > { %v4340_v52 = vsel %vm1030_vm5, %v4331_v21, %v4339_v47  ;;  %v5482_v33 = vsel %vm965_vm3, %v5480_v57, %v5481_v37  ;;  %v4111_v7 = vsel %vm965_vm3, %v4109_v10, %v4110_v22  ;;  %v5304_v54 = vshll.u32 %v5118_v44, 16  ;;  %v12725_v50 = vpop.permute.xlu1 %5856  ;;  %v12727_v32 = vpop.permute.xlu0 %5952  ;;  %v4724_v21 = vld [vmem:[#allocation3 + $0xc0] sm:$0xf0]  ;;  %v4820_v22 = vld [vmem:[#allocation3 + $0xc8] sm:$0x1f] }
 0x28c   : > { %5840 = vrot.lane.b32.xlu1 %v4340_v52, %s10738_s25  ;;  %v3480_v25 = vmax.f32 %v3432_v62, 0.0  ;;  %v3512_v49 = vmin.f32 %v3432_v62, 0.0  ;;  %v3481_v23 = vmax.f32 %v3435_v17, 0.0  ;;  %v3513_v20 = vmin.f32 %v3435_v17, 0.0  ;;  %v12729_v57 = vpop.f32.mrb[56].mxu0 }
 0x28d   : > { %5966 = vrot.lane.b32.xlu0 %v5482_v33, %s10741_s12  ;;  %v5303_v45 = vrot.slane %v5301_v63, 3  ;;  %v5306_v61 = vrot.slane %v5304_v54, 4  ;;  %v5309_v31 = vshrl.u32 %v5119_v8, 16  ;;  %v5312_v51 = vshll.u32 %v5119_v8, 16  ;;  %v3441_v62 = vpop.f32.mrb[57].mxu0 }
 0x28e   : > { %v3545_v4 = vmul.f32 %v12003_v59, %v3512_v49  ;;  %v3546_v11 = vmul.f32 %v12003_v59, %v3513_v20  ;;  %v4629_v56 = vshrl.u32 %v4431_v24, 16  ;;  %v4632_v15 = vshll.u32 %v4431_v24, 16  ;;  %v12734_v54 = vpop.f32.mrb[58].mxu0 }
 0x28f   : > { %v5307_v5 = vor.u32 %v5306_v61, %v5303_v45  ;;  %v5311_v38 = vrot.slane %v5309_v31, 3  ;;  %v5314_v44 = vrot.slane %v5312_v51, 4  ;;  %v4637_v35 = vshrl.u32 %v4432_v12, 16  ;;  %v4133_v51 = vld [vmem:[#allocation3 + $0xc8] sm:$0x1f] }
 0x290   : > { %5810 = vrot.lane.b32.xlu1 %v4111_v7, %s10736_s20  ;;  %v3577_v8 = vadd.f32 %v3545_v4, %v3480_v25  ;;  %v3578_v47 = vadd.f32 %v3546_v11, %v3481_v23  ;;  %v4631_v37 = vrot.slane %v4629_v56, 3  ;;  %v4634_v10 = vrot.slane %v4632_v15, 4  ;;  %v3444_v7 = vpop.f32.mrb[59].mxu0  ;;  %v12742_v11 = vpop.permute.xlu1 %5826 }
 0x291   : > { %v5315_v17 = vor.u32 %v5314_v44, %v5311_v38  ;;  %v4639_v63 = vrot.slane %v4637_v35, 3  ;;  %v4640_v52 = vshll.u32 %v4432_v12, 16  ;;  %v6159_v33 = vsel %vm3018_vm10, %v6114_v18, %v12675_v0  ;;  %v12744_v56 = vpop.permute.xlu0 %5920  ;;  %v12747_v35 = vld [vmem:[#allocation3 + $0xd8] sm:$0xf] }
 0x292   : > { %v12736_v24 = vpack.c.bf16 %v3578_v47, %v3577_v8  ;;  %v4635_v49 = vor.u32 %v4634_v10, %v4631_v37  ;;  %v5013_v20 = vshrl.u32 %v4724_v21, 16  ;;  %v5016_v45 = vshll.u32 %v4724_v21, 16  ;;  %v5413_v10 = vld [vmem:[#allocation3 + $0xd0] sm:$0xf0] }
 0x293   : > { %v5316_v25 = vsel %vm644_vm8, %v5307_v5, %v5315_v17  ;;  %v4642_v23 = vrot.slane %v4640_v52, 4  ;;  %v5021_v61 = vshrl.u32 %v4820_v22, 16  ;;  %v5024_v31 = vshll.u32 %v4820_v22, 16  ;;  %v3748_v52 = vld [vmem:[#allocation3 + $0xd8] sm:$0xf] }
 0x294   : > { %14762 = vst [vmem:[#allocation24_spill] sm:$0xff] %v12736_v24  ;;  %v3668_v4 = vrot.slane %v12736_v24, 4  ;;  %5934 = vrot.lane.b32.xlu0 %v5316_v25, %s10738_s25  ;;  %v5015_v12 = vrot.slane %v5013_v20, 4  ;;  %v5018_v0 = vrot.slane %v5016_v45, 5  ;;  %v4342_v18 = vshrl.u32 %v12686_v46, 16 }
 0x295   : > { %v4643_v15 = vor.u32 %v4642_v23, %v4639_v63  ;;  %v5023_v38 = vrot.slane %v5021_v61, 4  ;;  %v5026_v44 = vrot.slane %v5024_v31, 5  ;;  %v4345_v5 = vshll.u32 %v12686_v46, 16  ;;  %v12754_v46 = vld [vmem:[#allocation3 + $0xd0] sm:$0xf0] }
 0x296   : > { %3715 = vst.msk [vmem:[#allocation3 + $0xe0] sm:$0xf0] %vm3687_vm1, %v3668_v4  ;;  %v5019_v21 = vor.u32 %v5018_v0, %v5015_v12  ;;  %v4344_v8 = vrot.slane %v4342_v18, 4  ;;  %v4350_v47 = vshrl.u32 %v4133_v51, 16  ;;  %v4353_v37 = vshll.u32 %v4133_v51, 16 }
 0x297   : > { %3716 = vst.msk [vmem:[#allocation3 + $0xe8] sm:$0xf] %vm3689_vm2, %v3668_v4  ;;  %v4644_v22 = vsel %vm644_vm8, %v4635_v49, %v4643_v15  ;;  %v5027_v62 = vor.u32 %v5026_v44, %v5023_v38  ;;  %v4347_v17 = vrot.slane %v4345_v5, 5  ;;  %v6193_v63 = vsel %vm3084_vm12, %v6159_v33, %v12658_v39  ;;  %v10608_v25 = vld [vmem:[#allocation3 + $0x58] sm:$0xf] }
 0x298   : > { %5872 = vrot.lane.b32.xlu1 %v4644_v22, %s10741_s12  ;;  %v4352_v20 = vrot.slane %v4350_v47, 4  ;;  %v4355_v45 = vrot.slane %v4353_v37, 5  ;;  %6481 = vmatprep.mubr.bf16.mxu1 %v6193_v63  ;;  %v6065_v7 = vsel %vm3084_vm12, %v12697_v3, %v12653_v60  ;;  %v3850_v23 = vshll.u32 %v10608_v25, 16  ;;  %v12767_v60 = vpop.permute.xlu1 %5796  ;;  %v12769_v3 = vpop.permute.xlu0 %5890  ;;  %v5120_v44 = vld [vmem:[#allocation3 + $0xd0] sm:$0xf8] }
 0x299   : > { %v5989_v49 = vsel %vm2952_vm7, %v12434_v29, %v12625_v36  ;;  %v5028_v39 = vsel %vm1030_vm5, %v5019_v21, %v5027_v62  ;;  %v4348_v33 = vor.u32 %v4347_v17, %v4344_v8  ;;  %6482 = vmatmul.mubr.bf16.gmra.mrb[8].mxu1 %v6065_v7  ;;  %v5483_v61 = vrot.slane %v5413_v10, 4  ;;  %v10565_v8 = vld [vmem:[%s14712_s3 + $0x88] sm:$0xff]   ;;  %v4433_v17 = vld [vmem:[#allocation3 + $0xd0] sm:$0xf8]  ;;  %v12811_v7 = vld [vmem:[#allocation3 + $0xd8] sm:$0xf] }
 0x29a   : > { %5904 = vrot.lane.b32.xlu0 %v5028_v39, %s10736_s20  ;;  %v4356_v31 = vor.u32 %v4355_v45, %v4352_v20  ;;  %v5484_v51 = vrot.slane %v12747_v35, 4  ;;  %v4112_v4 = vrot.slane %v12754_v46, 4  ;;  %v4113_v12 = vrot.slane %v3748_v52, 4  ;;  %10330 = vmatprep.subr.bf16.mxu1 %v10565_v8 }
 0x29b   : > { %v12773_v29 = vsel %vm3018_vm10, %v5989_v49, %v12673_v19  ;;  %v3440_v36 = vadd.f32 %v12712_v27, %v12729_v57  ;;  %v14763_v0 = vshrl.u32 %v12409_v13, 16  ;;  %v14764_v15 = vshll.u32 %v12409_v13, 16  ;;  %10331 = vmatpush3.bf16.msra.mxu1 %v10565_v8 }
 0x29c   : > { %v4357_v5 = vsel %vm1030_vm5, %v4348_v33, %v4356_v31  ;;  %v6117_v21 = vsel %vm2952_vm7, %v12445_v14, %v12702_v30  ;;  %v5485_v19 = vsel %vm965_vm3, %v5483_v61, %v5484_v51  ;;  %v3443_v57 = vadd.f32 %v12712_v27, %v12734_v54  ;;  %v12804_v63 = vpop.permute.xlu0 %5954  ;;  %v12814_v33 = vpop.permute.xlu1 %5858 }
 0x29d   : > { %v12779_v18 = vrot.slane %v14763_v0, 3  ;;  %v12783_v38 = vrot.slane %v14764_v15, 4  ;;  %5842 = vrot.lane.b32.xlu1 %v4357_v5, %s10738_s25  ;;  %v4114_v13 = vsel %vm965_vm3, %v4112_v4, %v4113_v12  ;;  %v3514_v47 = vmin.f32 %v3440_v36, 0.0  ;;  %v12817_v12 = vld [vmem:[#allocation3 + $0xd0] sm:$0xf0] }
 0x29e   : > { %v14765_v37 = vshrl.u32 %v12280_v6, 16  ;;  %v12801_v22 = vrot.slane %v3850_v23, 4  ;;  %5968 = vrot.lane.b32.xlu0 %v5485_v19, %s10741_s12  ;;  %v3482_v14 = vmax.f32 %v3440_v36, 0.0  ;;  %v3515_v30 = vmin.f32 %v3443_v57, 0.0  ;;  %v12819_v36 = vpop.f32.mrb[60].mxu0 }
 0x29f   : > { %v5318_v54 = vshrl.u32 %v5120_v44, 16  ;;  %v5321_v62 = vshll.u32 %v5120_v44, 16  ;;  %v3547_v52 = vmul.f32 %v12003_v59, %v3514_v47  ;;  %v3845_v20 = vor.u32 %v12783_v38, %v12779_v18  ;;  %v4821_v5 = vld [vmem:[#allocation3 + $0xd8] sm:$0x1f]  ;;  %v3449_v19 = vpop.f32.mrb[61].mxu0 }
 0x2a0   : > { %v12799_v10 = vrot.slane %v14765_v37, 3  ;;  %v5326_v6 = vshrl.u32 %v12747_v35, 16  ;;  %v5329_v45 = vshll.u32 %v12747_v35, 16  ;;  %v3483_v25 = vmax.f32 %v3443_v57, 0.0  ;;  %v12825_v37 = vpop.f32.mrb[62].mxu0 }
 0x2a1   : > { %v3548_v23 = vmul.f32 %v12003_v59, %v3515_v30  ;;  %v5320_v49 = vrot.slane %v5318_v54, 3  ;;  %v5323_v39 = vrot.slane %v5321_v62, 4  ;;  %5812 = vrot.lane.b32.xlu1 %v4114_v13, %s10736_s20  ;;  %v3579_v61 = vadd.f32 %v3547_v52, %v3482_v14  ;;  %v12830_v52 = vpop.permute.xlu0 %5922  ;;  %v12899_v38 = vld [vmem:[#allocation3 + $0x68] sm:$0xf] }
 0x2a2   : > { %v5328_v31 = vrot.slane %v5326_v6, 3  ;;  %v5331_v51 = vrot.slane %v5329_v45, 4  ;;  %v4646_v4 = vshrl.u32 %v4433_v17, 16  ;;  %v4649_v15 = vshll.u32 %v4433_v17, 16  ;;  %v3452_v17 = vpop.f32.mrb[63].mxu0 }
 0x2a3   : > { %v3580_v35 = vadd.f32 %v3548_v23, %v3483_v25  ;;  %v5324_v0 = vor.u32 %v5323_v39, %v5320_v49  ;;  %v4654_v44 = vshrl.u32 %v12811_v7, 16  ;;  %v4657_v47 = vshll.u32 %v12811_v7, 16  ;;  %v4134_v49 = vld [vmem:[#allocation3 + $0xd8] sm:$0x1f]  ;;  %v12847_v17 = vld [vmem:[#allocation3 + $0xe8] sm:$0xf] }
 0x2a4   : > { %v5332_v57 = vor.u32 %v5331_v51, %v5328_v31  ;;  %v4648_v8 = vrot.slane %v4646_v4, 3  ;;  %v6161_v13 = vsel %vm3018_vm10, %v6117_v21, %v12744_v56  ;;  %v4651_v30 = vrot.slane %v4649_v15, 4  ;;  %v12836_v31 = vpop.permute.xlu1 %5828 }
 0x2a5   : > { %v12827_v14 = vpack.c.bf16 %v3580_v35, %v3579_v61  ;;  %v4656_v54 = vrot.slane %v4654_v44, 3  ;;  %v5030_v62 = vshrl.u32 %v12817_v12, 16  ;;  %v4659_v45 = vrot.slane %v4657_v47, 4  ;;  %v12842_v47 = vld [vmem:[#allocation3 + $0xe8] sm:$0xf] }
 0x2a6   : > { %v5333_v6 = vsel %vm644_vm8, %v5324_v0, %v5332_v57  ;;  %v5033_v25 = vshll.u32 %v12817_v12, 16  ;;  %v5038_v23 = vshrl.u32 %v4821_v5, 16  ;;  %v4652_v21 = vor.u32 %v4651_v30, %v4648_v8 }
 0x2a7   : > { %14766 = vst [vmem:[#allocation25_spill] sm:$0xff] %v12827_v14  ;;  %v3669_v56 = vrot.slane %v12827_v14, 4  ;;  %5936 = vrot.lane.b32.xlu0 %v5333_v6, %s10738_s25  ;;  %v5032_v39 = vrot.slane %v5030_v62, 4  ;;  %v5041_v61 = vshll.u32 %v4821_v5, 16  ;;  %v4660_v51 = vor.u32 %v4659_v45, %v4656_v54  ;;  %v5414_v62 = vld [vmem:[#allocation3 + $0xe0] sm:$0xf0] }
 0x2a8   : > { %v5035_v4 = vrot.slane %v5033_v25, 5  ;;  %v5040_v35 = vrot.slane %v5038_v23, 4  ;;  %v4359_v15 = vshrl.u32 %v12754_v46, 16  ;;  %v4362_v44 = vshll.u32 %v12754_v46, 16  ;;  %v12850_v23 = vld [vmem:[#allocation3 + $0xe0] sm:$0xf0] }
 0x2a9   : > { %3717 = vst.msk [vmem:[#allocation3 + $0xf0] sm:$0xf0] %vm3687_vm1, %v3669_v56  ;;  %v5043_v0 = vrot.slane %v5041_v61, 5  ;;  %v4367_v19 = vshrl.u32 %v4134_v49, 16  ;;  %v4370_v57 = vshll.u32 %v4134_v49, 16  ;;  %v4661_v5 = vsel %vm644_vm8, %v4652_v21, %v4660_v51  ;;  %v12852_v49 = vpop.permute.xlu1 %5798 }
 0x2aa   : > { %3718 = vst.msk [vmem:[#allocation3 + $0xf8] sm:$0xf] %vm3689_vm2, %v3669_v56  ;;  %v5036_v8 = vor.u32 %v5035_v4, %v5032_v39  ;;  %v4361_v30 = vrot.slane %v4359_v15, 4  ;;  %v6196_v54 = vsel %vm3084_vm12, %v6161_v13, %v12727_v32  ;;  %5874 = vrot.lane.b32.xlu1 %v4661_v5, %s10741_s12  ;;  %v4364_v45 = vrot.slane %v4362_v44, 5  ;;  %v12854_v56 = vpop.permute.xlu0 %5892  ;;  %v10609_v32 = vld [vmem:[#allocation3 + $0x50] sm:$0xf0] }
 0x2ab   : > { %v5044_v6 = vor.u32 %v5043_v0, %v5040_v35  ;;  %v4369_v25 = vrot.slane %v4367_v19, 4  ;;  %v4372_v46 = vrot.slane %v4370_v57, 5  ;;  %6489 = vmatprep.mubr.bf16.mxu1 %v6196_v54  ;;  %v3853_v21 = vor.u32 %v12801_v22, %v12799_v10  ;;  %v10610_v39 = vld [vmem:[#allocation3 + $0x58] sm:$0xf]  ;;  %v3733_v44 = vld [vmem:[#allocation3 + $0x60] sm:$0xf8] }
 0x2ac   : > { %v4773_v13 = vrot.slane %v10609_v32, 4  ;;  %v4774_v61 = vrot.slane %v10610_v39, 4  ;;  %v6068_v51 = vsel %vm3084_vm12, %v12773_v29, %v12725_v50  ;;  %v4365_v35 = vor.u32 %v4364_v45, %v4361_v30 }
 0x2ad   : > { %v5045_v4 = vsel %vm1030_vm5, %v5036_v8, %v5044_v6  ;;  %v4373_v15 = vor.u32 %v4372_v46, %v4369_v25  ;;  %6490 = vmatmul.mubr.bf16.gmra.mrb[12].mxu1 %v6068_v51  ;;  %v5486_v0 = vrot.slane %v5414_v62, 4  ;;  %v14767_v19 = vor.u32 %v12440_v2, %v12438_v42  ;;  %v5122_v2 = vld [vmem:[#allocation3 + $0xe0] sm:$0xf8]  ;;  %v12892_v45 = vpop.permute.xlu1 %5860 }
 0x2ae   : > { %v14768_v10 = vor.u32 %v12406_v58, %v12402_v48  ;;  %5906 = vrot.lane.b32.xlu0 %v5045_v4, %s10736_s20  ;;  %v5487_v57 = vrot.slane %v12842_v47, 4  ;;  %v4115_v50 = vrot.slane %v12850_v23, 4  ;;  %v4116_v29 = vrot.slane %v12847_v17, 4 }
 0x2af   : > { %v4374_v8 = vsel %vm1030_vm5, %v4365_v35, %v4373_v15  ;;  %v3448_v42 = vadd.f32 %v12712_v27, %v12819_v36  ;;  %v12886_v58 = vsel %vm644_vm8, %v3845_v20, %v3853_v21  ;;  %v3856_v30 = vshrl.u32 %v3733_v44, 16  ;;  %v12910_v15 = vld [vmem:[#allocation3 + $0xe8] sm:$0xf] }
 0x2b0   : > { %v3837_v22 = vsel %vm644_vm8, %v14768_v10, %v14767_v19  ;;  %5844 = vrot.lane.b32.xlu1 %v4374_v8, %s10738_s25  ;;  %v4775_v54 = vsel %vm965_vm3, %v4773_v13, %v4774_v61  ;;  %v4117_v36 = vsel %vm965_vm3, %v4115_v50, %v4116_v29  ;;  %v3859_v6 = vshll.u32 %v3733_v44, 16  ;;  %v4435_v61 = vld [vmem:[#allocation3 + $0xe0] sm:$0xf8] }
 0x2b1   : > { %v5992_v5 = vsel %vm2952_vm7, %v3837_v22, %v12700_v26  ;;  %v5488_v26 = vsel %vm965_vm3, %v5486_v0, %v5487_v57  ;;  %v3516_v62 = vmin.f32 %v3448_v42, 0.0  ;;  %v6120_v18 = vsel %vm2952_vm7, %v4775_v54, %v12769_v3 }
 0x2b2   : > { %v12880_v48 = vsel %vm3018_vm10, %v5992_v5, %v12742_v11  ;;  %v12894_v11 = vpop.permute.xlu0 %5956  ;;  %5970 = vrot.lane.b32.xlu0 %v5488_v26, %s10741_s12  ;;  %v3864_v20 = vshrl.u32 %v12899_v38, 16  ;;  %v3451_v25 = vadd.f32 %v12712_v27, %v12825_v37  ;;  %v5335_v46 = vshrl.u32 %v5122_v2, 16 }
 0x2b3   : > { %v3484_v21 = vmax.f32 %v3448_v42, 0.0  ;;  %v3549_v32 = vmul.f32 %v12003_v59, %v3516_v62  ;;  %v5338_v13 = vshll.u32 %v5122_v2, 16  ;;  %v5343_v39 = vshrl.u32 %v12842_v47, 16  ;;  %v12920_v42 = vld [vmem:[#allocation3 + $0xe0] sm:$0xf0]  ;;  %v12922_v2 = vpop.permute.xlu1 %5830 }
 0x2b4   : > { %5814 = vrot.lane.b32.xlu1 %v4117_v36, %s10736_s20  ;;  %v12907_v3 = vrot.slane %v3856_v30, 3  ;;  %v3867_v51 = vshll.u32 %v12899_v38, 16  ;;  %v3517_v4 = vmin.f32 %v3451_v25, 0.0  ;;  %v5337_v35 = vrot.slane %v5335_v46, 3 }
 0x2b5   : > { %v12912_v0 = vrot.slane %v3859_v6, 4  ;;  %v3485_v27 = vmax.f32 %v3451_v25, 0.0  ;;  %v5340_v37 = vrot.slane %v5338_v13, 4  ;;  %v5345_v44 = vrot.slane %v5343_v39, 3 }
 0x2b6   : > { %v3550_v19 = vmul.f32 %v12003_v59, %v3517_v4  ;;  %v5346_v10 = vshll.u32 %v12842_v47, 16  ;;  %v4663_v22 = vshrl.u32 %v4435_v61, 16  ;;  %v4666_v57 = vshll.u32 %v4435_v61, 16  ;;  %v12924_v26 = vpop.permute.xlu0 %5924  ;;  %v4822_v47 = vld [vmem:[#allocation3 + $0xe8] sm:$0x1f] }
 0x2b7   : > { %v3581_v50 = vadd.f32 %v3549_v32, %v3484_v21  ;;  %v12916_v29 = vrot.slane %v3864_v20, 3  ;;  %v4671_v5 = vshrl.u32 %v12910_v15, 16  ;;  %v4674_v8 = vshll.u32 %v12910_v15, 16 }
 0x2b8   : > { %v3582_v30 = vadd.f32 %v3550_v19, %v3485_v27  ;;  %v5341_v54 = vor.u32 %v5340_v37, %v5337_v35  ;;  %v5348_v59 = vrot.slane %v5346_v10, 4  ;;  %v4665_v36 = vrot.slane %v4663_v22, 3  ;;  %v4135_v27 = vld [vmem:[#allocation3 + $0xe8] sm:$0x1f] }
 0x2b9   : > { %v4668_v62 = vrot.slane %v4666_v57, 4  ;;  %v4673_v6 = vrot.slane %v4671_v5, 3  ;;  %v4676_v25 = vrot.slane %v4674_v8, 4  ;;  %v6163_v20 = vsel %vm3018_vm10, %v6120_v18, %v12830_v52 }
 0x2ba   : > { %v12928_v46 = vpack.c.bf16 %v3582_v30, %v3581_v50  ;;  %v5349_v21 = vor.u32 %v5348_v59, %v5345_v44  ;;  %v5047_v32 = vshrl.u32 %v12920_v42, 16  ;;  %v5050_v13 = vshll.u32 %v12920_v42, 16  ;;  %v12937_v50 = vpop.permute.xlu1 %5800  ;;  %v12939_v5 = vpop.permute.xlu0 %5894 }
 0x2bb   : > { %v4669_v39 = vor.u32 %v4668_v62, %v4665_v36  ;;  %v4677_v61 = vor.u32 %v4676_v25, %v4673_v6  ;;  %v5055_v4 = vshrl.u32 %v4822_v47, 16  ;;  %v5058_v35 = vshll.u32 %v4822_v47, 16  ;;  %v5415_v36 = vld [vmem:[#allocation3 + $0xf0] sm:$0xf0]  ;;  %v10612_v25 = vld [vmem:[#allocation3 + $0x60] sm:$0xf0] }
 0x2bc   : > { %14769 = vst [vmem:[#allocation26_spill] sm:$0xff] %v12928_v46  ;;  %v3670_v37 = vrot.slane %v12928_v46, 4  ;;  %v5350_v19 = vsel %vm644_vm8, %v5341_v54, %v5349_v21  ;;  %v5049_v10 = vrot.slane %v5047_v32, 4  ;;  %v5052_v22 = vrot.slane %v5050_v13, 5  ;;  %v5125_v32 = vld [vmem:[#allocation3 + $0xf8] sm:$0xf] }
 0x2bd   : > { %5938 = vrot.lane.b32.xlu0 %v5350_v19, %s10738_s25  ;;  %v4678_v52 = vsel %vm644_vm8, %v4669_v39, %v4677_v61  ;;  %v5057_v18 = vrot.slane %v5055_v4, 4  ;;  %v5060_v44 = vrot.slane %v5058_v35, 5  ;;  %v4376_v57 = vshrl.u32 %v12850_v23, 16  ;;  %v12947_v13 = vld [vmem:[#allocation3 + $0xf8] sm:$0xf] }
 0x2be   : > { %3719 = vst.msk [vmem:[#allocation3 + $0x100] sm:$0xf0] %vm3687_vm1, %v3670_v37  ;;  %5876 = vrot.lane.b32.xlu1 %v4678_v52, %s10741_s12  ;;  %v5053_v8 = vor.u32 %v5052_v22, %v5049_v10  ;;  %v4379_v30 = vshll.u32 %v12850_v23, 16  ;;  %v4384_v54 = vshrl.u32 %v4135_v27, 16  ;;  %v4387_v59 = vshll.u32 %v4135_v27, 16 }
 0x2bf   : > { %3720 = vst.msk [vmem:[#allocation3 + $0x108] sm:$0xf] %vm3689_vm2, %v3670_v37  ;;  %v5061_v47 = vor.u32 %v5060_v44, %v5057_v18  ;;  %v4378_v62 = vrot.slane %v4376_v57, 4  ;;  %v6199_v6 = vsel %vm3084_vm12, %v6163_v20, %v12804_v63  ;;  %v4776_v21 = vrot.slane %v10612_v25, 4  ;;  %v10613_v35 = vld [vmem:[#allocation3 + $0x68] sm:$0xf]  ;;  %v12959_v22 = vpop.permute.xlu0 %5958 }
 0x2c0   : > { %v4381_v39 = vrot.slane %v4379_v30, 5  ;;  %v4386_v61 = vrot.slane %v4384_v54, 4  ;;  %v4389_v4 = vrot.slane %v4387_v59, 5  ;;  %6497 = vmatprep.mubr.bf16.mxu1 %v6199_v6  ;;  %v4777_v37 = vrot.slane %v10613_v35, 4  ;;  %v12949_v23 = vld [vmem:[#allocation3 + $0xf0] sm:$0xf0] }
 0x2c1   : > { %v12953_v27 = vrot.slane %v3867_v51, 4  ;;  %v5062_v19 = vsel %vm1030_vm5, %v5053_v8, %v5061_v47  ;;  %v6071_v63 = vsel %vm3084_vm12, %v12880_v48, %v12814_v33  ;;  %v5489_v20 = vrot.slane %v5415_v36, 4  ;;  %v3735_v10 = vld [vmem:[#allocation3 + $0x70] sm:$0xf8]  ;;  %v12971_v8 = vpop.permute.xlu1 %5862 }
 0x2c2   : > { %v5995_v52 = vsel %vm2952_vm7, %v12886_v58, %v12767_v60  ;;  %5908 = vrot.lane.b32.xlu0 %v5062_v19, %s10736_s20  ;;  %v4382_v18 = vor.u32 %v4381_v39, %v4378_v62  ;;  %v4390_v38 = vor.u32 %v4389_v4, %v4386_v61  ;;  %6498 = vmatmul.mubr.bf16.gmra.mrb[16].mxu1 %v6071_v63  ;;  %v5490_v51 = vrot.slane %v5125_v32, 4  ;;  %v5124_v44 = vld [vmem:[#allocation3 + $0xf0] sm:$0xf8]  ;;  %v12985_v61 = vld [vmem:[#allocation3 + $0xf8] sm:$0xf] }
 0x2c3   : > { %v12967_v57 = vsel %vm3018_vm10, %v5995_v52, %v12836_v31  ;;  %v4118_v33 = vrot.slane %v12949_v23, 4  ;;  %v4119_v48 = vrot.slane %v12947_v13, 4  ;;  %v4778_v60 = vsel %vm965_vm3, %v4776_v21, %v4777_v37  ;;  %v4437_v59 = vld [vmem:[#allocation3 + $0xf0] sm:$0xf8]  ;;  %v10614_v4 = vld [vmem:[#allocation3 + $0x78] sm:$0xf] }
 0x2c4   : > { %v4391_v30 = vsel %vm1030_vm5, %v4382_v18, %v4390_v38  ;;  %v5491_v58 = vsel %vm965_vm3, %v5489_v20, %v5490_v51  ;;  %v3873_v54 = vshrl.u32 %v3735_v10, 16  ;;  %v6123_v47 = vsel %vm2952_vm7, %v4778_v60, %v12854_v56  ;;  %v12991_v51 = vld [vmem:[#allocation3 + $0xf0] sm:$0xf0] }
 0x2c5   : > { %5846 = vrot.lane.b32.xlu1 %v4391_v30, %s10738_s25  ;;  %v5352_v62 = vshrl.u32 %v5124_v44, 16  ;;  %v4120_v6 = vsel %vm965_vm3, %v4118_v33, %v4119_v48  ;;  %v3876_v25 = vshll.u32 %v3735_v10, 16  ;;  %v5355_v21 = vshll.u32 %v5124_v44, 16  ;;  %v12995_v30 = vpop.permute.xlu1 %5832 }
 0x2c6   : > { %5972 = vrot.lane.b32.xlu0 %v5491_v58, %s10741_s12  ;;  %v5360_v39 = vshrl.u32 %v5125_v32, 16  ;;  %v3881_v35 = vshrl.u32 %v10614_v4, 16  ;;  %v5363_v19 = vshll.u32 %v5125_v32, 16  ;;  %v4680_v63 = vshrl.u32 %v4437_v59, 16  ;;  %v12987_v20 = vpop.permute.xlu0 %5926 }
 0x2c7   : > { %v5354_v37 = vrot.slane %v5352_v62, 3  ;;  %v12989_v52 = vrot.slane %v3873_v54, 3  ;;  %v5357_v56 = vrot.slane %v5355_v21, 4  ;;  %v4683_v38 = vshll.u32 %v4437_v59, 16  ;;  %v4823_v62 = vld [vmem:[#allocation3 + $0xf8] sm:$0x1f] }
 0x2c8   : > { %v5362_v18 = vrot.slane %v5360_v39, 3  ;;  %v3884_v10 = vshll.u32 %v10614_v4, 16  ;;  %v5365_v44 = vrot.slane %v5363_v19, 4  ;;  %v4682_v33 = vrot.slane %v4680_v63, 3 }
 0x2c9   : > { %5816 = vrot.lane.b32.xlu1 %v4120_v6, %s10736_s20  ;;  %v4688_v48 = vshrl.u32 %v12985_v61, 16  ;;  %v12997_v32 = vrot.slane %v3876_v25, 4  ;;  %v5358_v60 = vor.u32 %v5357_v56, %v5354_v37  ;;  %v4685_v58 = vrot.slane %v4683_v38, 4  ;;  %v4136_v25 = vld [vmem:[#allocation3 + $0xf8] sm:$0x1f]  ;;  %v13009_v46 = vpop.permute.xlu1 %5802 }
 0x2ca   : > { %v4691_v54 = vshll.u32 %v12985_v61, 16  ;;  %v13000_v21 = vrot.slane %v3881_v35, 3  ;;  %v5366_v59 = vor.u32 %v5365_v44, %v5362_v18  ;;  %v5064_v6 = vshrl.u32 %v12991_v51, 16 }
 0x2cb   : > { %v4690_v39 = vrot.slane %v4688_v48, 3  ;;  %v4686_v4 = vor.u32 %v4685_v58, %v4682_v33  ;;  %v6165_v63 = vsel %vm3018_vm10, %v6123_v47, %v12924_v26  ;;  %v5067_v36 = vshll.u32 %v12991_v51, 16  ;;  %v13006_v31 = vpop.permute.xlu0 %5896 }
 0x2cc   : > { %v4693_v19 = vrot.slane %v4691_v54, 4  ;;  %v5367_v37 = vsel %vm644_vm8, %v5358_v60, %v5366_v59  ;;  %v5066_v56 = vrot.slane %v5064_v6, 4  ;;  %v5072_v38 = vshrl.u32 %v4823_v62, 16 }
 0x2cd   : > { %v5075_v35 = vshll.u32 %v4823_v62, 16  ;;  %5940 = vrot.lane.b32.xlu0 %v5367_v37, %s10738_s25  ;;  %v5069_v44 = vrot.slane %v5067_v36, 5  ;;  %v4393_v33 = vshrl.u32 %v12949_v23, 16  ;;  %v4396_v26 = vshll.u32 %v12949_v23, 16  ;;  %v5416_v62 = vld [vmem:[#allocation3 + $0x100] sm:$0xf0] }
 0x2ce   : > { %v4694_v18 = vor.u32 %v4693_v19, %v4690_v39  ;;  %v5074_v47 = vrot.slane %v5072_v38, 4  ;;  %v4401_v58 = vshrl.u32 %v4136_v25, 16  ;;  %v4404_v54 = vshll.u32 %v4136_v25, 16  ;;  %v5127_v37 = vld [vmem:[#allocation3 + $0x108] sm:$0xf] }
 0x2cf   : > { %v5077_v48 = vrot.slane %v5075_v35, 5  ;;  %v5070_v60 = vor.u32 %v5069_v44, %v5066_v56  ;;  %v4395_v59 = vrot.slane %v4393_v33, 4  ;;  %v4398_v6 = vrot.slane %v4396_v26, 5  ;;  %v13015_v24 = vpop.permute.xlu0 %5960  ;;  %v10616_v35 = vld [vmem:[#allocation3 + $0x78] sm:$0xf] }
 0x2d0   : > { %v4695_v14 = vsel %vm644_vm8, %v4686_v4, %v4694_v18  ;;  %v4403_v36 = vrot.slane %v4401_v58, 4  ;;  %v4406_v19 = vrot.slane %v4404_v54, 5  ;;  %v6202_v23 = vsel %vm3084_vm12, %v6165_v63, %v12894_v11  ;;  %v10615_v4 = vld [vmem:[#allocation3 + $0x70] sm:$0xf0] }
 0x2d1   : > { %5878 = vrot.lane.b32.xlu1 %v4695_v14, %s10741_s12  ;;  %v5078_v39 = vor.u32 %v5077_v48, %v5074_v47  ;;  %v13020_v38 = vrot.slane %v3884_v10, 4  ;;  %v4399_v25 = vor.u32 %v4398_v6, %v4395_v59  ;;  %6505 = vmatprep.mubr.bf16.mxu1 %v6202_v23  ;;  %v4779_v56 = vrot.slane %v10615_v4, 4  ;;  %v5126_v47 = vld [vmem:[#allocation3 + $0x100] sm:$0xf8]  ;;  %v13026_v48 = vpop.permute.xlu1 %5864 }
 0x2d2   : > { %v4780_v18 = vrot.slane %v10616_v35, 4  ;;  %v4407_v33 = vor.u32 %v4406_v19, %v4403_v36  ;;  %v6074_v14 = vsel %vm3084_vm12, %v12967_v57, %v12892_v45  ;;  %v5492_v26 = vrot.slane %v5416_v62, 4  ;;  %v13039_v57 = vld [vmem:[#allocation3 + $0x80] sm:$0xf8]  ;;  %v13054_v36 = vld [vmem:[#allocation3 + $0x108] sm:$0xf] }
 0x2d3   : > { %v5079_v44 = vsel %vm1030_vm5, %v5070_v60, %v5078_v39  ;;  %v14770_v11 = vor.u32 %v12953_v27, %v12916_v29  ;;  %v14771_v10 = vor.u32 %v12912_v0, %v12907_v3  ;;  %6506 = vmatmul.mubr.bf16.gmra.mrb[20].mxu1 %v6074_v14  ;;  %v5493_v58 = vrot.slane %v5127_v37, 4  ;;  %v4439_v60 = vld [vmem:[#allocation3 + $0x100] sm:$0xf8]  ;;  %v5128_v14 = vld [vmem:[#allocation3 + $0x110] sm:$0xf8] }
 0x2d4   : > { %5910 = vrot.lane.b32.xlu0 %v5079_v44, %s10736_s20  ;;  %v4408_v45 = vsel %vm1030_vm5, %v4399_v25, %v4407_v33  ;;  %v5369_v27 = vshrl.u32 %v5126_v47, 16  ;;  %v4781_v6 = vsel %vm965_vm3, %v4779_v56, %v4780_v18  ;;  %v5372_v62 = vshll.u32 %v5126_v47, 16 }
 0x2d5   : > { %v3871_v63 = vsel %vm644_vm8, %v14771_v10, %v14770_v11  ;;  %5848 = vrot.lane.b32.xlu1 %v4408_v45, %s10738_s25  ;;  %v5494_v0 = vsel %vm965_vm3, %v5492_v26, %v5493_v58  ;;  %v13049_v59 = vpop.permute.xlu0 %5928  ;;  %v5377_v39 = vshrl.u32 %v5127_v37, 16  ;;  %v5380_v23 = vshll.u32 %v5127_v37, 16  ;;  %v13060_v26 = vpop.permute.xlu1 %5834  ;;  %v13064_v10 = vld [vmem:[#allocation3 + $0x118] sm:$0xf] }
 0x2d6   : > { %v5998_v54 = vsel %vm2952_vm7, %v3871_v63, %v12852_v49  ;;  %v3887_v49 = vor.u32 %v13020_v38, %v13000_v21  ;;  %v5371_v19 = vrot.slane %v5369_v27, 3  ;;  %v4697_v25 = vshrl.u32 %v4439_v60, 16 }
 0x2d7   : > { %v13043_v29 = vsel %vm3018_vm10, %v5998_v54, %v12922_v2  ;;  %v3890_v2 = vshrl.u32 %v13039_v57, 16  ;;  %v6126_v4 = vsel %vm2952_vm7, %v4781_v6, %v12939_v5  ;;  %v5374_v35 = vrot.slane %v5372_v62, 4  ;;  %v10617_v54 = vld [vmem:[#allocation3 + $0x88] sm:$0xf] }
 0x2d8   : > { %5974 = vrot.lane.b32.xlu0 %v5494_v0, %s10741_s12  ;;  %v5379_v44 = vrot.slane %v5377_v39, 3  ;;  %v4700_v33 = vshll.u32 %v4439_v60, 16  ;;  %v5382_v56 = vrot.slane %v5380_v23, 4  ;;  %v4699_v18 = vrot.slane %v4697_v25, 3 }
 0x2d9   : > { %v4705_v47 = vshrl.u32 %v13054_v36, 16  ;;  %v4708_v11 = vshll.u32 %v13054_v36, 16  ;;  %v3893_v37 = vshll.u32 %v13039_v57, 16  ;;  %v5375_v63 = vor.u32 %v5374_v35, %v5371_v19 }
 0x2da   : > { %v4702_v58 = vrot.slane %v4700_v33, 4  ;;  %v6167_v5 = vsel %vm3018_vm10, %v6126_v4, %v12987_v20  ;;  %v3898_v45 = vshrl.u32 %v10617_v54, 16  ;;  %v5383_v60 = vor.u32 %v5382_v56, %v5379_v44  ;;  %v13069_v6 = vpop.permute.xlu0 %5898  ;;  %v13076_v4 = vld [vmem:[#allocation3 + $0x100] sm:$0xf0] }
 0x2db   : > { %v4707_v0 = vrot.slane %v4705_v47, 3  ;;  %v4710_v27 = vrot.slane %v4708_v11, 4  ;;  %v5386_v39 = vshrl.u32 %v5128_v14, 16  ;;  %v5389_v23 = vshll.u32 %v5128_v14, 16  ;;  %v4824_v14 = vld [vmem:[#allocation3 + $0x108] sm:$0x1f] }
 0x2dc   : > { %v4703_v62 = vor.u32 %v4702_v58, %v4699_v18  ;;  %v5394_v25 = vshrl.u32 %v13064_v10, 16  ;;  %v5384_v3 = vsel %vm644_vm8, %v5375_v63, %v5383_v60  ;;  %v5397_v19 = vshll.u32 %v13064_v10, 16  ;;  %v13079_v18 = vpop.permute.xlu1 %5804  ;;  %v10618_v63 = vld [vmem:[#allocation3 + $0x80] sm:$0xf0]  ;;  %v10619_v60 = vld [vmem:[#allocation3 + $0x88] sm:$0xf] }
 0x2dd   : > { %v4711_v57 = vor.u32 %v4710_v27, %v4707_v0  ;;  %v6205_v20 = vsel %vm3084_vm12, %v6167_v5, %v12959_v22  ;;  %v3901_v35 = vshll.u32 %v10617_v54, 16  ;;  %5942 = vrot.lane.b32.xlu0 %v5384_v3, %s10738_s25  ;;  %v5388_v44 = vrot.slane %v5386_v39, 3 }
 0x2de   : > { %v5391_v33 = vrot.slane %v5389_v23, 4  ;;  %v5396_v56 = vrot.slane %v5394_v25, 3  ;;  %6513 = vmatprep.mubr.bf16.mxu1 %v6205_v20  ;;  %v5399_v11 = vrot.slane %v5397_v19, 4  ;;  %v4782_v58 = vrot.slane %v10618_v63, 4  ;;  %v13082_v22 = vpop.permute.xlu0 %5962 }
 0x2df   : > { %v4712_v47 = vsel %vm644_vm8, %v4703_v62, %v4711_v57  ;;  %v4783_v0 = vrot.slane %v10619_v60, 4  ;;  %v6077_v3 = vsel %vm3084_vm12, %v13043_v29, %v12971_v8  ;;  %v5081_v54 = vshrl.u32 %v13076_v4, 16  ;;  %v13097_v8 = vld [vmem:[#allocation3 + $0x110] sm:$0xf0] }
 0x2e0   : > { %5880 = vrot.lane.b32.xlu1 %v4712_v47, %s10741_s12  ;;  %v5392_v5 = vor.u32 %v5391_v33, %v5388_v44  ;;  %v5084_v27 = vshll.u32 %v13076_v4, 16  ;;  %v5400_v39 = vor.u32 %v5399_v11, %v5396_v56  ;;  %6514 = vmatmul.mubr.bf16.gmra.mrb[24].mxu1 %v6077_v3  ;;  %v5089_v62 = vshrl.u32 %v4824_v14, 16 }
 0x2e1   : > { %v5092_v23 = vshll.u32 %v4824_v14, 16  ;;  %v14772_v25 = vor.u32 %v12997_v32, %v12989_v52  ;;  %v3892_v19 = vrot.slane %v3890_v2, 3  ;;  %v5083_v20 = vrot.slane %v5081_v54, 4  ;;  %v5867_v52 = vpop.permute.xlu1 %5866  ;;  %v3739_v2 = vld [vmem:[#allocation3 + $0x90] sm:$0xf8] }
 0x2e2   : > { %v5086_v44 = vrot.slane %v5084_v27, 5  ;;  %v3895_v29 = vrot.slane %v3893_v37, 4  ;;  %v5401_v33 = vsel %vm644_vm8, %v5392_v5, %v5400_v39  ;;  %v5091_v56 = vrot.slane %v5089_v62, 4  ;;  %v10620_v5 = vld [vmem:[#allocation3 + $0x90] sm:$0xf0] }
 0x2e3   : > { %v3888_v57 = vsel %vm644_vm8, %v14772_v25, %v3887_v49  ;;  %v5094_v47 = vrot.slane %v5092_v23, 5  ;;  %v3900_v11 = vrot.slane %v3898_v45, 3  ;;  %v3903_v14 = vrot.slane %v3901_v35, 4  ;;  %5944 = vrot.lane.b32.xlu0 %v5401_v33, %s10738_s25  ;;  %v10622_v23 = vld [vmem:[#allocation3 + $0x98] sm:$0xf] }
 0x2e4   : > { %v4784_v21 = vsel %vm965_vm3, %v4782_v58, %v4783_v0  ;;  %v5087_v38 = vor.u32 %v5086_v44, %v5083_v20  ;;  %v5495_v63 = vrot.slane %v13097_v8, 4  ;;  %v5496_v37 = vrot.slane %v13064_v10, 4  ;;  %v5931_v60 = vpop.permute.xlu0 %5930 }
 0x2e5   : > { %v6129_v32 = vsel %vm2952_vm7, %v4784_v21, %v13006_v31  ;;  %v5095_v49 = vor.u32 %v5094_v47, %v5091_v56  ;;  %v6001_v45 = vsel %vm2952_vm7, %v3888_v57, %v12937_v50  ;;  %v4785_v58 = vrot.slane %v10620_v5, 4  ;;  %v10621_v50 = vld [vmem:[#allocation3 + $0x98] sm:$0xf] }
 0x2e6   : > { %v6169_v35 = vsel %vm3018_vm10, %v6129_v32, %v13049_v59  ;;  %v6041_v0 = vsel %vm3018_vm10, %v6001_v45, %v12995_v30  ;;  %v3896_v3 = vor.u32 %v3895_v29, %v3892_v19  ;;  %v3904_v27 = vor.u32 %v3903_v14, %v3900_v11 }
 0x2e7   : > { %v5096_v31 = vsel %vm1030_vm5, %v5087_v38, %v5095_v49  ;;  %v6208_v54 = vsel %vm3084_vm12, %v6169_v35, %v13015_v24  ;;  %v3907_v10 = vshrl.u32 %v3739_v2, 16  ;;  %v4786_v39 = vrot.slane %v10621_v50, 4  ;;  %v5837_v24 = vpop.permute.xlu1 %5836  ;;  %v10623_v49 = vld [vmem:[#allocation3 + $0xa0] sm:$0xf0] }
 0x2e8   : > { %5912 = vrot.lane.b32.xlu0 %v5096_v31, %s10736_s20  ;;  %6521 = vmatprep.mubr.bf16.mxu1 %v6208_v54  ;;  %v6080_v59 = vsel %vm3084_vm12, %v6041_v0, %v13026_v48  ;;  %v3910_v62 = vshll.u32 %v3739_v2, 16  ;;  %v3915_v25 = vshrl.u32 %v10622_v23, 16  ;;  %v3918_v30 = vshll.u32 %v10622_v23, 16  ;;  %v3741_v54 = vld [vmem:[#allocation3 + $0xa0] sm:$0xf8] }
 0x2e9   : > { %v5497_v57 = vsel %vm965_vm3, %v5495_v63, %v5496_v37  ;;  %6522 = vmatmul.mubr.bf16.gmra.mrb[28].mxu1 %v6080_v59  ;;  %v4787_v19 = vsel %vm965_vm3, %v4785_v58, %v4786_v39  ;;  %v3905_v29 = vsel %vm644_vm8, %v3896_v3, %v3904_v27  ;;  %v3909_v33 = vrot.slane %v3907_v10, 3  ;;  %v10624_v63 = vld [vmem:[#allocation3 + $0xa8] sm:$0xf] }
 0x2ea   : > { %v6132_v20 = vsel %vm2952_vm7, %v4787_v19, %v13069_v6  ;;  %v3912_v56 = vrot.slane %v3910_v62, 4  ;;  %v3917_v47 = vrot.slane %v3915_v25, 3  ;;  %v3920_v11 = vrot.slane %v3918_v30, 4  ;;  %v10625_v39 = vld [vmem:[#allocation3 + $0xa8] sm:$0xf] }
 0x2eb   : > { %v5901_v44 = vpop.permute.xlu0 %5900  ;;  %v6171_v48 = vsel %vm3018_vm10, %v6132_v20, %v5931_v60  ;;  %v6004_v21 = vsel %vm2952_vm7, %v3905_v29, %v13009_v46  ;;  %v5807_v38 = vpop.permute.xlu1 %5806  ;;  %v4788_v2 = vrot.slane %v10623_v49, 4  ;;  %v4789_v37 = vrot.slane %v10624_v63, 4 }
 0x2ec   : > { %5976 = vrot.lane.b32.xlu0 %v5497_v57, %s10741_s12  ;;  %v6211_v14 = vsel %vm3084_vm12, %v6171_v48, %v13082_v22  ;;  %v6043_v6 = vsel %vm3018_vm10, %v6004_v21, %v13060_v26  ;;  %v3913_v45 = vor.u32 %v3912_v56, %v3909_v33  ;;  %v3921_v35 = vor.u32 %v3920_v11, %v3917_v47  ;;  %v10626_v33 = vld [vmem:[#allocation3 + $0xb0] sm:$0xf0]  ;;  %v10627_v56 = vld [vmem:[#allocation3 + $0xb8] sm:$0xf] }
 0x2ed   : > { %6529 = vmatprep.mubr.bf16.mxu1 %v6211_v14  ;;  %v6083_v60 = vsel %vm3084_vm12, %v6043_v6, %v5867_v52  ;;  %v4790_v22 = vsel %vm965_vm3, %v4788_v2, %v4789_v37  ;;  %v3924_v10 = vshrl.u32 %v3741_v54, 16  ;;  %v3927_v50 = vshll.u32 %v3741_v54, 16 }
 0x2ee   : > { %v3922_v46 = vsel %vm644_vm8, %v3913_v45, %v3921_v35  ;;  %v6135_v58 = vsel %vm2952_vm7, %v4790_v22, %v5901_v44  ;;  %v3932_v59 = vshrl.u32 %v10625_v39, 16  ;;  %v3935_v62 = vshll.u32 %v10625_v39, 16  ;;  %v3743_v35 = vld [vmem:[#allocation3 + $0xb0] sm:$0xf8]  ;;  %v10629_v39 = vld [vmem:[#allocation3 + $0xc0] sm:$0xf0] }
 0x2ef   : > { %v5965_v32 = vpop.permute.xlu0 %5964  ;;  %v5869_v5 = vpop.permute.xlu1 %5868  ;;  %v6007_v26 = vsel %vm2952_vm7, %v3922_v46, %v13079_v18  ;;  %v3926_v30 = vrot.slane %v3924_v10, 3  ;;  %v3929_v18 = vrot.slane %v3927_v50, 4  ;;  %v4803_v44 = vrot.slane %v12991_v51, 4 }
 0x2f0   : > { %v6045_v31 = vsel %vm3018_vm10, %v6007_v26, %v5837_v24  ;;  %v3934_v57 = vrot.slane %v3932_v59, 3  ;;  %v3937_v19 = vrot.slane %v3935_v62, 4  ;;  %v4804_v29 = vrot.slane %v12985_v61, 4  ;;  %v10630_v62 = vld [vmem:[#allocation3 + $0xc8] sm:$0xf] }
 0x2f1   : > { %6530 = vmatmul.mubr.bf16.gmra.mrb[32].mxu1 %v6083_v60  ;;  %v6086_v27 = vsel %vm3084_vm12, %v6045_v31, %v5869_v5  ;;  %v4791_v48 = vrot.slane %v10626_v33, 4  ;;  %v4792_v47 = vrot.slane %v10627_v56, 4  ;;  %v4806_v11 = vrot.slane %v13076_v4, 4 }
 0x2f2   : > { %v4807_v14 = vrot.slane %v13054_v36, 4  ;;  %v3930_v21 = vor.u32 %v3929_v18, %v3926_v30  ;;  %v3938_v6 = vor.u32 %v3937_v19, %v3934_v57  ;;  %v3941_v22 = vshrl.u32 %v3743_v35, 16 }
 0x2f3   : > { %v5839_v23 = vpop.permute.xlu1 %5838  ;;  %v4793_v51 = vsel %vm965_vm3, %v4791_v48, %v4792_v47  ;;  %v3944_v46 = vshll.u32 %v3743_v35, 16  ;;  %v4794_v59 = vrot.slane %v10629_v39, 4  ;;  %v4797_v35 = vrot.slane %v12817_v12, 4 }
 0x2f4   : > { %v13149_v49 = vsel %vm965_vm3, %v4806_v11, %v4807_v14  ;;  %v3939_v61 = vsel %vm644_vm8, %v3930_v21, %v3938_v6  ;;  %v3943_v54 = vrot.slane %v3941_v22, 3  ;;  %v3745_v11 = vld [vmem:[#allocation3 + $0xc0] sm:$0xf8] }
 0x2f5   : > { %v5933_v0 = vpop.permute.xlu0 %5932  ;;  %v6010_v4 = vsel %vm2952_vm7, %v3939_v61, %v5807_v38  ;;  %v3946_v38 = vrot.slane %v3944_v46, 4  ;;  %v3958_v21 = vshrl.u32 %v3745_v11, 16  ;;  %v3961_v6 = vshll.u32 %v3745_v11, 16 }
 0x2f6   : > { %v6173_v3 = vsel %vm3018_vm10, %v6135_v58, %v5933_v0  ;;  %v6047_v60 = vsel %vm3018_vm10, %v6010_v4, %v5839_v23  ;;  %v10628_v58 = vld [vmem:[#allocation3 + $0xb8] sm:$0xf]  ;;  %v4795_v23 = vrot.slane %v10630_v62, 4 }
 0x2f7   : > { %v6214_v52 = vsel %vm3084_vm12, %v6173_v3, %v5965_v32  ;;  %v5809_v20 = vpop.permute.xlu1 %5808  ;;  %v13146_v32 = vsel %vm965_vm3, %v4803_v44, %v4804_v29  ;;  %v3949_v0 = vshrl.u32 %v10628_v58, 16  ;;  %v3952_v26 = vshll.u32 %v10628_v58, 16 }
 0x2f8   : > { %6537 = vmatprep.mubr.bf16.mxu1 %v6214_v52  ;;  %v4796_v18 = vsel %vm965_vm3, %v4794_v59, %v4795_v23  ;;  %v10632_v59 = vld [vmem:[#allocation3 + $0xd8] sm:$0xf] }
 0x2f9   : > { %6538 = vmatmul.mubr.bf16.gmra.mrb[36].mxu1 %v6086_v27  ;;  %v3951_v52 = vrot.slane %v3949_v0, 3  ;;  %v3954_v27 = vrot.slane %v3952_v26, 4  ;;  %v3983_v62 = vshrl.u32 %v10632_v59, 16  ;;  %v3986_v23 = vshll.u32 %v10632_v59, 16 }
 0x2fa   : > { %v4020_v59 = vshll.u32 %v12947_v13, 16 }
 0x2fb   : > { %v5903_v25 = vpop.permute.xlu0 %5902  ;;  %v5871_v2 = vpop.permute.xlu1 %5870  ;;  %v3955_v30 = vor.u32 %v3954_v27, %v3951_v52  ;;  %v3747_v27 = vld [vmem:[#allocation3 + $0xd0] sm:$0xf8] }
 0x2fc   : > { %v6138_v63 = vsel %vm2952_vm7, %v4793_v51, %v5903_v25  ;;  %v6089_v5 = vsel %vm3084_vm12, %v6047_v60, %v5871_v2  ;;  %v3947_v25 = vor.u32 %v3946_v38, %v3943_v54  ;;  %v10631_v51 = vld [vmem:[#allocation3 + $0xc8] sm:$0xf]  ;;  %v3978_v39 = vshll.u32 %v3747_v27, 16 }
 0x2fd   : > { %v3966_v61 = vshrl.u32 %v10631_v51, 16  ;;  %v3969_v2 = vshll.u32 %v10631_v51, 16 }
 0x2fe   : > { %v3956_v57 = vsel %vm644_vm8, %v3947_v25, %v3955_v30 }
 0x2ff   : > { %v5967_v24 = vpop.permute.xlu0 %5966  ;;  %v5841_v31 = vpop.permute.xlu1 %5840  ;;  %v6013_v29 = vsel %vm2952_vm7, %v3956_v57, %v5809_v20  ;;  %v3963_v20 = vrot.slane %v3961_v6, 4  ;;  %v3968_v4 = vrot.slane %v3966_v61, 3  ;;  %v3985_v57 = vrot.slane %v3983_v62, 3 }
 0x300   : > { %v6049_v48 = vsel %vm3018_vm10, %v6013_v29, %v5841_v31  ;;  %v4800_v29 = vrot.slane %v12920_v42, 4 }
 0x303   : > { %v5811_v10 = vpop.permute.xlu1 %5810 }
 0x306   : > { %v5935_v37 = vpop.permute.xlu0 %5934 }
 0x307   : > { %v6175_v36 = vsel %vm3018_vm10, %v6138_v63, %v5935_v37  ;;  %v3960_v37 = vrot.slane %v3958_v21, 3 }
 0x308   : > { %v6217_v45 = vsel %vm3084_vm12, %v6175_v36, %v5967_v24  ;;  %v3971_v36 = vrot.slane %v3969_v2, 4 }
 0x309   : > { %6545 = vmatprep.mubr.bf16.mxu1 %v6217_v45  ;;  %v3964_v22 = vor.u32 %v3963_v20, %v3960_v37 }
 0x30a   : > { %6546 = vmatmul.mubr.bf16.gmra.mrb[40].mxu1 %v6089_v5  ;;  %v5873_v19 = vpop.permute.xlu1 %5872  ;;  %v4798_v5 = vrot.slane %v12811_v7, 4  ;;  %v3972_v46 = vor.u32 %v3971_v36, %v3968_v4  ;;  %v4000_v36 = vshrl.u32 %v12847_v17, 16 }
 0x30b   : > { %v6092_v47 = vsel %vm3084_vm12, %v6049_v48, %v5873_v19  ;;  %v3988_v19 = vrot.slane %v3986_v23, 4 }
 0x30c   : > { %v5905_v3 = vpop.permute.xlu0 %5904  ;;  %v4799_v0 = vsel %vm965_vm3, %v4797_v35, %v4798_v5  ;;  %v3973_v26 = vsel %vm644_vm8, %v3964_v22, %v3972_v46  ;;  %v4002_v22 = vrot.slane %v4000_v36, 3 }
 0x30d   : > { %v6141_v24 = vsel %vm2952_vm7, %v4796_v18, %v5905_v3  ;;  %v6016_v54 = vsel %vm2952_vm7, %v3973_v26, %v5811_v10  ;;  %v3980_v10 = vrot.slane %v3978_v39, 4  ;;  %v4017_v39 = vshrl.u32 %v12947_v13, 16 }
 0x30e   : > { %v4022_v13 = vrot.slane %v4020_v59, 4 }
 0x30f   : > { %v5843_v14 = vpop.permute.xlu1 %5842 }
 0x310   : > { %v5969_v50 = vpop.permute.xlu0 %5968  ;;  %v6051_v52 = vsel %vm3018_vm10, %v6016_v54, %v5843_v14 }
 0x313   : > { %v5813_v60 = vpop.permute.xlu1 %5812 }
 0x319   : > { %v5937_v44 = vpop.permute.xlu0 %5936 }
 0x31a   : > { %v6177_v33 = vsel %vm3018_vm10, %v6141_v24, %v5937_v44 }
 0x31b   : > { %v6220_v56 = vsel %vm3084_vm12, %v6177_v33, %v5969_v50  ;;  %v3975_v50 = vshrl.u32 %v3747_v27, 16  ;;  %v4801_v33 = vrot.slane %v12910_v15, 4 }
 0x31c   : > { %6553 = vmatprep.mubr.bf16.mxu1 %v6220_v56  ;;  %v5875_v58 = vpop.permute.xlu1 %5874  ;;  %v3989_v56 = vor.u32 %v3988_v19, %v3985_v57 }
 0x31d   : > { %6554 = vmatmul.mubr.bf16.gmra.mrb[44].mxu1 %v6092_v47  ;;  %v6095_v7 = vsel %vm3084_vm12, %v6051_v52, %v5875_v58  ;;  %v3977_v18 = vrot.slane %v3975_v50, 3  ;;  %v4802_v11 = vsel %vm965_vm3, %v4800_v29, %v4801_v33  ;;  %v5498_v29 = vld [vmem:[#allocation3 + $0x28] sm:$0x1f] }
 0x31f   : > { %v3981_v48 = vor.u32 %v3980_v10, %v3977_v18 }
 0x320   : > { %v5907_v63 = vpop.permute.xlu0 %5906 }
 0x321   : > { %v6144_v3 = vsel %vm2952_vm7, %v4799_v0, %v5907_v63  ;;  %v3990_v14 = vsel %vm644_vm8, %v3981_v48, %v3989_v56  ;;  %v3749_v63 = vld [vmem:[#allocation3 + $0xe0] sm:$0xf8]  ;;  %v4019_v48 = vrot.slane %v4017_v39, 3 }
 0x322   : > { %v5845_v25 = vpop.permute.xlu1 %5844  ;;  %v6019_v51 = vsel %vm2952_vm7, %v3990_v14, %v5813_v60  ;;  %v3992_v20 = vshrl.u32 %v3749_v63, 16  ;;  %v3995_v4 = vshll.u32 %v3749_v63, 16  ;;  %v5523_v14 = vshrl.u32 %v5498_v29, 16  ;;  %v5499_v63 = vld [vmem:[#allocation3 + $0x38] sm:$0x1f] }
 0x323   : > { %v6053_v2 = vsel %vm3018_vm10, %v6019_v51, %v5845_v25  ;;  %v4023_v51 = vor.u32 %v4022_v13, %v4019_v48 }
 0x324   : > { %v5971_v45 = vpop.permute.xlu0 %5970  ;;  %v3994_v60 = vrot.slane %v3992_v20, 3  ;;  %v3997_v5 = vrot.slane %v3995_v4, 4  ;;  %v10634_v20 = vld [vmem:[#allocation3 + $0x30] sm:$0xf0] }
 0x325   : > { %v5532_v4 = vshrl.u32 %v10634_v20, 16  ;;  %v5535_v36 = vshll.u32 %v10634_v20, 16 }
 0x326   : > { %v5815_v24 = vpop.permute.xlu1 %5814  ;;  %v3998_v54 = vor.u32 %v3997_v5, %v3994_v60 }
 0x32f   : > { %v5939_v31 = vpop.permute.xlu0 %5938 }
 0x330   : > { %v6179_v38 = vsel %vm3018_vm10, %v6144_v3, %v5939_v31  ;;  %v5877_v47 = vpop.permute.xlu1 %5876  ;;  %v3751_v3 = vld [vmem:[#allocation3 + $0xf0] sm:$0xf8] }
 0x331   : > { %v6223_v12 = vsel %vm3084_vm12, %v6179_v38, %v5971_v45  ;;  %v6098_v15 = vsel %vm3084_vm12, %v6053_v2, %v5877_v47  ;;  %v4003_v45 = vshll.u32 %v12847_v17, 16  ;;  %v4012_v17 = vshll.u32 %v3751_v3, 16  ;;  %v10633_v47 = vld [vmem:[#allocation3 + $0x20] sm:$0xf0] }
 0x332   : > { %6561 = vmatprep.mubr.bf16.mxu1 %v6223_v12 }
 0x333   : > { %6562 = vmatmul.mubr.bf16.gmra.mrb[48].mxu1 %v6095_v7  ;;  %v4005_v46 = vrot.slane %v4003_v45, 4  ;;  %v4009_v7 = vshrl.u32 %v3751_v3, 16  ;;  %v4014_v33 = vrot.slane %v4012_v17, 4  ;;  %v10635_v3 = vld [vmem:[#allocation3 + $0x40] sm:$0xf0] }
 0x334   : > { %v5909_v30 = vpop.permute.xlu0 %5908 }
 0x335   : > { %v6147_v21 = vsel %vm2952_vm7, %v4802_v11, %v5909_v30  ;;  %v4006_v38 = vor.u32 %v4005_v46, %v4002_v22  ;;  %v4011_v19 = vrot.slane %v4009_v7, 3  ;;  %v5518_v11 = vshll.u32 %v10633_v47, 16 }
 0x336   : > { %v5540_v22 = vshrl.u32 %v5499_v63, 16 }
 0x337   : > { %v5847_v37 = vpop.permute.xlu1 %5846  ;;  %v4007_v62 = vsel %vm644_vm8, %v3998_v54, %v4006_v38  ;;  %v5520_v2 = vrot.slane %v5518_v11, 5  ;;  %v5552_v54 = vshll.u32 %v10635_v3, 16  ;;  %v10636_v11 = vld [vmem:[#allocation3 + $0x50] sm:$0xf0] }
 0x338   : > { %v5973_v44 = vpop.permute.xlu0 %5972  ;;  %v6022_v18 = vsel %vm2952_vm7, %v4007_v62, %v5815_v24  ;;  %v5526_v24 = vshll.u32 %v5498_v29, 16  ;;  %v5534_v62 = vrot.slane %v5532_v4, 4 }
 0x339   : > { %v6055_v57 = vsel %vm3018_vm10, %v6022_v18, %v5847_v37 }
 0x33a   : > { %v5528_v37 = vrot.slane %v5526_v24, 5  ;;  %v5569_v24 = vshll.u32 %v10636_v11, 16 }
 0x33b   : > { %v13189_v58 = vpop.permute.xlu1 %5816 }
 0x33f   : > { %v5941_v6 = vpop.permute.xlu0 %5940 }
 0x340   : > { %v6181_v61 = vsel %vm3018_vm10, %v6147_v21, %v5941_v6  ;;  %v4015_v6 = vor.u32 %v4014_v33, %v4011_v19  ;;  %v5542_v19 = vrot.slane %v5540_v22, 4 }
 0x341   : > { %v6226_v42 = vsel %vm3084_vm12, %v6181_v61, %v5973_v44 }
 0x342   : > { %6569 = vmatprep.mubr.bf16.mxu1 %v6226_v42  ;;  %v4024_v60 = vsel %vm644_vm8, %v4015_v6, %v4023_v51  ;;  %v5502_v51 = vld [vmem:[#allocation3 + $0x68] sm:$0x1f] }
 0x343   : > { %6570 = vmatmul.mubr.bf16.gmra.mrb[52].mxu1 %v6098_v15  ;;  %v5879_v23 = vpop.permute.xlu1 %5878  ;;  %v5525_v15 = vrot.slane %v5523_v14, 4  ;;  %v5566_v14 = vshrl.u32 %v10636_v11, 16  ;;  %v5591_v4 = vshrl.u32 %v5502_v51, 16 }
 0x344   : > { %v6101_v56 = vsel %vm3084_vm12, %v6055_v57, %v5879_v23  ;;  %v5537_v23 = vrot.slane %v5535_v36, 5  ;;  %v5594_v36 = vshll.u32 %v5502_v51, 16 }
 0x346   : > { %v5911_v35 = vpop.permute.xlu0 %5910 }
 0x347   : > { %v6150_v25 = vsel %vm2952_vm7, %v13146_v32, %v5911_v35  ;;  %v5515_v32 = vshrl.u32 %v10633_v47, 16  ;;  %v5849_v42 = vpop.permute.xlu1 %5848  ;;  %v5500_v35 = vld [vmem:[#allocation3 + $0x48] sm:$0x1f] }
 0x348   : > { %v5557_v7 = vshrl.u32 %v5500_v35, 16  ;;  %v5560_v17 = vshll.u32 %v5500_v35, 16  ;;  %v5571_v35 = vrot.slane %v5569_v24, 5 }
 0x349   : > { %v5517_v61 = vrot.slane %v5515_v32, 4 }
 0x34a   : > { %v5975_v0 = vpop.permute.xlu0 %5974  ;;  %v10062_v26 = vpop.f32.mrb[0].mxu1  ;;  %v5559_v47 = vrot.slane %v5557_v7, 4  ;;  %v5562_v32 = vrot.slane %v5560_v17, 5  ;;  %v10638_v7 = vld [vmem:[#allocation3 + $0x70] sm:$0xf0] }
 0x34b   : > { %v10063_v31 = vpop.f32.mrb[1].mxu1  ;;  %v5600_v17 = vshrl.u32 %v10638_v7, 16 }
 0x34c   : > { %v13191_v52 = vadd.f32 %v10063_v31, %v10062_v26  ;;  %v10065_v27 = vpop.f32.mrb[2].mxu1  ;;  %v5543_v26 = vshll.u32 %v5499_v63, 16  ;;  %v5549_v31 = vshrl.u32 %v10635_v3, 16 }
 0x34d   : > { %v10066_v12 = vpop.f32.mrb[3].mxu1 }
 0x34e   : > { %v13193_v50 = vadd.f32 %v10066_v12, %v10065_v27  ;;  %v5529_v12 = vor.u32 %v5528_v37, %v5525_v15  ;;  %v5545_v48 = vrot.slane %v5543_v26, 5  ;;  %v5551_v13 = vrot.slane %v5549_v31, 4 }
 0x34f   : > { %v5943_v30 = vpop.permute.xlu0 %5942  ;;  %v5563_v37 = vor.u32 %v5562_v32, %v5559_v47  ;;  %v5593_v31 = vrot.slane %v5591_v4, 4 }
 0x350   : > { %v6183_v10 = vsel %vm3018_vm10, %v6150_v25, %v5943_v30 }
 0x351   : > { %v6229_v44 = vsel %vm3084_vm12, %v6183_v10, %v5975_v0  ;;  %v5521_v0 = vor.u32 %v5520_v2, %v5517_v61  ;;  %v5538_v61 = vor.u32 %v5537_v23, %v5534_v62  ;;  %v5546_v2 = vor.u32 %v5545_v48, %v5542_v19 }
 0x352   : > { %6577 = vmatprep.mubr.bf16.mxu1 %v6229_v44  ;;  %v5881_v27 = vpop.permute.xlu1 %5880  ;;  %v5501_v44 = vld [vmem:[#allocation3 + $0x58] sm:$0x1f] }
 0x353   : > { %6578 = vmatmul.mubr.bf16.gmra.mrb[56].mxu1 %v6101_v56  ;;  %v5554_v56 = vrot.slane %v5552_v54, 5  ;;  %v5577_v6 = vshll.u32 %v5501_v44, 16  ;;  %v5547_v22 = vsel %vm1030_vm5, %v5538_v61, %v5546_v2  ;;  %v5596_v54 = vrot.slane %v5594_v36, 5  ;;  %v5506_v36 = vld [vmem:[#allocation3 + $0xa8] sm:$0x1f] }
 0x355   : > { %v5945_v21 = vpop.permute.xlu0 %5944  ;;  %v5555_v63 = vor.u32 %v5554_v56, %v5551_v13  ;;  %v5602_v13 = vrot.slane %v5600_v17, 4  ;;  %v5505_v56 = vld [vmem:[#allocation3 + $0x98] sm:$0x1f] }
 0x356   : > { %v5645_v4 = vshll.u32 %v5505_v56, 16  ;;  %v5507_v17 = vld [vmem:[#allocation3 + $0xb8] sm:$0x1f] }
 0x357   : > { %v5564_v26 = vsel %vm1030_vm5, %v5555_v63, %v5563_v37 }
 0x35a   : > { %v5913_v45 = vpop.permute.xlu0 %5912 }
 0x35b   : > { %v6153_v5 = vsel %vm2952_vm7, %v13149_v49, %v5913_v45  ;;  %v10068_v46 = vpop.f32.mrb[4].mxu1  ;;  %v6025_v49 = vsel %vm2952_vm7, %v4024_v60, %v13189_v58  ;;  %v5530_v58 = vsel %vm1030_vm5, %v5521_v0, %v5529_v12  ;;  %v5568_v45 = vrot.slane %v5566_v14, 4  ;;  %v5503_v0 = vld [vmem:[#allocation3 + $0x78] sm:$0x1f] }
 0x35c   : > { %v10069_v38 = vpop.f32.mrb[5].mxu1  ;;  %v6185_v30 = vsel %vm3018_vm10, %v6153_v5, %v5945_v21  ;;  %v6057_v10 = vsel %vm3018_vm10, %v6025_v49, %v5849_v42  ;;  %v5574_v21 = vshrl.u32 %v5501_v44, 16  ;;  %v10637_v42 = vld [vmem:[#allocation3 + $0x60] sm:$0xf0]  ;;  %v5579_v5 = vrot.slane %v5577_v6, 5 }
 0x35d   : > { %v13208_v39 = vadd.f32 %v10069_v38, %v10068_v46  ;;  %v10071_v59 = vpop.f32.mrb[6].mxu1  ;;  %v6104_v33 = vsel %vm3084_vm12, %v6057_v10, %v5881_v27  ;;  %v5583_v15 = vshrl.u32 %v10637_v42, 16  ;;  %v5586_v20 = vshll.u32 %v10637_v42, 16  ;;  %v5504_v38 = vld [vmem:[#allocation3 + $0x88] sm:$0x1f] }
 0x35e   : > { %v5977_v25 = vpop.permute.xlu0 %5976  ;;  %v10072_v18 = vpop.f32.mrb[7].mxu1  ;;  %v5576_v60 = vrot.slane %v5574_v21, 4  ;;  %v5572_v27 = vor.u32 %v5571_v35, %v5568_v45  ;;  %v5608_v62 = vshrl.u32 %v5503_v0, 16  ;;  %v5611_v23 = vshll.u32 %v5503_v0, 16  ;;  %v10639_v49 = vld [vmem:[#allocation3 + $0x80] sm:$0xf0] }
 0x35f   : > { %v6232_v57 = vsel %vm3084_vm12, %v6185_v30, %v5977_v25  ;;  %v13215_v29 = vadd.f32 %v10072_v18, %v10071_v59  ;;  %v5585_v46 = vrot.slane %v5583_v15, 4  ;;  %v5588_v3 = vrot.slane %v5586_v20, 5  ;;  %v10640_v42 = vld [vmem:[#allocation3 + $0x90] sm:$0xf0] }
 0x360   : > { %6585 = vmatprep.mubr.bf16.mxu1 %v6232_v57  ;;  %v5580_v12 = vor.u32 %v5579_v5, %v5576_v60  ;;  %v5603_v59 = vshll.u32 %v10638_v7, 16  ;;  %v5617_v25 = vshrl.u32 %v10639_v49, 16  ;;  %v5620_v30 = vshll.u32 %v10639_v49, 16 }
 0x361   : > { %6586 = vmatmul.mubr.bf16.gmra.mrb[60].mxu1 %v6104_v33  ;;  %v5625_v18 = vshrl.u32 %v5504_v38, 16  ;;  %v5628_v10 = vshll.u32 %v5504_v38, 16  ;;  %v5589_v19 = vor.u32 %v5588_v3, %v5585_v46  ;;  %v5597_v44 = vor.u32 %v5596_v54, %v5593_v31 }
 0x362   : > { %10332 = vmatprep.mubr.msk.bf16.mxu1 %vm2952_vm7, %v5530_v58  ;;  %v5581_v48 = vsel %vm1030_vm5, %v5572_v27, %v5580_v12  ;;  %v5605_v32 = vrot.slane %v5603_v59, 5  ;;  %v5610_v11 = vrot.slane %v5608_v62, 4  ;;  %v5613_v14 = vrot.slane %v5611_v23, 5 }
 0x363   : > { %v5619_v24 = vrot.slane %v5617_v25, 4  ;;  %v5622_v6 = vrot.slane %v5620_v30, 5  ;;  %v5627_v51 = vrot.slane %v5625_v18, 4  ;;  %v5630_v61 = vrot.slane %v5628_v10, 5  ;;  %v5508_v25 = vld [vmem:[#allocation3 + $0xc8] sm:$0x1f] }
 0x364   : > { %v5598_v63 = vsel %vm1030_vm5, %v5589_v19, %v5597_v44  ;;  %v5634_v15 = vshrl.u32 %v10640_v42, 16  ;;  %v5637_v37 = vshll.u32 %v10640_v42, 16  ;;  %v5642_v20 = vshrl.u32 %v5505_v56, 16  ;;  %v10642_v10 = vld [vmem:[#allocation3 + $0xb0] sm:$0xf0] }
 0x365   : > { %v5606_v45 = vor.u32 %v5605_v32, %v5602_v13  ;;  %v5614_v35 = vor.u32 %v5613_v14, %v5610_v11  ;;  %v5623_v60 = vor.u32 %v5622_v6, %v5619_v24  ;;  %v5631_v5 = vor.u32 %v5630_v61, %v5627_v51 }
 0x366   : > { %v5662_v3 = vshll.u32 %v5506_v36, 16  ;;  %v5636_v31 = vrot.slane %v5634_v15, 4  ;;  %v5639_v54 = vrot.slane %v5637_v37, 5  ;;  %v5644_v38 = vrot.slane %v5642_v20, 4 }
 0x367   : > { %v5647_v27 = vrot.slane %v5645_v4, 5  ;;  %v5615_v12 = vsel %vm1030_vm5, %v5606_v45, %v5614_v35  ;;  %v5632_v7 = vsel %vm1030_vm5, %v5623_v60, %v5631_v5  ;;  %v5671_v19 = vshll.u32 %v10642_v10, 16 }
 0x368   : > { %v5664_v49 = vrot.slane %v5662_v3, 5  ;;  %v5640_v30 = vor.u32 %v5639_v54, %v5636_v31  ;;  %v5676_v44 = vshrl.u32 %v5507_v17, 16  ;;  %v5696_v32 = vshll.u32 %v5508_v25, 16 }
 0x369   : > { %10333 = vmatmul.mubr.msk.bf16.vlgmr.msra.gmra.mrb[64].mxu1 %vm2952_vm7, %v5547_v22  ;;  %v10641_v22 = vld [vmem:[#allocation3 + $0xa0] sm:$0xf0]  ;;  %v5648_v18 = vor.u32 %v5647_v27, %v5644_v38  ;;  %v5673_v51 = vrot.slane %v5671_v19, 5 }
 0x36a   : > { %10336 = vmatprep.mubr.msk.bf16.mxu1 %vm2952_vm7, %v5564_v26  ;;  %v5651_v46 = vshrl.u32 %v10641_v22, 16  ;;  %v5654_v0 = vshll.u32 %v10641_v22, 16  ;;  %v5659_v26 = vshrl.u32 %v5506_v36, 16  ;;  %v5678_v61 = vrot.slane %v5676_v44, 4  ;;  %v10644_v22 = vld [vmem:[#allocation3 + $0xd0] sm:$0xf0] }
 0x36b   : > { %v5649_v24 = vsel %vm1030_vm5, %v5640_v30, %v5648_v18  ;;  %v5698_v4 = vrot.slane %v5696_v32, 5  ;;  %v5705_v3 = vshll.u32 %v10644_v22, 16 }
 0x36c   : > { %v10074_v57 = vpop.f32.mrb[8].mxu1  ;;  %v5653_v59 = vrot.slane %v5651_v46, 4  ;;  %v5656_v62 = vrot.slane %v5654_v0, 5  ;;  %v5661_v23 = vrot.slane %v5659_v26, 4  ;;  %v5702_v46 = vshrl.u32 %v10644_v22, 16 }
 0x36d   : > { %v10075_v33 = vpop.f32.mrb[9].mxu1  ;;  %v5510_v0 = vld [vmem:[#allocation3 + $0xe8] sm:$0x1f]  ;;  %v5707_v30 = vrot.slane %v5705_v3, 5 }
 0x36e   : > { %v13225_v58 = vadd.f32 %v10075_v33, %v10074_v57  ;;  %v10077_v47 = vpop.f32.mrb[10].mxu1  ;;  %v5668_v57 = vshrl.u32 %v10642_v10, 16  ;;  %v5679_v33 = vshll.u32 %v5507_v17, 16  ;;  %v5657_v11 = vor.u32 %v5656_v62, %v5653_v59  ;;  %v10645_v17 = vld [vmem:[#allocation3 + $0xe0] sm:$0xf0] }
 0x36f   : > { %v10078_v21 = vpop.f32.mrb[11].mxu1  ;;  %v5665_v14 = vor.u32 %v5664_v49, %v5661_v23  ;;  %v5719_v59 = vshrl.u32 %v10645_v17, 16  ;;  %v5722_v62 = vshll.u32 %v10645_v17, 16  ;;  %v5727_v23 = vshrl.u32 %v5510_v0, 16 }
 0x370   : > { %v13227_v2 = vadd.f32 %v10078_v21, %v10077_v47  ;;  %v5693_v47 = vshrl.u32 %v5508_v25, 16  ;;  %v5509_v21 = vld [vmem:[#allocation3 + $0xd8] sm:$0x1f]  ;;  %v5670_v6 = vrot.slane %v5668_v57, 4  ;;  %v5730_v49 = vshll.u32 %v5510_v0, 16 }
 0x371   : > { %10337 = vmatmul.mubr.msk.bf16.gmra.mrb[68].mxu1 %vm2952_vm7, %v5581_v48  ;;  %v10643_v48 = vld [vmem:[#allocation3 + $0xc0] sm:$0xf0]  ;;  %v5666_v45 = vsel %vm1030_vm5, %v5657_v11, %v5665_v14  ;;  %v5710_v31 = vshrl.u32 %v5509_v21, 16  ;;  %v5713_v54 = vshll.u32 %v5509_v21, 16  ;;  %v5704_v25 = vrot.slane %v5702_v46, 4 }
 0x372   : > { %10340 = vmatprep.mubr.msk.bf16.mxu1 %vm2952_vm7, %v5598_v63  ;;  %v5685_v13 = vshrl.u32 %v10643_v48, 16  ;;  %v5688_v56 = vshll.u32 %v10643_v48, 16  ;;  %v5681_v63 = vrot.slane %v5679_v33, 5  ;;  %v5695_v20 = vrot.slane %v5693_v47, 4  ;;  %v5512_v47 = vld [vmem:[#allocation3 + $0x108] sm:$0x1f] }
 0x373   : > { %v5674_v38 = vor.u32 %v5673_v51, %v5670_v6  ;;  %v5712_v18 = vrot.slane %v5710_v31, 4  ;;  %v5715_v10 = vrot.slane %v5713_v54, 5  ;;  %v5721_v44 = vrot.slane %v5719_v59, 4  ;;  %v10646_v14 = vld [vmem:[#allocation3 + $0xf0] sm:$0xf0] }
 0x374   : > { %v5687_v15 = vrot.slane %v5685_v13, 4  ;;  %v5690_v37 = vrot.slane %v5688_v56, 5  ;;  %v5682_v27 = vor.u32 %v5681_v63, %v5678_v61  ;;  %v5724_v33 = vrot.slane %v5722_v62, 5  ;;  %v5511_v56 = vld [vmem:[#allocation3 + $0xf8] sm:$0x1f] }
 0x375   : > { %v5729_v48 = vrot.slane %v5727_v23, 4  ;;  %v5732_v13 = vrot.slane %v5730_v49, 5  ;;  %v5708_v32 = vor.u32 %v5707_v30, %v5704_v25  ;;  %v5716_v11 = vor.u32 %v5715_v10, %v5712_v18  ;;  %v10647_v61 = vld [vmem:[#allocation3 + $0x100] sm:$0xf0] }
 0x376   : > { %v5683_v57 = vsel %vm1030_vm5, %v5674_v38, %v5682_v27  ;;  %v5739_v21 = vshll.u32 %v10646_v14, 16  ;;  %v5744_v6 = vshrl.u32 %v5511_v56, 16  ;;  %v5747_v51 = vshll.u32 %v5511_v56, 16 }
 0x377   : > { %v5753_v63 = vshrl.u32 %v10647_v61, 16  ;;  %v5770_v27 = vshrl.u32 %v13097_v8, 16 }
 0x378   : > { %v5746_v22 = vrot.slane %v5744_v6, 4  ;;  %v5749_v46 = vrot.slane %v5747_v51, 5 }
 0x379   : > { %10341 = vmatmul.mubr.msk.bf16.gmra.mrb[72].mxu1 %vm2952_vm7, %v5615_v12  ;;  %v5691_v12 = vor.u32 %v5690_v37, %v5687_v15  ;;  %v5725_v15 = vor.u32 %v5724_v33, %v5721_v44  ;;  %v5733_v37 = vor.u32 %v5732_v13, %v5729_v48  ;;  %v5755_v0 = vrot.slane %v5753_v63, 4 }
 0x37a   : > { %10344 = vmatprep.mubr.msk.bf16.mxu1 %vm2952_vm7, %v5632_v7  ;;  %v5699_v7 = vor.u32 %v5698_v4, %v5695_v20  ;;  %v5761_v20 = vshrl.u32 %v5512_v47, 16  ;;  %v5764_v4 = vshll.u32 %v5512_v47, 16  ;;  %v5750_v62 = vor.u32 %v5749_v46, %v5746_v22 }
 0x37b   : > { %v5734_v31 = vsel %vm1030_vm5, %v5725_v15, %v5733_v37  ;;  %v5772_v18 = vrot.slane %v5770_v27, 4 }
 0x37c   : > { %v5700_v19 = vsel %vm1030_vm5, %v5691_v12, %v5699_v7  ;;  %v5763_v54 = vrot.slane %v5761_v20, 4  ;;  %v5766_v38 = vrot.slane %v5764_v4, 5  ;;  %v5773_v12 = vshll.u32 %v13097_v8, 16 }
 0x37e   : > { %v5767_v25 = vor.u32 %v5766_v38, %v5763_v54 }
 0x380   : > { %v10080_v42 = vpop.f32.mrb[12].mxu1 }
 0x381   : > { %v10081_v36 = vpop.f32.mrb[13].mxu1  ;;  %10345 = vmatmul.mubr.msk.bf16.gmra.mrb[76].mxu1 %vm2952_vm7, %v5649_v24  ;;  %v5736_v24 = vshrl.u32 %v10646_v14, 16 }
 0x382   : > { %v13239_v35 = vadd.f32 %v10081_v36, %v10080_v42  ;;  %v10083_v60 = vpop.f32.mrb[14].mxu1  ;;  %10348 = vmatprep.mubr.msk.bf16.mxu1 %vm2952_vm7, %v5666_v45  ;;  %v5756_v42 = vshll.u32 %v10647_v61, 16  ;;  %v5717_v36 = vsel %vm1030_vm5, %v5708_v32, %v5716_v11 }
 0x383   : > { %v10084_v5 = vpop.f32.mrb[15].mxu1  ;;  %v5738_v45 = vrot.slane %v5736_v24, 4 }
 0x384   : > { %v13242_v26 = vadd.f32 %v10084_v5, %v10083_v60  ;;  %v5741_v60 = vrot.slane %v5739_v21, 5  ;;  %v5513_v5 = vld [vmem:[#allocation3 + $0x118] sm:$0x1f]  ;;  %v5758_v3 = vrot.slane %v5756_v42, 5 }
 0x385   : > { %v5778_v7 = vshrl.u32 %v5513_v5, 16  ;;  %v5781_v17 = vshll.u32 %v5513_v5, 16 }
 0x386   : > { %v5742_v59 = vor.u32 %v5741_v60, %v5738_v45  ;;  %v5759_v49 = vor.u32 %v5758_v3, %v5755_v0 }
 0x387   : > { %v5780_v44 = vrot.slane %v5778_v7, 4  ;;  %v5783_v33 = vrot.slane %v5781_v17, 5  ;;  %v7135_v7 = vld [vmem:[#allocation4] sm:$0xf0]  ;;  %v7136_v17 = vld [vmem:[#allocation4 + $0x8] sm:$0xf] }
 0x388   : > { %v5751_v13 = vsel %vm1030_vm5, %v5742_v59, %v5750_v62  ;;  %v5768_v8 = vsel %vm1030_vm5, %v5759_v49, %v5767_v25  ;;  %v7199_v62 = vrot.slane %v7135_v7, 4 }
 0x389   : > { %10349 = vmatmul.mubr.msk.bf16.gmra.mrb[80].mxu1 %vm2952_vm7, %v5683_v57  ;;  %v5784_v32 = vor.u32 %v5783_v33, %v5780_v44  ;;  %v7248_v44 = vld [vmem:[#allocation4 + $0x8] sm:$0x1f] }
 0x38a   : > { %10352 = vmatprep.mubr.msk.bf16.mxu1 %vm2952_vm7, %v5700_v19  ;;  %v5775_v19 = vrot.slane %v5773_v12, 5 }
 0x38c   : > { %v5776_v47 = vor.u32 %v5775_v19, %v5772_v18  ;;  %v7247_v19 = vld [vmem:[#allocation4] sm:$0xe0] }
 0x38d   : > { %v7312_v33 = vrot.slane %v7247_v19, 5 }
 0x38e   : > { %v5785_v11 = vsel %vm1030_vm5, %v5776_v47, %v5784_v32 }
 0x391   : > { %10353 = vmatmul.mubr.msk.bf16.gmra.mrb[84].mxu1 %vm2952_vm7, %v5717_v36 }
 0x392   : > { %10356 = vmatprep.mubr.msk.bf16.mxu1 %vm2952_vm7, %v5734_v31 }
 0x395   : > { %v10086_v23 = vpop.f32.mrb[16].mxu1 }
 0x396   : > { %v10087_v30 = vpop.f32.mrb[17].mxu1 }
 0x397   : > { %v13254_v10 = vadd.f32 %v10087_v30, %v10086_v23  ;;  %v10089_v57 = vpop.f32.mrb[18].mxu1  ;;  %v7200_v23 = vrot.slane %v7136_v17, 4  ;;  %v13303_v17 = vld [vmem:[%s14714_s5 + $0x80] sm:$0xff]  }
 0x398   : > { %v10090_v48 = vpop.f32.mrb[19].mxu1  ;;  %10444 = vmatprep.subr.bf16.mxu1 %v13303_v17 }
 0x399   : > { %v13257_v56 = vadd.f32 %v10090_v48, %v10089_v57  ;;  %10357 = vmatmul.mubr.msk.bf16.gmra.mrb[88].mxu1 %vm2952_vm7, %v5751_v13  ;;  %v7201_v18 = vsel %vm965_vm3, %v7199_v62, %v7200_v23  ;;  %v7313_v48 = vrot.slane %v7248_v44, 5  ;;  %v7137_v13 = vld [vmem:[#allocation4 + $0x10] sm:$0xf0]  ;;  %v10568_v44 = vld [vmem:[%s14714_s5 + $0x40] sm:$0xff]  }
 0x39a   : > { %10360 = vmatprep.mubr.msk.bf16.mxu1 %vm2952_vm7, %v5768_v8  ;;  %8033 = vrot.lane.b32.xlu1 %v7201_v18, %s10736_s20  ;;  %v7138_v8 = vld [vmem:[#allocation4 + $0x18] sm:$0xf]  ;;  %v7202_v47 = vrot.slane %v7137_v13, 4 }
 0x39b   : > { %v7203_v32 = vrot.slane %v7138_v8, 4  ;;  %10446 = vmatpush3.bf16.msra.mxu1 %v13303_v17  ;;  %10176 = vmatprep.subr.bf16.mxu0 %v10568_v44  ;;  %v13351_v44 = vstv %s9885_s30 }
 0x3a1   : > { %10361 = vmatmul.mubr.msk.bf16.gmra.mrb[92].mxu1 %vm2952_vm7, %v5785_v11  ;;  %v7314_v11 = vsel %vm7311_vm0, %v7312_v33, %v7313_v48 }
 0x3a2   : > { %8065 = vrot.lane.b32.xlu1 %v7314_v11, %s10738_s25 }
 0x3a6   : > { %v10092_v14 = vpop.f32.mrb[20].mxu1 }
 0x3a7   : > { %v10093_v24 = vpop.f32.mrb[21].mxu1 }
 0x3a8   : > { %v13264_v21 = vadd.f32 %v10093_v24, %v10092_v14  ;;  %v10095_v6 = vpop.f32.mrb[22].mxu1  ;;  %v7204_v14 = vsel %vm965_vm3, %v7202_v47, %v7203_v32  ;;  %v7249_v24 = vld [vmem:[#allocation4 + $0x10] sm:$0xe0]  ;;  %v10569_v32 = vld [vmem:[%s14714_s5] sm:$0xff]  }
 0x3a9   : > { %v10096_v51 = vpop.f32.mrb[23].mxu1  ;;  %8035 = vrot.lane.b32.xlu1 %v7204_v14, %s10736_s20  ;;  %10177 = vmatpush3.bf16.msra.mxu0 %v10569_v32  ;;  %v10570_v14 = vld [vmem:[%s14714_s5 + $0x48] sm:$0xff]  }
 0x3aa   : > { %v13266_v61 = vadd.f32 %v10096_v51, %v10095_v6  ;;  %v7250_v6 = vld [vmem:[#allocation4 + $0x18] sm:$0x1f]  ;;  %10178 = vmatprep.subr.bf16.mxu0 %v10570_v14 }
 0x3b3   : > { %v10098_v63 = vpop.f32.mrb[24].mxu1 }
 0x3b4   : > { %v10099_v42 = vpop.f32.mrb[25].mxu1 }
 0x3b5   : > { %v13268_v15 = vadd.f32 %v10099_v42, %v10098_v63  ;;  %v10101_v37 = vpop.f32.mrb[26].mxu1  ;;  %v7315_v63 = vrot.slane %v7249_v24, 5  ;;  %v7316_v42 = vrot.slane %v7250_v6, 5 }
 0x3b6   : > { %v10102_v20 = vpop.f32.mrb[27].mxu1 }
 0x3b7   : > { %v13270_v4 = vadd.f32 %v10102_v20, %v10101_v37 }
 0x3bc   : > { %v10104_v36 = vpop.f32.mrb[28].mxu1 }
 0x3bd   : > { %v10105_v45 = vpop.f32.mrb[29].mxu1 }
 0x3be   : > { %v13272_v60 = vadd.f32 %v10105_v45, %v10104_v36  ;;  %v10107_v5 = vpop.f32.mrb[30].mxu1  ;;  %v7317_v45 = vsel %vm7311_vm0, %v7315_v63, %v7316_v42  ;;  %v10571_v42 = vld [vmem:[%s14714_s5 + $0x8] sm:$0xff]  }
 0x3bf   : > { %v10108_v22 = vpop.f32.mrb[31].mxu1  ;;  %8067 = vrot.lane.b32.xlu1 %v7317_v45, %s10738_s25  ;;  %10179 = vmatpush3.bf16.msra.mxu0 %v10571_v42 }
 0x3c0   : > { %v13274_v46 = vadd.f32 %v10108_v22, %v10107_v5 }
 0x3c4   : > { %v10110_v0 = vpop.f32.mrb[32].mxu1 }
 0x3c5   : > { %v10111_v3 = vpop.f32.mrb[33].mxu1 }
 0x3c6   : > { %v13276_v31 = vadd.f32 %v10111_v3, %v10110_v0  ;;  %v10113_v54 = vpop.f32.mrb[34].mxu1 }
 0x3c7   : > { %v10114_v38 = vpop.f32.mrb[35].mxu1 }
 0x3c8   : > { %v13278_v27 = vadd.f32 %v10114_v38, %v10113_v54 }
 0x3cc   : > { %v10116_v12 = vpop.f32.mrb[36].mxu1 }
 0x3cd   : > { %v10117_v59 = vpop.f32.mrb[37].mxu1 }
 0x3ce   : > { %v13280_v49 = vadd.f32 %v10117_v59, %v10116_v12  ;;  %v10119_v25 = vpop.f32.mrb[38].mxu1  ;;  %v10567_v59 = vld [vmem:[%s14714_s5 + $0x88] sm:$0xff]  }
 0x3cf   : > { %v10120_v30 = vpop.f32.mrb[39].mxu1  ;;  %10445 = vmatprep.subr.bf16.mxu1 %v10567_v59 }
 0x3d0   : > { %v13283_v57 = vadd.f32 %v10120_v30, %v10119_v25  ;;  %10447 = vmatpush3.bf16.msra.mxu1 %v10567_v59 }
 0x3dd   : > { %v10122_v51 = vpop.f32.mrb[40].mxu1 }
 0x3de   : > { %v10123_v37 = vpop.f32.mrb[41].mxu1 }
 0x3df   : > { %v13290_v20 = vadd.f32 %v10123_v37, %v10122_v51  ;;  %v10125_v36 = vpop.f32.mrb[42].mxu1 }
 0x3e0   : > { %v10126_v5 = vpop.f32.mrb[43].mxu1 }
 0x3e1   : > { %v13294_v22 = vadd.f32 %v10126_v5, %v10125_v36 }
 0x3f0   : > { %v10128_v0 = vpop.f32.mrb[44].mxu1 }
 0x3f1   : > { %v10129_v3 = vpop.f32.mrb[45].mxu1 }
 0x3f2   : > { %v13296_v54 = vadd.f32 %v10129_v3, %v10128_v0  ;;  %v10131_v38 = vpop.f32.mrb[46].mxu1  ;;  %v10572_v0 = vld [vmem:[%s14714_s5 + $0x50] sm:$0xff]  }
 0x3f3   : > { %v10132_v12 = vpop.f32.mrb[47].mxu1  ;;  %10180 = vmatprep.subr.bf16.mxu0 %v10572_v0 }
 0x3f4   : > { %v13298_v7 = vadd.f32 %v10132_v12, %v10131_v38 }
 0x406   : > { %v10134_v62 = vpop.f32.mrb[48].mxu1 }
 0x407   : > { %v10135_v23 = vpop.f32.mrb[49].mxu1 }
 0x408   : > { %v13310_v25 = vadd.f32 %v10135_v23, %v10134_v62  ;;  %v10137_v30 = vpop.f32.mrb[50].mxu1  ;;  %v13344_v62 = vld [vmem:[%s14713_s4] ss:$0 sm:$0xff]  ;;  %v10573_v23 = vld [vmem:[%s14714_s5 + $0x10] sm:$0xff]  }
 0x409   : > { %v10138_v18 = vpop.f32.mrb[51].mxu1  ;;  %10181 = vmatpush3.bf16.msra.mxu0 %v10573_v23  ;;  %v6492_v14 = vadd.f32 %v13239_v35, %v13344_v62 }
 0x40a   : > { %v13312_v19 = vadd.f32 %v10138_v18, %v10137_v30  ;;  %v6476_v30 = vadd.f32 %v13208_v39, %v13344_v62  ;;  %v6484_v39 = vadd.f32 %v13225_v58, %v13344_v62  ;;  %v13377_v58 = vadd.f32 %v13266_v61, %v13344_v62 }
 0x40b   : > { %v13394_v61 = vadd.f32 %v13274_v46, %v13344_v62 }
 0x416   : > { %v10140_v33 = vpop.f32.mrb[52].mxu1 }
 0x417   : > { %v10141_v48 = vpop.f32.mrb[53].mxu1 }
 0x418   : > { %v13317_v13 = vadd.f32 %v10141_v48, %v10140_v33  ;;  %v10143_v8 = vpop.f32.mrb[54].mxu1  ;;  %v6468_v33 = vadd.f32 %v13191_v52, %v13344_v62  ;;  %v6479_v48 = vadd.f32 %v13215_v29, %v13344_v62  ;;  %v6487_v52 = vadd.f32 %v13227_v2, %v13344_v62 }
 0x419   : > { %v10144_v47 = vpop.f32.mrb[55].mxu1  ;;  %v13369_v29 = vadd.f32 %v13264_v21, %v13344_v62  ;;  %v13385_v21 = vadd.f32 %v13272_v60, %v13344_v62  ;;  %v13403_v60 = vadd.f32 %v13280_v49, %v13344_v62  ;;  %v13417_v49 = vadd.f32 %v13278_v27, %v13344_v62 }
 0x41a   : > { %v13322_v11 = vadd.f32 %v10144_v47, %v10143_v8  ;;  %v6471_v8 = vadd.f32 %v13193_v50, %v13344_v62  ;;  %v13373_v50 = vadd.f32 %v13254_v10, %v13344_v62  ;;  %v13389_v10 = vadd.f32 %v13268_v15, %v13344_v62 }
 0x41b   : > { %v13407_v15 = vadd.f32 %v13276_v31, %v13344_v62  ;;  %v13428_v27 = vadd.f32 %v13296_v54, %v13344_v62 }
 0x426   : > { %v10146_v24 = vpop.f32.mrb[56].mxu1 }
 0x427   : > { %v10147_v6 = vpop.f32.mrb[57].mxu1 }
 0x428   : > { %v13327_v51 = vadd.f32 %v10147_v6, %v10146_v24  ;;  %v10149_v63 = vpop.f32.mrb[58].mxu1  ;;  %v6495_v24 = vadd.f32 %v13242_v26, %v13344_v62  ;;  %v13381_v26 = vadd.f32 %v13257_v56, %v13344_v62  ;;  %v13398_v56 = vadd.f32 %v13270_v4, %v13344_v62 }
 0x429   : > { %v10150_v37 = vpop.f32.mrb[59].mxu1 }
 0x42a   : > { %v13332_v36 = vadd.f32 %v10150_v37, %v10149_v63 }
 0x434   : > { %v10152_v45 = vpop.f32.mrb[60].mxu1 }
 0x435   : > { %v10153_v5 = vpop.f32.mrb[61].mxu1 }
 0x436   : > { %v13337_v3 = vadd.f32 %v10153_v5, %v10152_v45  ;;  %v10155_v38 = vpop.f32.mrb[62].mxu1 }
 0x437   : > { %v10156_v12 = vpop.f32.mrb[63].mxu1 }
 0x438   : > { %v13339_v59 = vadd.f32 %v10156_v12, %v10155_v38 }
 0x43c   : > { %v10334_v18 = vpop.f32.mrb[64].mxu1 }
 0x43d   : > { %v6637_v47 = vadd.f32 %v10334_v18, %v6476_v30  ;;  %v6628_v32 = vpop.f32.mrb[65].mxu1  ;;  %v13412_v18 = vadd.f32 %v13283_v57, %v13344_v62  ;;  %v10574_v57 = vld [vmem:[%s14714_s5 + $0x58] sm:$0xff]  }
 0x43e   : > { %v6629_v6 = vadd.f32 %v6628_v32, %v6468_v33  ;;  %v10335_v63 = vpop.f32.mrb[66].mxu1  ;;  %10182 = vmatprep.subr.bf16.mxu0 %v10574_v57 }
 0x43f   : > { %v6789_v35 = vmin.f32 %v6637_v47, 0.0  ;;  %v6640_v42 = vadd.f32 %v10335_v63, %v6479_v48  ;;  %v6631_v37 = vpop.f32.mrb[67].mxu1  ;;  %v6757_v23 = vmax.f32 %v6637_v47, 0.0 }
 0x440   : > { %v6787_v2 = vmin.f32 %v6629_v6, 0.0  ;;  %v6632_v45 = vadd.f32 %v6631_v37, %v6471_v8  ;;  %v6755_v4 = vmax.f32 %v6629_v6, 0.0 }
 0x441   : > { %v6822_v5 = vmul.f32 %v13351_v44, %v6789_v35  ;;  %v6790_v0 = vmin.f32 %v6640_v42, 0.0  ;;  %v6758_v30 = vmax.f32 %v6640_v42, 0.0  ;;  %v13421_v35 = vadd.f32 %v13290_v20, %v13344_v62 }
 0x442   : > { %v6820_v38 = vmul.f32 %v13351_v44, %v6787_v2  ;;  %v6788_v12 = vmin.f32 %v6632_v45, 0.0  ;;  %v6756_v33 = vmax.f32 %v6632_v45, 0.0  ;;  %v13434_v20 = vadd.f32 %v13298_v7, %v13344_v62  ;;  %v10575_v7 = vld [vmem:[%s14714_s5 + $0x18] sm:$0xff]  }
 0x443   : > { %v6823_v46 = vmul.f32 %v13351_v44, %v6790_v0  ;;  %v6854_v32 = vadd.f32 %v6822_v5, %v6757_v23  ;;  %10183 = vmatpush3.bf16.msra.mxu0 %v10575_v7 }
 0x444   : > { %v6821_v48 = vmul.f32 %v13351_v44, %v6788_v12  ;;  %v10338_v8 = vpop.f32.mrb[68].mxu1  ;;  %v6852_v6 = vadd.f32 %v6820_v38, %v6755_v4 }
 0x445   : > { %v6855_v31 = vadd.f32 %v6823_v46, %v6758_v30  ;;  %v6653_v63 = vadd.f32 %v10338_v8, %v6492_v14  ;;  %v6644_v47 = vpop.f32.mrb[69].mxu1 }
 0x446   : > { %v6853_v42 = vadd.f32 %v6821_v48, %v6756_v33  ;;  %v6645_v37 = vadd.f32 %v6644_v47, %v6484_v39  ;;  %v10339_v2 = vpop.f32.mrb[70].mxu1  ;;  %v13440_v39 = vadd.f32 %v13294_v22, %v13344_v62  ;;  %v13455_v22 = vadd.f32 %v13312_v19, %v13344_v62 }
 0x447   : > { %v13430_v45 = vpack.c.bf16 %v6855_v31, %v6854_v32  ;;  %v6793_v14 = vmin.f32 %v6653_v63, 0.0  ;;  %v6656_v5 = vadd.f32 %v10339_v2, %v6495_v24  ;;  %v6647_v0 = vpop.f32.mrb[71].mxu1  ;;  %v13446_v24 = vadd.f32 %v13310_v25, %v13344_v62 }
 0x448   : > { %v13436_v12 = vpack.c.bf16 %v6853_v42, %v6852_v6  ;;  %v6791_v38 = vmin.f32 %v6645_v37, 0.0  ;;  %v6648_v23 = vadd.f32 %v6647_v0, %v6487_v52  ;;  %v6761_v48 = vmax.f32 %v6653_v63, 0.0 }
 0x449   : > { %v6959_v54 = vrot.slane %v13430_v45, 4  ;;  %v6826_v30 = vmul.f32 %v13351_v44, %v6793_v14  ;;  %v6794_v46 = vmin.f32 %v6656_v5, 0.0  ;;  %v6762_v25 = vmax.f32 %v6656_v5, 0.0 }
 0x44a   : > { %v6958_v4 = vrot.slane %v13436_v12, 4  ;;  %v6824_v52 = vmul.f32 %v13351_v44, %v6791_v38  ;;  %v6792_v33 = vmin.f32 %v6648_v23, 0.0  ;;  %v13462_v32 = vadd.f32 %v13317_v13, %v13344_v62 }
 0x44b   : > { %6992 = vst.msk [vmem:[#allocation4 + $0x30] sm:$0xf0] %vm3687_vm1, %v6959_v54  ;;  %v6827_v8 = vmul.f32 %v13351_v44, %v6794_v46  ;;  %v6759_v31 = vmax.f32 %v6645_v37, 0.0  ;;  %v6760_v19 = vmax.f32 %v6648_v23, 0.0  ;;  %v13469_v63 = vadd.f32 %v13322_v11, %v13344_v62 }
 0x44c   : > { %6993 = vst.msk [vmem:[#allocation4 + $0x38] sm:$0xf] %vm3689_vm2, %v6959_v54  ;;  %6991 = vst.msk [vmem:[#allocation4 + $0x28] sm:$0xf] %vm3689_vm2, %v6958_v4  ;;  %v6825_v47 = vmul.f32 %v13351_v44, %v6792_v33  ;;  %v10342_v57 = vpop.f32.mrb[72].mxu1  ;;  %v6858_v6 = vadd.f32 %v6826_v30, %v6761_v48  ;;  %v13474_v14 = vadd.f32 %v13327_v51, %v13344_v62 }
 0x44d   : > { %6990 = vst.msk [vmem:[#allocation4 + $0x20] sm:$0xf0] %vm3687_vm1, %v6958_v4  ;;  %v6859_v42 = vadd.f32 %v6827_v8, %v6762_v25  ;;  %v6669_v13 = vadd.f32 %v10342_v57, %v13369_v29  ;;  %v6660_v2 = vpop.f32.mrb[73].mxu1  ;;  %v6856_v5 = vadd.f32 %v6824_v52, %v6759_v31  ;;  %v13479_v23 = vadd.f32 %v13332_v36, %v13344_v62 }
 0x44e   : > { %v6857_v37 = vadd.f32 %v6825_v47, %v6760_v19  ;;  %v6661_v0 = vadd.f32 %v6660_v2, %v13373_v50  ;;  %v10343_v38 = vpop.f32.mrb[74].mxu1  ;;  %v13486_v46 = vadd.f32 %v13337_v3, %v13344_v62 }
 0x44f   : > { %v13481_v11 = vpack.c.bf16 %v6859_v42, %v6858_v6  ;;  %v6797_v54 = vmin.f32 %v6669_v13, 0.0  ;;  %v6672_v30 = vadd.f32 %v10343_v38, %v13377_v58  ;;  %v6663_v29 = vpop.f32.mrb[75].mxu1  ;;  %v6765_v7 = vmax.f32 %v6669_v13, 0.0 }
 0x450   : > { %v13488_v51 = vpack.c.bf16 %v6857_v37, %v6856_v5  ;;  %v6795_v4 = vmin.f32 %v6661_v0, 0.0  ;;  %v6664_v50 = vadd.f32 %v6663_v29, %v13381_v26  ;;  %v6763_v33 = vmax.f32 %v6661_v0, 0.0 }
 0x451   : > { %v6961_v52 = vrot.slane %v13481_v11, 4  ;;  %v6830_v36 = vmul.f32 %v13351_v44, %v6797_v54  ;;  %v6798_v48 = vmin.f32 %v6672_v30, 0.0  ;;  %v6766_v8 = vmax.f32 %v6672_v30, 0.0 }
 0x452   : > { %v6960_v25 = vrot.slane %v13488_v51, 4  ;;  %v6828_v58 = vmul.f32 %v13351_v44, %v6795_v4  ;;  %v6796_v31 = vmin.f32 %v6664_v50, 0.0  ;;  %v7586_v3 = vld [vmem:[#allocation4 + $0x30] sm:$0xe0]  ;;  %v6764_v26 = vmax.f32 %v6664_v50, 0.0 }
 0x453   : > { %6996 = vst.msk [vmem:[#allocation4 + $0x50] sm:$0xf0] %vm3687_vm1, %v6961_v52  ;;  %v6831_v19 = vmul.f32 %v13351_v44, %v6798_v48  ;;  %v7587_v47 = vld [vmem:[#allocation4 + $0x38] sm:$0x1f]  ;;  %v7651_v57 = vrot.slane %v7586_v3, 5  ;;  %v13500_v42 = vadd.f32 %v13339_v59, %v13344_v62  ;;  %v6862_v13 = vadd.f32 %v6830_v36, %v6765_v7 }
 0x454   : > { %6997 = vst.msk [vmem:[#allocation4 + $0x58] sm:$0xf] %vm3689_vm2, %v6961_v52  ;;  %v7362_v6 = vld [vmem:[#allocation4 + $0x30] sm:$0xf8]  ;;  %6995 = vst.msk [vmem:[#allocation4 + $0x48] sm:$0xf] %vm3689_vm2, %v6960_v25  ;;  %v6829_v2 = vmul.f32 %v13351_v44, %v6796_v31  ;;  %v6860_v54 = vadd.f32 %v6828_v58, %v6763_v33 }
 0x455   : > { %6994 = vst.msk [vmem:[#allocation4 + $0x40] sm:$0xf0] %vm3687_vm1, %v6960_v25  ;;  %v10346_v5 = vpop.f32.mrb[76].mxu1  ;;  %v7652_v37 = vrot.slane %v7587_v47, 5  ;;  %v7363_v0 = vld [vmem:[#allocation4 + $0x38] sm:$0x7]  ;;  %v6863_v30 = vadd.f32 %v6831_v19, %v6766_v8 }
 0x456   : > { %v7427_v38 = vrot.slane %v7362_v6, 3  ;;  %v6685_v29 = vadd.f32 %v10346_v5, %v13385_v21  ;;  %v6676_v4 = vpop.f32.mrb[77].mxu1  ;;  %v7428_v50 = vrot.slane %v7363_v0, 3  ;;  %v7141_v52 = vld [vmem:[#allocation4 + $0x30] sm:$0xf0]  ;;  %v6861_v59 = vadd.f32 %v6829_v2, %v6764_v26  ;;  %v10576_v58 = vld [vmem:[%s14714_s5 + $0x60] sm:$0xff]  }
 0x457   : > { %v6677_v62 = vadd.f32 %v6676_v4, %v13389_v10  ;;  %v7653_v48 = vsel %vm7311_vm0, %v7651_v57, %v7652_v37  ;;  %v10347_v25 = vpop.f32.mrb[78].mxu1  ;;  %v7142_v7 = vld [vmem:[#allocation4 + $0x38] sm:$0xf]  ;;  %v7208_v36 = vrot.slane %v7141_v52, 4  ;;  %v13508_v31 = vpack.c.bf16 %v6863_v30, %v6862_v13  ;;  %v7584_v57 = vld [vmem:[#allocation4 + $0x20] sm:$0xe0]  ;;  %10184 = vmatprep.subr.bf16.mxu0 %v10576_v58 }
 0x458   : > { %v6769_v3 = vmax.f32 %v6685_v29, 0.0  ;;  %v6801_v47 = vmin.f32 %v6685_v29, 0.0  ;;  %8131 = vrot.lane.b32.xlu0 %v7653_v48, %s10736_s20  ;;  %v7429_v33 = vsel %vm7086_vm4, %v7427_v38, %v7428_v50  ;;  %v6679_v21 = vpop.f32.mrb[79].mxu1  ;;  %v13515_v8 = vpack.c.bf16 %v6861_v59, %v6860_v54  ;;  %v7585_v37 = vld [vmem:[#allocation4 + $0x28] sm:$0x1f] }
 0x459   : > { %v6767_v10 = vmax.f32 %v6677_v62, 0.0  ;;  %v6799_v19 = vmin.f32 %v6677_v62, 0.0  ;;  %8099 = vrot.lane.b32.xlu1 %v7429_v33, %s10741_s12  ;;  %v6688_v26 = vadd.f32 %v10347_v25, %v13394_v61  ;;  %v6963_v6 = vrot.slane %v13508_v31, 4  ;;  %v7253_v0 = vld [vmem:[#allocation4 + $0x30] sm:$0xe0]  ;;  %v10577_v61 = vld [vmem:[%s14714_s5 + $0x20] sm:$0xff]  }
 0x45a   : > { %v6834_v13 = vmul.f32 %v13351_v44, %v6801_v47  ;;  %v6680_v2 = vadd.f32 %v6679_v21, %v13398_v56  ;;  %v7209_v5 = vrot.slane %v7142_v7, 4  ;;  %v6962_v38 = vrot.slane %v13515_v8, 4  ;;  %v7254_v4 = vld [vmem:[#allocation4 + $0x38] sm:$0x1f]  ;;  %v7699_v62 = vld [vmem:[#allocation4 + $0x50] sm:$0xf8]  ;;  %10185 = vmatpush3.bf16.msra.mxu0 %v10577_v61 }
 0x45b   : > { %v6832_v54 = vmul.f32 %v13351_v44, %v6799_v19  ;;  %v6770_v30 = vmax.f32 %v6688_v26, 0.0  ;;  %v6802_v29 = vmin.f32 %v6688_v26, 0.0  ;;  %7000 = vst.msk [vmem:[#allocation4 + $0x70] sm:$0xf0] %vm3687_vm1, %v6963_v6  ;;  %v7648_v7 = vrot.slane %v7584_v57, 5 }
 0x45c   : > { %7001 = vst.msk [vmem:[#allocation4 + $0x78] sm:$0xf] %vm3689_vm2, %v6963_v6  ;;  %v6866_v56 = vadd.f32 %v6834_v13, %v6769_v3  ;;  %v6768_v50 = vmax.f32 %v6680_v2, 0.0  ;;  %v6800_v52 = vmin.f32 %v6680_v2, 0.0  ;;  %v7210_v59 = vsel %vm965_vm3, %v7208_v36, %v7209_v5  ;;  %6999 = vst.msk [vmem:[#allocation4 + $0x68] sm:$0xf] %vm3689_vm2, %v6962_v38 }
 0x45d   : > { %6998 = vst.msk [vmem:[#allocation4 + $0x60] sm:$0xf0] %vm3687_vm1, %v6962_v38  ;;  %v6864_v48 = vadd.f32 %v6832_v54, %v6767_v10  ;;  %v6835_v25 = vmul.f32 %v13351_v44, %v6802_v29  ;;  %8039 = vrot.lane.b32.xlu1 %v7210_v59, %s10736_s20  ;;  %v7649_v47 = vrot.slane %v7585_v37, 5  ;;  %v10350_v33 = vpop.f32.mrb[80].mxu1  ;;  %v7321_v36 = vrot.slane %v7253_v0, 5 }
 0x45e   : > { %v6833_v3 = vmul.f32 %v13351_v44, %v6800_v52  ;;  %v6701_v21 = vadd.f32 %v10350_v33, %v13403_v60  ;;  %v6692_v58 = vpop.f32.mrb[81].mxu1  ;;  %v7322_v19 = vrot.slane %v7254_v4, 5  ;;  %v7700_v2 = vld [vmem:[#allocation4 + $0x58] sm:$0x7]  ;;  %v7764_v5 = vrot.slane %v7699_v62, 3 }
 0x45f   : > { %v6867_v26 = vadd.f32 %v6835_v25, %v6770_v30  ;;  %v7650_v6 = vsel %vm7311_vm0, %v7648_v7, %v7649_v47  ;;  %v6693_v10 = vadd.f32 %v6692_v58, %v13407_v15  ;;  %v10351_v13 = vpop.f32.mrb[82].mxu1  ;;  %v7360_v15 = vld [vmem:[#allocation4 + $0x20] sm:$0xf8]  ;;  %v7765_v52 = vrot.slane %v7700_v2, 3  ;;  %v7361_v62 = vld [vmem:[#allocation4 + $0x28] sm:$0x7] }
 0x460   : > { %v6865_v38 = vadd.f32 %v6833_v3, %v6768_v50  ;;  %8129 = vrot.lane.b32.xlu0 %v7650_v6, %s10736_s20  ;;  %v6773_v57 = vmax.f32 %v6701_v21, 0.0  ;;  %v6805_v37 = vmin.f32 %v6701_v21, 0.0  ;;  %v7323_v54 = vsel %vm7311_vm0, %v7321_v36, %v7322_v19  ;;  %v6695_v29 = vpop.f32.mrb[83].mxu1  ;;  %v7811_v25 = vld [vmem:[#allocation4 + $0x50] sm:$0xf0] }
 0x461   : > { %v13540_v60 = vpack.c.bf16 %v6867_v26, %v6866_v56  ;;  %v6771_v0 = vmax.f32 %v6693_v10, 0.0  ;;  %v6803_v4 = vmin.f32 %v6693_v10, 0.0  ;;  %8071 = vrot.lane.b32.xlu1 %v7323_v54, %s10738_s25  ;;  %v6704_v30 = vadd.f32 %v10351_v13, %v13412_v18  ;;  %v10578_v56 = vld [vmem:[%s14714_s5 + $0x68] sm:$0xff]   ;;  %v7812_v3 = vld [vmem:[#allocation4 + $0x58] sm:$0xf] }
 0x462   : > { %v13544_v61 = vpack.c.bf16 %v6865_v38, %v6864_v48  ;;  %v6838_v50 = vmul.f32 %v13351_v44, %v6805_v37  ;;  %v6696_v59 = vadd.f32 %v6695_v29, %v13417_v49  ;;  %v10579_v48 = vld [vmem:[%s14714_s5 + $0x28] sm:$0xff]   ;;  %v7766_v58 = vsel %vm7086_vm4, %v7764_v5, %v7765_v52  ;;  %v7139_v19 = vld [vmem:[#allocation4 + $0x20] sm:$0xf0]  ;;  %10186 = vmatprep.subr.bf16.mxu0 %v10578_v56  ;;  %v7590_v52 = vld [vmem:[#allocation4 + $0x50] sm:$0xe0] }
 0x463   : > { %v6965_v7 = vrot.slane %v13540_v60, 4  ;;  %v6836_v47 = vmul.f32 %v13351_v44, %v6803_v4  ;;  %v6774_v33 = vmax.f32 %v6704_v30, 0.0  ;;  %v6806_v18 = vmin.f32 %v6704_v30, 0.0  ;;  %10187 = vmatpush3.bf16.msra.mxu0 %v10579_v48  ;;  %v7474_v16 = vld [vmem:[#allocation4 + $0x30] sm:$0xf0] }
 0x464   : > { %v6964_v21 = vrot.slane %v13544_v61, 4  ;;  %v6870_v49 = vadd.f32 %v6838_v50, %v6773_v57  ;;  %v6772_v36 = vmax.f32 %v6696_v59, 0.0  ;;  %8163 = vrot.lane.b32.xlu0 %v7766_v58, %s10738_s25  ;;  %v6804_v10 = vmin.f32 %v6696_v59, 0.0  ;;  %v10354_v2 = vpop.f32.mrb[84].mxu1  ;;  %v7140_v50 = vld [vmem:[#allocation4 + $0x28] sm:$0xf] }
 0x465   : > { %7004 = vst.msk [vmem:[#allocation4 + $0x90] sm:$0xf0] %vm3687_vm1, %v6965_v7  ;;  %v6868_v26 = vadd.f32 %v6836_v47, %v6771_v0  ;;  %v6839_v6 = vmul.f32 %v13351_v44, %v6806_v18  ;;  %v7424_v13 = vrot.slane %v7360_v15, 3  ;;  %v7425_v5 = vrot.slane %v7361_v62, 3  ;;  %v6708_v54 = vpop.f32.mrb[85].mxu1 }
 0x466   : > { %7005 = vst.msk [vmem:[#allocation4 + $0x98] sm:$0xf] %vm3689_vm2, %v6965_v7  ;;  %7003 = vst.msk [vmem:[#allocation4 + $0x88] sm:$0xf] %vm3689_vm2, %v6964_v21  ;;  %v7876_v38 = vrot.slane %v7811_v25, 4  ;;  %v7877_v57 = vrot.slane %v7812_v3, 4  ;;  %v6717_v37 = vadd.f32 %v10354_v2, %v13428_v27  ;;  %v6837_v0 = vmul.f32 %v13351_v44, %v6804_v10 }
 0x467   : > { %7002 = vst.msk [vmem:[#allocation4 + $0x80] sm:$0xf0] %vm3687_vm1, %v6964_v21  ;;  %v6871_v29 = vadd.f32 %v6839_v6, %v6774_v33  ;;  %v6709_v4 = vadd.f32 %v6708_v54, %v13421_v35  ;;  %v10355_v30 = vpop.f32.mrb[86].mxu1  ;;  %v7205_v15 = vrot.slane %v7139_v19, 4  ;;  %v7426_v59 = vsel %vm7086_vm4, %v7424_v13, %v7425_v5  ;;  %v7591_v25 = vld [vmem:[#allocation4 + $0x58] sm:$0x1f] }
 0x468   : > { %v7878_v56 = vsel %vm965_vm3, %v7876_v38, %v7877_v57  ;;  %v6777_v7 = vmax.f32 %v6717_v37, 0.0  ;;  %v6809_v62 = vmin.f32 %v6717_v37, 0.0  ;;  %v6711_v47 = vpop.f32.mrb[87].mxu1  ;;  %v10580_v27 = vld [vmem:[%s14714_s5 + $0x70] sm:$0xff]   ;;  %v6869_v18 = vadd.f32 %v6837_v0, %v6772_v36  ;;  %8097 = vrot.lane.b32.xlu1 %v7426_v59, %s10741_s12  ;;  %v7251_v6 = vld [vmem:[#allocation4 + $0x20] sm:$0xe0] }
 0x469   : > { %v13572_v33 = vpack.c.bf16 %v6871_v29, %v6870_v49  ;;  %8195 = vrot.lane.b32.xlu0 %v7878_v56, %s10741_s12  ;;  %v6775_v35 = vmax.f32 %v6709_v4, 0.0  ;;  %v6807_v3 = vmin.f32 %v6709_v4, 0.0  ;;  %v6720_v21 = vadd.f32 %v10355_v30, %v13434_v20  ;;  %10188 = vmatprep.subr.bf16.mxu0 %v10580_v27  ;;  %v7252_v2 = vld [vmem:[#allocation4 + $0x28] sm:$0x1f]  ;;  %v7697_v5 = vld [vmem:[#allocation4 + $0x40] sm:$0xf8] }
 0x46a   : > { %v6842_v48 = vmul.f32 %v13351_v44, %v6809_v62  ;;  %v7206_v58 = vrot.slane %v7140_v50, 4  ;;  %v7657_v19 = vrot.slane %v7590_v52, 5  ;;  %v13579_v13 = vpack.c.bf16 %v6869_v18, %v6868_v26  ;;  %v7698_v29 = vld [vmem:[#allocation4 + $0x48] sm:$0x7] }
 0x46b   : > { %v6967_v10 = vrot.slane %v13572_v33, 4  ;;  %v6840_v49 = vmul.f32 %v13351_v44, %v6807_v3  ;;  %v7658_v36 = vrot.slane %v7591_v25, 5  ;;  %v6778_v57 = vmax.f32 %v6720_v21, 0.0 }
 0x46c   : > { %v6874_v38 = vadd.f32 %v6842_v48, %v6777_v7  ;;  %v6810_v37 = vmin.f32 %v6720_v21, 0.0  ;;  %v7207_v54 = vsel %vm965_vm3, %v7205_v15, %v7206_v58  ;;  %v6966_v20 = vrot.slane %v13579_v13, 4  ;;  %v10358_v30 = vpop.f32.mrb[88].mxu1  ;;  %v7366_v48 = vld [vmem:[#allocation4 + $0x50] sm:$0xf8] }
 0x46d   : > { %7008 = vst.msk [vmem:[#allocation4 + $0xb0] sm:$0xf0] %vm3687_vm1, %v6967_v10  ;;  %v6872_v0 = vadd.f32 %v6840_v49, %v6775_v35  ;;  %8037 = vrot.lane.b32.xlu1 %v7207_v54, %s10736_s20  ;;  %v7659_v26 = vsel %vm7311_vm0, %v7657_v19, %v7658_v36  ;;  %v6712_v4 = vadd.f32 %v6711_v47, %v13440_v39  ;;  %v7318_v15 = vrot.slane %v7251_v6, 5  ;;  %v6724_v56 = vpop.f32.mrb[89].mxu1  ;;  %v10581_v58 = vld [vmem:[%s14714_s5 + $0x30] sm:$0xff]  }
 0x46e   : > { %7009 = vst.msk [vmem:[#allocation4 + $0xb8] sm:$0xf] %vm3689_vm2, %v6967_v10  ;;  %v6843_v50 = vmul.f32 %v13351_v44, %v6810_v37  ;;  %8135 = vrot.lane.b32.xlu0 %v7659_v26, %s10736_s20  ;;  %v7319_v52 = vrot.slane %v7252_v2, 5  ;;  %v7761_v59 = vrot.slane %v7697_v5, 3  ;;  %7007 = vst.msk [vmem:[#allocation4 + $0xa8] sm:$0xf] %vm3689_vm2, %v6966_v20  ;;  %v6733_v27 = vadd.f32 %v10358_v30, %v13462_v32 }
 0x46f   : > { %7006 = vst.msk [vmem:[#allocation4 + $0xa0] sm:$0xf0] %vm3687_vm1, %v6966_v20  ;;  %v6776_v7 = vmax.f32 %v6712_v4, 0.0  ;;  %v6808_v62 = vmin.f32 %v6712_v4, 0.0  ;;  %v7762_v25 = vrot.slane %v7698_v29, 3  ;;  %v10359_v18 = vpop.f32.mrb[90].mxu1  ;;  %v6725_v35 = vadd.f32 %v6724_v56, %v13446_v24  ;;  %10189 = vmatpush3.bf16.msra.mxu0 %v10581_v58 }
 0x470   : > { %v6875_v39 = vadd.f32 %v6843_v50, %v6778_v57  ;;  %v7320_v47 = vsel %vm7311_vm0, %v7318_v15, %v7319_v52  ;;  %v6736_v3 = vadd.f32 %v10359_v18, %v13469_v63  ;;  %v6727_v21 = vpop.f32.mrb[91].mxu1  ;;  %v6781_v6 = vmax.f32 %v6733_v27, 0.0  ;;  %v7367_v49 = vld [vmem:[#allocation4 + $0x58] sm:$0x7]  ;;  %v7809_v36 = vld [vmem:[#allocation4 + $0x40] sm:$0xf0] }
 0x471   : > { %v6841_v19 = vmul.f32 %v13351_v44, %v6808_v62  ;;  %8069 = vrot.lane.b32.xlu1 %v7320_v47, %s10738_s25  ;;  %v7763_v32 = vsel %vm7086_vm4, %v7761_v59, %v7762_v25  ;;  %v6813_v10 = vmin.f32 %v6733_v27, 0.0  ;;  %v6779_v24 = vmax.f32 %v6725_v35, 0.0  ;;  %v7810_v57 = vld [vmem:[#allocation4 + $0x48] sm:$0xf]  ;;  %v10582_v37 = vld [vmem:[%s14714_s5 + $0x78] sm:$0xff]  }
 0x472   : > { %v13603_v2 = vpack.c.bf16 %v6875_v39, %v6874_v38  ;;  %8161 = vrot.lane.b32.xlu0 %v7763_v32, %s10738_s25  ;;  %v6811_v63 = vmin.f32 %v6725_v35, 0.0  ;;  %v6782_v5 = vmax.f32 %v6736_v3, 0.0  ;;  %v6814_v20 = vmin.f32 %v6736_v3, 0.0  ;;  %v7145_v4 = vld [vmem:[#allocation4 + $0x50] sm:$0xf0]  ;;  %10190 = vmatprep.subr.bf16.mxu0 %v10582_v37  ;;  %v10583_v59 = vld [vmem:[%s14714_s5 + $0x38] sm:$0xff]  }
 0x473   : > { %v6873_v54 = vadd.f32 %v6841_v19, %v6776_v7  ;;  %v6846_v29 = vmul.f32 %v13351_v44, %v6813_v10  ;;  %v7433_v26 = vrot.slane %v7366_v48, 3  ;;  %v7434_v50 = vrot.slane %v7367_v49, 3  ;;  %v7146_v52 = vld [vmem:[#allocation4 + $0x58] sm:$0xf]  ;;  %v7588_v27 = vld [vmem:[#allocation4 + $0x40] sm:$0xe0]  ;;  %10191 = vmatpush3.bf16.msra.mxu0 %v10583_v59 }
 0x474   : > { %v6969_v38 = vrot.slane %v13603_v2, 4  ;;  %v6844_v30 = vmul.f32 %v13351_v44, %v6811_v63  ;;  %v7873_v15 = vrot.slane %v7809_v36, 4  ;;  %v6847_v62 = vmul.f32 %v13351_v44, %v6814_v20  ;;  %v7589_v18 = vld [vmem:[#allocation4 + $0x48] sm:$0x1f]  ;;  %v10362_v39 = vpop.f32.mrb[92].mxu1  ;;  %10364 = vmatprep.subr.bf16.mxu0 %v13303_v17 }
 0x475   : > { %v13615_v56 = vpack.c.bf16 %v6873_v54, %v6872_v0  ;;  %v6878_v7 = vadd.f32 %v6846_v29, %v6781_v6  ;;  %v7874_v25 = vrot.slane %v7810_v57, 4  ;;  %v7435_v35 = vsel %vm7086_vm4, %v7433_v26, %v7434_v50  ;;  %v6740_v58 = vpop.f32.mrb[93].mxu1  ;;  %v7257_v49 = vld [vmem:[#allocation4 + $0x50] sm:$0xe0]  ;;  %v7258_v17 = vld [vmem:[#allocation4 + $0x58] sm:$0x1f] }
 0x476   : > { %7012 = vst.msk [vmem:[#allocation4 + $0xd0] sm:$0xf0] %vm3687_vm1, %v6969_v38  ;;  %v6876_v47 = vadd.f32 %v6844_v30, %v6779_v24  ;;  %v6728_v3 = vadd.f32 %v6727_v21, %v13455_v22  ;;  %v7214_v48 = vrot.slane %v7145_v4, 4  ;;  %v6879_v19 = vadd.f32 %v6847_v62, %v6782_v5  ;;  %8103 = vrot.lane.b32.xlu1 %v7435_v35, %s10741_s12  ;;  %v10363_v10 = vpop.f32.mrb[94].mxu1  ;;  %v7704_v30 = vld [vmem:[#allocation4 + $0x78] sm:$0x7] }
 0x477   : > { %7013 = vst.msk [vmem:[#allocation4 + $0xd8] sm:$0xf] %vm3689_vm2, %v6969_v38  ;;  %v6968_v0 = vrot.slane %v13615_v56, 4  ;;  %v7875_v32 = vsel %vm965_vm3, %v7873_v15, %v7874_v25  ;;  %v7215_v6 = vrot.slane %v7146_v52, 4  ;;  %v7654_v22 = vrot.slane %v7588_v27, 5  ;;  %v6743_v63 = vpop.f32.mrb[95].mxu1 }
 0x478   : > { %8193 = vrot.lane.b32.xlu0 %v7875_v32, %s10741_s12  ;;  %v6780_v36 = vmax.f32 %v6728_v3, 0.0  ;;  %v6812_v24 = vmin.f32 %v6728_v3, 0.0  ;;  %v7655_v21 = vrot.slane %v7589_v18, 5  ;;  %v13629_v5 = vpack.c.bf16 %v6879_v19, %v6878_v7  ;;  %v7703_v38 = vld [vmem:[#allocation4 + $0x70] sm:$0xf8] }
 0x479   : > { %7010 = vst.msk [vmem:[#allocation4 + $0xc0] sm:$0xf0] %vm3687_vm1, %v6968_v0  ;;  %v7216_v57 = vsel %vm965_vm3, %v7214_v48, %v7215_v6  ;;  %v6749_v37 = vadd.f32 %v10362_v39, %v13486_v46  ;;  %v6741_v54 = vadd.f32 %v6740_v58, %v13474_v14  ;;  %v6752_v26 = vadd.f32 %v10363_v10, %v13500_v42  ;;  %v7933_v25 = vld [vmem:[#allocation4 + $0xa0] sm:$0xe0]  ;;  %v7815_v35 = vld [vmem:[#allocation4 + $0x70] sm:$0xf0] }
 0x47a   : > { %7011 = vst.msk [vmem:[#allocation4 + $0xc8] sm:$0xf] %vm3689_vm2, %v6968_v0  ;;  %v6845_v29 = vmul.f32 %v13351_v44, %v6812_v24  ;;  %v7656_v20 = vsel %vm7311_vm0, %v7654_v22, %v7655_v21  ;;  %v7327_v4 = vrot.slane %v7257_v49, 5  ;;  %v6971_v50 = vrot.slane %v13629_v5, 4  ;;  %8043 = vrot.lane.b32.xlu1 %v7216_v57, %s10736_s20  ;;  %v7816_v3 = vld [vmem:[#allocation4 + $0x78] sm:$0xf] }
 0x47b   : > { %v6785_v15 = vmax.f32 %v6749_v37, 0.0  ;;  %v6817_v52 = vmin.f32 %v6749_v37, 0.0  ;;  %v6783_v59 = vmax.f32 %v6741_v54, 0.0  ;;  %v6815_v14 = vmin.f32 %v6741_v54, 0.0  ;;  %v7934_v32 = vld [vmem:[#allocation4 + $0xa8] sm:$0x1f] }
 0x47c   : > { %v6877_v46 = vadd.f32 %v6845_v29, %v6780_v36  ;;  %8133 = vrot.lane.b32.xlu0 %v7656_v20, %s10736_s20  ;;  %v6786_v7 = vmax.f32 %v6752_v26, 0.0  ;;  %v6818_v62 = vmin.f32 %v6752_v26, 0.0  ;;  %7016 = vst.msk [vmem:[#allocation4 + $0xf0] sm:$0xf0] %vm3687_vm1, %v6971_v50  ;;  %v7328_v27 = vrot.slane %v7258_v17, 5 }
 0x47d   : > { %7017 = vst.msk [vmem:[#allocation4 + $0xf8] sm:$0xf] %vm3689_vm2, %v6971_v50  ;;  %v6850_v42 = vmul.f32 %v13351_v44, %v6817_v52  ;;  %v7770_v18 = vrot.slane %v7703_v38, 3  ;;  %v7771_v39 = vrot.slane %v7704_v30, 3  ;;  %v6848_v58 = vmul.f32 %v13351_v44, %v6815_v14  ;;  %v7935_v6 = vld [vmem:[#allocation4 + $0xb0] sm:$0xe0] }
 0x47e   : > { %v13643_v48 = vpack.c.bf16 %v6877_v46, %v6876_v47  ;;  %v6851_v0 = vmul.f32 %v13351_v44, %v6818_v62  ;;  %v6744_v19 = vadd.f32 %v6743_v63, %v13479_v23  ;;  %v7936_v10 = vld [vmem:[#allocation4 + $0xb8] sm:$0x1f]  ;;  %v7329_v36 = vsel %vm7311_vm0, %v7327_v4, %v7328_v27  ;;  %v7364_v21 = vld [vmem:[#allocation4 + $0x40] sm:$0xf8]  ;;  %v7365_v57 = vld [vmem:[#allocation4 + $0x48] sm:$0x7] }
 0x47f   : > { %v6882_v49 = vadd.f32 %v6850_v42, %v6785_v15  ;;  %v7772_v24 = vsel %vm7086_vm4, %v7770_v18, %v7771_v39  ;;  %v8003_v22 = vrot.slane %v7933_v25, 5  ;;  %v6880_v37 = vadd.f32 %v6848_v58, %v6783_v59  ;;  %8075 = vrot.lane.b32.xlu1 %v7329_v36, %s10738_s25  ;;  %v7594_v63 = vld [vmem:[#allocation4 + $0x70] sm:$0xe0]  ;;  %v7595_v17 = vld [vmem:[#allocation4 + $0x78] sm:$0x1f] }
 0x480   : > { %v6970_v47 = vrot.slane %v13643_v48, 4  ;;  %v6883_v54 = vadd.f32 %v6851_v0, %v6786_v7  ;;  %8167 = vrot.lane.b32.xlu0 %v7772_v24, %s10738_s25  ;;  %v6784_v23 = vmax.f32 %v6744_v19, 0.0  ;;  %v6816_v29 = vmin.f32 %v6744_v19, 0.0  ;;  %v7143_v38 = vld [vmem:[#allocation4 + $0x40] sm:$0xf0] }
 0x481   : > { %v8004_v20 = vrot.slane %v7934_v32, 5  ;;  %v8006_v26 = vrot.slane %v7935_v6, 5  ;;  %v8007_v4 = vrot.slane %v7936_v10, 5  ;;  %v7882_v50 = vrot.slane %v7815_v35, 4  ;;  %v7144_v59 = vld [vmem:[#allocation4 + $0x48] sm:$0xf] }
 0x482   : > { %7014 = vst.msk [vmem:[#allocation4 + $0xe0] sm:$0xf0] %vm3687_vm1, %v6970_v47  ;;  %v13655_v30 = vpack.c.bf16 %v6883_v54, %v6882_v49  ;;  %v7883_v15 = vrot.slane %v7816_v3, 4  ;;  %v7430_v52 = vrot.slane %v7364_v21, 3  ;;  %v6849_v46 = vmul.f32 %v13351_v44, %v6816_v29  ;;  %v7937_v25 = vld [vmem:[#allocation4 + $0xc0] sm:$0xe0] }
 0x483   : > { %7015 = vst.msk [vmem:[#allocation4 + $0xe8] sm:$0xf] %vm3689_vm2, %v6970_v47  ;;  %v8005_v14 = vsel %vm7311_vm0, %v8003_v22, %v8004_v20  ;;  %v8008_v7 = vsel %vm7311_vm0, %v8006_v26, %v8007_v4  ;;  %v7431_v62 = vrot.slane %v7365_v57, 3  ;;  %v7938_v42 = vld [vmem:[#allocation4 + $0xc8] sm:$0x1f]  ;;  %v7663_v35 = vrot.slane %v7594_v63, 5 }
 0x484   : > { %14773 = vst [vmem:[#allocation27_spill] sm:$0xff] %v13655_v30  ;;  %v7701_v27 = vld [vmem:[#allocation4 + $0x60] sm:$0xf8]  ;;  %v6973_v18 = vrot.slane %v13655_v30, 4  ;;  %10380 = vmatprep.mubr.msk.bf16.mxu1 %vm2952_vm7, %v8005_v14  ;;  %v7884_v39 = vsel %vm965_vm3, %v7882_v50, %v7883_v15  ;;  %v7664_v3 = vrot.slane %v7595_v17, 5  ;;  %v6881_v0 = vadd.f32 %v6849_v46, %v6784_v23 }
 0x485   : > { %v7939_v58 = vld [vmem:[#allocation4 + $0xd0] sm:$0xe0]  ;;  %10381 = vmatmul.mubr.msk.bf16.vlgmr.msra.gmra.mrb[96].mxu1 %vm2952_vm7, %v8008_v7  ;;  %8199 = vrot.lane.b32.xlu0 %v7884_v39, %s10741_s12  ;;  %v7432_v44 = vsel %vm7086_vm4, %v7430_v52, %v7431_v62  ;;  %v7211_v19 = vrot.slane %v7143_v38, 4  ;;  %v7212_v32 = vrot.slane %v7144_v59, 4  ;;  %v7940_v6 = vld [vmem:[#allocation4 + $0xd8] sm:$0x1f] }
 0x486   : > { %v7702_v10 = vld [vmem:[#allocation4 + $0x68] sm:$0x7]  ;;  %7020 = vst.msk [vmem:[#allocation4 + $0x110] sm:$0xf0] %vm3687_vm1, %v6973_v18  ;;  %8101 = vrot.lane.b32.xlu1 %v7432_v44, %s10741_s12  ;;  %v8009_v49 = vrot.slane %v7937_v25, 5  ;;  %v8010_v36 = vrot.slane %v7938_v42, 5  ;;  %v13669_v21 = vpack.c.bf16 %v6881_v0, %v6880_v37  ;;  %v7665_v57 = vsel %vm7311_vm0, %v7663_v35, %v7664_v3 }
 0x487   : > { %7021 = vst.msk [vmem:[#allocation4 + $0x118] sm:$0xf] %vm3689_vm2, %v6973_v18  ;;  %v7255_v24 = vld [vmem:[#allocation4 + $0x40] sm:$0xe0]  ;;  %v7256_v22 = vld [vmem:[#allocation4 + $0x48] sm:$0x1f]  ;;  %v7213_v4 = vsel %vm965_vm3, %v7211_v19, %v7212_v32 }
 0x488   : > { %14774 = vst [vmem:[#allocation28_spill] sm:$0xff] %v13669_v21  ;;  %v8012_v47 = vrot.slane %v7939_v58, 5  ;;  %v7813_v54 = vld [vmem:[#allocation4 + $0x60] sm:$0xf0]  ;;  %v8011_v23 = vsel %vm7311_vm0, %v8009_v49, %v8010_v36  ;;  %v8013_v63 = vrot.slane %v7940_v6, 5  ;;  %v7767_v17 = vrot.slane %v7701_v27, 3 }
 0x489   : > { %v7768_v29 = vrot.slane %v7702_v10, 3  ;;  %v7814_v20 = vld [vmem:[#allocation4 + $0x68] sm:$0xf]  ;;  %v6972_v26 = vrot.slane %v13669_v21, 4  ;;  %8139 = vrot.lane.b32.xlu0 %v7665_v57, %s10736_s20  ;;  %10384 = vmatprep.mubr.msk.bf16.mxu1 %vm2952_vm7, %v8011_v23  ;;  %v7324_v37 = vrot.slane %v7255_v24, 5  ;;  %v7325_v38 = vrot.slane %v7256_v22, 5 }
 0x48a   : > { %v7941_v50 = vld [vmem:[#allocation4 + $0xe0] sm:$0xe0]  ;;  %8041 = vrot.lane.b32.xlu1 %v7213_v4, %s10736_s20  ;;  %v7370_v15 = vld [vmem:[#allocation4 + $0x70] sm:$0xf8]  ;;  %v7371_v52 = vld [vmem:[#allocation4 + $0x78] sm:$0x7]  ;;  %v8014_v25 = vsel %vm7311_vm0, %v8012_v47, %v8013_v63 }
 0x48b   : > { %v7942_v59 = vld [vmem:[#allocation4 + $0xe8] sm:$0x1f]  ;;  %7018 = vst.msk [vmem:[#allocation4 + $0x100] sm:$0xf0] %vm3687_vm1, %v6972_v26  ;;  %v7879_v46 = vrot.slane %v7813_v54, 4  ;;  %v7880_v14 = vrot.slane %v7814_v20, 4  ;;  %v7769_v42 = vsel %vm7086_vm4, %v7767_v17, %v7768_v29  ;;  %v7326_v39 = vsel %vm7311_vm0, %v7324_v37, %v7325_v38 }
 0x48c   : > { %7019 = vst.msk [vmem:[#allocation4 + $0x108] sm:$0xf] %vm3689_vm2, %v6972_v26  ;;  %v8015_v7 = vrot.slane %v7941_v50, 5  ;;  %v8016_v62 = vrot.slane %v7942_v59, 5  ;;  %v7592_v27 = vld [vmem:[#allocation4 + $0x60] sm:$0xe0] }
 0x48d   : > { %v7593_v18 = vld [vmem:[#allocation4 + $0x68] sm:$0x1f]  ;;  %10385 = vmatmul.mubr.msk.bf16.gmra.mrb[100].mxu1 %vm2952_vm7, %v8014_v25  ;;  %8165 = vrot.lane.b32.xlu0 %v7769_v42, %s10738_s25  ;;  %v7439_v35 = vrot.slane %v7370_v15, 3  ;;  %v7440_v3 = vrot.slane %v7371_v52, 3  ;;  %v7943_v0 = vld [vmem:[#allocation4 + $0xf0] sm:$0xe0]  ;;  %v7881_v6 = vsel %vm965_vm3, %v7879_v46, %v7880_v14 }
 0x48e   : > { %v8017_v58 = vsel %vm7311_vm0, %v8015_v7, %v8016_v62  ;;  %v7944_v44 = vld [vmem:[#allocation4 + $0xf8] sm:$0x1f]  ;;  %8073 = vrot.lane.b32.xlu1 %v7326_v39, %s10738_s25  ;;  %v7149_v19 = vld [vmem:[#allocation4 + $0x70] sm:$0xf0]  ;;  %v8018_v10 = vrot.slane %v7943_v0, 5  ;;  %v7660_v36 = vrot.slane %v7592_v27, 5 }
 0x48f   : > { %10388 = vmatprep.mubr.msk.bf16.mxu1 %vm2952_vm7, %v8017_v58  ;;  %v7150_v32 = vld [vmem:[#allocation4 + $0x78] sm:$0xf]  ;;  %v8019_v49 = vrot.slane %v7944_v44, 5  ;;  %v7661_v24 = vrot.slane %v7593_v18, 5  ;;  %v7707_v22 = vld [vmem:[#allocation4 + $0x90] sm:$0xf8]  ;;  %v7441_v57 = vsel %vm7086_vm4, %v7439_v35, %v7440_v3 }
 0x490   : > { %v7220_v47 = vrot.slane %v7149_v19, 4  ;;  %v7221_v54 = vrot.slane %v7150_v32, 4  ;;  %v7708_v23 = vld [vmem:[#allocation4 + $0x98] sm:$0x7]  ;;  %v7261_v63 = vld [vmem:[#allocation4 + $0x70] sm:$0xe0] }
 0x491   : > { %8197 = vrot.lane.b32.xlu0 %v7881_v6, %s10741_s12  ;;  %v7262_v17 = vld [vmem:[#allocation4 + $0x78] sm:$0x1f]  ;;  %v8020_v37 = vsel %vm7311_vm0, %v8018_v10, %v8019_v49  ;;  %v7662_v38 = vsel %vm7311_vm0, %v7660_v36, %v7661_v24  ;;  %v7776_v50 = vrot.slane %v7707_v22, 3  ;;  %v7777_v15 = vrot.slane %v7708_v23, 3  ;;  %v7947_v52 = vld [vmem:[#allocation4 + $0x110] sm:$0xe0] }
 0x492   : > { %8107 = vrot.lane.b32.xlu1 %v7441_v57, %s10741_s12  ;;  %v7945_v29 = vld [vmem:[#allocation4 + $0x100] sm:$0xe0]  ;;  %v7819_v59 = vld [vmem:[#allocation4 + $0x90] sm:$0xf0]  ;;  %v7222_v46 = vsel %vm965_vm3, %v7220_v47, %v7221_v54  ;;  %v7333_v14 = vrot.slane %v7261_v63, 5  ;;  %v7334_v7 = vrot.slane %v7262_v17, 5 }
 0x493   : > { %v7946_v20 = vld [vmem:[#allocation4 + $0x108] sm:$0x1f]  ;;  %v8021_v26 = vrot.slane %v7945_v29, 5  ;;  %v7948_v25 = vld [vmem:[#allocation4 + $0x118] sm:$0x1f]  ;;  %v8024_v39 = vrot.slane %v7947_v52, 5  ;;  %v7778_v35 = vsel %vm7086_vm4, %v7776_v50, %v7777_v15 }
 0x494   : > { %v8022_v4 = vrot.slane %v7946_v20, 5  ;;  %v7820_v42 = vld [vmem:[#allocation4 + $0x98] sm:$0xf]  ;;  %v7368_v27 = vld [vmem:[#allocation4 + $0x60] sm:$0xf8]  ;;  %v8025_v3 = vrot.slane %v7948_v25, 5  ;;  %v7335_v44 = vsel %vm7311_vm0, %v7333_v14, %v7334_v7 }
 0x495   : > { %10389 = vmatmul.mubr.msk.bf16.gmra.mrb[104].mxu1 %vm2952_vm7, %v8020_v37  ;;  %8137 = vrot.lane.b32.xlu0 %v7662_v38, %s10736_s20  ;;  %v7369_v18 = vld [vmem:[#allocation4 + $0x68] sm:$0x7]  ;;  %v7888_v58 = vrot.slane %v7819_v59, 4  ;;  %v7889_v0 = vrot.slane %v7820_v42, 4  ;;  %v7436_v19 = vrot.slane %v7368_v27, 3 }
 0x496   : > { %v8023_v62 = vsel %vm7311_vm0, %v8021_v26, %v8022_v4  ;;  %8047 = vrot.lane.b32.xlu1 %v7222_v46, %s10736_s20  ;;  %v7437_v32 = vrot.slane %v7369_v18, 3  ;;  %v7598_v6 = vld [vmem:[#allocation4 + $0x90] sm:$0xe0]  ;;  %v7599_v10 = vld [vmem:[#allocation4 + $0x98] sm:$0x1f]  ;;  %v8026_v24 = vsel %vm7311_vm0, %v8024_v39, %v8025_v3 }
 0x497   : > { %10392 = vmatprep.mubr.msk.bf16.mxu1 %vm2952_vm7, %v8023_v62  ;;  %v7147_v49 = vld [vmem:[#allocation4 + $0x60] sm:$0xf0]  ;;  %v7148_v36 = vld [vmem:[#allocation4 + $0x68] sm:$0xf]  ;;  %v7890_v22 = vsel %vm965_vm3, %v7888_v58, %v7889_v0  ;;  %v7669_v57 = vrot.slane %v7598_v6, 5  ;;  %v7670_v47 = vrot.slane %v7599_v10, 5 }
 0x498   : > { %v7438_v54 = vsel %vm7086_vm4, %v7436_v19, %v7437_v32  ;;  %v7217_v23 = vrot.slane %v7147_v49, 4  ;;  %v7218_v63 = vrot.slane %v7148_v36, 4  ;;  %v7705_v17 = vld [vmem:[#allocation4 + $0x80] sm:$0xf8]  ;;  %v7706_v29 = vld [vmem:[#allocation4 + $0x88] sm:$0x7] }
 0x499   : > { %8171 = vrot.lane.b32.xlu0 %v7778_v35, %s10738_s25  ;;  %v7259_v20 = vld [vmem:[#allocation4 + $0x60] sm:$0xe0]  ;;  %v7260_v26 = vld [vmem:[#allocation4 + $0x68] sm:$0x1f]  ;;  %v7671_v4 = vsel %vm7311_vm0, %v7669_v57, %v7670_v47  ;;  %v7773_v37 = vrot.slane %v7705_v17, 3  ;;  %v7774_v38 = vrot.slane %v7706_v29, 3 }
 0x49a   : > { %8079 = vrot.lane.b32.xlu1 %v7335_v44, %s10738_s25  ;;  %v7219_v50 = vsel %vm965_vm3, %v7217_v23, %v7218_v63  ;;  %v7330_v15 = vrot.slane %v7259_v20, 5  ;;  %v7331_v52 = vrot.slane %v7260_v26, 5  ;;  %v7817_v59 = vld [vmem:[#allocation4 + $0x80] sm:$0xf0]  ;;  %v7818_v46 = vld [vmem:[#allocation4 + $0x88] sm:$0xf] }
 0x49b   : > { %v7374_v14 = vld [vmem:[#allocation4 + $0x90] sm:$0xf8]  ;;  %v7375_v7 = vld [vmem:[#allocation4 + $0x98] sm:$0x7]  ;;  %v7775_v62 = vsel %vm7086_vm4, %v7773_v37, %v7774_v38  ;;  %v7885_v25 = vrot.slane %v7817_v59, 4  ;;  %v7886_v42 = vrot.slane %v7818_v46, 4 }
 0x49c   : > { %v7332_v27 = vsel %vm7311_vm0, %v7330_v15, %v7331_v52  ;;  %v7445_v18 = vrot.slane %v7374_v14, 3  ;;  %v7446_v39 = vrot.slane %v7375_v7, 3  ;;  %v7596_v35 = vld [vmem:[#allocation4 + $0x80] sm:$0xe0]  ;;  %v7597_v3 = vld [vmem:[#allocation4 + $0x88] sm:$0x1f] }
 0x49d   : > { %10393 = vmatmul.mubr.msk.bf16.gmra.mrb[108].mxu1 %vm2952_vm7, %v8026_v24  ;;  %8203 = vrot.lane.b32.xlu0 %v7890_v22, %s10741_s12  ;;  %v7153_v58 = vld [vmem:[#allocation4 + $0x90] sm:$0xf0]  ;;  %v7154_v0 = vld [vmem:[#allocation4 + $0x98] sm:$0xf]  ;;  %v7887_v44 = vsel %vm965_vm3, %v7885_v25, %v7886_v42  ;;  %v7666_v19 = vrot.slane %v7596_v35, 5  ;;  %v7667_v32 = vrot.slane %v7597_v3, 5  ;;  %v13730_v42 = vpop.permute.xlu1 %8033 }
 0x49e   : > { %8105 = vrot.lane.b32.xlu1 %v7438_v54, %s10741_s12  ;;  %v7447_v6 = vsel %vm7086_vm4, %v7445_v18, %v7446_v39  ;;  %v7226_v10 = vrot.slane %v7153_v58, 4  ;;  %v7227_v49 = vrot.slane %v7154_v0, 4  ;;  %v7711_v36 = vld [vmem:[#allocation4 + $0xb0] sm:$0xf8]  ;;  %v7712_v24 = vld [vmem:[#allocation4 + $0xb8] sm:$0x7] }
 0x49f   : > { %v7265_v22 = vld [vmem:[#allocation4 + $0x90] sm:$0xe0]  ;;  %v7266_v57 = vld [vmem:[#allocation4 + $0x98] sm:$0x1f]  ;;  %v7668_v47 = vsel %vm7311_vm0, %v7666_v19, %v7667_v32  ;;  %v7782_v54 = vrot.slane %v7711_v36, 3  ;;  %v7783_v23 = vrot.slane %v7712_v24, 3 }
 0x4a0   : > { %v7228_v63 = vsel %vm965_vm3, %v7226_v10, %v7227_v49  ;;  %v7339_v17 = vrot.slane %v7265_v22, 5  ;;  %v7340_v29 = vrot.slane %v7266_v57, 5  ;;  %v7823_v20 = vld [vmem:[#allocation4 + $0xb0] sm:$0xf0]  ;;  %v7824_v26 = vld [vmem:[#allocation4 + $0xb8] sm:$0xf] }
 0x4a1   : > { %8143 = vrot.lane.b32.xlu0 %v7671_v4, %s10736_s20  ;;  %v7372_v4 = vld [vmem:[#allocation4 + $0x80] sm:$0xf8]  ;;  %v7373_v37 = vld [vmem:[#allocation4 + $0x88] sm:$0x7]  ;;  %v7784_v38 = vsel %vm7086_vm4, %v7782_v54, %v7783_v23  ;;  %v7895_v15 = vrot.slane %v7824_v26, 4  ;;  %v13739_v54 = vpop.permute.xlu1 %8065 }
 0x4a2   : > { %8045 = vrot.lane.b32.xlu1 %v7219_v50, %s10736_s20  ;;  %v7894_v50 = vrot.slane %v7823_v20, 4  ;;  %v7341_v52 = vsel %vm7311_vm0, %v7339_v17, %v7340_v29  ;;  %v7442_v59 = vrot.slane %v7372_v4, 3  ;;  %v7443_v46 = vrot.slane %v7373_v37, 3  ;;  %v7602_v14 = vld [vmem:[#allocation4 + $0xb0] sm:$0xe0] }
 0x4a3   : > { %v7603_v7 = vld [vmem:[#allocation4 + $0xb8] sm:$0x1f]  ;;  %v7152_v25 = vld [vmem:[#allocation4 + $0x88] sm:$0xf]  ;;  %v7675_v18 = vrot.slane %v7602_v14, 5 }
 0x4a4   : > { %v7676_v39 = vrot.slane %v7603_v7, 5  ;;  %v7444_v35 = vsel %vm7086_vm4, %v7442_v59, %v7443_v46  ;;  %v7224_v58 = vrot.slane %v7152_v25, 4  ;;  %v7709_v0 = vld [vmem:[#allocation4 + $0xa0] sm:$0xf8]  ;;  %v7264_v32 = vld [vmem:[#allocation4 + $0x88] sm:$0x1f] }
 0x4a5   : > { %8169 = vrot.lane.b32.xlu0 %v7775_v62, %s10738_s25  ;;  %v7151_v62 = vld [vmem:[#allocation4 + $0x80] sm:$0xf0]  ;;  %v7779_v10 = vrot.slane %v7709_v0, 3  ;;  %v7337_v22 = vrot.slane %v7264_v32, 5  ;;  %v7378_v23 = vld [vmem:[#allocation4 + $0xb0] sm:$0xf8]  ;;  %v13746_v59 = vpop.permute.xlu1 %8035 }
 0x4a6   : > { %8077 = vrot.lane.b32.xlu1 %v7332_v27, %s10738_s25  ;;  %v7896_v27 = vsel %vm965_vm3, %v7894_v50, %v7895_v15  ;;  %v7223_v3 = vrot.slane %v7151_v62, 4  ;;  %v7263_v19 = vld [vmem:[#allocation4 + $0x80] sm:$0xe0]  ;;  %v7451_v4 = vrot.slane %v7378_v23, 3  ;;  %v7601_v50 = vld [vmem:[#allocation4 + $0xa8] sm:$0x1f] }
 0x4a7   : > { %v7336_v24 = vrot.slane %v7263_v19, 5  ;;  %v7821_v57 = vld [vmem:[#allocation4 + $0xa0] sm:$0xf0]  ;;  %v7157_v15 = vld [vmem:[#allocation4 + $0xb0] sm:$0xf0]  ;;  %v7673_v7 = vrot.slane %v7601_v50, 5 }
 0x4a8   : > { %v7225_v36 = vsel %vm965_vm3, %v7223_v3, %v7224_v58  ;;  %v7891_v29 = vrot.slane %v7821_v57, 4  ;;  %v7232_v25 = vrot.slane %v7157_v15, 4  ;;  %v7270_v3 = vld [vmem:[#allocation4 + $0xb8] sm:$0x1f]  ;;  %v7718_v41 = vld [vmem:[#allocation4 + $0xe8] sm:$0x7] }
 0x4a9   : > { %8201 = vrot.lane.b32.xlu0 %v7887_v44, %s10741_s12  ;;  %v7710_v44 = vld [vmem:[#allocation4 + $0xa8] sm:$0x7]  ;;  %v7338_v26 = vsel %vm7311_vm0, %v7336_v24, %v7337_v22  ;;  %v7376_v24 = vld [vmem:[#allocation4 + $0xa0] sm:$0xf8]  ;;  %v7792_v40 = vrot.slane %v7718_v41, 3 }
 0x4aa   : > { %8111 = vrot.lane.b32.xlu1 %v7447_v6, %s10741_s12  ;;  %v7677_v6 = vsel %vm7311_vm0, %v7675_v18, %v7676_v39  ;;  %v7780_v49 = vrot.slane %v7710_v44, 3  ;;  %v7715_v18 = vld [vmem:[#allocation4 + $0xd0] sm:$0xf8]  ;;  %v7716_v39 = vld [vmem:[#allocation4 + $0xd8] sm:$0x7] }
 0x4ab   : > { %v7788_v0 = vrot.slane %v7715_v18, 3  ;;  %v7789_v44 = vrot.slane %v7716_v39, 3  ;;  %v7377_v22 = vld [vmem:[#allocation4 + $0xa8] sm:$0x7]  ;;  %v7267_v18 = vld [vmem:[#allocation4 + $0xa0] sm:$0xe0] }
 0x4ac   : > { %v7781_v17 = vsel %vm7086_vm4, %v7779_v10, %v7780_v49  ;;  %v7827_v10 = vld [vmem:[#allocation4 + $0xd0] sm:$0xf0]  ;;  %v7828_v49 = vld [vmem:[#allocation4 + $0xd8] sm:$0xf]  ;;  %v7268_v39 = vld [vmem:[#allocation4 + $0xa8] sm:$0x1f] }
 0x4ad   : > { %8141 = vrot.lane.b32.xlu0 %v7668_v47, %s10736_s20  ;;  %v7822_v47 = vld [vmem:[#allocation4 + $0xa8] sm:$0xf]  ;;  %v7790_v57 = vsel %vm7086_vm4, %v7788_v0, %v7789_v44  ;;  %v7901_v23 = vrot.slane %v7828_v49, 4 }
 0x4ae   : > { %8051 = vrot.lane.b32.xlu1 %v7228_v63, %s10736_s20  ;;  %v7379_v63 = vld [vmem:[#allocation4 + $0xb8] sm:$0x7]  ;;  %v7892_v20 = vrot.slane %v7822_v47, 4  ;;  %v7900_v47 = vrot.slane %v7827_v10, 4  ;;  %v7826_v10 = vld [vmem:[#allocation4 + $0xc8] sm:$0xf] }
 0x4af   : > { %v7452_v37 = vrot.slane %v7379_v63, 3 }
 0x4b0   : > { %v7893_v46 = vsel %vm965_vm3, %v7891_v29, %v7892_v20  ;;  %v7449_v29 = vrot.slane %v7377_v22, 3  ;;  %v7606_v20 = vld [vmem:[#allocation4 + $0xd0] sm:$0xe0]  ;;  %v7902_v50 = vsel %vm965_vm3, %v7900_v47, %v7901_v23  ;;  %v7383_v22 = vld [vmem:[#allocation4 + $0xd8] sm:$0x7]  ;;  %v7898_v23 = vrot.slane %v7826_v10, 4 }
 0x4b1   : > { %8175 = vrot.lane.b32.xlu0 %v7784_v38, %s10738_s25  ;;  %v7600_v38 = vld [vmem:[#allocation4 + $0xa0] sm:$0xe0]  ;;  %v7453_v62 = vsel %vm7086_vm4, %v7451_v4, %v7452_v37  ;;  %v7156_v37 = vld [vmem:[#allocation4 + $0xa8] sm:$0xf]  ;;  %v7681_v15 = vrot.slane %v7606_v20, 5 }
 0x4b2   : > { %8083 = vrot.lane.b32.xlu1 %v7341_v52, %s10738_s25  ;;  %v7158_v52 = vld [vmem:[#allocation4 + $0xb8] sm:$0xf]  ;;  %v7672_v14 = vrot.slane %v7600_v38, 5  ;;  %v7155_v4 = vld [vmem:[#allocation4 + $0xa0] sm:$0xf0] }
 0x4b4   : > { %v7674_v58 = vsel %vm7311_vm0, %v7672_v14, %v7673_v7  ;;  %v7229_v7 = vrot.slane %v7155_v4, 4  ;;  %v7605_v4 = vld [vmem:[#allocation4 + $0xc8] sm:$0x1f] }
 0x4b5   : > { %8207 = vrot.lane.b32.xlu0 %v7896_v27, %s10741_s12  ;;  %v7233_v27 = vrot.slane %v7158_v52, 4 }
 0x4b6   : > { %8109 = vrot.lane.b32.xlu1 %v7444_v35, %s10741_s12  ;;  %v7269_v35 = vld [vmem:[#allocation4 + $0xb0] sm:$0xe0] }
 0x4b7   : > { %v7234_v19 = vsel %vm965_vm3, %v7232_v25, %v7233_v27  ;;  %v7345_v32 = vrot.slane %v7269_v35, 5  ;;  %v7713_v25 = vld [vmem:[#allocation4 + $0xc0] sm:$0xf8]  ;;  %v7714_v27 = vld [vmem:[#allocation4 + $0xc8] sm:$0x7] }
 0x4b8   : > { %v7786_v0 = vrot.slane %v7714_v27, 3 }
 0x4b9   : > { %8147 = vrot.lane.b32.xlu0 %v7677_v6, %s10736_s20  ;;  %v7346_v6 = vrot.slane %v7270_v3, 5 }
 0x4ba   : > { %8049 = vrot.lane.b32.xlu1 %v7225_v36, %s10736_s20  ;;  %v13755_v36 = vpop.permute.xlu1 %8067 }
 0x4bb   : > { %v7347_v63 = vsel %vm7311_vm0, %v7345_v32, %v7346_v6  ;;  %v7343_v32 = vrot.slane %v7268_v39, 5  ;;  %v7825_v6 = vld [vmem:[#allocation4 + $0xc0] sm:$0xf0]  ;;  %v7720_v39 = vld [vmem:[#allocation4 + $0xf8] sm:$0x7] }
 0x4bc   : > { %v7897_v47 = vrot.slane %v7825_v6, 4 }
 0x4bd   : > { %8173 = vrot.lane.b32.xlu0 %v7781_v17, %s10738_s25  ;;  %v7448_v17 = vrot.slane %v7376_v24, 3  ;;  %v7382_v24 = vld [vmem:[#allocation4 + $0xd0] sm:$0xf8] }
 0x4be   : > { %8081 = vrot.lane.b32.xlu1 %v7338_v26, %s10738_s25  ;;  %v7607_v26 = vld [vmem:[#allocation4 + $0xd8] sm:$0x1f] }
 0x4bf   : > { %v7682_v52 = vrot.slane %v7607_v26, 5  ;;  %v7450_v14 = vsel %vm7086_vm4, %v7448_v17, %v7449_v29  ;;  %v7457_v17 = vrot.slane %v7382_v24, 3  ;;  %v7458_v29 = vrot.slane %v7383_v22, 3  ;;  %v7604_v26 = vld [vmem:[#allocation4 + $0xc0] sm:$0xe0] }
 0x4c0   : > { %v7795_v24 = vrot.slane %v7720_v39, 3 }
 0x4c1   : > { %8205 = vrot.lane.b32.xlu0 %v7893_v46, %s10741_s12  ;;  %v7683_v3 = vsel %vm7311_vm0, %v7681_v15, %v7682_v52  ;;  %v7899_v52 = vsel %vm965_vm3, %v7897_v47, %v7898_v23  ;;  %v7831_v23 = vld [vmem:[#allocation4 + $0xf0] sm:$0xf0] }
 0x4c2   : > { %8115 = vrot.lane.b32.xlu1 %v7453_v62, %s10741_s12  ;;  %v7230_v62 = vrot.slane %v7156_v37, 4  ;;  %v7161_v37 = vld [vmem:[#allocation4 + $0xd0] sm:$0xf0] }
 0x4c4   : > { %v7231_v44 = vsel %vm965_vm3, %v7229_v7, %v7230_v62  ;;  %v7679_v7 = vrot.slane %v7605_v4, 5  ;;  %v7459_v62 = vsel %vm7086_vm4, %v7457_v17, %v7458_v29  ;;  %v7380_v17 = vld [vmem:[#allocation4 + $0xc0] sm:$0xf8]  ;;  %v7381_v29 = vld [vmem:[#allocation4 + $0xc8] sm:$0x7] }
 0x4c5   : > { %8145 = vrot.lane.b32.xlu0 %v7674_v58, %s10736_s20  ;;  %v7785_v58 = vrot.slane %v7713_v25, 3  ;;  %v7238_v25 = vrot.slane %v7161_v37, 4  ;;  %v7455_v39 = vrot.slane %v7381_v29, 3 }
 0x4c6   : > { %8055 = vrot.lane.b32.xlu1 %v7234_v19, %s10736_s20  ;;  %v7342_v19 = vrot.slane %v7267_v18, 5  ;;  %v7719_v18 = vld [vmem:[#allocation4 + $0xf0] sm:$0xf8] }
 0x4c7   : > { %v7794_v10 = vrot.slane %v7719_v18, 3  ;;  %v7454_v18 = vrot.slane %v7380_v17, 3 }
 0x4c9   : > { %8179 = vrot.lane.b32.xlu0 %v7790_v57, %s10738_s25  ;;  %v7787_v57 = vsel %vm7086_vm4, %v7785_v58, %v7786_v0  ;;  %v7274_v58 = vld [vmem:[#allocation4 + $0xd8] sm:$0x1f] }
 0x4ca   : > { %8087 = vrot.lane.b32.xlu1 %v7347_v63, %s10738_s25  ;;  %v13765_v46 = vpop.permute.xlu0 %8131  ;;  %v7344_v63 = vsel %vm7311_vm0, %v7342_v19, %v7343_v32  ;;  %v7022_v19 = vld [vmem:[#allocation4] sm:$0xf8]  ;;  %v7023_v32 = vld [vmem:[#allocation4 + $0x8] sm:$0x7]  ;;  %v7352_v47 = vrot.slane %v7274_v58, 5 }
 0x4cb   : > { %v13762_v38 = vpop.permute.xlu1 %8099  ;;  %v7088_v4 = vrot.slane %v7023_v32, 3  ;;  %v7611_v58 = vld [vmem:[#allocation4 + $0xf8] sm:$0x1f] }
 0x4cc   : > { %v7025_v32 = vld [vmem:[#allocation4 + $0x18] sm:$0x7]  ;;  %v7688_v29 = vrot.slane %v7611_v58, 5 }
 0x4cd   : > { %8211 = vrot.lane.b32.xlu0 %v7902_v50, %s10741_s12  ;;  %v7162_v50 = vld [vmem:[#allocation4 + $0xd8] sm:$0xf] }
 0x4ce   : > { %8113 = vrot.lane.b32.xlu1 %v7450_v14, %s10741_s12  ;;  %v7678_v14 = vrot.slane %v7604_v26, 5  ;;  %v7239_v27 = vrot.slane %v7162_v50, 4  ;;  %v7087_v26 = vrot.slane %v7022_v19, 3  ;;  %v7473_v50 = vld [vmem:[#allocation4 + $0x28] sm:$0xf] }
 0x4cf   : > { %v13770_v35 = vpop.permute.xlu1 %8039  ;;  %v7024_v19 = vld [vmem:[#allocation4 + $0x10] sm:$0xf8] }
 0x4d0   : > { %v7680_v6 = vsel %vm7311_vm0, %v7678_v14, %v7679_v7  ;;  %v7240_v22 = vsel %vm965_vm3, %v7238_v25, %v7239_v27  ;;  %v7796_v14 = vsel %vm7086_vm4, %v7794_v10, %v7795_v24  ;;  %v7089_v10 = vsel %vm7086_vm4, %v7087_v26, %v7088_v4  ;;  %v7475_v24 = vld [vmem:[#allocation4 + $0x38] sm:$0xf] }
 0x4d1   : > { %8151 = vrot.lane.b32.xlu0 %v7683_v3, %s10736_s20  ;;  %v7273_v3 = vld [vmem:[#allocation4 + $0xd0] sm:$0xe0]  ;;  %v8227_v26 = vsel %vm2952_vm7, %v7089_v10, %v13730_v42  ;;  %v7540_v4 = vrot.slane %v7475_v24, 4  ;;  %v7387_v24 = vld [vmem:[#allocation4 + $0xf8] sm:$0x7] }
 0x4d2   : > { %8053 = vrot.lane.b32.xlu1 %v7231_v44, %s10736_s20  ;;  %v13776_v49 = vpop.permute.xlu0 %8129  ;;  %v8274_v41 = vsel %vm3018_vm10, %v8227_v26, %v13739_v54  ;;  %v7464_v26 = vrot.slane %v7387_v24, 3 }
 0x4d3   : > { %v13781_v20 = vpop.permute.xlu1 %8071 }
 0x4d5   : > { %8177 = vrot.lane.b32.xlu0 %v7787_v57, %s10738_s25  ;;  %v7351_v57 = vrot.slane %v7273_v3, 5  ;;  %v7610_v3 = vld [vmem:[#allocation4 + $0xf0] sm:$0xe0] }
 0x4d6   : > { %8085 = vrot.lane.b32.xlu1 %v7344_v63, %s10738_s25  ;;  %v13784_v15 = vpop.permute.xlu0 %8163  ;;  %v7832_v63 = vld [vmem:[#allocation4 + $0xf8] sm:$0xf]  ;;  %v7687_v17 = vrot.slane %v7610_v3, 5  ;;  %v7091_v3 = vrot.slane %v7025_v32, 3 }
 0x4d7   : > { %v7907_v25 = vrot.slane %v7832_v63, 4  ;;  %v7353_v27 = vsel %vm7311_vm0, %v7351_v57, %v7352_v47 }
 0x4d9   : > { %8209 = vrot.lane.b32.xlu0 %v7899_v52, %s10741_s12  ;;  %v7472_v52 = vld [vmem:[#allocation4 + $0x20] sm:$0xf0] }
 0x4da   : > { %8119 = vrot.lane.b32.xlu1 %v7459_v62, %s10741_s12  ;;  %v13790_v0 = vpop.permute.xlu1 %8097  ;;  %v7906_v62 = vrot.slane %v7831_v23, 4  ;;  %v7537_v23 = vrot.slane %v7473_v50, 4  ;;  %v7536_v63 = vrot.slane %v7472_v52, 4  ;;  %v7539_v50 = vrot.slane %v7474_v16, 4  ;;  %v7271_v52 = vld [vmem:[#allocation4 + $0xc0] sm:$0xe0] }
 0x4db   : > { %v13792_v44 = vpop.permute.xlu0 %8195 }
 0x4dc   : > { %v7908_v57 = vsel %vm965_vm3, %v7906_v62, %v7907_v25  ;;  %v7272_v62 = vld [vmem:[#allocation4 + $0xc8] sm:$0x1f]  ;;  %v7090_v25 = vrot.slane %v7024_v19, 3  ;;  %v7538_v53 = vsel %vm965_vm3, %v7536_v63, %v7537_v23  ;;  %v7541_v32 = vsel %vm965_vm3, %v7539_v50, %v7540_v4  ;;  %v7608_v4 = vld [vmem:[#allocation4 + $0xe0] sm:$0xe0] }
 0x4dd   : > { %8149 = vrot.lane.b32.xlu0 %v7680_v6, %s10736_s20  ;;  %v7159_v6 = vld [vmem:[#allocation4 + $0xc0] sm:$0xf0]  ;;  %v7830_v19 = vld [vmem:[#allocation4 + $0xe8] sm:$0xf] }
 0x4de   : > { %8059 = vrot.lane.b32.xlu1 %v7240_v22, %s10736_s20  ;;  %v7160_v22 = vld [vmem:[#allocation4 + $0xc8] sm:$0xf]  ;;  %v7235_v9 = vrot.slane %v7159_v6, 4  ;;  %v7349_v6 = vrot.slane %v7272_v62, 5 }
 0x4df   : > { %v13798_v37 = vpop.permute.xlu1 %8037  ;;  %v7236_v28 = vrot.slane %v7160_v22, 4  ;;  %v7829_v22 = vld [vmem:[#allocation4 + $0xe0] sm:$0xf0]  ;;  %v7385_v62 = vld [vmem:[#allocation4 + $0xe8] sm:$0x7] }
 0x4e0   : > { %v13801_v7 = vpop.permute.xlu0 %8135 }
 0x4e1   : > { %8183 = vrot.lane.b32.xlu0 %v7796_v14, %s10738_s25  ;;  %v7717_v14 = vld [vmem:[#allocation4 + $0xe0] sm:$0xf8]  ;;  %v7237_v42 = vsel %vm965_vm3, %v7235_v9, %v7236_v28  ;;  %v7092_v28 = vsel %vm7086_vm4, %v7090_v25, %v7091_v3  ;;  %v8358_v9 = vsel %vm2952_vm7, %v7541_v32, %v13765_v46  ;;  %v7684_v3 = vrot.slane %v7608_v4, 5 }
 0x4e2   : > { %8091 = vrot.lane.b32.xlu1 %v7353_v27, %s10738_s25  ;;  %v7456_v27 = vsel %vm7086_vm4, %v7454_v18, %v7455_v39  ;;  %v7791_v58 = vrot.slane %v7717_v14, 3  ;;  %v8355_v18 = vsel %vm2952_vm7, %v7538_v53, %v13776_v49  ;;  %v7348_v39 = vrot.slane %v7271_v52, 5  ;;  %v7386_v49 = vld [vmem:[#allocation4 + $0xf0] sm:$0xf8]  ;;  %v7384_v52 = vld [vmem:[#allocation4 + $0xe0] sm:$0xf8] }
 0x4e3   : > { %v13807_v34 = vpop.permute.xlu1 %8069  ;;  %v8404_v54 = vsel %vm3018_vm10, %v8358_v9, %v13784_v15  ;;  %v7609_v15 = vld [vmem:[#allocation4 + $0xe8] sm:$0x1f]  ;;  %v10648_v25 = vld [vmem:[%s14714_s5 + $0x80] sm:$0xff]  }
 0x4e4   : > { %v8162_v47 = vpop.permute.xlu0 %8161  ;;  %v7793_v63 = vsel %vm7086_vm4, %v7791_v58, %v7792_v40  ;;  %v7350_v14 = vsel %vm7311_vm0, %v7348_v39, %v7349_v6  ;;  %v8437_v46 = vsel %vm3084_vm12, %v8404_v54, %v13792_v44  ;;  %v7463_v40 = vrot.slane %v7386_v49, 3  ;;  %v7723_v6 = vld [vmem:[#allocation4 + $0x110] sm:$0xf8]  ;;  %v7163_v32 = vld [vmem:[#allocation4 + $0xe0] sm:$0xf0] }
 0x4e5   : > { %8215 = vrot.lane.b32.xlu0 %v7908_v57, %s10741_s12  ;;  %v7689_v57 = vsel %vm7311_vm0, %v7687_v17, %v7688_v29  ;;  %v8402_v10 = vsel %vm3018_vm10, %v8355_v18, %v8162_v47  ;;  %v8306_v47 = vsel %vm3084_vm12, %v8274_v41, %v13790_v0  ;;  %v7903_v17 = vrot.slane %v7829_v22, 4  ;;  %v7724_v22 = vld [vmem:[#allocation4 + $0x118] sm:$0x7] }
 0x4e6   : > { %8117 = vrot.lane.b32.xlu1 %v7456_v27, %s10741_s12  ;;  %v7904_v29 = vrot.slane %v7830_v19, 4  ;;  %v8230_v0 = vsel %vm2952_vm7, %v7092_v28, %v13746_v59  ;;  %v7685_v58 = vrot.slane %v7609_v15, 5  ;;  %v10649_v59 = vld [vmem:[%s14714_s5 + $0x88] sm:$0xff]   ;;  %v7465_v18 = vsel %vm7086_vm4, %v7463_v40, %v7464_v26  ;;  %v7836_v54 = vld [vmem:[#allocation4 + $0x118] sm:$0xf] }
 0x4e7   : > { %v7461_v39 = vrot.slane %v7385_v62, 3  ;;  %v7800_v49 = vrot.slane %v7723_v6, 3  ;;  %v7801_v24 = vrot.slane %v7724_v22, 3  ;;  %v7241_v9 = vrot.slane %v7163_v32, 4  ;;  %v7027_v15 = vld [vmem:[#allocation4 + $0x28] sm:$0x7] }
 0x4e8   : > { %v13821_v16 = vpop.permute.xlu1 %8103  ;;  %v7905_v44 = vsel %vm965_vm3, %v7903_v17, %v7904_v29  ;;  %v7276_v17 = vld [vmem:[#allocation4 + $0xe8] sm:$0x1f]  ;;  %v7913_v4 = vrot.slane %v7836_v54, 4  ;;  %v13880_v22 = vld [vmem:[#allocation4 + $0x38] sm:$0x7] }
 0x4e9   : > { %8155 = vrot.lane.b32.xlu0 %v7689_v57, %s10736_s20  ;;  %v8276_v57 = vsel %vm3018_vm10, %v8230_v0, %v13755_v36  ;;  %v7802_v40 = vsel %vm7086_vm4, %v7800_v49, %v7801_v24  ;;  %v7355_v62 = vrot.slane %v7276_v17, 5  ;;  %v7833_v49 = vld [vmem:[#allocation4 + $0x100] sm:$0xf0]  ;;  %v7834_v24 = vld [vmem:[#allocation4 + $0x108] sm:$0xf]  ;;  %v7094_v17 = vrot.slane %v7027_v15, 3 }
 0x4ea   : > { %8057 = vrot.lane.b32.xlu1 %v7237_v42, %s10736_s20  ;;  %v8194_v53 = vpop.permute.xlu0 %8193  ;;  %v7460_v42 = vrot.slane %v7384_v52, 3  ;;  %v8309_v36 = vsel %vm3084_vm12, %v8276_v57, %v13762_v38  ;;  %v7479_v57 = vld [vmem:[#allocation4 + $0x58] sm:$0xf]  ;;  %v7389_v54 = vld [vmem:[#allocation4 + $0x108] sm:$0x7] }
 0x4eb   : > { %v8434_v23 = vsel %vm3084_vm12, %v8402_v10, %v8194_v53  ;;  %v7164_v10 = vld [vmem:[#allocation4 + $0xe8] sm:$0xf]  ;;  %v7686_v53 = vsel %vm7311_vm0, %v7684_v3, %v7685_v58  ;;  %v7026_v3 = vld [vmem:[#allocation4 + $0x20] sm:$0xf8]  ;;  %v7165_v58 = vld [vmem:[#allocation4 + $0xf0] sm:$0xf0] }
 0x4ec   : > { %8712 = vmatprep.mubr.bf16.mxu0 %v8434_v23  ;;  %v13839_v27 = vpop.permute.xlu1 %8043  ;;  %v7462_v28 = vsel %vm7086_vm4, %v7460_v42, %v7461_v39  ;;  %v7242_v23 = vrot.slane %v7164_v10, 4 }
 0x4ed   : > { %8181 = vrot.lane.b32.xlu0 %v7793_v63, %s10738_s25  ;;  %8713 = vmatmul.mubr.bf16.vlgmr.msra.gmra.mrb[64].mxu0 %v8306_v47  ;;  %v7835_v63 = vld [vmem:[#allocation4 + $0x110] sm:$0xf0]  ;;  %v7275_v47 = vld [vmem:[#allocation4 + $0xe0] sm:$0xe0] }
 0x4ee   : > { %8089 = vrot.lane.b32.xlu1 %v7350_v14, %s10738_s25  ;;  %8720 = vmatprep.mubr.bf16.mxu0 %v8437_v46  ;;  %v13846_v50 = vpop.permute.xlu0 %8133  ;;  %v7477_v14 = vld [vmem:[#allocation4 + $0x48] sm:$0xf]  ;;  %v7476_v46 = vld [vmem:[#allocation4 + $0x40] sm:$0xf0]  ;;  %v7912_v26 = vrot.slane %v7835_v63, 4  ;;  %v7243_v0 = vsel %vm965_vm3, %v7241_v9, %v7242_v23  ;;  %v7354_v52 = vrot.slane %v7275_v47, 5 }
 0x4ef   : > { %10365 = vmatpush3.bf16.msra.mxu0 %v10648_v25  ;;  %v7721_v25 = vld [vmem:[#allocation4 + $0x100] sm:$0xf8]  ;;  %v7543_v42 = vrot.slane %v7477_v14, 4  ;;  %v7542_v39 = vrot.slane %v7476_v46, 4  ;;  %v7244_v9 = vrot.slane %v7165_v58, 4  ;;  %v7093_v14 = vrot.slane %v7026_v3, 3 }
 0x4f0   : > { %10366 = vmatprep.subr.bf16.mxu0 %v10649_v59  ;;  %v7914_v10 = vsel %vm965_vm3, %v7912_v26, %v7913_v4  ;;  %v7388_v63 = vld [vmem:[#allocation4 + $0x100] sm:$0xf8]  ;;  %v13887_v47 = vld [vmem:[#allocation4 + $0x30] sm:$0xf8]  ;;  %v7546_v46 = vrot.slane %v7479_v57, 4  ;;  %v7909_v4 = vrot.slane %v7833_v49, 4 }
 0x4f1   : > { %8213 = vrot.lane.b32.xlu0 %v7905_v44, %s10741_s12  ;;  %v13860_v19 = vpop.permute.xlu1 %8075  ;;  %v7722_v44 = vld [vmem:[#allocation4 + $0x108] sm:$0x7]  ;;  %v7467_v58 = vrot.slane %v7389_v54, 3  ;;  %v7096_v15 = vrot.slane %v13887_v47, 3  ;;  %v7544_v3 = vsel %vm965_vm3, %v7542_v39, %v7543_v42 }
 0x4f2   : > { %8123 = vrot.lane.b32.xlu1 %v7465_v18, %s10741_s12  ;;  %v13862_v41 = vpop.permute.xlu0 %8167  ;;  %v7478_v18 = vld [vmem:[#allocation4 + $0x50] sm:$0xf0]  ;;  %v8361_v49 = vsel %vm2952_vm7, %v7544_v3, %v13846_v50  ;;  %v7838_v54 = vld [vmem:[#allocation4 + $0x128] sm:$0xf]  ;;  %v7612_v3 = vld [vmem:[#allocation4 + $0x100] sm:$0xe0] }
 0x4f3   : > { %10367 = vmatpush3.bf16.msra.mxu0 %v10649_v59  ;;  %v7166_v59 = vld [vmem:[#allocation4 + $0xf8] sm:$0xf] }
 0x4f4   : > { %v7245_v23 = vrot.slane %v7166_v59, 4  ;;  %v7097_v59 = vrot.slane %v13880_v22, 3 }
 0x4f5   : > { %8153 = vrot.lane.b32.xlu0 %v7686_v53, %s10736_s20  ;;  %8721 = vmatmul.mubr.bf16.gmra.mrb[68].mxu0 %v8309_v36  ;;  %v7797_v53 = vrot.slane %v7721_v25, 3  ;;  %v7798_v36 = vrot.slane %v7722_v44, 3  ;;  %v7725_v25 = vld [vmem:[#allocation4 + $0x120] sm:$0xf8]  ;;  %v7726_v44 = vld [vmem:[#allocation4 + $0x128] sm:$0x7] }
 0x4f6   : > { %8121 = vrot.lane.b32.xlu1 %v7462_v28, %s10741_s12  ;;  %v7356_v28 = vsel %vm7311_vm0, %v7354_v52, %v7355_v62  ;;  %v7466_v62 = vrot.slane %v7388_v63, 3  ;;  %v7246_v57 = vsel %vm965_vm3, %v7244_v9, %v7245_v23  ;;  %v7837_v23 = vld [vmem:[#allocation4 + $0x120] sm:$0xf0] }
 0x4f7   : > { %v13870_v29 = vpop.permute.xlu0 %8199  ;;  %v7799_v52 = vsel %vm7086_vm4, %v7797_v53, %v7798_v36  ;;  %v7803_v53 = vrot.slane %v7725_v25, 3  ;;  %v7804_v36 = vrot.slane %v7726_v44, 3  ;;  %v7915_v44 = vrot.slane %v7837_v23, 4  ;;  %v7951_v23 = vld [vmem:[#allocation4 + $0x130] sm:$0xe0] }
 0x4f8   : > { %v13872_v38 = vpop.permute.xlu1 %8101 }
 0x4f9   : > { %8187 = vrot.lane.b32.xlu0 %v7802_v40, %s10738_s25  ;;  %v7545_v40 = vrot.slane %v7478_v18, 4  ;;  %v7095_v18 = vsel %vm7086_vm4, %v7093_v14, %v7094_v17  ;;  %v7805_v25 = vsel %vm7086_vm4, %v7803_v53, %v7804_v36 }
 0x4fa   : > { %8061 = vrot.lane.b32.xlu1 %v7243_v0, %s10736_s20  ;;  %v7910_v0 = vrot.slane %v7834_v24, 4  ;;  %v7277_v24 = vld [vmem:[#allocation4 + $0xf0] sm:$0xe0]  ;;  %v8233_v22 = vsel %vm2952_vm7, %v7095_v18, %v13798_v37  ;;  %v7468_v37 = vsel %vm7086_vm4, %v7466_v62, %v7467_v58 }
 0x4fb   : > { %v13878_v6 = vpop.permute.xlu0 %8139  ;;  %v7547_v42 = vsel %vm965_vm3, %v7545_v40, %v7546_v46  ;;  %v8278_v47 = vsel %vm3018_vm10, %v8233_v22, %v13807_v34  ;;  %v7614_v22 = vld [vmem:[#allocation4 + $0x110] sm:$0xe0] }
 0x4fc   : > { %v13882_v32 = vpop.permute.xlu1 %8041  ;;  %v7911_v9 = vsel %vm965_vm3, %v7909_v4, %v7910_v0  ;;  %v8364_v50 = vsel %vm2952_vm7, %v7547_v42, %v13801_v7  ;;  %v8312_v40 = vsel %vm3084_vm12, %v8278_v47, %v13872_v38  ;;  %v7390_v4 = vld [vmem:[#allocation4 + $0x110] sm:$0xf8]  ;;  %v7391_v0 = vld [vmem:[#allocation4 + $0x118] sm:$0x7] }
 0x4fd   : > { %8219 = vrot.lane.b32.xlu0 %v7914_v10, %s10741_s12  ;;  %v8408_v46 = vsel %vm3018_vm10, %v8364_v50, %v13862_v41  ;;  %v7916_v41 = vrot.slane %v7838_v54, 4  ;;  %v7469_v38 = vrot.slane %v7390_v4, 3  ;;  %v7470_v58 = vrot.slane %v7391_v0, 3  ;;  %v7615_v42 = vld [vmem:[#allocation4 + $0x118] sm:$0x1f] }
 0x4fe   : > { %8093 = vrot.lane.b32.xlu1 %v7356_v28, %s10738_s25  ;;  %v7278_v28 = vld [vmem:[#allocation4 + $0xf8] sm:$0x1f]  ;;  %v8443_v34 = vsel %vm3084_vm12, %v8408_v46, %v13870_v29  ;;  %v7727_v46 = vld [vmem:[#allocation4 + $0x130] sm:$0xf8]  ;;  %v7693_v0 = vrot.slane %v7614_v22, 5 }
 0x4ff   : > { %v8166_v26 = vpop.permute.xlu0 %8165  ;;  %v7358_v7 = vrot.slane %v7278_v28, 5  ;;  %v7917_v29 = vsel %vm965_vm3, %v7915_v44, %v7916_v41  ;;  %v7952_v47 = vld [vmem:[#allocation4 + $0x138] sm:$0x1f]  ;;  %v7480_v44 = vld [vmem:[#allocation4 + $0x60] sm:$0xf0] }
 0x500   : > { %v13890_v10 = vpop.permute.xlu1 %8073  ;;  %v8406_v39 = vsel %vm3018_vm10, %v8361_v49, %v8166_v26  ;;  %v7357_v26 = vrot.slane %v7277_v24, 5  ;;  %v7098_v49 = vsel %vm7086_vm4, %v7096_v15, %v7097_v59  ;;  %v7690_v24 = vrot.slane %v7612_v3, 5  ;;  %v7949_v15 = vld [vmem:[#allocation4 + $0x120] sm:$0xe0]  ;;  %v7481_v41 = vld [vmem:[#allocation4 + $0x68] sm:$0xf] }
 0x501   : > { %8185 = vrot.lane.b32.xlu0 %v7799_v52, %s10738_s25  ;;  %v8236_v53 = vsel %vm2952_vm7, %v7098_v49, %v13770_v35  ;;  %v7471_v59 = vsel %vm7086_vm4, %v7469_v38, %v7470_v58  ;;  %v8027_v54 = vrot.slane %v7949_v15, 5  ;;  %v7806_v38 = vrot.slane %v7727_v46, 3  ;;  %v7030_v3 = vld [vmem:[#allocation4 + $0x40] sm:$0xf8]  ;;  %v7840_v49 = vld [vmem:[#allocation4 + $0x138] sm:$0xf] }
 0x502   : > { %8063 = vrot.lane.b32.xlu1 %v7246_v57, %s10736_s20  ;;  %v7613_v57 = vld [vmem:[#allocation4 + $0x108] sm:$0x1f]  ;;  %v7359_v18 = vsel %vm7311_vm0, %v7357_v26, %v7358_v7 }
 0x503   : > { %v8198_v63 = vpop.permute.xlu0 %8197  ;;  %v7691_v28 = vrot.slane %v7613_v57, 5 }
 0x504   : > { %v13911_v17 = vpop.permute.xlu1 %8107  ;;  %v8440_v14 = vsel %vm3084_vm12, %v8406_v39, %v8198_v63  ;;  %v8280_v39 = vsel %vm3018_vm10, %v8236_v53, %v13781_v20  ;;  %v8031_v20 = vrot.slane %v7952_v47, 5  ;;  %v7483_v53 = vld [vmem:[#allocation4 + $0x78] sm:$0xf] }
 0x505   : > { %8217 = vrot.lane.b32.xlu0 %v7911_v9, %s10741_s12  ;;  %8728 = vmatprep.mubr.bf16.mxu0 %v8440_v14  ;;  %v7950_v9 = vld [vmem:[#allocation4 + $0x128] sm:$0x1f]  ;;  %v8315_v35 = vsel %vm3084_vm12, %v8280_v39, %v13821_v16  ;;  %v8030_v14 = vrot.slane %v7951_v23, 5  ;;  %v7692_v4 = vsel %vm7311_vm0, %v7690_v24, %v7691_v28  ;;  %v7549_v39 = vrot.slane %v7481_v41, 4 }
 0x506   : > { %8125 = vrot.lane.b32.xlu1 %v7468_v37, %s10741_s12  ;;  %8729 = vmatmul.mubr.bf16.gmra.mrb[72].mxu0 %v8312_v40  ;;  %v8028_v50 = vrot.slane %v7950_v9, 5  ;;  %v7728_v40 = vld [vmem:[#allocation4 + $0x138] sm:$0x7]  ;;  %v7919_v9 = vrot.slane %v7840_v49, 4 }
 0x507   : > { %v13924_v52 = vpop.permute.xlu0 %8137  ;;  %8736 = vmatprep.mubr.bf16.mxu0 %v8443_v34  ;;  %v7694_v34 = vrot.slane %v7615_v42, 5  ;;  %v8032_v16 = vsel %vm7311_vm0, %v8030_v14, %v8031_v20  ;;  %v7807_v58 = vrot.slane %v7728_v40, 3  ;;  %v7548_v42 = vrot.slane %v7480_v44, 4  ;;  %v7033_v40 = vld [vmem:[#allocation4 + $0x58] sm:$0x7] }
 0x508   : > { %v13926_v62 = vpop.permute.xlu1 %8047  ;;  %v8029_v26 = vsel %vm7311_vm0, %v8027_v54, %v8028_v50 }
 0x509   : > { %8189 = vrot.lane.b32.xlu0 %v7805_v25, %s10738_s25  ;;  %10396 = vmatprep.mubr.msk.bf16.mxu1 %vm2952_vm7, %v8029_v26  ;;  %v7031_v25 = vld [vmem:[#allocation4 + $0x48] sm:$0x7]  ;;  %v7695_v28 = vsel %vm7311_vm0, %v7693_v0, %v7694_v34  ;;  %v7550_v47 = vsel %vm965_vm3, %v7548_v42, %v7549_v39  ;;  %v7032_v26 = vld [vmem:[#allocation4 + $0x50] sm:$0xf8]  ;;  %v7484_v42 = vld [vmem:[#allocation4 + $0x80] sm:$0xf0] }
 0x50a   : > { %8095 = vrot.lane.b32.xlu1 %v7359_v18, %s10738_s25  ;;  %10397 = vmatmul.mubr.msk.bf16.gmra.mrb[112].mxu1 %vm2952_vm7, %v8032_v16  ;;  %v7839_v18 = vld [vmem:[#allocation4 + $0x130] sm:$0xf0]  ;;  %v7100_v22 = vrot.slane %v7031_v25, 3  ;;  %v8367_v20 = vsel %vm2952_vm7, %v7550_v47, %v13924_v52  ;;  %v7485_v39 = vld [vmem:[#allocation4 + $0x88] sm:$0xf] }
 0x50b   : > { %v13935_v36 = vpop.permute.xlu0 %8171  ;;  %v7918_v15 = vrot.slane %v7839_v18, 4 }
 0x50c   : > { %v13939_v63 = vpop.permute.xlu1 %8079 }
 0x50d   : > { %8221 = vrot.lane.b32.xlu0 %v7917_v29, %s10741_s12  ;;  %v7482_v29 = vld [vmem:[#allocation4 + $0x70] sm:$0xf0]  ;;  %v7920_v46 = vsel %vm965_vm3, %v7918_v15, %v7919_v9 }
 0x50e   : > { %8127 = vrot.lane.b32.xlu1 %v7471_v59, %s10741_s12  ;;  %8737 = vmatmul.mubr.bf16.gmra.mrb[76].mxu0 %v8315_v35  ;;  %v7099_v59 = vrot.slane %v7030_v3, 3  ;;  %v7551_v23 = vrot.slane %v7482_v29, 4  ;;  %v7552_v35 = vrot.slane %v7483_v53, 4  ;;  %v7102_v3 = vrot.slane %v7032_v26, 3  ;;  %v7486_v15 = vld [vmem:[#allocation4 + $0x90] sm:$0xf0] }
 0x50f   : > { %v8204_v37 = vpop.permute.xlu0 %8203  ;;  %v7557_v47 = vrot.slane %v7486_v15, 4  ;;  %v7038_v15 = vld [vmem:[#allocation4 + $0x80] sm:$0xf8] }
 0x510   : > { %v8106_v7 = vpop.permute.xlu1 %8105  ;;  %v7101_v14 = vsel %vm7086_vm4, %v7099_v59, %v7100_v22  ;;  %v7035_v59 = vld [vmem:[#allocation4 + $0x68] sm:$0x7] }
 0x511   : > { %8157 = vrot.lane.b32.xlu0 %v7692_v4, %s10736_s20  ;;  %v7553_v4 = vsel %vm965_vm3, %v7551_v23, %v7552_v35  ;;  %v8239_v0 = vsel %vm2952_vm7, %v7101_v14, %v13882_v32  ;;  %v7554_v23 = vrot.slane %v7484_v42, 4 }
 0x512   : > { %9149 = vrot.lane.b32.xlu1 %v13430_v45, %s10736_s20  ;;  %v7808_v45 = vsel %vm7086_vm4, %v7806_v38, %v7807_v58  ;;  %v8370_v25 = vsel %vm2952_vm7, %v7553_v4, %v13878_v6  ;;  %v8282_v44 = vsel %vm3018_vm10, %v8239_v0, %v13890_v10  ;;  %v7103_v58 = vrot.slane %v7033_v40, 3  ;;  %v7036_v4 = vld [vmem:[#allocation4 + $0x70] sm:$0xf8]  ;;  %v7037_v0 = vld [vmem:[#allocation4 + $0x78] sm:$0x7] }
 0x513   : > { %v13954_v57 = vpop.permute.xlu0 %8143  ;;  %v8412_v38 = vsel %vm3018_vm10, %v8370_v25, %v13935_v36  ;;  %v8318_v32 = vsel %vm3084_vm12, %v8282_v44, %v8106_v7 }
 0x514   : > { %v13956_v24 = vpop.permute.xlu1 %8045  ;;  %v8449_v6 = vsel %vm3084_vm12, %v8412_v38, %v8204_v37  ;;  %v7104_v49 = vsel %vm7086_vm4, %v7102_v3, %v7103_v58 }
 0x515   : > { %8159 = vrot.lane.b32.xlu0 %v7695_v28, %s10736_s20  ;;  %v8242_v36 = vsel %vm2952_vm7, %v7104_v49, %v13839_v27  ;;  %v7487_v27 = vld [vmem:[#allocation4 + $0x98] sm:$0xf] }
 0x516   : > { %v8284_v7 = vsel %vm3018_vm10, %v8242_v36, %v13860_v19  ;;  %v7555_v19 = vrot.slane %v7485_v39, 4  ;;  %v7558_v14 = vrot.slane %v7487_v27, 4  ;;  %v7039_v27 = vld [vmem:[#allocation4 + $0x88] sm:$0x7] }
 0x517   : > { %v8170_v54 = vpop.permute.xlu0 %8169  ;;  %v8321_v37 = vsel %vm3084_vm12, %v8284_v7, %v13911_v17 }
 0x518   : > { %v13961_v50 = vpop.permute.xlu1 %8077  ;;  %v8410_v34 = vsel %vm3018_vm10, %v8367_v20, %v8170_v54  ;;  %v7106_v54 = vrot.slane %v7035_v59, 3  ;;  %v7489_v59 = vld [vmem:[#allocation4 + $0xa8] sm:$0xf] }
 0x519   : > { %8191 = vrot.lane.b32.xlu0 %v7808_v45, %s10738_s25 }
 0x51b   : > { %v8202_v16 = vpop.permute.xlu0 %8201 }
 0x51c   : > { %v13977_v41 = vpop.permute.xlu1 %8111  ;;  %v8446_v52 = vsel %vm3084_vm12, %v8410_v34, %v8202_v16  ;;  %v7559_v34 = vsel %vm965_vm3, %v7557_v47, %v7558_v14  ;;  %v7111_v47 = vrot.slane %v7038_v15, 3  ;;  %v7112_v14 = vrot.slane %v7039_v27, 3 }
 0x51d   : > { %8223 = vrot.lane.b32.xlu0 %v7920_v46, %s10741_s12  ;;  %8744 = vmatprep.mubr.bf16.mxu0 %v8446_v52  ;;  %v7556_v46 = vsel %vm965_vm3, %v7554_v23, %v7555_v19  ;;  %v8376_v52 = vsel %vm2952_vm7, %v7559_v34, %v13954_v57  ;;  %v7490_v19 = vld [vmem:[#allocation4 + $0xb0] sm:$0xf0]  ;;  %s9886_s12 = sld [smem:[#allocation5 + $0x2]] }
 0x51e   : > { %8745 = vmatmul.mubr.bf16.gmra.mrb[80].mxu0 %v8318_v32  ;;  %v7040_v34 = vld [vmem:[#allocation4 + $0x90] sm:$0xf8] }
 0x51f   : > { %v8142_v18 = vpop.permute.xlu0 %8141  ;;  %8752 = vmatprep.mubr.bf16.mxu0 %v8449_v6 }
 0x520   : > { %v13985_v10 = vpop.permute.xlu1 %8051  ;;  %v8373_v26 = vsel %vm2952_vm7, %v7556_v46, %v8142_v18  ;;  %v7108_v18 = vrot.slane %v7036_v4, 3  ;;  %v7113_v4 = vsel %vm7086_vm4, %v7111_v47, %v7112_v14  ;;  %v7494_v14 = vld [vmem:[#allocation4 + $0xd0] sm:$0xf0] }
 0x521   : > { %9147 = vrot.lane.b32.xlu0 %v13436_v12, %s10736_s20  ;;  %v7034_v12 = vld [vmem:[#allocation4 + $0x60] sm:$0xf8] }
 0x522   : > { %v7105_v35 = vrot.slane %v7034_v12, 3  ;;  %v7488_v12 = vld [vmem:[#allocation4 + $0xa0] sm:$0xf0] }
 0x523   : > { %v8176_v29 = vpop.permute.xlu0 %8175 }
 0x524   : > { %v13994_v53 = vpop.permute.xlu1 %8083  ;;  %v7107_v40 = vsel %vm7086_vm4, %v7105_v35, %v7106_v54  ;;  %v8416_v3 = vsel %vm3018_vm10, %v8376_v52, %v8176_v29  ;;  %v7560_v54 = vrot.slane %v7488_v12, 4 }
 0x525   : > { %v8245_v16 = vsel %vm2952_vm7, %v7107_v40, %v13956_v24  ;;  %v7109_v24 = vrot.slane %v7037_v0, 3 }
 0x526   : > { %8753 = vmatmul.mubr.bf16.gmra.mrb[84].mxu0 %v8321_v37  ;;  %v8286_v38 = vsel %vm3018_vm10, %v8245_v16, %v13961_v50  ;;  %v7041_v16 = vld [vmem:[#allocation4 + $0x98] sm:$0x7] }
 0x527   : > { %v8208_v28 = vpop.permute.xlu0 %8207  ;;  %v7110_v50 = vsel %vm7086_vm4, %v7108_v18, %v7109_v24 }
 0x528   : > { %v8110_v22 = vpop.permute.xlu1 %8109  ;;  %v8455_v49 = vsel %vm3084_vm12, %v8416_v3, %v8208_v28  ;;  %v8248_v7 = vsel %vm2952_vm7, %v7110_v50, %v13926_v62  ;;  %v7491_v62 = vld [vmem:[#allocation4 + $0xb8] sm:$0xf]  ;;  %v7115_v50 = vrot.slane %v7041_v16, 3 }
 0x529   : > { %v8324_v6 = vsel %vm3084_vm12, %v8286_v38, %v8110_v22  ;;  %v8288_v29 = vsel %vm3018_vm10, %v8248_v7, %v13939_v63  ;;  %v7561_v63 = vrot.slane %v7489_v59, 4  ;;  %v7564_v46 = vrot.slane %v7491_v62, 4  ;;  %v7493_v62 = vld [vmem:[#allocation4 + $0xc8] sm:$0xf] }
 0x52a   : > { %v8327_v22 = vsel %vm3084_vm12, %v8288_v29, %v13977_v41 }
 0x52b   : > { %v13998_v45 = vpop.permute.xlu0 %8147 }
 0x52c   : > { %v14000_v9 = vpop.permute.xlu1 %8049 }
 0x52f   : > { %v8174_v17 = vpop.permute.xlu0 %8173 }
 0x530   : > { %v8082_v20 = vpop.permute.xlu1 %8081  ;;  %v8414_v25 = vsel %vm3018_vm10, %v8373_v26, %v8174_v17  ;;  %v7563_v17 = vrot.slane %v7490_v19, 4  ;;  %v7562_v26 = vsel %vm965_vm3, %v7560_v54, %v7561_v63  ;;  %v7492_v19 = vld [vmem:[#allocation4 + $0xc0] sm:$0xf0]  ;;  %v7043_v63 = vld [vmem:[#allocation4 + $0xa8] sm:$0x7] }
 0x533   : > { %v8206_v44 = vpop.permute.xlu0 %8205 }
 0x534   : > { %v14013_v32 = vpop.permute.xlu1 %8115  ;;  %v8452_v58 = vsel %vm3084_vm12, %v8414_v25, %v8206_v44  ;;  %v7565_v25 = vsel %vm965_vm3, %v7563_v17, %v7564_v46  ;;  %v8251_v44 = vsel %vm2952_vm7, %v7113_v4, %v14000_v9  ;;  %v7495_v17 = vld [vmem:[#allocation4 + $0xd8] sm:$0xf]  ;;  %v7566_v46 = vrot.slane %v7492_v19, 4 }
 0x535   : > { %8760 = vmatprep.mubr.bf16.mxu0 %v8452_v58  ;;  %v8382_v58 = vsel %vm2952_vm7, %v7565_v25, %v13998_v45  ;;  %v8290_v3 = vsel %vm3018_vm10, %v8251_v44, %v8082_v20  ;;  %v7118_v4 = vrot.slane %v7043_v63, 3 }
 0x536   : > { %8761 = vmatmul.mubr.bf16.gmra.mrb[88].mxu0 %v8324_v6 }
 0x537   : > { %v8146_v36 = vpop.permute.xlu0 %8145  ;;  %8768 = vmatprep.mubr.bf16.mxu0 %v8455_v49 }
 0x538   : > { %v14019_v57 = vpop.permute.xlu1 %8055  ;;  %v8379_v0 = vsel %vm2952_vm7, %v7562_v26, %v8146_v36  ;;  %v7114_v36 = vrot.slane %v7040_v34, 3  ;;  %v7570_v34 = vrot.slane %v7495_v17, 4 }
 0x53a   : > { %v7116_v45 = vsel %vm7086_vm4, %v7114_v36, %v7115_v50 }
 0x53b   : > { %v8180_v37 = vpop.permute.xlu0 %8179  ;;  %v8254_v20 = vsel %vm2952_vm7, %v7116_v45, %v13985_v10  ;;  %v7042_v10 = vld [vmem:[#allocation4 + $0xa0] sm:$0xf8] }
 0x53c   : > { %v14026_v42 = vpop.permute.xlu1 %8087  ;;  %v8420_v24 = vsel %vm3018_vm10, %v8382_v58, %v8180_v37  ;;  %v8292_v37 = vsel %vm3018_vm10, %v8254_v20, %v13994_v53  ;;  %v7117_v26 = vrot.slane %v7042_v10, 3 }
 0x53e   : > { %8769 = vmatmul.mubr.bf16.gmra.mrb[92].mxu0 %v8327_v22  ;;  %v7119_v58 = vsel %vm7086_vm4, %v7117_v26, %v7118_v4 }
 0x53f   : > { %v8212_v28 = vpop.permute.xlu0 %8211 }
 0x540   : > { %v8114_v39 = vpop.permute.xlu1 %8113  ;;  %v8461_v9 = vsel %vm3084_vm12, %v8420_v24, %v8212_v28  ;;  %v7044_v24 = vld [vmem:[#allocation4 + $0xb0] sm:$0xf8] }
 0x541   : > { %v8330_v49 = vsel %vm3084_vm12, %v8290_v3, %v8114_v39  ;;  %v8333_v39 = vsel %vm3084_vm12, %v8292_v37, %v14013_v32  ;;  %v7120_v10 = vrot.slane %v7044_v24, 3  ;;  %v7498_v24 = vld [vmem:[#allocation4 + $0xf0] sm:$0xf0] }
 0x543   : > { %v14030_v23 = vpop.permute.xlu0 %8151 }
 0x544   : > { %v14032_v35 = vpop.permute.xlu1 %8053 }
 0x545   : > { %v8257_v50 = vsel %vm2952_vm7, %v7119_v58, %v14032_v35  ;;  %v7047_v58 = vld [vmem:[#allocation4 + $0xc8] sm:$0x7] }
 0x547   : > { %v8178_v41 = vpop.permute.xlu0 %8177 }
 0x548   : > { %v14034_v40 = vpop.permute.xlu1 %8085  ;;  %v8418_v52 = vsel %vm3018_vm10, %v8379_v0, %v8178_v41  ;;  %v7567_v41 = vrot.slane %v7493_v62, 4  ;;  %v7569_v0 = vrot.slane %v7494_v14, 4 }
 0x54a   : > { %v7571_v36 = vsel %vm965_vm3, %v7569_v0, %v7570_v34  ;;  %v7496_v34 = vld [vmem:[#allocation4 + $0xe0] sm:$0xf0] }
 0x54b   : > { %v8210_v38 = vpop.permute.xlu0 %8209  ;;  %v8388_v37 = vsel %vm2952_vm7, %v7571_v36, %v14030_v23 }
 0x54c   : > { %v14046_v6 = vpop.permute.xlu1 %8119  ;;  %v8458_v18 = vsel %vm3084_vm12, %v8418_v52, %v8210_v38  ;;  %v7568_v52 = vsel %vm965_vm3, %v7566_v46, %v7567_v41 }
 0x54d   : > { %8776 = vmatprep.mubr.bf16.mxu0 %v8458_v18 }
 0x54e   : > { %8777 = vmatmul.mubr.bf16.gmra.mrb[96].mxu0 %v8330_v49  ;;  %v7045_v49 = vld [vmem:[#allocation4 + $0xb8] sm:$0x7] }
 0x54f   : > { %v8150_v7 = vpop.permute.xlu0 %8149  ;;  %8784 = vmatprep.mubr.bf16.mxu0 %v8461_v9  ;;  %v7121_v63 = vrot.slane %v7045_v49, 3  ;;  %v7499_v49 = vld [vmem:[#allocation4 + $0xf8] sm:$0xf] }
 0x550   : > { %v14052_v29 = vpop.permute.xlu1 %8059  ;;  %v8385_v3 = vsel %vm2952_vm7, %v7568_v52, %v8150_v7  ;;  %v8294_v7 = vsel %vm3018_vm10, %v8257_v50, %v14034_v40  ;;  %v7046_v52 = vld [vmem:[#allocation4 + $0xc0] sm:$0xf8] }
 0x551   : > { %v7122_v40 = vsel %vm7086_vm4, %v7120_v10, %v7121_v63 }
 0x553   : > { %v8184_v22 = vpop.permute.xlu0 %8183 }
 0x554   : > { %v14059_v12 = vpop.permute.xlu1 %8091  ;;  %v8424_v62 = vsel %vm3018_vm10, %v8388_v37, %v8184_v22  ;;  %v8260_v22 = vsel %vm2952_vm7, %v7122_v40, %v14019_v57  ;;  %v7572_v57 = vrot.slane %v7496_v34, 4  ;;  %v7123_v37 = vrot.slane %v7046_v52, 3 }
 0x556   : > { %8785 = vmatmul.mubr.bf16.gmra.mrb[100].mxu0 %v8333_v39 }
 0x557   : > { %v8216_v28 = vpop.permute.xlu0 %8215 }
 0x558   : > { %v14063_v59 = vpop.f32.mrb[96].mxu1  ;;  %v8118_v15 = vpop.permute.xlu1 %8117  ;;  %v8467_v14 = vsel %vm3084_vm12, %v8424_v62, %v8216_v28  ;;  %v8296_v28 = vsel %vm3018_vm10, %v8260_v22, %v14026_v42  ;;  %v7124_v42 = vrot.slane %v7047_v58, 3  ;;  %v7048_v22 = vld [vmem:[#allocation4 + $0xd0] sm:$0xf8] }
 0x559   : > { %v14065_v27 = vpop.f32.mrb[97].mxu1  ;;  %v8336_v35 = vsel %vm3084_vm12, %v8294_v7, %v8118_v15  ;;  %v8339_v0 = vsel %vm3084_vm12, %v8296_v28, %v14046_v6  ;;  %v7575_v6 = vrot.slane %v7498_v24, 4  ;;  %v7049_v28 = vld [vmem:[#allocation4 + $0xd8] sm:$0x7] }
 0x55a   : > { %v14067_v54 = vpop.f32.mrb[98].mxu1  ;;  %v7125_v63 = vsel %vm7086_vm4, %v7123_v37, %v7124_v42  ;;  %v7127_v37 = vrot.slane %v7049_v28, 3 }
 0x55b   : > { %v14069_v47 = vpop.f32.mrb[99].mxu1  ;;  %v14071_v53 = vpop.permute.xlu0 %8155 }
 0x55c   : > { %v14073_v32 = vpop.permute.xlu1 %8057 }
 0x55d   : > { %v8263_v34 = vsel %vm2952_vm7, %v7125_v63, %v14073_v32 }
 0x55f   : > { %v8182_v16 = vpop.permute.xlu0 %8181 }
 0x560   : > { %v14075_v25 = vpop.f32.mrb[100].mxu1  ;;  %v14077_v44 = vpop.permute.xlu1 %8089  ;;  %v8422_v9 = vsel %vm3018_vm10, %v8385_v3, %v8182_v16  ;;  %v7497_v16 = vld [vmem:[#allocation4 + $0xe8] sm:$0xf] }
 0x561   : > { %v14080_v38 = vpop.f32.mrb[101].mxu1  ;;  %v8298_v24 = vsel %vm3018_vm10, %v8263_v34, %v14077_v44 }
 0x562   : > { %v14084_v18 = vpop.f32.mrb[102].mxu1 }
 0x563   : > { %v14090_v45 = vpop.f32.mrb[103].mxu1  ;;  %v8214_v20 = vpop.permute.xlu0 %8213 }
 0x564   : > { %v14096_v39 = vpop.permute.xlu1 %8123  ;;  %v8464_v19 = vsel %vm3084_vm12, %v8422_v9, %v8214_v20  ;;  %v7573_v9 = vrot.slane %v7497_v16, 4 }
 0x565   : > { %8792 = vmatprep.mubr.bf16.mxu0 %v8464_v19  ;;  %v7576_v19 = vrot.slane %v7499_v49, 4 }
 0x566   : > { %8793 = vmatmul.mubr.bf16.gmra.mrb[104].mxu0 %v8336_v35  ;;  %v7574_v10 = vsel %vm965_vm3, %v7572_v57, %v7573_v9  ;;  %v7126_v9 = vrot.slane %v7048_v22, 3 }
 0x567   : > { %v8154_v17 = vpop.permute.xlu0 %8153  ;;  %8800 = vmatprep.mubr.bf16.mxu0 %v8467_v14 }
 0x568   : > { %v14102_v23 = vpop.f32.mrb[104].mxu1  ;;  %v8122_v41 = vpop.permute.xlu1 %8121  ;;  %v8391_v14 = vsel %vm2952_vm7, %v7574_v10, %v8154_v17  ;;  %v7050_v10 = vld [vmem:[#allocation4 + $0xe0] sm:$0xf8] }
 0x569   : > { %v14104_v46 = vpop.f32.mrb[105].mxu1  ;;  %v8342_v57 = vsel %vm3084_vm12, %v8298_v24, %v8122_v41  ;;  %v7129_v28 = vrot.slane %v7050_v10, 3 }
 0x56a   : > { %v14107_v26 = vpop.f32.mrb[106].mxu1 }
 0x56b   : > { %v14111_v15 = vpop.f32.mrb[107].mxu1  ;;  %v8188_v4 = vpop.permute.xlu0 %8187 }
 0x56c   : > { %v8062_v36 = vpop.permute.xlu1 %8061 }
 0x56e   : > { %8801 = vmatmul.mubr.bf16.gmra.mrb[108].mxu0 %v8339_v0  ;;  %v7577_v0 = vsel %vm965_vm3, %v7575_v6, %v7576_v19  ;;  %v7500_v19 = vld [vmem:[#allocation4 + $0x100] sm:$0xf0] }
 0x56f   : > { %v8220_v3 = vpop.permute.xlu0 %8219  ;;  %v8394_v58 = vsel %vm2952_vm7, %v7577_v0, %v14071_v53  ;;  %v7501_v53 = vld [vmem:[#allocation4 + $0x108] sm:$0xf] }
 0x570   : > { %v14117_v50 = vpop.f32.mrb[108].mxu1  ;;  %v8094_v40 = vpop.permute.xlu1 %8093  ;;  %v8428_v17 = vsel %vm3018_vm10, %v8394_v58, %v8188_v4  ;;  %v7051_v4 = vld [vmem:[#allocation4 + $0xe8] sm:$0x7]  ;;  %v7579_v41 = vrot.slane %v7501_v53, 4 }
 0x571   : > { %v14119_v20 = vpop.f32.mrb[109].mxu1  ;;  %v8473_v32 = vsel %vm3084_vm12, %v8428_v17, %v8220_v3  ;;  %v7130_v0 = vrot.slane %v7051_v4, 3  ;;  %v7503_v17 = vld [vmem:[#allocation4 + $0x118] sm:$0xf] }
 0x572   : > { %v14121_v7 = vpop.f32.mrb[110].mxu1 }
 0x573   : > { %v14123_v62 = vpop.f32.mrb[111].mxu1  ;;  %v8186_v35 = vpop.permute.xlu0 %8185  ;;  %v7131_v24 = vsel %vm7086_vm4, %v7129_v28, %v7130_v0 }
 0x574   : > { %v8426_v16 = vsel %vm3018_vm10, %v8391_v14, %v8186_v35  ;;  %v8064_v6 = vpop.permute.xlu1 %8063  ;;  %v7128_v35 = vsel %vm7086_vm4, %v7126_v9, %v7127_v37  ;;  %v7578_v14 = vrot.slane %v7500_v19, 4  ;;  %v7053_v9 = vld [vmem:[#allocation4 + $0xf8] sm:$0x7] }
 0x575   : > { %v8266_v44 = vsel %vm2952_vm7, %v7128_v35, %v14052_v29  ;;  %v7582_v35 = vrot.slane %v7503_v17, 4  ;;  %v7133_v10 = vrot.slane %v7053_v9, 3  ;;  %v7924_v17 = vld [vmem:[#allocation4 + $0x58] sm:$0x1f] }
 0x576   : > { %v8300_v22 = vsel %vm3018_vm10, %v8266_v44, %v14059_v12 }
 0x577   : > { %v8218_v52 = vpop.permute.xlu0 %8217  ;;  %v8345_v3 = vsel %vm3084_vm12, %v8300_v22, %v14096_v39  ;;  %v7052_v39 = vld [vmem:[#allocation4 + $0xf0] sm:$0xf8] }
 0x578   : > { %v8470_v49 = vsel %vm3084_vm12, %v8426_v16, %v8218_v52  ;;  %v8126_v34 = vpop.permute.xlu1 %8125  ;;  %v7580_v16 = vsel %vm965_vm3, %v7578_v14, %v7579_v41  ;;  %v7921_v14 = vld [vmem:[#allocation4 + $0x40] sm:$0xe0]  ;;  %v7922_v41 = vld [vmem:[#allocation4 + $0x48] sm:$0x1f] }
 0x579   : > { %8808 = vmatprep.mubr.bf16.mxu0 %v8470_v49  ;;  %v7502_v49 = vld [vmem:[#allocation4 + $0x110] sm:$0xf0]  ;;  %v7985_v28 = vrot.slane %v7921_v14, 5 }
 0x57a   : > { %8809 = vmatmul.mubr.bf16.gmra.mrb[112].mxu0 %v8342_v57  ;;  %v8269_v57 = vsel %vm2952_vm7, %v7131_v24, %v8062_v36  ;;  %v7581_v53 = vrot.slane %v7502_v49, 4  ;;  %v7923_v49 = vld [vmem:[#allocation4 + $0x50] sm:$0xe0] }
 0x57b   : > { %v8190_v42 = vpop.permute.xlu0 %8189  ;;  %8816 = vmatprep.mubr.bf16.mxu0 %v8473_v32  ;;  %v8302_v32 = vsel %vm3018_vm10, %v8269_v57, %v8094_v40  ;;  %v7986_v40 = vrot.slane %v7922_v41, 5  ;;  %v7926_v57 = vld [vmem:[#allocation4 + $0x68] sm:$0x1f] }
 0x57c   : > { %v8096_v19 = vpop.permute.xlu1 %8095  ;;  %v8348_v44 = vsel %vm3084_vm12, %v8302_v32, %v8126_v34 }
 0x57d   : > { %v7987_v24 = vsel %vm7311_vm0, %v7985_v28, %v7986_v40 }
 0x57f   : > { %v8222_v63 = vpop.permute.xlu0 %8221 }
 0x580   : > { %v8128_v22 = vpop.permute.xlu1 %8127 }
 0x582   : > { %8817 = vmatmul.mubr.bf16.gmra.mrb[116].mxu0 %v8345_v3 }
 0x583   : > { %v8158_v52 = vpop.permute.xlu0 %8157 }
 0x584   : > { %v8397_v29 = vsel %vm2952_vm7, %v7580_v16, %v8158_v52 }
 0x585   : > { %v8430_v58 = vsel %vm3018_vm10, %v8397_v29, %v8190_v42  ;;  %v7132_v42 = vrot.slane %v7052_v39, 3  ;;  %v7989_v39 = vrot.slane %v7924_v17, 5 }
 0x586   : > { %v8476_v12 = vsel %vm3084_vm12, %v8430_v58, %v8222_v63  ;;  %v7583_v63 = vsel %vm965_vm3, %v7581_v53, %v7582_v35  ;;  %v7927_v53 = vld [vmem:[#allocation4 + $0x70] sm:$0xe0]  ;;  %v7928_v35 = vld [vmem:[#allocation4 + $0x78] sm:$0x1f] }
 0x587   : > { %v8160_v37 = vpop.permute.xlu0 %8159  ;;  %8824 = vmatprep.mubr.bf16.mxu0 %v8476_v12  ;;  %v7134_v36 = vsel %vm7086_vm4, %v7132_v42, %v7133_v10  ;;  %v7925_v12 = vld [vmem:[#allocation4 + $0x60] sm:$0xe0]  ;;  %v7930_v42 = vld [vmem:[#allocation4 + $0x88] sm:$0x1f]  ;;  %v7994_v10 = vrot.slane %v7927_v53, 5 }
 0x588   : > { %v8400_v3 = vsel %vm2952_vm7, %v7583_v63, %v8160_v37  ;;  %v8272_v0 = vsel %vm2952_vm7, %v7134_v36, %v8064_v6  ;;  %v7988_v6 = vrot.slane %v7923_v49, 5  ;;  %v7991_v9 = vrot.slane %v7925_v12, 5 }
 0x589   : > { %v8304_v52 = vsel %vm3018_vm10, %v8272_v0, %v8096_v19  ;;  %v7992_v37 = vrot.slane %v7926_v57, 5  ;;  %v7998_v41 = vrot.slane %v7930_v42, 5 }
 0x58a   : > { %8825 = vmatmul.mubr.bf16.gmra.mrb[120].mxu0 %v8348_v44  ;;  %v8351_v58 = vsel %vm3084_vm12, %v8304_v52, %v8128_v22  ;;  %v7990_v32 = vsel %vm7311_vm0, %v7988_v6, %v7989_v39  ;;  %v7929_v44 = vld [vmem:[#allocation4 + $0x80] sm:$0xe0]  ;;  %v7931_v22 = vld [vmem:[#allocation4 + $0x90] sm:$0xe0] }
 0x58b   : > { %v8192_v4 = vpop.permute.xlu0 %8191  ;;  %v7993_v19 = vsel %vm7311_vm0, %v7991_v9, %v7992_v37  ;;  %v7997_v14 = vrot.slane %v7929_v44, 5  ;;  %v8000_v28 = vrot.slane %v7931_v22, 5 }
 0x58c   : > { %v8432_v16 = vsel %vm3018_vm10, %v8400_v3, %v8192_v4  ;;  %v7995_v4 = vrot.slane %v7928_v35, 5  ;;  %v7932_v3 = vld [vmem:[#allocation4 + $0x98] sm:$0x1f] }
 0x58d   : > { %v7999_v36 = vsel %vm7311_vm0, %v7997_v14, %v7998_v41  ;;  %v8001_v40 = vrot.slane %v7932_v3, 5 }
 0x58e   : > { %v7996_v63 = vsel %vm7311_vm0, %v7994_v10, %v7995_v4 }
 0x58f   : > { %v8224_v34 = vpop.permute.xlu0 %8223  ;;  %v8002_v0 = vsel %vm7311_vm0, %v8000_v28, %v8001_v40 }
 0x590   : > { %v8479_v29 = vsel %vm3084_vm12, %v8432_v16, %v8224_v34 }
 0x591   : > { %8832 = vmatprep.mubr.bf16.mxu0 %v8479_v29 }
 0x592   : > { %8833 = vmatmul.mubr.bf16.gmra.mrb[124].mxu0 %v8351_v58 }
 0x593   : > { %10368 = vmatprep.mubr.msk.bf16.mxu0 %vm2952_vm7, %v7987_v24 }
 0x59a   : > { %10369 = vmatmul.mubr.msk.bf16.vlgmr.msra.gmra.mrb[128].mxu0 %vm2952_vm7, %v7990_v32 }
 0x59b   : > { %10372 = vmatprep.mubr.msk.bf16.mxu0 %vm2952_vm7, %v7993_v19 }
 0x5a2   : > { %10373 = vmatmul.mubr.msk.bf16.gmra.mrb[132].mxu0 %vm2952_vm7, %v7996_v63 }
 0x5a3   : > { %10376 = vmatprep.mubr.msk.bf16.mxu0 %vm2952_vm7, %v7999_v36 }
 0x5aa   : > { %10377 = vmatmul.mubr.msk.bf16.gmra.mrb[136].mxu0 %vm2952_vm7, %v8002_v0 }
 0x5c0   : > { %v10192_v16 = vpop.f32.mrb[64].mxu0 }
 0x5c1   : > { %v10193_v34 = vpop.f32.mrb[65].mxu0 }
 0x5c2   : > { %v14175_v52 = vadd.f32 %v10193_v34, %v10192_v16  ;;  %v10195_v29 = vpop.f32.mrb[66].mxu0 }
 0x5c3   : > { %v10196_v58 = vpop.f32.mrb[67].mxu0 }
 0x5c4   : > { %v14177_v24 = vadd.f32 %v10196_v58, %v10195_v29 }
 0x5c8   : > { %v10198_v49 = vpop.f32.mrb[68].mxu0 }
 0x5c9   : > { %v10199_v17 = vpop.f32.mrb[69].mxu0 }
 0x5ca   : > { %v14179_v12 = vadd.f32 %v10199_v17, %v10198_v49  ;;  %v10201_v57 = vpop.f32.mrb[70].mxu0 }
 0x5cb   : > { %v10202_v6 = vpop.f32.mrb[71].mxu0 }
 0x5cc   : > { %v14181_v39 = vadd.f32 %v10202_v6, %v10201_v57 }
 0x5d9   : > { %v10204_v9 = vpop.f32.mrb[72].mxu0 }
 0x5da   : > { %v10205_v37 = vpop.f32.mrb[73].mxu0 }
 0x5db   : > { %v14183_v32 = vadd.f32 %v10205_v37, %v10204_v9  ;;  %v10207_v19 = vpop.f32.mrb[74].mxu0 }
 0x5dc   : > { %v10208_v53 = vpop.f32.mrb[75].mxu0 }
 0x5dd   : > { %v14185_v35 = vadd.f32 %v10208_v53, %v10207_v19  ;;  %v14189_v41 = vpop.f32.mrb[112].mxu1 }
 0x5de   : > { %v14193_v36 = vpop.f32.mrb[113].mxu1 }
 0x5df   : > { %v14195_v22 = vpop.f32.mrb[114].mxu1 }
 0x5e0   : > { %v14197_v3 = vpop.f32.mrb[115].mxu1 }
 0x5e1   : > { %v10210_v44 = vpop.f32.mrb[76].mxu0 }
 0x5e2   : > { %v10211_v42 = vpop.f32.mrb[77].mxu0 }
 0x5e3   : > { %v14187_v10 = vadd.f32 %v10211_v42, %v10210_v44  ;;  %v10213_v4 = vpop.f32.mrb[78].mxu0  ;;  %v14210_v42 = vld [vmem:[%s14715_s6] ss:$0 sm:$0xff] }
 0x5e4   : > { %v10214_v14 = vpop.f32.mrb[79].mxu0 }
 0x5e5   : > { %v14191_v63 = vadd.f32 %v10214_v14, %v10213_v4 }
 0x5f1   : > { %v10216_v28 = vpop.f32.mrb[80].mxu0 }
 0x5f2   : > { %v10217_v40 = vpop.f32.mrb[81].mxu0 }
 0x5f3   : > { %v14199_v0 = vadd.f32 %v10217_v40, %v10216_v28  ;;  %v10219_v16 = vpop.f32.mrb[82].mxu0 }
 0x5f4   : > { %v10220_v34 = vpop.f32.mrb[83].mxu0 }
 0x5f5   : > { %v14201_v29 = vadd.f32 %v10220_v34, %v10219_v16  ;;  %v14215_v34 = vstv %s9886_s12  ;;  %s364_s12 = sand.u32 1, %s10723_s14  }
 0x5f6   : > { %s9882_s29 = sshll.u32 %s364_s12, 6 }
 0x5f7   : > { %s366_s27 = scalar_lea.vmem [#allocation8], %s9882_s29  ;;  %s10669_s29 = sshll.u32 %s10742_s17, 4  ;;  %s10670_s29 = int_to_ptr.vmem [resolvable:$false] %s10669_s29 }
 0x5f8   : > { %s9802_s11 = sshll.u32 %s366_s27, 4  ;;  %s10671_s18 = scalar_lea.vmem %s10670_s29, 2048  ;;  %s14660_s11 = int_to_ptr.vmem [resolvable:$true] %s9802_s11 }
 0x5f9   : > { %v10222_v58 = vpop.f32.mrb[84].mxu0  ;;  %s10665_s21 = scalar_lea.vmem %s14660_s11, 1024  ;;  %p10672_p13 = scmp.lt.s32.totalorder %s14660_s11, %s10670_s29 }
 0x5fa   : > { %v10223_v49 = vpop.f32.mrb[85].mxu0  ;;  %p10666_p9 = scmp.ne.s32.totalorder %s14660_s11, %s10665_s21  ;;  %p10673_p0 = scmp.lt.s32.totalorder %s10671_s18, %s10665_s21 }
 0x5fb   : > { %v14203_v17 = vadd.f32 %v10223_v49, %v10222_v58  ;;  %v10225_v57 = vpop.f32.mrb[86].mxu0 }
 0x5fc   : > { %v10226_v6 = vpop.f32.mrb[87].mxu0  ;;  %p10667_p11 = pnand %p10666_p9, %p10837_p5  ;;  %p10674_p1 = por %p10673_p0, %p10672_p13 }
 0x5fd   : > { %v14205_v9 = vadd.f32 %v10226_v6, %v10225_v57 }
 0x5fe   : > { %p10668_p12 = pneg %p10667_p11 }
 0x600   : > { %p10675_p2 = pnand %p10674_p1, %p10668_p12 }
 0x609   : > { %v10228_v37 = vpop.f32.mrb[88].mxu0 }
 0x60a   : > { %v10229_v19 = vpop.f32.mrb[89].mxu0 }
 0x60b   : > { %v10230_v53 = vadd.f32 %v10229_v19, %v10228_v37  ;;  %v10231_v44 = vpop.f32.mrb[90].mxu0 }
 0x60c   : > { %v10232_v4 = vpop.f32.mrb[91].mxu0 }
 0x60d   : > { %v8763_v14 = vadd.f32 %v10230_v53, %v14210_v42  ;;  %v10233_v28 = vadd.f32 %v10232_v4, %v10231_v44 }
 0x60f   : > { %v8924_v40 = vadd.f32 %v14065_v27, %v8763_v14  ;;  %v8766_v16 = vadd.f32 %v10233_v28, %v14210_v42 }
 0x611   : > { %v9046_v58 = vmin.f32 %v8924_v40, 0.0  ;;  %v8927_v49 = vadd.f32 %v14069_v47, %v8766_v16  ;;  %v10234_v57 = vpop.f32.mrb[92].mxu0  ;;  %v9014_v43 = vmax.f32 %v8924_v40, 0.0 }
 0x612   : > { %v10235_v6 = vpop.f32.mrb[93].mxu0 }
 0x613   : > { %v9079_v37 = vmul.f32 %v14215_v34, %v9046_v58  ;;  %v9047_v19 = vmin.f32 %v8927_v49, 0.0  ;;  %v10236_v1 = vadd.f32 %v10235_v6, %v10234_v57  ;;  %v10237_v55 = vpop.f32.mrb[94].mxu0  ;;  %v9015_v53 = vmax.f32 %v8927_v49, 0.0 }
 0x614   : > { %v10238_v21 = vpop.f32.mrb[95].mxu0 }
 0x615   : > { %v9080_v44 = vmul.f32 %v14215_v34, %v9047_v19  ;;  %v8771_v27 = vadd.f32 %v10236_v1, %v14210_v42  ;;  %v10239_v4 = vadd.f32 %v10238_v21, %v10237_v55  ;;  %v14221_v14 = vadd.f32 %v9079_v37, %v9014_v43 }
 0x617   : > { %v14223_v28 = vadd.f32 %v9080_v44, %v9015_v53  ;;  %v8932_v47 = vadd.f32 %v14063_v59, %v8771_v27  ;;  %v8774_v16 = vadd.f32 %v10239_v4, %v14210_v42 }
 0x619   : > { %v9048_v58 = vmin.f32 %v8932_v47, 0.0  ;;  %v8935_v57 = vadd.f32 %v14067_v54, %v8774_v16  ;;  %v9016_v19 = vmax.f32 %v8932_v47, 0.0 }
 0x61b   : > { %v9081_v49 = vmul.f32 %v14215_v34, %v9048_v58  ;;  %v9049_v6 = vmin.f32 %v8935_v57, 0.0  ;;  %v9017_v1 = vmax.f32 %v8935_v57, 0.0 }
 0x61d   : > { %v9082_v43 = vmul.f32 %v14215_v34, %v9049_v6  ;;  %v14232_v55 = vadd.f32 %v9081_v49, %v9016_v19 }
 0x61f   : > { %v14234_v21 = vadd.f32 %v9082_v43, %v9017_v1 }
 0x621   : > { %v10240_v59 = vpop.f32.mrb[96].mxu0 }
 0x622   : > { %v10241_v53 = vpop.f32.mrb[97].mxu0 }
 0x623   : > { %v10242_v54 = vadd.f32 %v10241_v53, %v10240_v59  ;;  %v10243_v44 = vpop.f32.mrb[98].mxu0 }
 0x624   : > { %v10244_v27 = vpop.f32.mrb[99].mxu0 }
 0x625   : > { %v8779_v4 = vadd.f32 %v10242_v54, %v14210_v42  ;;  %v10245_v16 = vadd.f32 %v10244_v27, %v10243_v44 }
 0x627   : > { %v8940_v47 = vadd.f32 %v14080_v38, %v8779_v4  ;;  %v8782_v58 = vadd.f32 %v10245_v16, %v14210_v42 }
 0x629   : > { %v9050_v57 = vmin.f32 %v8940_v47, 0.0  ;;  %v8943_v49 = vadd.f32 %v14090_v45, %v8782_v58  ;;  %v10246_v6 = vpop.f32.mrb[100].mxu0  ;;  %v9018_v59 = vmax.f32 %v8940_v47, 0.0 }
 0x62a   : > { %v10247_v19 = vpop.f32.mrb[101].mxu0 }
 0x62b   : > { %v9083_v1 = vmul.f32 %v14215_v34, %v9050_v57  ;;  %v9051_v43 = vmin.f32 %v8943_v49, 0.0  ;;  %v10248_v40 = vadd.f32 %v10247_v19, %v10246_v6  ;;  %v10249_v37 = vpop.f32.mrb[102].mxu0  ;;  %v9019_v30 = vmax.f32 %v8943_v49, 0.0 }
 0x62c   : > { %v10250_v53 = vpop.f32.mrb[103].mxu0 }
 0x62d   : > { %v9084_v54 = vmul.f32 %v14215_v34, %v9051_v43  ;;  %v8787_v44 = vadd.f32 %v10248_v40, %v14210_v42  ;;  %v10251_v38 = vadd.f32 %v10250_v53, %v10249_v37  ;;  %v14245_v27 = vadd.f32 %v9083_v1, %v9018_v59  ;;  %v10584_v40 = vld [vmem:[%s14716_s7] sm:$0xff]   ;;  %v10586_v43 = vld [vmem:[%s14716_s7 + $0x10] sm:$0xff]  }
 0x62e   : > { %10400 = vmatprep.subr.bf16.mxu1 %v10584_v40 }
 0x62f   : > { %v14247_v4 = vadd.f32 %v9084_v54, %v9019_v30  ;;  %v8948_v45 = vadd.f32 %v14075_v25, %v8787_v44  ;;  %v8790_v16 = vadd.f32 %v10251_v38, %v14210_v42  ;;  %v10585_v30 = vld [vmem:[%s14716_s7 + $0x8] sm:$0xff]   ;;  %10401 = vmatpush3.bf16.msra.mxu1 %v10584_v40  ;;  %v10588_v40 = vld [vmem:[%s14716_s7 + $0x20] sm:$0xff]  }
 0x630   : > { %10402 = vmatprep.subr.bf16.mxu1 %v10585_v30 }
 0x631   : > { %v9052_v58 = vmin.f32 %v8948_v45, 0.0  ;;  %v8951_v57 = vadd.f32 %v14084_v18, %v8790_v16  ;;  %v9020_v25 = vmax.f32 %v8948_v45, 0.0  ;;  %v10587_v16 = vld [vmem:[%s14716_s7 + $0x18] sm:$0xff]  }
 0x633   : > { %v9085_v49 = vmul.f32 %v14215_v34, %v9052_v58  ;;  %v9053_v6 = vmin.f32 %v8951_v57, 0.0  ;;  %v9021_v37 = vmax.f32 %v8951_v57, 0.0  ;;  %10403 = vmatpush3.bf16.msra.mxu1 %v10585_v30 }
 0x634   : > { %10404 = vmatprep.subr.bf16.mxu1 %v10586_v43 }
 0x635   : > { %v9086_v19 = vmul.f32 %v14215_v34, %v9053_v6  ;;  %v14262_v18 = vadd.f32 %v9085_v49, %v9020_v25 }
 0x637   : > { %v14264_v1 = vadd.f32 %v9086_v19, %v9021_v37  ;;  %10405 = vmatpush3.bf16.msra.mxu1 %v10586_v43  ;;  %v10589_v43 = vld [vmem:[%s14716_s7 + $0x28] sm:$0xff]  }
 0x638   : > { %10406 = vmatprep.subr.bf16.mxu1 %v10587_v16 }
 0x639   : > { %v10252_v59 = vpop.f32.mrb[104].mxu0 }
 0x63a   : > { %v10253_v54 = vpop.f32.mrb[105].mxu0 }
 0x63b   : > { %v10254_v44 = vadd.f32 %v10253_v54, %v10252_v59  ;;  %v10255_v38 = vpop.f32.mrb[106].mxu0  ;;  %10407 = vmatpush3.bf16.msra.mxu1 %v10587_v16 }
 0x63c   : > { %v10256_v45 = vpop.f32.mrb[107].mxu0  ;;  %10408 = vmatprep.subr.bf16.mxu1 %v10588_v40 }
 0x63d   : > { %v8795_v58 = vadd.f32 %v10254_v44, %v14210_v42  ;;  %v10257_v57 = vadd.f32 %v10256_v45, %v10255_v38 }
 0x63f   : > { %v8956_v49 = vadd.f32 %v14104_v46, %v8795_v58  ;;  %v8798_v6 = vadd.f32 %v10257_v57, %v14210_v42  ;;  %10409 = vmatpush3.bf16.msra.mxu1 %v10588_v40 }
 0x640   : > { %10410 = vmatprep.subr.bf16.mxu1 %v10589_v43 }
 0x641   : > { %v9054_v30 = vmin.f32 %v8956_v49, 0.0  ;;  %v8959_v25 = vadd.f32 %v14111_v15, %v8798_v6  ;;  %v10258_v37 = vpop.f32.mrb[108].mxu0  ;;  %v9022_v46 = vmax.f32 %v8956_v49, 0.0 }
 0x642   : > { %v10259_v19 = vpop.f32.mrb[109].mxu0 }
 0x643   : > { %v9087_v59 = vmul.f32 %v14215_v34, %v9054_v30  ;;  %v9055_v54 = vmin.f32 %v8959_v25, 0.0  ;;  %v10260_v44 = vadd.f32 %v10259_v19, %v10258_v37  ;;  %v10261_v38 = vpop.f32.mrb[110].mxu0  ;;  %v9023_v58 = vmax.f32 %v8959_v25, 0.0  ;;  %10411 = vmatpush3.bf16.msra.mxu1 %v10589_v43 }
 0x644   : > { %v10262_v45 = vpop.f32.mrb[111].mxu0 }
 0x645   : > { %v9088_v57 = vmul.f32 %v14215_v34, %v9055_v54  ;;  %v8803_v15 = vadd.f32 %v10260_v44, %v14210_v42  ;;  %v10263_v6 = vadd.f32 %v10262_v45, %v10261_v38  ;;  %v14287_v47 = vadd.f32 %v9087_v59, %v9022_v46 }
 0x647   : > { %v14289_v30 = vadd.f32 %v9088_v57, %v9023_v58  ;;  %v8964_v37 = vadd.f32 %v14102_v23, %v8803_v15  ;;  %v8806_v16 = vadd.f32 %v10263_v6, %v14210_v42 }
 0x649   : > { %v9056_v49 = vmin.f32 %v8964_v37, 0.0  ;;  %v8967_v19 = vadd.f32 %v14107_v26, %v8806_v16  ;;  %v9024_v59 = vmax.f32 %v8964_v37, 0.0 }
 0x64b   : > { %v9089_v54 = vmul.f32 %v14215_v34, %v9056_v49  ;;  %v9057_v44 = vmin.f32 %v8967_v19, 0.0  ;;  %v9025_v38 = vmax.f32 %v8967_v19, 0.0 }
 0x64d   : > { %v9090_v46 = vmul.f32 %v14215_v34, %v9057_v44  ;;  %v10264_v45 = vpop.f32.mrb[112].mxu0  ;;  %v14298_v58 = vadd.f32 %v9089_v54, %v9024_v59 }
 0x64e   : > { %v10265_v23 = vpop.f32.mrb[113].mxu0 }
 0x64f   : > { %v14300_v40 = vadd.f32 %v9090_v46, %v9025_v38  ;;  %v10266_v57 = vadd.f32 %v10265_v23, %v10264_v45  ;;  %v10267_v15 = vpop.f32.mrb[114].mxu0 }
 0x650   : > { %v10268_v26 = vpop.f32.mrb[115].mxu0 }
 0x651   : > { %v8811_v6 = vadd.f32 %v10266_v57, %v14210_v42  ;;  %v10269_v16 = vadd.f32 %v10268_v26, %v10267_v15 }
 0x653   : > { %v8972_v43 = vadd.f32 %v14119_v20, %v8811_v6  ;;  %v8814_v37 = vadd.f32 %v10269_v16, %v14210_v42 }
 0x655   : > { %v9058_v19 = vmin.f32 %v8972_v43, 0.0  ;;  %v8975_v44 = vadd.f32 %v14123_v62, %v8814_v37  ;;  %v10270_v54 = vpop.f32.mrb[116].mxu0  ;;  %v9026_v25 = vmax.f32 %v8972_v43, 0.0 }
 0x656   : > { %v10271_v59 = vpop.f32.mrb[117].mxu0 }
 0x657   : > { %v9091_v38 = vmul.f32 %v14215_v34, %v9058_v19  ;;  %v9059_v46 = vmin.f32 %v8975_v44, 0.0  ;;  %v10272_v45 = vadd.f32 %v10271_v59, %v10270_v54  ;;  %v10273_v23 = vpop.f32.mrb[118].mxu0  ;;  %v9027_v15 = vmax.f32 %v8975_v44, 0.0 }
 0x658   : > { %v10274_v57 = vpop.f32.mrb[119].mxu0 }
 0x659   : > { %v9092_v26 = vmul.f32 %v14215_v34, %v9059_v46  ;;  %v8819_v49 = vadd.f32 %v10272_v45, %v14210_v42  ;;  %v10275_v20 = vadd.f32 %v10274_v57, %v10273_v23  ;;  %v14311_v6 = vadd.f32 %v9091_v38, %v9026_v25 }
 0x65b   : > { %v14313_v16 = vadd.f32 %v9092_v26, %v9027_v15  ;;  %v8980_v62 = vadd.f32 %v14117_v50, %v8819_v49  ;;  %v8822_v37 = vadd.f32 %v10275_v20, %v14210_v42 }
 0x65d   : > { %v9060_v19 = vmin.f32 %v8980_v62, 0.0  ;;  %v8983_v54 = vadd.f32 %v14121_v7, %v8822_v37  ;;  %v10276_v59 = vpop.f32.mrb[120].mxu0  ;;  %v9028_v38 = vmax.f32 %v8980_v62, 0.0 }
 0x65e   : > { %v10277_v44 = vpop.f32.mrb[121].mxu0 }
 0x65f   : > { %v9093_v46 = vmul.f32 %v14215_v34, %v9060_v19  ;;  %v9061_v45 = vmin.f32 %v8983_v54, 0.0  ;;  %v10278_v23 = vadd.f32 %v10277_v44, %v10276_v59  ;;  %v10279_v25 = vpop.f32.mrb[122].mxu0  ;;  %v9029_v15 = vmax.f32 %v8983_v54, 0.0 }
 0x660   : > { %v10280_v57 = vpop.f32.mrb[123].mxu0 }
 0x661   : > { %v9094_v50 = vmul.f32 %v14215_v34, %v9061_v45  ;;  %v10281_v49 = vadd.f32 %v10280_v57, %v10279_v25  ;;  %v8827_v26 = vadd.f32 %v10278_v23, %v14210_v42  ;;  %v14323_v20 = vadd.f32 %v9093_v46, %v9028_v38 }
 0x663   : > { %v14325_v7 = vadd.f32 %v9094_v50, %v9029_v15  ;;  %v8988_v37 = vadd.f32 %v14193_v36, %v8827_v26  ;;  %v8830_v43 = vadd.f32 %v10281_v49, %v14210_v42 }
 0x665   : > { %v9062_v19 = vmin.f32 %v8988_v37, 0.0  ;;  %v8991_v59 = vadd.f32 %v14197_v3, %v8830_v43  ;;  %v10282_v44 = vpop.f32.mrb[124].mxu0  ;;  %v9030_v38 = vmax.f32 %v8988_v37, 0.0 }
 0x666   : > { %v10283_v54 = vpop.f32.mrb[125].mxu0 }
 0x667   : > { %v9095_v45 = vmul.f32 %v14215_v34, %v9062_v19  ;;  %v9063_v25 = vmin.f32 %v8991_v59, 0.0  ;;  %v10284_v23 = vadd.f32 %v10283_v54, %v10282_v44  ;;  %v10285_v46 = vpop.f32.mrb[126].mxu0  ;;  %v9031_v15 = vmax.f32 %v8991_v59, 0.0 }
 0x668   : > { %v10286_v57 = vpop.f32.mrb[127].mxu0  ;;  %v8723_v19 = vadd.f32 %v14179_v12, %v14210_v42 }
 0x669   : > { %v9096_v36 = vmul.f32 %v14215_v34, %v9063_v25  ;;  %v8835_v50 = vadd.f32 %v10284_v23, %v14210_v42  ;;  %v10287_v49 = vadd.f32 %v10286_v57, %v10285_v46  ;;  %v14335_v26 = vadd.f32 %v9095_v45, %v9030_v38 }
 0x66a   : > { %v8715_v45 = vadd.f32 %v14175_v52, %v14210_v42 }
 0x66b   : > { %14775 = vst [vmem:[#allocation29_spill] sm:$0xff] %v14335_v26  ;;  %v14337_v3 = vadd.f32 %v9096_v36, %v9031_v15  ;;  %v8996_v43 = vadd.f32 %v14189_v41, %v8835_v50  ;;  %v8838_v62 = vadd.f32 %v10287_v49, %v14210_v42  ;;  %v8726_v41 = vadd.f32 %v14181_v39, %v14210_v42 }
 0x66c   : > { %v8718_v50 = vadd.f32 %v14177_v24, %v14210_v42 }
 0x66d   : > { %v9064_v59 = vmin.f32 %v8996_v43, 0.0  ;;  %v8999_v44 = vadd.f32 %v14195_v22, %v8838_v62  ;;  %v10370_v54 = vpop.f32.mrb[128].mxu0  ;;  %v9032_v62 = vmax.f32 %v8996_v43, 0.0 }
 0x66e   : > { %v8884_v25 = vadd.f32 %v10370_v54, %v8723_v19  ;;  %v8875_v23 = vpop.f32.mrb[129].mxu0 }
 0x66f   : > { %v9097_v46 = vmul.f32 %v14215_v34, %v9064_v59  ;;  %v9065_v38 = vmin.f32 %v8999_v44, 0.0  ;;  %v8876_v57 = vadd.f32 %v8875_v23, %v8715_v45  ;;  %v10371_v12 = vpop.f32.mrb[130].mxu0  ;;  %v9033_v49 = vmax.f32 %v8999_v44, 0.0 }
 0x670   : > { %v9036_v15 = vmin.f32 %v8884_v25, 0.0  ;;  %v8887_v36 = vadd.f32 %v10371_v12, %v8726_v41  ;;  %v8878_v22 = vpop.f32.mrb[131].mxu0  ;;  %v9004_v45 = vmax.f32 %v8884_v25, 0.0  ;;  %v8739_v23 = vadd.f32 %v14187_v10, %v14210_v42 }
 0x671   : > { %v9098_v52 = vmul.f32 %v14215_v34, %v9065_v38  ;;  %v9034_v19 = vmin.f32 %v8876_v57, 0.0  ;;  %v8879_v39 = vadd.f32 %v8878_v22, %v8718_v50  ;;  %v14355_v53 = vadd.f32 %v9097_v46, %v9032_v62 }
 0x672   : > { %v9069_v54 = vmul.f32 %v14215_v34, %v9036_v15  ;;  %v9037_v37 = vmin.f32 %v8887_v36, 0.0  ;;  %v9005_v41 = vmax.f32 %v8887_v36, 0.0  ;;  %v9002_v12 = vmax.f32 %v8876_v57, 0.0 }
 0x673   : > { %v14357_v59 = vadd.f32 %v9098_v52, %v9033_v49  ;;  %v9067_v24 = vmul.f32 %v14215_v34, %v9034_v19  ;;  %v9035_v44 = vmin.f32 %v8879_v39, 0.0  ;;  %v8731_v15 = vadd.f32 %v14183_v32, %v14210_v42 }
 0x674   : > { %v9070_v43 = vmul.f32 %v14215_v34, %v9037_v37  ;;  %v9101_v38 = vadd.f32 %v9069_v54, %v9004_v45  ;;  %v9003_v25 = vmax.f32 %v8879_v39, 0.0  ;;  %v8742_v37 = vadd.f32 %v14191_v63, %v14210_v42 }
 0x675   : > { %v10374_v26 = vpop.f32.mrb[132].mxu0  ;;  %v9068_v22 = vmul.f32 %v14215_v34, %v9035_v44  ;;  %v8734_v57 = vadd.f32 %v14185_v35, %v14210_v42  ;;  %v9099_v52 = vadd.f32 %v9067_v24, %v9002_v12  ;;  %v8755_v35 = vadd.f32 %v14203_v17, %v14210_v42 }
 0x676   : > { %v9102_v50 = vadd.f32 %v9070_v43, %v9005_v41  ;;  %v8900_v10 = vadd.f32 %v10374_v26, %v8739_v23  ;;  %v8891_v62 = vpop.f32.mrb[133].mxu0  ;;  %v8747_v24 = vadd.f32 %v14199_v0, %v14210_v42 }
 0x677   : > { %v8892_v49 = vadd.f32 %v8891_v62, %v8731_v15  ;;  %v10375_v36 = vpop.f32.mrb[134].mxu0  ;;  %v9100_v32 = vadd.f32 %v9068_v22, %v9003_v25  ;;  %v8758_v25 = vadd.f32 %v14205_v9, %v14210_v42 }
 0x678   : > { %v9132_v19 = vpack.c.bf16 %v9102_v50, %v9101_v38  ;;  %v9040_v54 = vmin.f32 %v8900_v10, 0.0  ;;  %v8894_v45 = vpop.f32.mrb[135].mxu0  ;;  %v8903_v41 = vadd.f32 %v10375_v36, %v8742_v37  ;;  %v9008_v38 = vmax.f32 %v8900_v10, 0.0 }
 0x679   : > { %v9038_v46 = vmin.f32 %v8892_v49, 0.0  ;;  %v8895_v39 = vadd.f32 %v8894_v45, %v8734_v57  ;;  %v9131_v43 = vpack.c.bf16 %v9100_v32, %v9099_v52  ;;  %v9006_v22 = vmax.f32 %v8892_v49, 0.0 }
 0x67a   : > { %9197 = vrot.lane.b32.xlu1 %v9132_v19, %s10738_s25  ;;  %v9073_v26 = vmul.f32 %v14215_v34, %v9040_v54  ;;  %v9041_v23 = vmin.f32 %v8903_v41, 0.0  ;;  %v9009_v12 = vmax.f32 %v8903_v41, 0.0  ;;  %v8750_v52 = vadd.f32 %v14201_v29, %v14210_v42 }
 0x67b   : > { %v9071_v63 = vmul.f32 %v14215_v34, %v9038_v46  ;;  %v9039_v44 = vmin.f32 %v8895_v39, 0.0  ;;  %9195 = vrot.lane.b32.xlu0 %v9131_v43, %s10738_s25  ;;  %v9007_v62 = vmax.f32 %v8895_v39, 0.0 }
 0x67c   : > { %v9074_v15 = vmul.f32 %v14215_v34, %v9041_v23  ;;  %v9105_v36 = vadd.f32 %v9073_v26, %v9008_v38 }
 0x67d   : > { %v10378_v50 = vpop.f32.mrb[136].mxu0  ;;  %v9072_v46 = vmul.f32 %v14215_v34, %v9039_v44  ;;  %v9103_v19 = vadd.f32 %v9071_v63, %v9006_v22 }
 0x67e   : > { %v8916_v37 = vadd.f32 %v10378_v50, %v8755_v35  ;;  %9153 = vrot.lane.b32.xlu1 %v13481_v11, %s10736_s20  ;;  %v8907_v17 = vpop.f32.mrb[137].mxu0  ;;  %v9106_v57 = vadd.f32 %v9074_v15, %v9009_v12 }
 0x67f   : > { %v8908_v0 = vadd.f32 %v8907_v17, %v8747_v24  ;;  %v10379_v10 = vpop.f32.mrb[138].mxu0  ;;  %v9104_v32 = vadd.f32 %v9072_v46, %v9007_v62  ;;  %9151 = vrot.lane.b32.xlu0 %v13488_v51, %s10736_s20 }
 0x680   : > { %v9044_v54 = vmin.f32 %v8916_v37, 0.0  ;;  %v8919_v9 = vadd.f32 %v10379_v10, %v8758_v25  ;;  %v8910_v49 = vpop.f32.mrb[139].mxu0  ;;  %v9134_v45 = vpack.c.bf16 %v9106_v57, %v9105_v36  ;;  %v9012_v29 = vmax.f32 %v8916_v37, 0.0 }
 0x681   : > { %v9042_v41 = vmin.f32 %v8908_v0, 0.0  ;;  %v8911_v39 = vadd.f32 %v8910_v49, %v8750_v52  ;;  %v9133_v11 = vpack.c.bf16 %v9104_v32, %v9103_v19  ;;  %v9010_v51 = vmax.f32 %v8908_v0, 0.0  ;;  %v14793_v0 = vld [vmem:[#allocation15_spill] sm:$0xff]  ;;  %v14794_v19 = vld [vmem:[#allocation16_spill] sm:$0xff] }
 0x682   : > { %v9077_v43 = vmul.f32 %v14215_v34, %v9044_v54  ;;  %v9045_v26 = vmin.f32 %v8919_v9, 0.0  ;;  %9201 = vrot.lane.b32.xlu1 %v9134_v45, %s10738_s25  ;;  %v9013_v42 = vmax.f32 %v8919_v9, 0.0 }
 0x683   : > { %v9075_v23 = vmul.f32 %v14215_v34, %v9042_v41  ;;  %v9043_v44 = vmin.f32 %v8911_v39, 0.0  ;;  %9199 = vrot.lane.b32.xlu0 %v9133_v11, %s10738_s25  ;;  %v9011_v35 = vmax.f32 %v8911_v39, 0.0  ;;  %v14795_v39 = vld [vmem:[#allocation17_spill] sm:$0xff] }
 0x684   : > { %v9078_v63 = vmul.f32 %v14215_v34, %v9045_v26  ;;  %v9109_v38 = vadd.f32 %v9077_v43, %v9012_v29  ;;  %v14796_v26 = vld [vmem:[#allocation18_spill] sm:$0xff] }
 0x685   : > { %v9076_v24 = vmul.f32 %v14215_v34, %v9043_v44  ;;  %v9107_v15 = vadd.f32 %v9075_v23, %v9010_v51  ;;  %v14776_v34 = vpack.c.bf16 %v14234_v21, %v14232_v55  ;;  %v9150_v55 = vpop.permute.xlu1 %9149  ;;  %v9148_v21 = vpop.permute.xlu0 %9147 }
 0x686   : > { %v9110_v12 = vadd.f32 %v9078_v63, %v9013_v42  ;;  %9157 = vrot.lane.b32.xlu1 %v13508_v31, %s10736_s20  ;;  %v14777_v31 = vpack.c.bf16 %v14223_v28, %v14221_v14  ;;  %v14785_v14 = vld [vmem:[#allocation28_spill] sm:$0xff] }
 0x687   : > { %v9108_v50 = vadd.f32 %v9076_v24, %v9011_v35  ;;  %9155 = vrot.lane.b32.xlu0 %v13515_v8, %s10736_s20  ;;  %v14778_v8 = vpack.c.bf16 %v14264_v1, %v14262_v18  ;;  %v14790_v1 = vld [vmem:[#allocation12_spill] sm:$0xff]  ;;  %v14797_v35 = vld [vmem:[#allocation19_spill] sm:$0xff] }
 0x688   : > { %v9136_v25 = vpack.c.bf16 %v9110_v12, %v9109_v38  ;;  %v14798_v12 = vld [vmem:[#allocation20_spill] sm:$0xff] }
 0x689   : > { %v9135_v22 = vpack.c.bf16 %v9108_v50, %v9107_v15 }
 0x68a   : > { %9205 = vrot.lane.b32.xlu1 %v9136_v25, %s10738_s25 }
 0x68b   : > { %9203 = vrot.lane.b32.xlu0 %v9135_v22, %s10738_s25 }
 0x68e   : > { %9161 = vrot.lane.b32.xlu1 %v13540_v60, %s10736_s20  ;;  %v14779_v60 = vpack.c.bf16 %v14247_v4, %v14245_v27  ;;  %v14789_v4 = vld [vmem:[#allocation11_spill] sm:$0xff] }
 0x68f   : > { %9159 = vrot.lane.b32.xlu0 %v13544_v61, %s10736_s20  ;;  %v14780_v61 = vpack.c.bf16 %v14300_v40, %v14298_v58 }
 0x692   : > { %9209 = vrot.lane.b32.xlu1 %v14776_v34, %s10738_s25 }
 0x693   : > { %9207 = vrot.lane.b32.xlu0 %v14777_v31, %s10738_s25 }
 0x696   : > { %9165 = vrot.lane.b32.xlu1 %v13572_v33, %s10736_s20  ;;  %v14781_v33 = vpack.c.bf16 %v14289_v30, %v14287_v47  ;;  %v9229_v47 = vsel %vm2952_vm7, %v14789_v4, %v9148_v21  ;;  %v9232_v30 = vsel %vm2952_vm7, %v14790_v1, %v9150_v55 }
 0x697   : > { %9163 = vrot.lane.b32.xlu0 %v13579_v13, %s10736_s20  ;;  %v14782_v13 = vpack.c.bf16 %v14325_v7, %v14323_v20  ;;  %v14791_v20 = vld [vmem:[#allocation13_spill] sm:$0xff] }
 0x69a   : > { %9213 = vrot.lane.b32.xlu1 %v14778_v8, %s10738_s25  ;;  %v14799_v8 = vld [vmem:[#allocation21_spill] sm:$0xff] }
 0x69b   : > { %9211 = vrot.lane.b32.xlu0 %v14779_v60, %s10738_s25 }
 0x69e   : > { %9169 = vrot.lane.b32.xlu1 %v13603_v2, %s10736_s20  ;;  %v14783_v2 = vpack.c.bf16 %v14313_v16, %v14311_v6 }
 0x69f   : > { %9167 = vrot.lane.b32.xlu0 %v13615_v56, %s10736_s20  ;;  %v14784_v56 = vld [vmem:[#allocation27_spill] sm:$0xff] }
 0x6a2   : > { %9217 = vrot.lane.b32.xlu1 %v14780_v61, %s10738_s25 }
 0x6a3   : > { %9215 = vrot.lane.b32.xlu0 %v14781_v33, %s10738_s25  ;;  %v14800_v33 = vld [vmem:[#allocation22_spill] sm:$0xff] }
 0x6a6   : > { %9173 = vrot.lane.b32.xlu1 %v13629_v5, %s10736_s20  ;;  %v14786_v5 = vpack.c.bf16 %v14357_v59, %v14355_v53  ;;  %v14792_v59 = vld [vmem:[#allocation14_spill] sm:$0xff] }
 0x6a7   : > { %9171 = vrot.lane.b32.xlu0 %v13643_v48, %s10736_s20  ;;  %v14787_v48 = vld [vmem:[#allocation29_spill] sm:$0xff] }
 0x6a8   : > { %v14788_v28 = vpack.c.bf16 %v14337_v3, %v14787_v48 }
 0x6aa   : > { %9221 = vrot.lane.b32.xlu1 %v14782_v13, %s10738_s25 }
 0x6ab   : > { %9219 = vrot.lane.b32.xlu0 %v14783_v2, %s10738_s25 }
 0x6ae   : > { %9177 = vrot.lane.b32.xlu1 %v14784_v56, %s10736_s20 }
 0x6af   : > { %9175 = vrot.lane.b32.xlu0 %v14785_v14, %s10736_s20  ;;  %s9887_s20 = sld [smem:[#allocation5 + $0x3]] }
 0x6b2   : > { %9225 = vrot.lane.b32.xlu1 %v14786_v5, %s10738_s25 }
 0x6b3   : > { %9223 = vrot.lane.b32.xlu0 %v14788_v28, %s10738_s25  ;;  %v14801_v28 = vld [vmem:[#allocation23_spill] sm:$0xff]  ;;  %s14667_s25 = scalar_lea.sflag [#allocation6], %s364_s12 }
 0x6ec   : > { %v9198_v27 = vpop.permute.xlu1 %9197 }
 0x6ed   : > { %v9196_v18 = vpop.permute.xlu0 %9195  ;;  %v9278_v53 = vsel %vm3018_vm10, %v9232_v30, %v9198_v27  ;;  %v14802_v27 = vld [vmem:[#allocation24_spill] sm:$0xff] }
 0x6ee   : > { %v9276_v58 = vsel %vm3018_vm10, %v9229_v47, %v9196_v18 }
 0x6ef   : > { %10412 = vmatprep.mubr.msk.bf16.mxu1 %vm3084_vm12, %v9276_v58 }
 0x6f0   : > { %v9154_v40 = vpop.permute.xlu1 %9153  ;;  %10413 = vmatmul.mubr.msk.bf16.vlgmr.msra.gmra.mrb[116].mxu1 %vm3084_vm12, %v9278_v53  ;;  %v14803_v53 = vld [vmem:[#allocation25_spill] sm:$0xff] }
 0x6f1   : > { %v9152_v6 = vpop.permute.xlu0 %9151  ;;  %v9238_v62 = vsel %vm2952_vm7, %v14792_v59, %v9154_v40  ;;  %v14529_v59 = vld [vmem:[%s14717_s8] ss:$0 sm:$0xff] }
 0x6f2   : > { %v9235_v7 = vsel %vm2952_vm7, %v14791_v20, %v9152_v6 }
 0x6f4   : > { %v9202_v16 = vpop.permute.xlu1 %9201 }
 0x6f5   : > { %v9200_v3 = vpop.permute.xlu0 %9199  ;;  %v9282_v37 = vsel %vm3018_vm10, %v9238_v62, %v9202_v16  ;;  %v14804_v16 = vld [vmem:[#allocation26_spill] sm:$0xff] }
 0x6f6   : > { %v9280_v46 = vsel %vm3018_vm10, %v9235_v7, %v9200_v3 }
 0x6f7   : > { %10416 = vmatprep.mubr.msk.bf16.mxu1 %vm3084_vm12, %v9280_v46 }
 0x6f8   : > { %v9158_v17 = vpop.permute.xlu1 %9157  ;;  %10417 = vmatmul.mubr.msk.bf16.gmra.mrb[120].mxu1 %vm3084_vm12, %v9282_v37 }
 0x6f9   : > { %v9156_v36 = vpop.permute.xlu0 %9155  ;;  %v9244_v32 = vsel %vm2952_vm7, %v14794_v19, %v9158_v17 }
 0x6fa   : > { %v9241_v10 = vsel %vm2952_vm7, %v14793_v0, %v9156_v36 }
 0x6fc   : > { %v9206_v57 = vpop.permute.xlu1 %9205 }
 0x6fd   : > { %v9204_v52 = vpop.permute.xlu0 %9203  ;;  %v9286_v9 = vsel %vm3018_vm10, %v9244_v32, %v9206_v57  ;;  %v14533_v57 = vstv %s9887_s20  ;;  %s14665_s20 = scalar_lea.hbm %s14719_s10, %s10045_s26 }
 0x6fe   : > { %v9284_v54 = vsel %vm3018_vm10, %v9241_v10, %v9204_v52 }
 0x6ff   : > { %10420 = vmatprep.mubr.msk.bf16.mxu1 %vm3084_vm12, %v9284_v54 }
 0x700   : > { %v9162_v49 = vpop.permute.xlu1 %9161  ;;  %10421 = vmatmul.mubr.msk.bf16.gmra.mrb[124].mxu1 %vm3084_vm12, %v9286_v9 }
 0x701   : > { %v9160_v45 = vpop.permute.xlu0 %9159  ;;  %v9250_v23 = vsel %vm2952_vm7, %v14796_v26, %v9162_v49 }
 0x702   : > { %v9247_v11 = vsel %vm2952_vm7, %v14795_v39, %v9160_v45 }
 0x704   : > { %v9210_v41 = vpop.permute.xlu1 %9209 }
 0x705   : > { %v9208_v43 = vpop.permute.xlu0 %9207  ;;  %v9290_v29 = vsel %vm3018_vm10, %v9250_v23, %v9210_v41 }
 0x706   : > { %v9288_v44 = vsel %vm3018_vm10, %v9247_v11, %v9208_v43 }
 0x707   : > { %10424 = vmatprep.mubr.msk.bf16.mxu1 %vm3084_vm12, %v9288_v44 }
 0x708   : > { %v9166_v42 = vpop.permute.xlu1 %9165  ;;  %10425 = vmatmul.mubr.msk.bf16.gmra.mrb[128].mxu1 %vm3084_vm12, %v9290_v29 }
 0x709   : > { %v9164_v63 = vpop.permute.xlu0 %9163  ;;  %v9256_v15 = vsel %vm2952_vm7, %v14798_v12, %v9166_v42 }
 0x70a   : > { %v9253_v24 = vsel %vm2952_vm7, %v14797_v35, %v9164_v63 }
 0x70c   : > { %v9214_v51 = vpop.permute.xlu1 %9213 }
 0x70d   : > { %v9212_v38 = vpop.permute.xlu0 %9211  ;;  %v9294_v25 = vsel %vm3018_vm10, %v9256_v15, %v9214_v51 }
 0x70e   : > { %v9292_v50 = vsel %vm3018_vm10, %v9253_v24, %v9212_v38 }
 0x70f   : > { %10428 = vmatprep.mubr.msk.bf16.mxu1 %vm3084_vm12, %v9292_v50 }
 0x710   : > { %v9170_v22 = vpop.permute.xlu1 %9169  ;;  %10429 = vmatmul.mubr.msk.bf16.gmra.mrb[132].mxu1 %vm3084_vm12, %v9294_v25 }
 0x711   : > { %v9168_v34 = vpop.permute.xlu0 %9167  ;;  %v9262_v13 = vsel %vm2952_vm7, %v14800_v33, %v9170_v22 }
 0x712   : > { %v9259_v60 = vsel %vm2952_vm7, %v14799_v8, %v9168_v34 }
 0x714   : > { %v9218_v31 = vpop.permute.xlu1 %9217 }
 0x715   : > { %v9216_v61 = vpop.permute.xlu0 %9215  ;;  %v9298_v56 = vsel %vm3018_vm10, %v9262_v13, %v9218_v31 }
 0x716   : > { %v9296_v2 = vsel %vm3018_vm10, %v9259_v60, %v9216_v61 }
 0x717   : > { %10432 = vmatprep.mubr.msk.bf16.mxu1 %vm3084_vm12, %v9296_v2 }
 0x718   : > { %v9174_v14 = vpop.permute.xlu1 %9173  ;;  %10433 = vmatmul.mubr.msk.bf16.gmra.mrb[136].mxu1 %vm3084_vm12, %v9298_v56 }
 0x719   : > { %v9172_v5 = vpop.permute.xlu0 %9171  ;;  %v9268_v4 = vsel %vm2952_vm7, %v14802_v27, %v9174_v14 }
 0x71a   : > { %v9265_v55 = vsel %vm2952_vm7, %v14801_v28, %v9172_v5 }
 0x71c   : > { %v9222_v48 = vpop.permute.xlu1 %9221 }
 0x71d   : > { %v9220_v21 = vpop.permute.xlu0 %9219  ;;  %v9302_v18 = vsel %vm3018_vm10, %v9268_v4, %v9222_v48 }
 0x71e   : > { %v9300_v47 = vsel %vm3018_vm10, %v9265_v55, %v9220_v21 }
 0x71f   : > { %10436 = vmatprep.mubr.msk.bf16.mxu1 %vm3084_vm12, %v9300_v47 }
 0x720   : > { %v9178_v1 = vpop.permute.xlu1 %9177  ;;  %10437 = vmatmul.mubr.msk.bf16.gmra.mrb[140].mxu1 %vm3084_vm12, %v9302_v18 }
 0x721   : > { %v9176_v30 = vpop.permute.xlu0 %9175  ;;  %v9274_v20 = vsel %vm2952_vm7, %v14804_v16, %v9178_v1 }
 0x722   : > { %v9271_v40 = vsel %vm2952_vm7, %v14803_v53, %v9176_v30 }
 0x724   : > { %v9226_v58 = vpop.permute.xlu1 %9225 }
 0x725   : > { %v9224_v6 = vpop.permute.xlu0 %9223  ;;  %v9306_v3 = vsel %vm3018_vm10, %v9274_v20, %v9226_v58 }
 0x726   : > { %v9304_v7 = vsel %vm3018_vm10, %v9271_v40, %v9224_v6 }
 0x727   : > { %10440 = vmatprep.mubr.msk.bf16.mxu1 %vm3084_vm12, %v9304_v7 }
 0x728   : > { %10441 = vmatmul.mubr.msk.bf16.gmra.mrb[144].mxu1 %vm3084_vm12, %v9306_v3 }
 0x7c3   : > { %v10414_v62 = vpop.f32.mrb[116].mxu1 }
 0x7c4   : > { %v9428_v46 = vpop.f32.mrb[117].mxu1  ;;  %v9437_v37 = vadd.f32 %v10414_v62, %v14529_v59 }
 0x7c5   : > { %v9429_v17 = vadd.f32 %v14529_v59, %v9428_v46  ;;  %v10415_v36 = vpop.f32.mrb[118].mxu1 }
 0x7c6   : > { %v9431_v0 = vpop.f32.mrb[119].mxu1  ;;  %v9440_v19 = vadd.f32 %v10415_v36, %v14529_v59  ;;  %v9589_v32 = vmin.f32 %v9437_v37, 0.0  ;;  %v9557_v35 = vmax.f32 %v9437_v37, 0.0 }
 0x7c7   : > { %v9587_v10 = vmin.f32 %v9429_v17, 0.0  ;;  %v9432_v52 = vadd.f32 %v14529_v59, %v9431_v0  ;;  %v9555_v54 = vmax.f32 %v9429_v17, 0.0 }
 0x7c8   : > { %v9590_v43 = vmin.f32 %v9440_v19, 0.0  ;;  %v9622_v23 = vmul.f32 %v14533_v57, %v9589_v32  ;;  %v9558_v25 = vmax.f32 %v9440_v19, 0.0 }
 0x7c9   : > { %v9620_v9 = vmul.f32 %v14533_v57, %v9587_v10  ;;  %v9588_v49 = vmin.f32 %v9432_v52, 0.0  ;;  %v9556_v45 = vmax.f32 %v9432_v52, 0.0 }
 0x7ca   : > { %v9623_v24 = vmul.f32 %v14533_v57, %v9590_v43  ;;  %v9654_v50 = vadd.f32 %v9622_v23, %v9557_v35 }
 0x7cb   : > { %v9621_v41 = vmul.f32 %v14533_v57, %v9588_v49  ;;  %v10418_v39 = vpop.f32.mrb[120].mxu1  ;;  %v9652_v11 = vadd.f32 %v9620_v9, %v9555_v54 }
 0x7cc   : > { %v9444_v26 = vpop.f32.mrb[121].mxu1  ;;  %v9453_v34 = vadd.f32 %v10418_v39, %v14529_v59  ;;  %v9686_v33 = vsel %vm2952_vm7, %v9654_v50, 0.0  ;;  %v9655_v13 = vadd.f32 %v9623_v24, %v9558_v25 }
 0x7cd   : > { %v9445_v44 = vadd.f32 %v14529_v59, %v9444_v26  ;;  %v10419_v29 = vpop.f32.mrb[122].mxu1  ;;  %v9684_v42 = vsel %vm2952_vm7, %v9652_v11, 0.0  ;;  %v9653_v63 = vadd.f32 %v9621_v41, %v9556_v45 }
 0x7ce   : > { %v9447_v51 = vpop.f32.mrb[123].mxu1  ;;  %9716 = vxpose.xlu0.b32.start [1/16] (narrow) %v9684_v42, 32  ;;  %v9456_v2 = vadd.f32 %v10419_v29, %v14529_v59  ;;  %v9593_v5 = vmin.f32 %v9453_v34, 0.0  ;;  %v9687_v28 = vsel %vm2952_vm7, %v9655_v13, 0.0  ;;  %v9561_v20 = vmax.f32 %v9453_v34, 0.0 }
 0x7cf   : > { %v9591_v38 = vmin.f32 %v9445_v44, 0.0  ;;  %v9448_v12 = vadd.f32 %v14529_v59, %v9447_v51  ;;  %v9685_v15 = vsel %vm2952_vm7, %v9653_v63, 0.0  ;;  %v9559_v14 = vmax.f32 %v9445_v44, 0.0 }
 0x7d0   : > { %v9594_v21 = vmin.f32 %v9456_v2, 0.0  ;;  %v9626_v1 = vmul.f32 %v14533_v57, %v9593_v5  ;;  %v9562_v3 = vmax.f32 %v9456_v2, 0.0 }
 0x7d1   : > { %v9624_v8 = vmul.f32 %v14533_v57, %v9591_v38  ;;  %v9592_v60 = vmin.f32 %v9448_v12, 0.0  ;;  %v9560_v27 = vmax.f32 %v9448_v12, 0.0 }
 0x7d2   : > { %9717 = vxpose.xlu0.b32.cont [2/16] (narrow) %v9685_v15, 32  ;;  %v9627_v40 = vmul.f32 %v14533_v57, %v9594_v21  ;;  %v9658_v37 = vadd.f32 %v9626_v1, %v9561_v20 }
 0x7d3   : > { %v10422_v22 = vpop.f32.mrb[124].mxu1  ;;  %v9625_v48 = vmul.f32 %v14533_v57, %v9592_v60  ;;  %v9656_v55 = vadd.f32 %v9624_v8, %v9559_v14 }
 0x7d4   : > { %v9460_v31 = vpop.f32.mrb[125].mxu1  ;;  %v9469_v7 = vadd.f32 %v10422_v22, %v14529_v59  ;;  %v9659_v0 = vadd.f32 %v9627_v40, %v9562_v3  ;;  %v9690_v41 = vsel %vm2952_vm7, %v9658_v37, 0.0 }
 0x7d5   : > { %v10423_v61 = vpop.f32.mrb[126].mxu1  ;;  %v9461_v47 = vadd.f32 %v14529_v59, %v9460_v31  ;;  %v9688_v58 = vsel %vm2952_vm7, %v9656_v55, 0.0  ;;  %v9657_v53 = vadd.f32 %v9625_v48, %v9560_v27 }
 0x7d6   : > { %9718 = vxpose.xlu0.b32.cont [3/16] (narrow) %v9686_v33, 32  ;;  %v9463_v56 = vpop.f32.mrb[127].mxu1  ;;  %v9472_v17 = vadd.f32 %v10423_v61, %v14529_v59  ;;  %v9597_v10 = vmin.f32 %v9469_v7, 0.0  ;;  %v9565_v54 = vmax.f32 %v9469_v7, 0.0  ;;  %v9691_v23 = vsel %vm2952_vm7, %v9659_v0, 0.0 }
 0x7d7   : > { %v9464_v6 = vadd.f32 %v14529_v59, %v9463_v56  ;;  %v9595_v62 = vmin.f32 %v9461_v47, 0.0  ;;  %v9689_v46 = vsel %vm2952_vm7, %v9657_v53, 0.0  ;;  %v9563_v39 = vmax.f32 %v9461_v47, 0.0 }
 0x7d8   : > { %v9598_v11 = vmin.f32 %v9472_v17, 0.0  ;;  %v9630_v44 = vmul.f32 %v14533_v57, %v9597_v10  ;;  %v9566_v22 = vmax.f32 %v9472_v17, 0.0 }
 0x7d9   : > { %v9596_v36 = vmin.f32 %v9464_v6, 0.0  ;;  %v9628_v19 = vmul.f32 %v14533_v57, %v9595_v62  ;;  %v9564_v51 = vmax.f32 %v9464_v6, 0.0 }
 0x7da   : > { %9719 = vxpose.xlu0.b32.cont [4/16] (narrow) %v9687_v28, 32  ;;  %v9631_v34 = vmul.f32 %v14533_v57, %v9598_v11  ;;  %v9662_v1 = vadd.f32 %v9630_v44, %v9565_v54 }
 0x7db   : > { %v10426_v4 = vpop.f32.mrb[128].mxu1  ;;  %v9629_v43 = vmul.f32 %v14533_v57, %v9596_v36  ;;  %v9660_v38 = vadd.f32 %v9628_v19, %v9563_v39 }
 0x7dc   : > { %v9476_v18 = vpop.f32.mrb[129].mxu1  ;;  %v14575_v31 = vadd.f32 %v10426_v4, %v14529_v59 }
 0x7dd   : > { %v10427_v30 = vpop.f32.mrb[130].mxu1  ;;  %v9477_v35 = vadd.f32 %v14529_v59, %v9476_v18  ;;  %v9661_v8 = vadd.f32 %v9629_v43, %v9564_v51  ;;  %v9692_v28 = vsel %vm2952_vm7, %v9660_v38, 0.0 }
 0x7de   : > { %9720 = vxpose.xlu0.b32.cont [5/16] (narrow) %v9688_v58, 32  ;;  %v9479_v16 = vpop.f32.mrb[131].mxu1  ;;  %v14579_v14 = vadd.f32 %v10427_v30, %v14529_v59  ;;  %v9663_v58 = vadd.f32 %v9631_v34, %v9566_v22  ;;  %v9601_v30 = vmin.f32 %v14575_v31, 0.0  ;;  %v9569_v36 = vmax.f32 %v14575_v31, 0.0 }
 0x7df   : > { %v14570_v24 = vadd.f32 %v14529_v59, %v9479_v16  ;;  %v9599_v56 = vmin.f32 %v9477_v35, 0.0  ;;  %v9693_v6 = vsel %vm2952_vm7, %v9661_v8, 0.0  ;;  %v9567_v0 = vmax.f32 %v9477_v35, 0.0 }
 0x7e0   : > { %v9602_v20 = vmin.f32 %v14579_v14, 0.0  ;;  %v9634_v19 = vmul.f32 %v14533_v57, %v9601_v30  ;;  %v9570_v31 = vmax.f32 %v14579_v14, 0.0 }
 0x7e1   : > { %v9600_v5 = vmin.f32 %v14570_v24, 0.0  ;;  %v9632_v16 = vmul.f32 %v14533_v57, %v9599_v56 }
 0x7e2   : > { %9721 = vxpose.xlu0.b32.cont [6/16] (narrow) %v9689_v46, 32 }
 0x7e3   : > { %v10430_v52 = vpop.f32.mrb[132].mxu1  ;;  %v9633_v7 = vmul.f32 %v14533_v57, %v9600_v5  ;;  %v9664_v43 = vadd.f32 %v9632_v16, %v9567_v0 }
 0x7e4   : > { %v9492_v32 = vpop.f32.mrb[133].mxu1  ;;  %v9501_v9 = vadd.f32 %v10430_v52, %v14529_v59  ;;  %v9694_v52 = vsel %vm2952_vm7, %v9662_v1, 0.0 }
 0x7e5   : > { %v9493_v49 = vadd.f32 %v14529_v59, %v9492_v32  ;;  %v10431_v45 = vpop.f32.mrb[134].mxu1  ;;  %v9568_v32 = vmax.f32 %v14570_v24, 0.0  ;;  %v9696_v30 = vsel %vm2952_vm7, %v9664_v43, 0.0 }
 0x7e6   : > { %9722 = vxpose.xlu0.b32.cont [7/16] (narrow) %v9690_v41, 32  ;;  %v9495_v26 = vpop.f32.mrb[135].mxu1  ;;  %v9504_v42 = vadd.f32 %v10431_v45, %v14529_v59  ;;  %v9605_v12 = vmin.f32 %v9501_v9, 0.0  ;;  %v9573_v53 = vmax.f32 %v9501_v9, 0.0  ;;  %v9695_v9 = vsel %vm2952_vm7, %v9663_v58, 0.0 }
 0x7e7   : > { %v9603_v29 = vmin.f32 %v9493_v49, 0.0  ;;  %v9496_v63 = vadd.f32 %v14529_v59, %v9495_v26  ;;  %v9571_v15 = vmax.f32 %v9493_v49, 0.0  ;;  %v14605_v45 = vmul.f32 %v14533_v57, %v9602_v20 }
 0x7e8   : > { %v9606_v60 = vmin.f32 %v9504_v42, 0.0  ;;  %v9638_v55 = vmul.f32 %v14533_v57, %v9605_v12  ;;  %v9574_v62 = vmax.f32 %v9504_v42, 0.0  ;;  %v9665_v42 = vadd.f32 %v9633_v7, %v9568_v32 }
 0x7e9   : > { %v9636_v50 = vmul.f32 %v14533_v57, %v9603_v29  ;;  %v9604_v25 = vmin.f32 %v9496_v63, 0.0  ;;  %v9572_v61 = vmax.f32 %v9496_v63, 0.0 }
 0x7ea   : > { %9723 = vxpose.xlu0.b32.cont [8/16] (narrow) %v9691_v23, 32  ;;  %v9639_v40 = vmul.f32 %v14533_v57, %v9606_v60  ;;  %v9670_v17 = vadd.f32 %v9638_v55, %v9573_v53 }
 0x7eb   : > { %v9637_v33 = vmul.f32 %v14533_v57, %v9604_v25  ;;  %v10434_v13 = vpop.f32.mrb[136].mxu1  ;;  %v9668_v2 = vadd.f32 %v9636_v50, %v9571_v15 }
 0x7ec   : > { %v9508_v48 = vpop.f32.mrb[137].mxu1  ;;  %v14598_v10 = vadd.f32 %v10434_v13, %v14529_v59  ;;  %v9671_v49 = vadd.f32 %v9639_v40, %v9574_v62  ;;  %v9702_v29 = vsel %vm2952_vm7, %v9670_v17, 0.0  ;;  %v9666_v17 = vadd.f32 %v9634_v19, %v9569_v36 }
 0x7ed   : > { %v9509_v21 = vadd.f32 %v14529_v59, %v9508_v48  ;;  %v10435_v27 = vpop.f32.mrb[138].mxu1  ;;  %v9700_v4 = vsel %vm2952_vm7, %v9668_v2, 0.0  ;;  %v9669_v47 = vadd.f32 %v9637_v33, %v9572_v61 }
 0x7ee   : > { %9724 = vxpose.xlu0.b32.cont [9/16] (narrow) %v9692_v28, 32  ;;  %9748 = vxpose.xlu1.b32.start [1/16] (narrow) %v9700_v4, 32  ;;  %v9511_v18 = vpop.f32.mrb[139].mxu1  ;;  %v9609_v63 = vmin.f32 %v14598_v10, 0.0  ;;  %v14614_v51 = vadd.f32 %v10435_v27, %v14529_v59  ;;  %v9703_v25 = vsel %vm2952_vm7, %v9671_v49, 0.0 }
 0x7ef   : > { %v14593_v3 = vadd.f32 %v14529_v59, %v9511_v18  ;;  %v9607_v46 = vmin.f32 %v9509_v21, 0.0  ;;  %v9701_v37 = vsel %vm2952_vm7, %v9669_v47, 0.0  ;;  %v9575_v12 = vmax.f32 %v9509_v21, 0.0 }
 0x7f0   : > { %v9610_v56 = vmin.f32 %v14614_v51, 0.0  ;;  %v9642_v18 = vmul.f32 %v14533_v57, %v9609_v63  ;;  %v9698_v63 = vsel %vm2952_vm7, %v9666_v17, 0.0 }
 0x7f1   : > { %v9608_v41 = vmin.f32 %v14593_v3, 0.0  ;;  %v9640_v26 = vmul.f32 %v14533_v57, %v9607_v46  ;;  %v9576_v55 = vmax.f32 %v14593_v3, 0.0  ;;  %v9577_v3 = vmax.f32 %v14598_v10, 0.0 }
 0x7f2   : > { %9725 = vxpose.xlu0.b32.cont [10/16] (narrow) %v9693_v6, 32  ;;  %9749 = vxpose.xlu1.b32.cont [2/16] (narrow) %v9701_v37, 32  ;;  %v9643_v0 = vmul.f32 %v14533_v57, %v9610_v56 }
 0x7f3   : > { %v10438_v54 = vpop.f32.mrb[140].mxu1  ;;  %v9641_v22 = vmul.f32 %v14533_v57, %v9608_v41  ;;  %v9672_v2 = vadd.f32 %v9640_v26, %v9575_v12  ;;  %v9674_v41 = vadd.f32 %v9642_v18, %v9577_v3 }
 0x7f4   : > { %v9533_v39 = vadd.f32 %v10438_v54, %v14529_v59  ;;  %v9524_v11 = vpop.f32.mrb[141].mxu1  ;;  %v9697_v54 = vsel %vm2952_vm7, %v9665_v42, 0.0 }
 0x7f5   : > { %v9525_v23 = vadd.f32 %v14529_v59, %v9524_v11  ;;  %v10439_v44 = vpop.f32.mrb[142].mxu1  ;;  %v9704_v16 = vsel %vm2952_vm7, %v9672_v2, 0.0  ;;  %v9673_v20 = vadd.f32 %v9641_v22, %v9576_v55 }
 0x7f6   : > { %v9613_v35 = vmin.f32 %v9533_v39, 0.0  ;;  %v9536_v24 = vadd.f32 %v10439_v44, %v14529_v59  ;;  %9726 = vxpose.xlu0.b32.cont [11/16] (narrow) %v9694_v52, 32  ;;  %9750 = vxpose.xlu1.b32.cont [3/16] (narrow) %v9702_v29, 32  ;;  %v9527_v38 = vpop.f32.mrb[143].mxu1  ;;  %v9581_v34 = vmax.f32 %v9533_v39, 0.0 }
 0x7f7   : > { %v9611_v15 = vmin.f32 %v9525_v23, 0.0  ;;  %v9528_v50 = vadd.f32 %v14529_v59, %v9527_v38  ;;  %v9579_v61 = vmax.f32 %v9525_v23, 0.0  ;;  %v9705_v26 = vsel %vm2952_vm7, %v9673_v20, 0.0 }
 0x7f8   : > { %v9646_v8 = vmul.f32 %v14533_v57, %v9613_v35  ;;  %v9614_v60 = vmin.f32 %v9536_v24, 0.0  ;;  %v9582_v5 = vmax.f32 %v9536_v24, 0.0  ;;  %v9578_v23 = vmax.f32 %v14614_v51, 0.0 }
 0x7f9   : > { %v9644_v33 = vmul.f32 %v14533_v57, %v9611_v15  ;;  %v9612_v13 = vmin.f32 %v9528_v50, 0.0  ;;  %v9580_v21 = vmax.f32 %v9528_v50, 0.0  ;;  %v9706_v24 = vsel %vm2952_vm7, %v9674_v41, 0.0 }
 0x7fa   : > { %v9647_v48 = vmul.f32 %v14533_v57, %v9614_v60  ;;  %9727 = vxpose.xlu0.b32.cont [12/16] (narrow) %v9695_v9, 32  ;;  %9751 = vxpose.xlu1.b32.cont [4/16] (narrow) %v9703_v25, 32  ;;  %v9678_v28 = vadd.f32 %v9646_v8, %v9581_v34  ;;  %v9667_v38 = vadd.f32 %v14605_v45, %v9570_v31 }
 0x7fb   : > { %v9645_v27 = vmul.f32 %v14533_v57, %v9612_v13  ;;  %v10442_v4 = vpop.f32.mrb[144].mxu1  ;;  %v9676_v47 = vadd.f32 %v9644_v33, %v9579_v61  ;;  %v9675_v14 = vadd.f32 %v9643_v0, %v9578_v23 }
 0x7fc   : > { %v9549_v1 = vadd.f32 %v10442_v4, %v14529_v59  ;;  %v9540_v58 = vpop.f32.mrb[145].mxu1  ;;  %v9679_v53 = vadd.f32 %v9647_v48, %v9582_v5  ;;  %v9699_v15 = vsel %vm2952_vm7, %v9667_v38, 0.0  ;;  %v9710_v25 = vsel %vm2952_vm7, %v9678_v28, 0.0 }
 0x7fd   : > { %v9541_v40 = vadd.f32 %v14529_v59, %v9540_v58  ;;  %v10443_v6 = vpop.f32.mrb[146].mxu1  ;;  %v9677_v7 = vadd.f32 %v9645_v27, %v9580_v21  ;;  %v9707_v50 = vsel %vm2952_vm7, %v9675_v14, 0.0 }
 0x7fe   : > { %v9617_v62 = vmin.f32 %v9549_v1, 0.0  ;;  %v9552_v46 = vadd.f32 %v10443_v6, %v14529_v59  ;;  %9728 = vxpose.xlu0.b32.cont [13/16] (narrow) %v9696_v30, 32  ;;  %9752 = vxpose.xlu1.b32.cont [5/16] (narrow) %v9704_v16, 32  ;;  %v9543_v37 = vpop.f32.mrb[147].mxu1  ;;  %v9585_v9 = vmax.f32 %v9549_v1, 0.0  ;;  %v9711_v45 = vsel %vm2952_vm7, %v9679_v53, 0.0 }
 0x7ff   : > { %v9615_v52 = vmin.f32 %v9541_v40, 0.0  ;;  %v9544_v32 = vadd.f32 %v14529_v59, %v9543_v37  ;;  %v9583_v39 = vmax.f32 %v9541_v40, 0.0  ;;  %v9709_v51 = vsel %vm2952_vm7, %v9677_v7, 0.0 }
 0x800   : > { %v9650_v49 = vmul.f32 %v14533_v57, %v9617_v62  ;;  %v9618_v10 = vmin.f32 %v9552_v46, 0.0  ;;  %v9586_v36 = vmax.f32 %v9552_v46, 0.0 }
 0x801   : > { %v9648_v11 = vmul.f32 %v14533_v57, %v9615_v52  ;;  %v9616_v43 = vmin.f32 %v9544_v32, 0.0  ;;  %v9584_v44 = vmax.f32 %v9544_v32, 0.0 }
 0x802   : > { %v9651_v19 = vmul.f32 %v14533_v57, %v9618_v10  ;;  %9729 = vxpose.xlu0.b32.cont [14/16] (narrow) %v9697_v54, 32  ;;  %9753 = vxpose.xlu1.b32.cont [6/16] (narrow) %v9705_v26, 32  ;;  %v9682_v59 = vadd.f32 %v9650_v49, %v9585_v9 }
 0x803   : > { %v9649_v29 = vmul.f32 %v14533_v57, %v9616_v43  ;;  %v9680_v42 = vadd.f32 %v9648_v11, %v9583_v39  ;;  %v9708_v57 = vsel %vm2952_vm7, %v9676_v47, 0.0 }
 0x804   : > { %v9683_v35 = vadd.f32 %v9651_v19, %v9586_v36  ;;  %v9714_v8 = vsel %vm2952_vm7, %v9682_v59, 0.0 }
 0x805   : > { %v9681_v12 = vadd.f32 %v9649_v29, %v9584_v44  ;;  %v9712_v22 = vsel %vm2952_vm7, %v9680_v42, 0.0 }
 0x806   : > { %9730 = vxpose.xlu0.b32.cont [15/16] (narrow) %v9698_v63, 32  ;;  %9754 = vxpose.xlu1.b32.cont [7/16] (narrow) %v9706_v24, 32  ;;  %v9715_v60 = vsel %vm2952_vm7, %v9683_v35, 0.0 }
 0x807   : > { %v9713_v34 = vsel %vm2952_vm7, %v9681_v12, 0.0 }
 0x80a   : > { %9731 = vxpose.xlu0.b32.end [16/16] (narrow) %v9699_v15, 32  ;;  %9755 = vxpose.xlu1.b32.cont [8/16] (narrow) %v9707_v50, 32 }
 0x80e   : > { %9756 = vxpose.xlu1.b32.cont [9/16] (narrow) %v9708_v57, 32 }
 0x812   : > { %9757 = vxpose.xlu1.b32.cont [10/16] (narrow) %v9709_v51, 32 }
 0x816   : > { %9758 = vxpose.xlu1.b32.cont [11/16] (narrow) %v9710_v25, 32 }
 0x81a   : > { %9759 = vxpose.xlu1.b32.cont [12/16] (narrow) %v9711_v45, 32 }
 0x81e   : > { %9760 = vxpose.xlu1.b32.cont [13/16] (narrow) %v9712_v22, 32 }
 0x822   : > { %9761 = vxpose.xlu1.b32.cont [14/16] (narrow) %v9713_v34, 32 }
 0x826   : > { %9762 = vxpose.xlu1.b32.cont [15/16] (narrow) %v9714_v8, 32 }
 0x82a   : > { %9763 = vxpose.xlu1.b32.end [16/16] (narrow) %v9715_v60, 32 }
 0x84e   : > { %v9732_v61 = vpop.trf.xlu0 }
 0x84f   : > { %9780 = vst [vmem:[%s366_s27] sm:$0xff] %v9732_v61 }
 0x852   : > { %v9733_v33 = vpop.trf.xlu0 }
 0x853   : > { %9782 = vst [vmem:[%s366_s27 + $0x10] sm:$0xff] %v9733_v33 }
 0x856   : > { %v9734_v13 = vpop.trf.xlu0 }
 0x857   : > { %9784 = vst [vmem:[%s366_s27 + $0x20] sm:$0xff] %v9734_v13 }
 0x85a   : > { %v9735_v2 = vpop.trf.xlu0 }
 0x85b   : > { %9786 = vst [vmem:[%s366_s27 + $0x30] sm:$0xff] %v9735_v2 }
 0x86e   : > { %v9764_v56 = vpop.trf.xlu1 }
 0x86f   : > { %9781 = vst [vmem:[%s366_s27 + $0x8] sm:$0xff] %v9764_v56 }
 0x872   : > { %v9765_v5 = vpop.trf.xlu1 }
 0x873   : > { %9783 = vst [vmem:[%s366_s27 + $0x18] sm:$0xff] %v9765_v5 }
 0x876   : > { %v9766_v48 = vpop.trf.xlu1 }
 0x877   : > { %9785 = vst [vmem:[%s366_s27 + $0x28] sm:$0xff] %v9766_v48 }
 0x87a   : > { %v9767_v28 = vpop.trf.xlu1 }
 0x87b   : > { %9787 = vst [vmem:[%s366_s27 + $0x38] sm:$0xff] %v9767_v28 }
 0x87c   : > { %10678 = shalt.err (!%p10675_p2)
}
 0x87d   : > { %s10679_s12 = scalar_lea.hbm %s14665_s20, 1024  ;;  %s10683_s30 = scalar_lea.hbm %s14719_s10, 2048 }
 0x87e   : > { %p10680_p3 = scmp.ne.s32.totalorder %s14665_s20, %s10679_s12  ;;  %p10684_p8 = scmp.lt.u32.totalorder %s14665_s20, %s14719_s10 }
 0x87f   : > { %p10685_p10 = scmp.lt.u32.totalorder %s10683_s30, %s10679_s12  ;;  %p10687_p11 = scmp.lt.u32.totalorder %s10679_s12, %s14665_s20 }
 0x880   : > { %p10681_p4 = pnand %p10680_p3, %p10837_p5 }
 0x881   : > { %p10686_p9 = por %p10685_p10, %p10684_p8 }
 0x882   : > { %p10682_p7 = pneg %p10681_p4 }
 0x883   : > { %p10688_p12 = por %p10687_p11, %p10686_p9 }
 0x885   : > { %p10689_p13 = pnand %p10688_p12, %p10682_p7 }
 0x887   : > { %10692 = shalt.err (!%p10689_p13)
}
 0x888   : > { %s10743_s18 = smov 256   ;;  %s14805_s21 = smov 16  }
 0x889   : > { %10452 = dma.vmem_to_hbm [thread:$0]  (%p10837_p5), %s14660_s11, 1024, %s14665_s20, %s14667_s25, %s10743_s18, %s10743_s18, %s14805_s21  }
 0x88a PF: > { %p10464_p0 = scmp.ge.s32.totalorder %s10731_s16, 2  ;;  %s9817_s29 = sand.u32 1, %s10719_s13  }
 0x88b   : > { %s9818_s12 = scalar_lea.sflag [#allocation6], %s9817_s29 }
 0x88c   : > { %p10459_p1 = pnand %p10464_p0, %p10841_p6 }
 0x88e   : > { %10714 = dma.done.wait (!%p10459_p1), %s9818_s12, 1024  }
 0x88f   : > { %10716 = vsyncadd (!%p10459_p1), %s9818_s12, 4294966272  ;;  %p21_p2 = scmp.ge.s32.totalorder %s10824_s19, 4   ;;  %s14806_s13 = smov %s10723_s14 }
 0x890   : > { %s14807_s14 = smov %s10727_s15  ;;  %s14808_s15 = smov %s10835_s22 }
 0x891   : > { %s14809_s16 = smov %s10824_s19  ;;  %23 = sbr.rel (!%p21_p2) target bundleno = 4 (0x4), region = 109 }
 0x898   :  { %9823 = vsyncpa [#allocation6], 1 }
 0x899   :  { %9825 = vsyncpa [#allocation6 + $0x1], 1 }
 0x89a   :  { %9826 = vsyncpa [#allocation7], 1 }
 0x89b   :  { %9828 = vsyncpa [#allocation7 + $0x1], 1 }

</bundles_post_ra>
